<compile_context>
chip_gen: v7x
topology: tpu7x:2x2x1
jax: 0.10.0
libtpu: 0.0.40
codegen_flags: <defaults>
</compile_context>

<pallas_src>
import jax
import jax.numpy as jnp
from jax.experimental import pallas as pl
from jax.experimental.pallas import tpu as pltpu

C_OUT = 12
NPAIR = C_OUT // 2          # channel c is lane-packed next to channel c + NPAIR
KH = KW = 7
PAD = 2


def conv_bias_add_kernel(w_ref, b_ref, x_ref, other_ref, o_ref):
    # w_ref:     (NPAIR*KH*KW, 2*W_out) f32 VMEM - lane-packed per-tap weights
    # b_ref:     (NPAIR, 2*W_out)       f32 VMEM - lane-packed bias rows
    # x_ref:     (1, 1, H, W)               VMEM - raw NCHW input
    # other_ref: (1, C_OUT, H_out, W_out)   VMEM - residual
    # o_ref:     (1, C_OUT, H_out, W_out)   VMEM - output
    _, _, h, w = x_ref.shape
    _, _, h_out, w_out = o_ref.shape
    w2 = 2 * w_out
    taps = KH * KW

    # --- zero-pad the single input channel as an in-register value ---------
    x = x_ref[0, 0].astype(jnp.float32)                       # (H, W)
    zc = jnp.zeros((h, PAD), jnp.float32)
    zr = jnp.zeros((PAD, w + 2 * PAD), jnp.float32)
    x_pad = jnp.concatenate(
        [zr, jnp.concatenate([zc, x, zc], axis=1), zr], axis=0)   # (H+4, W+4)

    # --- per kw: lane-duplicated column window, reused by all kh / pairs ---
    x_dup = []
    for kw in range(KW):
        col = x_pad[:, kw:kw + w_out]                          # (H+4, W_out)
        x_dup.append(jnp.concatenate([col, col], axis=-1))     # (H+4, 2*W_out)

    # --- accumulators seeded with bias (removes zero-init + epilogue add) --
    accs = [jnp.broadcast_to(b_ref[p], (h_out, w2)) for p in range(NPAIR)]

    # --- direct conv: pure VALU mul/add stream on lane-packed tiles --------
    for kh in range(KH):
        for kw in range(KW):
            patch = x_dup[kw][kh:kh + h_out, :]                # (h_out, 2*w_out)
            t = kh * KW + kw
            for p in range(NPAIR):
                accs[p] = accs[p] + w_ref[p * taps + t] * patch

    # --- epilogue: fused residual add, then store both halves of each pair -
    for p in range(NPAIR):
        oth = jnp.concatenate(
            [other_ref[0, p].astype(jnp.float32),
             other_ref[0, p + NPAIR].astype(jnp.float32)], axis=-1)
        res = (accs[p] + oth).astype(o_ref.dtype)
        o_ref[0, p] = res[:, :w_out]
        o_ref[0, p + NPAIR] = res[:, w_out:]


def model_forward(x1, weight, bias, other):
    """x1: (1,1,H,W); weight: (12,1,7,7); bias: (12,); other: (1,12,H_out,W_out)."""
    n, c_in, h, w = x1.shape
    assert n == 1 and c_in == 1
    h_out = h + 2 * PAD - KH + 1
    w_out = w + 2 * PAD - KW + 1
    out_dtype = jnp.promote_types(x1.dtype, other.dtype)

    # Tiny wrapper-side prep (on 12*49 + 12 floats): lane-packed weight / bias
    # tables. Lanes [0:w_out] carry channel p, lanes [w_out:2*w_out] channel
    # p + NPAIR, matching the kernel's channel-pair packing.
    w12 = weight.reshape(C_OUT, KH * KW).astype(jnp.float32)
    w_pair = jnp.stack([w12[:NPAIR], w12[NPAIR:]], axis=-1)          # (6,49,2)
    w_tab = jnp.repeat(w_pair, w_out, axis=-1)                       # (6,49,2*w_out)
    w_tab = w_tab.reshape(NPAIR * KH * KW, 2 * w_out)                # (294,2*w_out)

    b_pair = jnp.stack([bias[:NPAIR].astype(jnp.float32),
                        bias[NPAIR:].astype(jnp.float32)], axis=-1)  # (6,2)
    b_tab = jnp.repeat(b_pair, w_out, axis=-1)                       # (6,2*w_out)

    return pl.pallas_call(
        conv_bias_add_kernel,
        out_shape=jax.ShapeDtypeStruct((1, C_OUT, h_out, w_out), out_dtype),
        in_specs=[
            pl.BlockSpec(memory_space=pltpu.MemorySpace.VMEM),   # weight table
            pl.BlockSpec(memory_space=pltpu.MemorySpace.VMEM),   # bias table
            pl.BlockSpec(memory_space=pltpu.MemorySpace.VMEM),   # x1 (full block)
            pl.BlockSpec(memory_space=pltpu.MemorySpace.VMEM),   # other (full block)
        ],
        out_specs=pl.BlockSpec(memory_space=pltpu.MemorySpace.VMEM),
    )(w_tab, b_tab, x1, other)


def reference_forward(x1, weight, bias, other):
    y = jax.lax.conv_general_dilated(
        x1, weight, window_strides=(1, 1), padding=[(PAD, PAD), (PAD, PAD)],
        dimension_numbers=("NCHW", "OIHW", "NCHW"),
        precision=jax.lax.Precision.HIGHEST)
    return y + bias[None, :, None, None] + other


if __name__ == "__main__":
    key = jax.random.PRNGKey(0)
    k_x, k_w, k_b, k_o = jax.random.split(key, 4)

    H, W = 16, 64
    H_out = H + 2 * PAD - KH + 1   # 14
    W_out = W + 2 * PAD - KW + 1   # 62

    x1 = jax.random.normal(k_x, (1, 1, H, W), jnp.float32)
    # Conv2d param init (Kaiming-uniform-like bound as in torch).
    fan_in = 1 * KH * KW
    bound = 1.0 / jnp.sqrt(fan_in)
    weight = jax.random.uniform(k_w, (C_OUT, 1, KH, KW), jnp.float32, -bound, bound)
    bias = jax.random.uniform(k_b, (C_OUT,), jnp.float32, -bound, bound)
    other = jax.random.normal(k_o, (1, C_OUT, H_out, W_out), jnp.float32)

    fwd = jax.jit(model_forward)
    out = jax.block_until_ready(fwd(x1, weight, bias, other))

    ref = jax.block_until_ready(reference_forward(x1, weight, bias, other))
    assert out.shape == (1, C_OUT, H_out, W_out)
    assert jnp.allclose(out, ref, atol=1e-4, rtol=1e-4)

    print("KERNEL_OK")
</pallas_src>

<mosaic_0001>
module attributes {stable_mosaic.version = 11 : i64} {
  func.func @conv_bias_add_kernel(%arg0: memref<294x124xf32, #tpu.memory_space<vmem>>, %arg1: memref<6x124xf32, #tpu.memory_space<vmem>>, %arg2: memref<1x1x16x64xf32, #tpu.memory_space<vmem>>, %arg3: memref<1x12x14x62xf32, #tpu.memory_space<vmem>>, %arg4: memref<1x12x14x62xf32, #tpu.memory_space<vmem>>) attributes {dimension_semantics = [], scalar_prefetch = 0 : i64, scratch_operands = 0 : i64, tpu.core_type = #tpu.core_type<tc>} {
    %c0 = arith.constant 0 : index
    %c0_0 = arith.constant 0 : index
    %c0_1 = arith.constant 0 : index
    %c0_2 = arith.constant 0 : index
    %0 = vector.load %arg2[%c0, %c0_0, %c0_1, %c0_2] : memref<1x1x16x64xf32, #tpu.memory_space<vmem>>, vector<1x1x16x64xf32>
    %1 = vector.shape_cast %0 : vector<1x1x16x64xf32> to vector<16x64xf32>
    %cst = arith.constant 0.000000e+00 : f32
    %2 = vector.broadcast %cst : f32 to vector<16x2xf32>
    %cst_3 = arith.constant 0.000000e+00 : f32
    %3 = vector.broadcast %cst_3 : f32 to vector<2x68xf32>
    %4 = tpu.concatenate %2, %1, %2 in 1 : vector<16x2xf32>, vector<16x64xf32>, vector<16x2xf32> -> vector<16x68xf32>
    %5 = tpu.concatenate %3, %4, %3 in 0 : vector<2x68xf32>, vector<16x68xf32>, vector<2x68xf32> -> vector<20x68xf32>
    %6 = vector.extract_strided_slice %5 {offsets = [0, 0], sizes = [20, 62], strides = [1, 1]} : vector<20x68xf32> to vector<20x62xf32>
    %7 = tpu.concatenate %6, %6 in 1 : vector<20x62xf32>, vector<20x62xf32> -> vector<20x124xf32>
    %8 = vector.extract_strided_slice %5 {offsets = [0, 1], sizes = [20, 62], strides = [1, 1]} : vector<20x68xf32> to vector<20x62xf32>
    %9 = tpu.concatenate %8, %8 in 1 : vector<20x62xf32>, vector<20x62xf32> -> vector<20x124xf32>
    %10 = vector.extract_strided_slice %5 {offsets = [0, 2], sizes = [20, 62], strides = [1, 1]} : vector<20x68xf32> to vector<20x62xf32>
    %11 = tpu.concatenate %10, %10 in 1 : vector<20x62xf32>, vector<20x62xf32> -> vector<20x124xf32>
    %12 = vector.extract_strided_slice %5 {offsets = [0, 3], sizes = [20, 62], strides = [1, 1]} : vector<20x68xf32> to vector<20x62xf32>
    %13 = tpu.concatenate %12, %12 in 1 : vector<20x62xf32>, vector<20x62xf32> -> vector<20x124xf32>
    %14 = vector.extract_strided_slice %5 {offsets = [0, 4], sizes = [20, 62], strides = [1, 1]} : vector<20x68xf32> to vector<20x62xf32>
    %15 = tpu.concatenate %14, %14 in 1 : vector<20x62xf32>, vector<20x62xf32> -> vector<20x124xf32>
    %16 = vector.extract_strided_slice %5 {offsets = [0, 5], sizes = [20, 62], strides = [1, 1]} : vector<20x68xf32> to vector<20x62xf32>
    %17 = tpu.concatenate %16, %16 in 1 : vector<20x62xf32>, vector<20x62xf32> -> vector<20x124xf32>
    %18 = vector.extract_strided_slice %5 {offsets = [0, 6], sizes = [20, 62], strides = [1, 1]} : vector<20x68xf32> to vector<20x62xf32>
    %19 = tpu.concatenate %18, %18 in 1 : vector<20x62xf32>, vector<20x62xf32> -> vector<20x124xf32>
    %c0_4 = arith.constant 0 : index
    %c0_5 = arith.constant 0 : index
    %20 = vector.load %arg1[%c0_4, %c0_5] : memref<6x124xf32, #tpu.memory_space<vmem>>, vector<1x124xf32>
    %21 = vector.shape_cast %20 : vector<1x124xf32> to vector<124xf32>
    %22 = vector.shape_cast %21 : vector<124xf32> to vector<1x124xf32>
    %23 = vector.broadcast %22 : vector<1x124xf32> to vector<14x124xf32>
    %c1 = arith.constant 1 : index
    %c0_6 = arith.constant 0 : index
    %24 = vector.load %arg1[%c1, %c0_6] : memref<6x124xf32, #tpu.memory_space<vmem>>, vector<1x124xf32>
    %25 = vector.shape_cast %24 : vector<1x124xf32> to vector<124xf32>
    %26 = vector.shape_cast %25 : vector<124xf32> to vector<1x124xf32>
    %27 = vector.broadcast %26 : vector<1x124xf32> to vector<14x124xf32>
    %c2 = arith.constant 2 : index
    %c0_7 = arith.constant 0 : index
    %28 = vector.load %arg1[%c2, %c0_7] : memref<6x124xf32, #tpu.memory_space<vmem>>, vector<1x124xf32>
    %29 = vector.shape_cast %28 : vector<1x124xf32> to vector<124xf32>
    %30 = vector.shape_cast %29 : vector<124xf32> to vector<1x124xf32>
    %31 = vector.broadcast %30 : vector<1x124xf32> to vector<14x124xf32>
    %c3 = arith.constant 3 : index
    %c0_8 = arith.constant 0 : index
    %32 = vector.load %arg1[%c3, %c0_8] : memref<6x124xf32, #tpu.memory_space<vmem>>, vector<1x124xf32>
    %33 = vector.shape_cast %32 : vector<1x124xf32> to vector<124xf32>
    %34 = vector.shape_cast %33 : vector<124xf32> to vector<1x124xf32>
    %35 = vector.broadcast %34 : vector<1x124xf32> to vector<14x124xf32>
    %c4 = arith.constant 4 : index
    %c0_9 = arith.constant 0 : index
    %36 = vector.load %arg1[%c4, %c0_9] : memref<6x124xf32, #tpu.memory_space<vmem>>, vector<1x124xf32>
    %37 = vector.shape_cast %36 : vector<1x124xf32> to vector<124xf32>
    %38 = vector.shape_cast %37 : vector<124xf32> to vector<1x124xf32>
    %39 = vector.broadcast %38 : vector<1x124xf32> to vector<14x124xf32>
    %c5 = arith.constant 5 : index
    %c0_10 = arith.constant 0 : index
    %40 = vector.load %arg1[%c5, %c0_10] : memref<6x124xf32, #tpu.memory_space<vmem>>, vector<1x124xf32>
    %41 = vector.shape_cast %40 : vector<1x124xf32> to vector<124xf32>
    %42 = vector.shape_cast %41 : vector<124xf32> to vector<1x124xf32>
    %43 = vector.broadcast %42 : vector<1x124xf32> to vector<14x124xf32>
    %44 = vector.extract_strided_slice %7 {offsets = [0, 0], sizes = [14, 124], strides = [1, 1]} : vector<20x124xf32> to vector<14x124xf32>
    %c0_11 = arith.constant 0 : index
    %c0_12 = arith.constant 0 : index
    %45 = vector.load %arg0[%c0_11, %c0_12] : memref<294x124xf32, #tpu.memory_space<vmem>>, vector<1x124xf32>
    %46 = vector.shape_cast %45 : vector<1x124xf32> to vector<124xf32>
    %47 = vector.shape_cast %46 : vector<124xf32> to vector<1x124xf32>
    %48 = vector.broadcast %47 : vector<1x124xf32> to vector<14x124xf32>
    %49 = arith.mulf %48, %44 : vector<14x124xf32>
    %50 = arith.addf %23, %49 : vector<14x124xf32>
    %c49 = arith.constant 49 : index
    %c0_13 = arith.constant 0 : index
    %51 = vector.load %arg0[%c49, %c0_13] : memref<294x124xf32, #tpu.memory_space<vmem>>, vector<1x124xf32>
    %52 = vector.shape_cast %51 : vector<1x124xf32> to vector<124xf32>
    %53 = vector.shape_cast %52 : vector<124xf32> to vector<1x124xf32>
    %54 = vector.broadcast %53 : vector<1x124xf32> to vector<14x124xf32>
    %55 = arith.mulf %54, %44 : vector<14x124xf32>
    %56 = arith.addf %27, %55 : vector<14x124xf32>
    %c98 = arith.constant 98 : index
    %c0_14 = arith.constant 0 : index
    %57 = vector.load %arg0[%c98, %c0_14] : memref<294x124xf32, #tpu.memory_space<vmem>>, vector<1x124xf32>
    %58 = vector.shape_cast %57 : vector<1x124xf32> to vector<124xf32>
    %59 = vector.shape_cast %58 : vector<124xf32> to vector<1x124xf32>
    %60 = vector.broadcast %59 : vector<1x124xf32> to vector<14x124xf32>
    %61 = arith.mulf %60, %44 : vector<14x124xf32>
    %62 = arith.addf %31, %61 : vector<14x124xf32>
    %c147 = arith.constant 147 : index
    %c0_15 = arith.constant 0 : index
    %63 = vector.load %arg0[%c147, %c0_15] : memref<294x124xf32, #tpu.memory_space<vmem>>, vector<1x124xf32>
    %64 = vector.shape_cast %63 : vector<1x124xf32> to vector<124xf32>
    %65 = vector.shape_cast %64 : vector<124xf32> to vector<1x124xf32>
    %66 = vector.broadcast %65 : vector<1x124xf32> to vector<14x124xf32>
    %67 = arith.mulf %66, %44 : vector<14x124xf32>
    %68 = arith.addf %35, %67 : vector<14x124xf32>
    %c196 = arith.constant 196 : index
    %c0_16 = arith.constant 0 : index
    %69 = vector.load %arg0[%c196, %c0_16] : memref<294x124xf32, #tpu.memory_space<vmem>>, vector<1x124xf32>
    %70 = vector.shape_cast %69 : vector<1x124xf32> to vector<124xf32>
    %71 = vector.shape_cast %70 : vector<124xf32> to vector<1x124xf32>
    %72 = vector.broadcast %71 : vector<1x124xf32> to vector<14x124xf32>
    %73 = arith.mulf %72, %44 : vector<14x124xf32>
    %74 = arith.addf %39, %73 : vector<14x124xf32>
    %c245 = arith.constant 245 : index
    %c0_17 = arith.constant 0 : index
    %75 = vector.load %arg0[%c245, %c0_17] : memref<294x124xf32, #tpu.memory_space<vmem>>, vector<1x124xf32>
    %76 = vector.shape_cast %75 : vector<1x124xf32> to vector<124xf32>
    %77 = vector.shape_cast %76 : vector<124xf32> to vector<1x124xf32>
    %78 = vector.broadcast %77 : vector<1x124xf32> to vector<14x124xf32>
    %79 = arith.mulf %78, %44 : vector<14x124xf32>
    %80 = arith.addf %43, %79 : vector<14x124xf32>
    %81 = vector.extract_strided_slice %9 {offsets = [0, 0], sizes = [14, 124], strides = [1, 1]} : vector<20x124xf32> to vector<14x124xf32>
    %c1_18 = arith.constant 1 : index
    %c0_19 = arith.constant 0 : index
    %82 = vector.load %arg0[%c1_18, %c0_19] : memref<294x124xf32, #tpu.memory_space<vmem>>, vector<1x124xf32>
    %83 = vector.shape_cast %82 : vector<1x124xf32> to vector<124xf32>
    %84 = vector.shape_cast %83 : vector<124xf32> to vector<1x124xf32>
    %85 = vector.broadcast %84 : vector<1x124xf32> to vector<14x124xf32>
    %86 = arith.mulf %85, %81 : vector<14x124xf32>
    %87 = arith.addf %50, %86 : vector<14x124xf32>
    %c50 = arith.constant 50 : index
    %c0_20 = arith.constant 0 : index
    %88 = vector.load %arg0[%c50, %c0_20] : memref<294x124xf32, #tpu.memory_space<vmem>>, vector<1x124xf32>
    %89 = vector.shape_cast %88 : vector<1x124xf32> to vector<124xf32>
    %90 = vector.shape_cast %89 : vector<124xf32> to vector<1x124xf32>
    %91 = vector.broadcast %90 : vector<1x124xf32> to vector<14x124xf32>
    %92 = arith.mulf %91, %81 : vector<14x124xf32>
    %93 = arith.addf %56, %92 : vector<14x124xf32>
    %c99 = arith.constant 99 : index
    %c0_21 = arith.constant 0 : index
    %94 = vector.load %arg0[%c99, %c0_21] : memref<294x124xf32, #tpu.memory_space<vmem>>, vector<1x124xf32>
    %95 = vector.shape_cast %94 : vector<1x124xf32> to vector<124xf32>
    %96 = vector.shape_cast %95 : vector<124xf32> to vector<1x124xf32>
    %97 = vector.broadcast %96 : vector<1x124xf32> to vector<14x124xf32>
    %98 = arith.mulf %97, %81 : vector<14x124xf32>
    %99 = arith.addf %62, %98 : vector<14x124xf32>
    %c148 = arith.constant 148 : index
    %c0_22 = arith.constant 0 : index
    %100 = vector.load %arg0[%c148, %c0_22] : memref<294x124xf32, #tpu.memory_space<vmem>>, vector<1x124xf32>
    %101 = vector.shape_cast %100 : vector<1x124xf32> to vector<124xf32>
    %102 = vector.shape_cast %101 : vector<124xf32> to vector<1x124xf32>
    %103 = vector.broadcast %102 : vector<1x124xf32> to vector<14x124xf32>
    %104 = arith.mulf %103, %81 : vector<14x124xf32>
    %105 = arith.addf %68, %104 : vector<14x124xf32>
    %c197 = arith.constant 197 : index
    %c0_23 = arith.constant 0 : index
    %106 = vector.load %arg0[%c197, %c0_23] : memref<294x124xf32, #tpu.memory_space<vmem>>, vector<1x124xf32>
    %107 = vector.shape_cast %106 : vector<1x124xf32> to vector<124xf32>
    %108 = vector.shape_cast %107 : vector<124xf32> to vector<1x124xf32>
    %109 = vector.broadcast %108 : vector<1x124xf32> to vector<14x124xf32>
    %110 = arith.mulf %109, %81 : vector<14x124xf32>
    %111 = arith.addf %74, %110 : vector<14x124xf32>
    %c246 = arith.constant 246 : index
    %c0_24 = arith.constant 0 : index
    %112 = vector.load %arg0[%c246, %c0_24] : memref<294x124xf32, #tpu.memory_space<vmem>>, vector<1x124xf32>
    %113 = vector.shape_cast %112 : vector<1x124xf32> to vector<124xf32>
    %114 = vector.shape_cast %113 : vector<124xf32> to vector<1x124xf32>
    %115 = vector.broadcast %114 : vector<1x124xf32> to vector<14x124xf32>
    %116 = arith.mulf %115, %81 : vector<14x124xf32>
    %117 = arith.addf %80, %116 : vector<14x124xf32>
    %118 = vector.extract_strided_slice %11 {offsets = [0, 0], sizes = [14, 124], strides = [1, 1]} : vector<20x124xf32> to vector<14x124xf32>
    %c2_25 = arith.constant 2 : index
    %c0_26 = arith.constant 0 : index
    %119 = vector.load %arg0[%c2_25, %c0_26] : memref<294x124xf32, #tpu.memory_space<vmem>>, vector<1x124xf32>
    %120 = vector.shape_cast %119 : vector<1x124xf32> to vector<124xf32>
    %121 = vector.shape_cast %120 : vector<124xf32> to vector<1x124xf32>
    %122 = vector.broadcast %121 : vector<1x124xf32> to vector<14x124xf32>
    %123 = arith.mulf %122, %118 : vector<14x124xf32>
    %124 = arith.addf %87, %123 : vector<14x124xf32>
    %c51 = arith.constant 51 : index
    %c0_27 = arith.constant 0 : index
    %125 = vector.load %arg0[%c51, %c0_27] : memref<294x124xf32, #tpu.memory_space<vmem>>, vector<1x124xf32>
    %126 = vector.shape_cast %125 : vector<1x124xf32> to vector<124xf32>
    %127 = vector.shape_cast %126 : vector<124xf32> to vector<1x124xf32>
    %128 = vector.broadcast %127 : vector<1x124xf32> to vector<14x124xf32>
    %129 = arith.mulf %128, %118 : vector<14x124xf32>
    %130 = arith.addf %93, %129 : vector<14x124xf32>
    %c100 = arith.constant 100 : index
    %c0_28 = arith.constant 0 : index
    %131 = vector.load %arg0[%c100, %c0_28] : memref<294x124xf32, #tpu.memory_space<vmem>>, vector<1x124xf32>
    %132 = vector.shape_cast %131 : vector<1x124xf32> to vector<124xf32>
    %133 = vector.shape_cast %132 : vector<124xf32> to vector<1x124xf32>
    %134 = vector.broadcast %133 : vector<1x124xf32> to vector<14x124xf32>
    %135 = arith.mulf %134, %118 : vector<14x124xf32>
    %136 = arith.addf %99, %135 : vector<14x124xf32>
    %c149 = arith.constant 149 : index
    %c0_29 = arith.constant 0 : index
    %137 = vector.load %arg0[%c149, %c0_29] : memref<294x124xf32, #tpu.memory_space<vmem>>, vector<1x124xf32>
    %138 = vector.shape_cast %137 : vector<1x124xf32> to vector<124xf32>
    %139 = vector.shape_cast %138 : vector<124xf32> to vector<1x124xf32>
    %140 = vector.broadcast %139 : vector<1x124xf32> to vector<14x124xf32>
    %141 = arith.mulf %140, %118 : vector<14x124xf32>
    %142 = arith.addf %105, %141 : vector<14x124xf32>
    %c198 = arith.constant 198 : index
    %c0_30 = arith.constant 0 : index
    %143 = vector.load %arg0[%c198, %c0_30] : memref<294x124xf32, #tpu.memory_space<vmem>>, vector<1x124xf32>
    %144 = vector.shape_cast %143 : vector<1x124xf32> to vector<124xf32>
    %145 = vector.shape_cast %144 : vector<124xf32> to vector<1x124xf32>
    %146 = vector.broadcast %145 : vector<1x124xf32> to vector<14x124xf32>
    %147 = arith.mulf %146, %118 : vector<14x124xf32>
    %148 = arith.addf %111, %147 : vector<14x124xf32>
    %c247 = arith.constant 247 : index
    %c0_31 = arith.constant 0 : index
    %149 = vector.load %arg0[%c247, %c0_31] : memref<294x124xf32, #tpu.memory_space<vmem>>, vector<1x124xf32>
    %150 = vector.shape_cast %149 : vector<1x124xf32> to vector<124xf32>
    %151 = vector.shape_cast %150 : vector<124xf32> to vector<1x124xf32>
    %152 = vector.broadcast %151 : vector<1x124xf32> to vector<14x124xf32>
    %153 = arith.mulf %152, %118 : vector<14x124xf32>
    %154 = arith.addf %117, %153 : vector<14x124xf32>
    %155 = vector.extract_strided_slice %13 {offsets = [0, 0], sizes = [14, 124], strides = [1, 1]} : vector<20x124xf32> to vector<14x124xf32>
    %c3_32 = arith.constant 3 : index
    %c0_33 = arith.constant 0 : index
    %156 = vector.load %arg0[%c3_32, %c0_33] : memref<294x124xf32, #tpu.memory_space<vmem>>, vector<1x124xf32>
    %157 = vector.shape_cast %156 : vector<1x124xf32> to vector<124xf32>
    %158 = vector.shape_cast %157 : vector<124xf32> to vector<1x124xf32>
    %159 = vector.broadcast %158 : vector<1x124xf32> to vector<14x124xf32>
    %160 = arith.mulf %159, %155 : vector<14x124xf32>
    %161 = arith.addf %124, %160 : vector<14x124xf32>
    %c52 = arith.constant 52 : index
    %c0_34 = arith.constant 0 : index
    %162 = vector.load %arg0[%c52, %c0_34] : memref<294x124xf32, #tpu.memory_space<vmem>>, vector<1x124xf32>
    %163 = vector.shape_cast %162 : vector<1x124xf32> to vector<124xf32>
    %164 = vector.shape_cast %163 : vector<124xf32> to vector<1x124xf32>
    %165 = vector.broadcast %164 : vector<1x124xf32> to vector<14x124xf32>
    %166 = arith.mulf %165, %155 : vector<14x124xf32>
    %167 = arith.addf %130, %166 : vector<14x124xf32>
    %c101 = arith.constant 101 : index
    %c0_35 = arith.constant 0 : index
    %168 = vector.load %arg0[%c101, %c0_35] : memref<294x124xf32, #tpu.memory_space<vmem>>, vector<1x124xf32>
    %169 = vector.shape_cast %168 : vector<1x124xf32> to vector<124xf32>
    %170 = vector.shape_cast %169 : vector<124xf32> to vector<1x124xf32>
    %171 = vector.broadcast %170 : vector<1x124xf32> to vector<14x124xf32>
    %172 = arith.mulf %171, %155 : vector<14x124xf32>
    %173 = arith.addf %136, %172 : vector<14x124xf32>
    %c150 = arith.constant 150 : index
    %c0_36 = arith.constant 0 : index
    %174 = vector.load %arg0[%c150, %c0_36] : memref<294x124xf32, #tpu.memory_space<vmem>>, vector<1x124xf32>
    %175 = vector.shape_cast %174 : vector<1x124xf32> to vector<124xf32>
    %176 = vector.shape_cast %175 : vector<124xf32> to vector<1x124xf32>
    %177 = vector.broadcast %176 : vector<1x124xf32> to vector<14x124xf32>
    %178 = arith.mulf %177, %155 : vector<14x124xf32>
    %179 = arith.addf %142, %178 : vector<14x124xf32>
    %c199 = arith.constant 199 : index
    %c0_37 = arith.constant 0 : index
    %180 = vector.load %arg0[%c199, %c0_37] : memref<294x124xf32, #tpu.memory_space<vmem>>, vector<1x124xf32>
    %181 = vector.shape_cast %180 : vector<1x124xf32> to vector<124xf32>
    %182 = vector.shape_cast %181 : vector<124xf32> to vector<1x124xf32>
    %183 = vector.broadcast %182 : vector<1x124xf32> to vector<14x124xf32>
    %184 = arith.mulf %183, %155 : vector<14x124xf32>
    %185 = arith.addf %148, %184 : vector<14x124xf32>
    %c248 = arith.constant 248 : index
    %c0_38 = arith.constant 0 : index
    %186 = vector.load %arg0[%c248, %c0_38] : memref<294x124xf32, #tpu.memory_space<vmem>>, vector<1x124xf32>
    %187 = vector.shape_cast %186 : vector<1x124xf32> to vector<124xf32>
    %188 = vector.shape_cast %187 : vector<124xf32> to vector<1x124xf32>
    %189 = vector.broadcast %188 : vector<1x124xf32> to vector<14x124xf32>
    %190 = arith.mulf %189, %155 : vector<14x124xf32>
    %191 = arith.addf %154, %190 : vector<14x124xf32>
    %192 = vector.extract_strided_slice %15 {offsets = [0, 0], sizes = [14, 124], strides = [1, 1]} : vector<20x124xf32> to vector<14x124xf32>
    %c4_39 = arith.constant 4 : index
    %c0_40 = arith.constant 0 : index
    %193 = vector.load %arg0[%c4_39, %c0_40] : memref<294x124xf32, #tpu.memory_space<vmem>>, vector<1x124xf32>
    %194 = vector.shape_cast %193 : vector<1x124xf32> to vector<124xf32>
    %195 = vector.shape_cast %194 : vector<124xf32> to vector<1x124xf32>
    %196 = vector.broadcast %195 : vector<1x124xf32> to vector<14x124xf32>
    %197 = arith.mulf %196, %192 : vector<14x124xf32>
    %198 = arith.addf %161, %197 : vector<14x124xf32>
    %c53 = arith.constant 53 : index
    %c0_41 = arith.constant 0 : index
    %199 = vector.load %arg0[%c53, %c0_41] : memref<294x124xf32, #tpu.memory_space<vmem>>, vector<1x124xf32>
    %200 = vector.shape_cast %199 : vector<1x124xf32> to vector<124xf32>
    %201 = vector.shape_cast %200 : vector<124xf32> to vector<1x124xf32>
    %202 = vector.broadcast %201 : vector<1x124xf32> to vector<14x124xf32>
    %203 = arith.mulf %202, %192 : vector<14x124xf32>
    %204 = arith.addf %167, %203 : vector<14x124xf32>
    %c102 = arith.constant 102 : index
    %c0_42 = arith.constant 0 : index
    %205 = vector.load %arg0[%c102, %c0_42] : memref<294x124xf32, #tpu.memory_space<vmem>>, vector<1x124xf32>
    %206 = vector.shape_cast %205 : vector<1x124xf32> to vector<124xf32>
    %207 = vector.shape_cast %206 : vector<124xf32> to vector<1x124xf32>
    %208 = vector.broadcast %207 : vector<1x124xf32> to vector<14x124xf32>
    %209 = arith.mulf %208, %192 : vector<14x124xf32>
    %210 = arith.addf %173, %209 : vector<14x124xf32>
    %c151 = arith.constant 151 : index
    %c0_43 = arith.constant 0 : index
    %211 = vector.load %arg0[%c151, %c0_43] : memref<294x124xf32, #tpu.memory_space<vmem>>, vector<1x124xf32>
    %212 = vector.shape_cast %211 : vector<1x124xf32> to vector<124xf32>
    %213 = vector.shape_cast %212 : vector<124xf32> to vector<1x124xf32>
    %214 = vector.broadcast %213 : vector<1x124xf32> to vector<14x124xf32>
    %215 = arith.mulf %214, %192 : vector<14x124xf32>
    %216 = arith.addf %179, %215 : vector<14x124xf32>
    %c200 = arith.constant 200 : index
    %c0_44 = arith.constant 0 : index
    %217 = vector.load %arg0[%c200, %c0_44] : memref<294x124xf32, #tpu.memory_space<vmem>>, vector<1x124xf32>
    %218 = vector.shape_cast %217 : vector<1x124xf32> to vector<124xf32>
    %219 = vector.shape_cast %218 : vector<124xf32> to vector<1x124xf32>
    %220 = vector.broadcast %219 : vector<1x124xf32> to vector<14x124xf32>
    %221 = arith.mulf %220, %192 : vector<14x124xf32>
    %222 = arith.addf %185, %221 : vector<14x124xf32>
    %c249 = arith.constant 249 : index
    %c0_45 = arith.constant 0 : index
    %223 = vector.load %arg0[%c249, %c0_45] : memref<294x124xf32, #tpu.memory_space<vmem>>, vector<1x124xf32>
    %224 = vector.shape_cast %223 : vector<1x124xf32> to vector<124xf32>
    %225 = vector.shape_cast %224 : vector<124xf32> to vector<1x124xf32>
    %226 = vector.broadcast %225 : vector<1x124xf32> to vector<14x124xf32>
    %227 = arith.mulf %226, %192 : vector<14x124xf32>
    %228 = arith.addf %191, %227 : vector<14x124xf32>
    %229 = vector.extract_strided_slice %17 {offsets = [0, 0], sizes = [14, 124], strides = [1, 1]} : vector<20x124xf32> to vector<14x124xf32>
    %c5_46 = arith.constant 5 : index
    %c0_47 = arith.constant 0 : index
    %230 = vector.load %arg0[%c5_46, %c0_47] : memref<294x124xf32, #tpu.memory_space<vmem>>, vector<1x124xf32>
    %231 = vector.shape_cast %230 : vector<1x124xf32> to vector<124xf32>
    %232 = vector.shape_cast %231 : vector<124xf32> to vector<1x124xf32>
    %233 = vector.broadcast %232 : vector<1x124xf32> to vector<14x124xf32>
    %234 = arith.mulf %233, %229 : vector<14x124xf32>
    %235 = arith.addf %198, %234 : vector<14x124xf32>
    %c54 = arith.constant 54 : index
    %c0_48 = arith.constant 0 : index
    %236 = vector.load %arg0[%c54, %c0_48] : memref<294x124xf32, #tpu.memory_space<vmem>>, vector<1x124xf32>
    %237 = vector.shape_cast %236 : vector<1x124xf32> to vector<124xf32>
    %238 = vector.shape_cast %237 : vector<124xf32> to vector<1x124xf32>
    %239 = vector.broadcast %238 : vector<1x124xf32> to vector<14x124xf32>
    %240 = arith.mulf %239, %229 : vector<14x124xf32>
    %241 = arith.addf %204, %240 : vector<14x124xf32>
    %c103 = arith.constant 103 : index
    %c0_49 = arith.constant 0 : index
    %242 = vector.load %arg0[%c103, %c0_49] : memref<294x124xf32, #tpu.memory_space<vmem>>, vector<1x124xf32>
    %243 = vector.shape_cast %242 : vector<1x124xf32> to vector<124xf32>
    %244 = vector.shape_cast %243 : vector<124xf32> to vector<1x124xf32>
    %245 = vector.broadcast %244 : vector<1x124xf32> to vector<14x124xf32>
    %246 = arith.mulf %245, %229 : vector<14x124xf32>
    %247 = arith.addf %210, %246 : vector<14x124xf32>
    %c152 = arith.constant 152 : index
    %c0_50 = arith.constant 0 : index
    %248 = vector.load %arg0[%c152, %c0_50] : memref<294x124xf32, #tpu.memory_space<vmem>>, vector<1x124xf32>
    %249 = vector.shape_cast %248 : vector<1x124xf32> to vector<124xf32>
    %250 = vector.shape_cast %249 : vector<124xf32> to vector<1x124xf32>
    %251 = vector.broadcast %250 : vector<1x124xf32> to vector<14x124xf32>
    %252 = arith.mulf %251, %229 : vector<14x124xf32>
    %253 = arith.addf %216, %252 : vector<14x124xf32>
    %c201 = arith.constant 201 : index
    %c0_51 = arith.constant 0 : index
    %254 = vector.load %arg0[%c201, %c0_51] : memref<294x124xf32, #tpu.memory_space<vmem>>, vector<1x124xf32>
    %255 = vector.shape_cast %254 : vector<1x124xf32> to vector<124xf32>
    %256 = vector.shape_cast %255 : vector<124xf32> to vector<1x124xf32>
    %257 = vector.broadcast %256 : vector<1x124xf32> to vector<14x124xf32>
    %258 = arith.mulf %257, %229 : vector<14x124xf32>
    %259 = arith.addf %222, %258 : vector<14x124xf32>
    %c250 = arith.constant 250 : index
    %c0_52 = arith.constant 0 : index
    %260 = vector.load %arg0[%c250, %c0_52] : memref<294x124xf32, #tpu.memory_space<vmem>>, vector<1x124xf32>
    %261 = vector.shape_cast %260 : vector<1x124xf32> to vector<124xf32>
    %262 = vector.shape_cast %261 : vector<124xf32> to vector<1x124xf32>
    %263 = vector.broadcast %262 : vector<1x124xf32> to vector<14x124xf32>
    %264 = arith.mulf %263, %229 : vector<14x124xf32>
    %265 = arith.addf %228, %264 : vector<14x124xf32>
    %266 = vector.extract_strided_slice %19 {offsets = [0, 0], sizes = [14, 124], strides = [1, 1]} : vector<20x124xf32> to vector<14x124xf32>
    %c6 = arith.constant 6 : index
    %c0_53 = arith.constant 0 : index
    %267 = vector.load %arg0[%c6, %c0_53] : memref<294x124xf32, #tpu.memory_space<vmem>>, vector<1x124xf32>
    %268 = vector.shape_cast %267 : vector<1x124xf32> to vector<124xf32>
    %269 = vector.shape_cast %268 : vector<124xf32> to vector<1x124xf32>
    %270 = vector.broadcast %269 : vector<1x124xf32> to vector<14x124xf32>
    %271 = arith.mulf %270, %266 : vector<14x124xf32>
    %272 = arith.addf %235, %271 : vector<14x124xf32>
    %c55 = arith.constant 55 : index
    %c0_54 = arith.constant 0 : index
    %273 = vector.load %arg0[%c55, %c0_54] : memref<294x124xf32, #tpu.memory_space<vmem>>, vector<1x124xf32>
    %274 = vector.shape_cast %273 : vector<1x124xf32> to vector<124xf32>
    %275 = vector.shape_cast %274 : vector<124xf32> to vector<1x124xf32>
    %276 = vector.broadcast %275 : vector<1x124xf32> to vector<14x124xf32>
    %277 = arith.mulf %276, %266 : vector<14x124xf32>
    %278 = arith.addf %241, %277 : vector<14x124xf32>
    %c104 = arith.constant 104 : index
    %c0_55 = arith.constant 0 : index
    %279 = vector.load %arg0[%c104, %c0_55] : memref<294x124xf32, #tpu.memory_space<vmem>>, vector<1x124xf32>
    %280 = vector.shape_cast %279 : vector<1x124xf32> to vector<124xf32>
    %281 = vector.shape_cast %280 : vector<124xf32> to vector<1x124xf32>
    %282 = vector.broadcast %281 : vector<1x124xf32> to vector<14x124xf32>
    %283 = arith.mulf %282, %266 : vector<14x124xf32>
    %284 = arith.addf %247, %283 : vector<14x124xf32>
    %c153 = arith.constant 153 : index
    %c0_56 = arith.constant 0 : index
    %285 = vector.load %arg0[%c153, %c0_56] : memref<294x124xf32, #tpu.memory_space<vmem>>, vector<1x124xf32>
    %286 = vector.shape_cast %285 : vector<1x124xf32> to vector<124xf32>
    %287 = vector.shape_cast %286 : vector<124xf32> to vector<1x124xf32>
    %288 = vector.broadcast %287 : vector<1x124xf32> to vector<14x124xf32>
    %289 = arith.mulf %288, %266 : vector<14x124xf32>
    %290 = arith.addf %253, %289 : vector<14x124xf32>
    %c202 = arith.constant 202 : index
    %c0_57 = arith.constant 0 : index
    %291 = vector.load %arg0[%c202, %c0_57] : memref<294x124xf32, #tpu.memory_space<vmem>>, vector<1x124xf32>
    %292 = vector.shape_cast %291 : vector<1x124xf32> to vector<124xf32>
    %293 = vector.shape_cast %292 : vector<124xf32> to vector<1x124xf32>
    %294 = vector.broadcast %293 : vector<1x124xf32> to vector<14x124xf32>
    %295 = arith.mulf %294, %266 : vector<14x124xf32>
    %296 = arith.addf %259, %295 : vector<14x124xf32>
    %c251 = arith.constant 251 : index
    %c0_58 = arith.constant 0 : index
    %297 = vector.load %arg0[%c251, %c0_58] : memref<294x124xf32, #tpu.memory_space<vmem>>, vector<1x124xf32>
    %298 = vector.shape_cast %297 : vector<1x124xf32> to vector<124xf32>
    %299 = vector.shape_cast %298 : vector<124xf32> to vector<1x124xf32>
    %300 = vector.broadcast %299 : vector<1x124xf32> to vector<14x124xf32>
    %301 = arith.mulf %300, %266 : vector<14x124xf32>
    %302 = arith.addf %265, %301 : vector<14x124xf32>
    %303 = vector.extract_strided_slice %7 {offsets = [1, 0], sizes = [14, 124], strides = [1, 1]} : vector<20x124xf32> to vector<14x124xf32>
    %c7 = arith.constant 7 : index
    %c0_59 = arith.constant 0 : index
    %304 = vector.load %arg0[%c7, %c0_59] : memref<294x124xf32, #tpu.memory_space<vmem>>, vector<1x124xf32>
    %305 = vector.shape_cast %304 : vector<1x124xf32> to vector<124xf32>
    %306 = vector.shape_cast %305 : vector<124xf32> to vector<1x124xf32>
    %307 = vector.broadcast %306 : vector<1x124xf32> to vector<14x124xf32>
    %308 = arith.mulf %307, %303 : vector<14x124xf32>
    %309 = arith.addf %272, %308 : vector<14x124xf32>
    %c56 = arith.constant 56 : index
    %c0_60 = arith.constant 0 : index
    %310 = vector.load %arg0[%c56, %c0_60] : memref<294x124xf32, #tpu.memory_space<vmem>>, vector<1x124xf32>
    %311 = vector.shape_cast %310 : vector<1x124xf32> to vector<124xf32>
    %312 = vector.shape_cast %311 : vector<124xf32> to vector<1x124xf32>
    %313 = vector.broadcast %312 : vector<1x124xf32> to vector<14x124xf32>
    %314 = arith.mulf %313, %303 : vector<14x124xf32>
    %315 = arith.addf %278, %314 : vector<14x124xf32>
    %c105 = arith.constant 105 : index
    %c0_61 = arith.constant 0 : index
    %316 = vector.load %arg0[%c105, %c0_61] : memref<294x124xf32, #tpu.memory_space<vmem>>, vector<1x124xf32>
    %317 = vector.shape_cast %316 : vector<1x124xf32> to vector<124xf32>
    %318 = vector.shape_cast %317 : vector<124xf32> to vector<1x124xf32>
    %319 = vector.broadcast %318 : vector<1x124xf32> to vector<14x124xf32>
    %320 = arith.mulf %319, %303 : vector<14x124xf32>
    %321 = arith.addf %284, %320 : vector<14x124xf32>
    %c154 = arith.constant 154 : index
    %c0_62 = arith.constant 0 : index
    %322 = vector.load %arg0[%c154, %c0_62] : memref<294x124xf32, #tpu.memory_space<vmem>>, vector<1x124xf32>
    %323 = vector.shape_cast %322 : vector<1x124xf32> to vector<124xf32>
    %324 = vector.shape_cast %323 : vector<124xf32> to vector<1x124xf32>
    %325 = vector.broadcast %324 : vector<1x124xf32> to vector<14x124xf32>
    %326 = arith.mulf %325, %303 : vector<14x124xf32>
    %327 = arith.addf %290, %326 : vector<14x124xf32>
    %c203 = arith.constant 203 : index
    %c0_63 = arith.constant 0 : index
    %328 = vector.load %arg0[%c203, %c0_63] : memref<294x124xf32, #tpu.memory_space<vmem>>, vector<1x124xf32>
    %329 = vector.shape_cast %328 : vector<1x124xf32> to vector<124xf32>
    %330 = vector.shape_cast %329 : vector<124xf32> to vector<1x124xf32>
    %331 = vector.broadcast %330 : vector<1x124xf32> to vector<14x124xf32>
    %332 = arith.mulf %331, %303 : vector<14x124xf32>
    %333 = arith.addf %296, %332 : vector<14x124xf32>
    %c252 = arith.constant 252 : index
    %c0_64 = arith.constant 0 : index
    %334 = vector.load %arg0[%c252, %c0_64] : memref<294x124xf32, #tpu.memory_space<vmem>>, vector<1x124xf32>
    %335 = vector.shape_cast %334 : vector<1x124xf32> to vector<124xf32>
    %336 = vector.shape_cast %335 : vector<124xf32> to vector<1x124xf32>
    %337 = vector.broadcast %336 : vector<1x124xf32> to vector<14x124xf32>
    %338 = arith.mulf %337, %303 : vector<14x124xf32>
    %339 = arith.addf %302, %338 : vector<14x124xf32>
    %340 = vector.extract_strided_slice %9 {offsets = [1, 0], sizes = [14, 124], strides = [1, 1]} : vector<20x124xf32> to vector<14x124xf32>
    %c8 = arith.constant 8 : index
    %c0_65 = arith.constant 0 : index
    %341 = vector.load %arg0[%c8, %c0_65] : memref<294x124xf32, #tpu.memory_space<vmem>>, vector<1x124xf32>
    %342 = vector.shape_cast %341 : vector<1x124xf32> to vector<124xf32>
    %343 = vector.shape_cast %342 : vector<124xf32> to vector<1x124xf32>
    %344 = vector.broadcast %343 : vector<1x124xf32> to vector<14x124xf32>
    %345 = arith.mulf %344, %340 : vector<14x124xf32>
    %346 = arith.addf %309, %345 : vector<14x124xf32>
    %c57 = arith.constant 57 : index
    %c0_66 = arith.constant 0 : index
    %347 = vector.load %arg0[%c57, %c0_66] : memref<294x124xf32, #tpu.memory_space<vmem>>, vector<1x124xf32>
    %348 = vector.shape_cast %347 : vector<1x124xf32> to vector<124xf32>
    %349 = vector.shape_cast %348 : vector<124xf32> to vector<1x124xf32>
    %350 = vector.broadcast %349 : vector<1x124xf32> to vector<14x124xf32>
    %351 = arith.mulf %350, %340 : vector<14x124xf32>
    %352 = arith.addf %315, %351 : vector<14x124xf32>
    %c106 = arith.constant 106 : index
    %c0_67 = arith.constant 0 : index
    %353 = vector.load %arg0[%c106, %c0_67] : memref<294x124xf32, #tpu.memory_space<vmem>>, vector<1x124xf32>
    %354 = vector.shape_cast %353 : vector<1x124xf32> to vector<124xf32>
    %355 = vector.shape_cast %354 : vector<124xf32> to vector<1x124xf32>
    %356 = vector.broadcast %355 : vector<1x124xf32> to vector<14x124xf32>
    %357 = arith.mulf %356, %340 : vector<14x124xf32>
    %358 = arith.addf %321, %357 : vector<14x124xf32>
    %c155 = arith.constant 155 : index
    %c0_68 = arith.constant 0 : index
    %359 = vector.load %arg0[%c155, %c0_68] : memref<294x124xf32, #tpu.memory_space<vmem>>, vector<1x124xf32>
    %360 = vector.shape_cast %359 : vector<1x124xf32> to vector<124xf32>
    %361 = vector.shape_cast %360 : vector<124xf32> to vector<1x124xf32>
    %362 = vector.broadcast %361 : vector<1x124xf32> to vector<14x124xf32>
    %363 = arith.mulf %362, %340 : vector<14x124xf32>
    %364 = arith.addf %327, %363 : vector<14x124xf32>
    %c204 = arith.constant 204 : index
    %c0_69 = arith.constant 0 : index
    %365 = vector.load %arg0[%c204, %c0_69] : memref<294x124xf32, #tpu.memory_space<vmem>>, vector<1x124xf32>
    %366 = vector.shape_cast %365 : vector<1x124xf32> to vector<124xf32>
    %367 = vector.shape_cast %366 : vector<124xf32> to vector<1x124xf32>
    %368 = vector.broadcast %367 : vector<1x124xf32> to vector<14x124xf32>
    %369 = arith.mulf %368, %340 : vector<14x124xf32>
    %370 = arith.addf %333, %369 : vector<14x124xf32>
    %c253 = arith.constant 253 : index
    %c0_70 = arith.constant 0 : index
    %371 = vector.load %arg0[%c253, %c0_70] : memref<294x124xf32, #tpu.memory_space<vmem>>, vector<1x124xf32>
    %372 = vector.shape_cast %371 : vector<1x124xf32> to vector<124xf32>
    %373 = vector.shape_cast %372 : vector<124xf32> to vector<1x124xf32>
    %374 = vector.broadcast %373 : vector<1x124xf32> to vector<14x124xf32>
    %375 = arith.mulf %374, %340 : vector<14x124xf32>
    %376 = arith.addf %339, %375 : vector<14x124xf32>
    %377 = vector.extract_strided_slice %11 {offsets = [1, 0], sizes = [14, 124], strides = [1, 1]} : vector<20x124xf32> to vector<14x124xf32>
    %c9 = arith.constant 9 : index
    %c0_71 = arith.constant 0 : index
    %378 = vector.load %arg0[%c9, %c0_71] : memref<294x124xf32, #tpu.memory_space<vmem>>, vector<1x124xf32>
    %379 = vector.shape_cast %378 : vector<1x124xf32> to vector<124xf32>
    %380 = vector.shape_cast %379 : vector<124xf32> to vector<1x124xf32>
    %381 = vector.broadcast %380 : vector<1x124xf32> to vector<14x124xf32>
    %382 = arith.mulf %381, %377 : vector<14x124xf32>
    %383 = arith.addf %346, %382 : vector<14x124xf32>
    %c58 = arith.constant 58 : index
    %c0_72 = arith.constant 0 : index
    %384 = vector.load %arg0[%c58, %c0_72] : memref<294x124xf32, #tpu.memory_space<vmem>>, vector<1x124xf32>
    %385 = vector.shape_cast %384 : vector<1x124xf32> to vector<124xf32>
    %386 = vector.shape_cast %385 : vector<124xf32> to vector<1x124xf32>
    %387 = vector.broadcast %386 : vector<1x124xf32> to vector<14x124xf32>
    %388 = arith.mulf %387, %377 : vector<14x124xf32>
    %389 = arith.addf %352, %388 : vector<14x124xf32>
    %c107 = arith.constant 107 : index
    %c0_73 = arith.constant 0 : index
    %390 = vector.load %arg0[%c107, %c0_73] : memref<294x124xf32, #tpu.memory_space<vmem>>, vector<1x124xf32>
    %391 = vector.shape_cast %390 : vector<1x124xf32> to vector<124xf32>
    %392 = vector.shape_cast %391 : vector<124xf32> to vector<1x124xf32>
    %393 = vector.broadcast %392 : vector<1x124xf32> to vector<14x124xf32>
    %394 = arith.mulf %393, %377 : vector<14x124xf32>
    %395 = arith.addf %358, %394 : vector<14x124xf32>
    %c156 = arith.constant 156 : index
    %c0_74 = arith.constant 0 : index
    %396 = vector.load %arg0[%c156, %c0_74] : memref<294x124xf32, #tpu.memory_space<vmem>>, vector<1x124xf32>
    %397 = vector.shape_cast %396 : vector<1x124xf32> to vector<124xf32>
    %398 = vector.shape_cast %397 : vector<124xf32> to vector<1x124xf32>
    %399 = vector.broadcast %398 : vector<1x124xf32> to vector<14x124xf32>
    %400 = arith.mulf %399, %377 : vector<14x124xf32>
    %401 = arith.addf %364, %400 : vector<14x124xf32>
    %c205 = arith.constant 205 : index
    %c0_75 = arith.constant 0 : index
    %402 = vector.load %arg0[%c205, %c0_75] : memref<294x124xf32, #tpu.memory_space<vmem>>, vector<1x124xf32>
    %403 = vector.shape_cast %402 : vector<1x124xf32> to vector<124xf32>
    %404 = vector.shape_cast %403 : vector<124xf32> to vector<1x124xf32>
    %405 = vector.broadcast %404 : vector<1x124xf32> to vector<14x124xf32>
    %406 = arith.mulf %405, %377 : vector<14x124xf32>
    %407 = arith.addf %370, %406 : vector<14x124xf32>
    %c254 = arith.constant 254 : index
    %c0_76 = arith.constant 0 : index
    %408 = vector.load %arg0[%c254, %c0_76] : memref<294x124xf32, #tpu.memory_space<vmem>>, vector<1x124xf32>
    %409 = vector.shape_cast %408 : vector<1x124xf32> to vector<124xf32>
    %410 = vector.shape_cast %409 : vector<124xf32> to vector<1x124xf32>
    %411 = vector.broadcast %410 : vector<1x124xf32> to vector<14x124xf32>
    %412 = arith.mulf %411, %377 : vector<14x124xf32>
    %413 = arith.addf %376, %412 : vector<14x124xf32>
    %414 = vector.extract_strided_slice %13 {offsets = [1, 0], sizes = [14, 124], strides = [1, 1]} : vector<20x124xf32> to vector<14x124xf32>
    %c10 = arith.constant 10 : index
    %c0_77 = arith.constant 0 : index
    %415 = vector.load %arg0[%c10, %c0_77] : memref<294x124xf32, #tpu.memory_space<vmem>>, vector<1x124xf32>
    %416 = vector.shape_cast %415 : vector<1x124xf32> to vector<124xf32>
    %417 = vector.shape_cast %416 : vector<124xf32> to vector<1x124xf32>
    %418 = vector.broadcast %417 : vector<1x124xf32> to vector<14x124xf32>
    %419 = arith.mulf %418, %414 : vector<14x124xf32>
    %420 = arith.addf %383, %419 : vector<14x124xf32>
    %c59 = arith.constant 59 : index
    %c0_78 = arith.constant 0 : index
    %421 = vector.load %arg0[%c59, %c0_78] : memref<294x124xf32, #tpu.memory_space<vmem>>, vector<1x124xf32>
    %422 = vector.shape_cast %421 : vector<1x124xf32> to vector<124xf32>
    %423 = vector.shape_cast %422 : vector<124xf32> to vector<1x124xf32>
    %424 = vector.broadcast %423 : vector<1x124xf32> to vector<14x124xf32>
    %425 = arith.mulf %424, %414 : vector<14x124xf32>
    %426 = arith.addf %389, %425 : vector<14x124xf32>
    %c108 = arith.constant 108 : index
    %c0_79 = arith.constant 0 : index
    %427 = vector.load %arg0[%c108, %c0_79] : memref<294x124xf32, #tpu.memory_space<vmem>>, vector<1x124xf32>
    %428 = vector.shape_cast %427 : vector<1x124xf32> to vector<124xf32>
    %429 = vector.shape_cast %428 : vector<124xf32> to vector<1x124xf32>
    %430 = vector.broadcast %429 : vector<1x124xf32> to vector<14x124xf32>
    %431 = arith.mulf %430, %414 : vector<14x124xf32>
    %432 = arith.addf %395, %431 : vector<14x124xf32>
    %c157 = arith.constant 157 : index
    %c0_80 = arith.constant 0 : index
    %433 = vector.load %arg0[%c157, %c0_80] : memref<294x124xf32, #tpu.memory_space<vmem>>, vector<1x124xf32>
    %434 = vector.shape_cast %433 : vector<1x124xf32> to vector<124xf32>
    %435 = vector.shape_cast %434 : vector<124xf32> to vector<1x124xf32>
    %436 = vector.broadcast %435 : vector<1x124xf32> to vector<14x124xf32>
    %437 = arith.mulf %436, %414 : vector<14x124xf32>
    %438 = arith.addf %401, %437 : vector<14x124xf32>
    %c206 = arith.constant 206 : index
    %c0_81 = arith.constant 0 : index
    %439 = vector.load %arg0[%c206, %c0_81] : memref<294x124xf32, #tpu.memory_space<vmem>>, vector<1x124xf32>
    %440 = vector.shape_cast %439 : vector<1x124xf32> to vector<124xf32>
    %441 = vector.shape_cast %440 : vector<124xf32> to vector<1x124xf32>
    %442 = vector.broadcast %441 : vector<1x124xf32> to vector<14x124xf32>
    %443 = arith.mulf %442, %414 : vector<14x124xf32>
    %444 = arith.addf %407, %443 : vector<14x124xf32>
    %c255 = arith.constant 255 : index
    %c0_82 = arith.constant 0 : index
    %445 = vector.load %arg0[%c255, %c0_82] : memref<294x124xf32, #tpu.memory_space<vmem>>, vector<1x124xf32>
    %446 = vector.shape_cast %445 : vector<1x124xf32> to vector<124xf32>
    %447 = vector.shape_cast %446 : vector<124xf32> to vector<1x124xf32>
    %448 = vector.broadcast %447 : vector<1x124xf32> to vector<14x124xf32>
    %449 = arith.mulf %448, %414 : vector<14x124xf32>
    %450 = arith.addf %413, %449 : vector<14x124xf32>
    %451 = vector.extract_strided_slice %15 {offsets = [1, 0], sizes = [14, 124], strides = [1, 1]} : vector<20x124xf32> to vector<14x124xf32>
    %c11 = arith.constant 11 : index
    %c0_83 = arith.constant 0 : index
    %452 = vector.load %arg0[%c11, %c0_83] : memref<294x124xf32, #tpu.memory_space<vmem>>, vector<1x124xf32>
    %453 = vector.shape_cast %452 : vector<1x124xf32> to vector<124xf32>
    %454 = vector.shape_cast %453 : vector<124xf32> to vector<1x124xf32>
    %455 = vector.broadcast %454 : vector<1x124xf32> to vector<14x124xf32>
    %456 = arith.mulf %455, %451 : vector<14x124xf32>
    %457 = arith.addf %420, %456 : vector<14x124xf32>
    %c60 = arith.constant 60 : index
    %c0_84 = arith.constant 0 : index
    %458 = vector.load %arg0[%c60, %c0_84] : memref<294x124xf32, #tpu.memory_space<vmem>>, vector<1x124xf32>
    %459 = vector.shape_cast %458 : vector<1x124xf32> to vector<124xf32>
    %460 = vector.shape_cast %459 : vector<124xf32> to vector<1x124xf32>
    %461 = vector.broadcast %460 : vector<1x124xf32> to vector<14x124xf32>
    %462 = arith.mulf %461, %451 : vector<14x124xf32>
    %463 = arith.addf %426, %462 : vector<14x124xf32>
    %c109 = arith.constant 109 : index
    %c0_85 = arith.constant 0 : index
    %464 = vector.load %arg0[%c109, %c0_85] : memref<294x124xf32, #tpu.memory_space<vmem>>, vector<1x124xf32>
    %465 = vector.shape_cast %464 : vector<1x124xf32> to vector<124xf32>
    %466 = vector.shape_cast %465 : vector<124xf32> to vector<1x124xf32>
    %467 = vector.broadcast %466 : vector<1x124xf32> to vector<14x124xf32>
    %468 = arith.mulf %467, %451 : vector<14x124xf32>
    %469 = arith.addf %432, %468 : vector<14x124xf32>
    %c158 = arith.constant 158 : index
    %c0_86 = arith.constant 0 : index
    %470 = vector.load %arg0[%c158, %c0_86] : memref<294x124xf32, #tpu.memory_space<vmem>>, vector<1x124xf32>
    %471 = vector.shape_cast %470 : vector<1x124xf32> to vector<124xf32>
    %472 = vector.shape_cast %471 : vector<124xf32> to vector<1x124xf32>
    %473 = vector.broadcast %472 : vector<1x124xf32> to vector<14x124xf32>
    %474 = arith.mulf %473, %451 : vector<14x124xf32>
    %475 = arith.addf %438, %474 : vector<14x124xf32>
    %c207 = arith.constant 207 : index
    %c0_87 = arith.constant 0 : index
    %476 = vector.load %arg0[%c207, %c0_87] : memref<294x124xf32, #tpu.memory_space<vmem>>, vector<1x124xf32>
    %477 = vector.shape_cast %476 : vector<1x124xf32> to vector<124xf32>
    %478 = vector.shape_cast %477 : vector<124xf32> to vector<1x124xf32>
    %479 = vector.broadcast %478 : vector<1x124xf32> to vector<14x124xf32>
    %480 = arith.mulf %479, %451 : vector<14x124xf32>
    %481 = arith.addf %444, %480 : vector<14x124xf32>
    %c256 = arith.constant 256 : index
    %c0_88 = arith.constant 0 : index
    %482 = vector.load %arg0[%c256, %c0_88] : memref<294x124xf32, #tpu.memory_space<vmem>>, vector<1x124xf32>
    %483 = vector.shape_cast %482 : vector<1x124xf32> to vector<124xf32>
    %484 = vector.shape_cast %483 : vector<124xf32> to vector<1x124xf32>
    %485 = vector.broadcast %484 : vector<1x124xf32> to vector<14x124xf32>
    %486 = arith.mulf %485, %451 : vector<14x124xf32>
    %487 = arith.addf %450, %486 : vector<14x124xf32>
    %488 = vector.extract_strided_slice %17 {offsets = [1, 0], sizes = [14, 124], strides = [1, 1]} : vector<20x124xf32> to vector<14x124xf32>
    %c12 = arith.constant 12 : index
    %c0_89 = arith.constant 0 : index
    %489 = vector.load %arg0[%c12, %c0_89] : memref<294x124xf32, #tpu.memory_space<vmem>>, vector<1x124xf32>
    %490 = vector.shape_cast %489 : vector<1x124xf32> to vector<124xf32>
    %491 = vector.shape_cast %490 : vector<124xf32> to vector<1x124xf32>
    %492 = vector.broadcast %491 : vector<1x124xf32> to vector<14x124xf32>
    %493 = arith.mulf %492, %488 : vector<14x124xf32>
    %494 = arith.addf %457, %493 : vector<14x124xf32>
    %c61 = arith.constant 61 : index
    %c0_90 = arith.constant 0 : index
    %495 = vector.load %arg0[%c61, %c0_90] : memref<294x124xf32, #tpu.memory_space<vmem>>, vector<1x124xf32>
    %496 = vector.shape_cast %495 : vector<1x124xf32> to vector<124xf32>
    %497 = vector.shape_cast %496 : vector<124xf32> to vector<1x124xf32>
    %498 = vector.broadcast %497 : vector<1x124xf32> to vector<14x124xf32>
    %499 = arith.mulf %498, %488 : vector<14x124xf32>
    %500 = arith.addf %463, %499 : vector<14x124xf32>
    %c110 = arith.constant 110 : index
    %c0_91 = arith.constant 0 : index
    %501 = vector.load %arg0[%c110, %c0_91] : memref<294x124xf32, #tpu.memory_space<vmem>>, vector<1x124xf32>
    %502 = vector.shape_cast %501 : vector<1x124xf32> to vector<124xf32>
    %503 = vector.shape_cast %502 : vector<124xf32> to vector<1x124xf32>
    %504 = vector.broadcast %503 : vector<1x124xf32> to vector<14x124xf32>
    %505 = arith.mulf %504, %488 : vector<14x124xf32>
    %506 = arith.addf %469, %505 : vector<14x124xf32>
    %c159 = arith.constant 159 : index
    %c0_92 = arith.constant 0 : index
    %507 = vector.load %arg0[%c159, %c0_92] : memref<294x124xf32, #tpu.memory_space<vmem>>, vector<1x124xf32>
    %508 = vector.shape_cast %507 : vector<1x124xf32> to vector<124xf32>
    %509 = vector.shape_cast %508 : vector<124xf32> to vector<1x124xf32>
    %510 = vector.broadcast %509 : vector<1x124xf32> to vector<14x124xf32>
    %511 = arith.mulf %510, %488 : vector<14x124xf32>
    %512 = arith.addf %475, %511 : vector<14x124xf32>
    %c208 = arith.constant 208 : index
    %c0_93 = arith.constant 0 : index
    %513 = vector.load %arg0[%c208, %c0_93] : memref<294x124xf32, #tpu.memory_space<vmem>>, vector<1x124xf32>
    %514 = vector.shape_cast %513 : vector<1x124xf32> to vector<124xf32>
    %515 = vector.shape_cast %514 : vector<124xf32> to vector<1x124xf32>
    %516 = vector.broadcast %515 : vector<1x124xf32> to vector<14x124xf32>
    %517 = arith.mulf %516, %488 : vector<14x124xf32>
    %518 = arith.addf %481, %517 : vector<14x124xf32>
    %c257 = arith.constant 257 : index
    %c0_94 = arith.constant 0 : index
    %519 = vector.load %arg0[%c257, %c0_94] : memref<294x124xf32, #tpu.memory_space<vmem>>, vector<1x124xf32>
    %520 = vector.shape_cast %519 : vector<1x124xf32> to vector<124xf32>
    %521 = vector.shape_cast %520 : vector<124xf32> to vector<1x124xf32>
    %522 = vector.broadcast %521 : vector<1x124xf32> to vector<14x124xf32>
    %523 = arith.mulf %522, %488 : vector<14x124xf32>
    %524 = arith.addf %487, %523 : vector<14x124xf32>
    %525 = vector.extract_strided_slice %19 {offsets = [1, 0], sizes = [14, 124], strides = [1, 1]} : vector<20x124xf32> to vector<14x124xf32>
    %c13 = arith.constant 13 : index
    %c0_95 = arith.constant 0 : index
    %526 = vector.load %arg0[%c13, %c0_95] : memref<294x124xf32, #tpu.memory_space<vmem>>, vector<1x124xf32>
    %527 = vector.shape_cast %526 : vector<1x124xf32> to vector<124xf32>
    %528 = vector.shape_cast %527 : vector<124xf32> to vector<1x124xf32>
    %529 = vector.broadcast %528 : vector<1x124xf32> to vector<14x124xf32>
    %530 = arith.mulf %529, %525 : vector<14x124xf32>
    %531 = arith.addf %494, %530 : vector<14x124xf32>
    %c62 = arith.constant 62 : index
    %c0_96 = arith.constant 0 : index
    %532 = vector.load %arg0[%c62, %c0_96] : memref<294x124xf32, #tpu.memory_space<vmem>>, vector<1x124xf32>
    %533 = vector.shape_cast %532 : vector<1x124xf32> to vector<124xf32>
    %534 = vector.shape_cast %533 : vector<124xf32> to vector<1x124xf32>
    %535 = vector.broadcast %534 : vector<1x124xf32> to vector<14x124xf32>
    %536 = arith.mulf %535, %525 : vector<14x124xf32>
    %537 = arith.addf %500, %536 : vector<14x124xf32>
    %c111 = arith.constant 111 : index
    %c0_97 = arith.constant 0 : index
    %538 = vector.load %arg0[%c111, %c0_97] : memref<294x124xf32, #tpu.memory_space<vmem>>, vector<1x124xf32>
    %539 = vector.shape_cast %538 : vector<1x124xf32> to vector<124xf32>
    %540 = vector.shape_cast %539 : vector<124xf32> to vector<1x124xf32>
    %541 = vector.broadcast %540 : vector<1x124xf32> to vector<14x124xf32>
    %542 = arith.mulf %541, %525 : vector<14x124xf32>
    %543 = arith.addf %506, %542 : vector<14x124xf32>
    %c160 = arith.constant 160 : index
    %c0_98 = arith.constant 0 : index
    %544 = vector.load %arg0[%c160, %c0_98] : memref<294x124xf32, #tpu.memory_space<vmem>>, vector<1x124xf32>
    %545 = vector.shape_cast %544 : vector<1x124xf32> to vector<124xf32>
    %546 = vector.shape_cast %545 : vector<124xf32> to vector<1x124xf32>
    %547 = vector.broadcast %546 : vector<1x124xf32> to vector<14x124xf32>
    %548 = arith.mulf %547, %525 : vector<14x124xf32>
    %549 = arith.addf %512, %548 : vector<14x124xf32>
    %c209 = arith.constant 209 : index
    %c0_99 = arith.constant 0 : index
    %550 = vector.load %arg0[%c209, %c0_99] : memref<294x124xf32, #tpu.memory_space<vmem>>, vector<1x124xf32>
    %551 = vector.shape_cast %550 : vector<1x124xf32> to vector<124xf32>
    %552 = vector.shape_cast %551 : vector<124xf32> to vector<1x124xf32>
    %553 = vector.broadcast %552 : vector<1x124xf32> to vector<14x124xf32>
    %554 = arith.mulf %553, %525 : vector<14x124xf32>
    %555 = arith.addf %518, %554 : vector<14x124xf32>
    %c258 = arith.constant 258 : index
    %c0_100 = arith.constant 0 : index
    %556 = vector.load %arg0[%c258, %c0_100] : memref<294x124xf32, #tpu.memory_space<vmem>>, vector<1x124xf32>
    %557 = vector.shape_cast %556 : vector<1x124xf32> to vector<124xf32>
    %558 = vector.shape_cast %557 : vector<124xf32> to vector<1x124xf32>
    %559 = vector.broadcast %558 : vector<1x124xf32> to vector<14x124xf32>
    %560 = arith.mulf %559, %525 : vector<14x124xf32>
    %561 = arith.addf %524, %560 : vector<14x124xf32>
    %562 = vector.extract_strided_slice %7 {offsets = [2, 0], sizes = [14, 124], strides = [1, 1]} : vector<20x124xf32> to vector<14x124xf32>
    %c14 = arith.constant 14 : index
    %c0_101 = arith.constant 0 : index
    %563 = vector.load %arg0[%c14, %c0_101] : memref<294x124xf32, #tpu.memory_space<vmem>>, vector<1x124xf32>
    %564 = vector.shape_cast %563 : vector<1x124xf32> to vector<124xf32>
    %565 = vector.shape_cast %564 : vector<124xf32> to vector<1x124xf32>
    %566 = vector.broadcast %565 : vector<1x124xf32> to vector<14x124xf32>
    %567 = arith.mulf %566, %562 : vector<14x124xf32>
    %568 = arith.addf %531, %567 : vector<14x124xf32>
    %c63 = arith.constant 63 : index
    %c0_102 = arith.constant 0 : index
    %569 = vector.load %arg0[%c63, %c0_102] : memref<294x124xf32, #tpu.memory_space<vmem>>, vector<1x124xf32>
    %570 = vector.shape_cast %569 : vector<1x124xf32> to vector<124xf32>
    %571 = vector.shape_cast %570 : vector<124xf32> to vector<1x124xf32>
    %572 = vector.broadcast %571 : vector<1x124xf32> to vector<14x124xf32>
    %573 = arith.mulf %572, %562 : vector<14x124xf32>
    %574 = arith.addf %537, %573 : vector<14x124xf32>
    %c112 = arith.constant 112 : index
    %c0_103 = arith.constant 0 : index
    %575 = vector.load %arg0[%c112, %c0_103] : memref<294x124xf32, #tpu.memory_space<vmem>>, vector<1x124xf32>
    %576 = vector.shape_cast %575 : vector<1x124xf32> to vector<124xf32>
    %577 = vector.shape_cast %576 : vector<124xf32> to vector<1x124xf32>
    %578 = vector.broadcast %577 : vector<1x124xf32> to vector<14x124xf32>
    %579 = arith.mulf %578, %562 : vector<14x124xf32>
    %580 = arith.addf %543, %579 : vector<14x124xf32>
    %c161 = arith.constant 161 : index
    %c0_104 = arith.constant 0 : index
    %581 = vector.load %arg0[%c161, %c0_104] : memref<294x124xf32, #tpu.memory_space<vmem>>, vector<1x124xf32>
    %582 = vector.shape_cast %581 : vector<1x124xf32> to vector<124xf32>
    %583 = vector.shape_cast %582 : vector<124xf32> to vector<1x124xf32>
    %584 = vector.broadcast %583 : vector<1x124xf32> to vector<14x124xf32>
    %585 = arith.mulf %584, %562 : vector<14x124xf32>
    %586 = arith.addf %549, %585 : vector<14x124xf32>
    %c210 = arith.constant 210 : index
    %c0_105 = arith.constant 0 : index
    %587 = vector.load %arg0[%c210, %c0_105] : memref<294x124xf32, #tpu.memory_space<vmem>>, vector<1x124xf32>
    %588 = vector.shape_cast %587 : vector<1x124xf32> to vector<124xf32>
    %589 = vector.shape_cast %588 : vector<124xf32> to vector<1x124xf32>
    %590 = vector.broadcast %589 : vector<1x124xf32> to vector<14x124xf32>
    %591 = arith.mulf %590, %562 : vector<14x124xf32>
    %592 = arith.addf %555, %591 : vector<14x124xf32>
    %c259 = arith.constant 259 : index
    %c0_106 = arith.constant 0 : index
    %593 = vector.load %arg0[%c259, %c0_106] : memref<294x124xf32, #tpu.memory_space<vmem>>, vector<1x124xf32>
    %594 = vector.shape_cast %593 : vector<1x124xf32> to vector<124xf32>
    %595 = vector.shape_cast %594 : vector<124xf32> to vector<1x124xf32>
    %596 = vector.broadcast %595 : vector<1x124xf32> to vector<14x124xf32>
    %597 = arith.mulf %596, %562 : vector<14x124xf32>
    %598 = arith.addf %561, %597 : vector<14x124xf32>
    %599 = vector.extract_strided_slice %9 {offsets = [2, 0], sizes = [14, 124], strides = [1, 1]} : vector<20x124xf32> to vector<14x124xf32>
    %c15 = arith.constant 15 : index
    %c0_107 = arith.constant 0 : index
    %600 = vector.load %arg0[%c15, %c0_107] : memref<294x124xf32, #tpu.memory_space<vmem>>, vector<1x124xf32>
    %601 = vector.shape_cast %600 : vector<1x124xf32> to vector<124xf32>
    %602 = vector.shape_cast %601 : vector<124xf32> to vector<1x124xf32>
    %603 = vector.broadcast %602 : vector<1x124xf32> to vector<14x124xf32>
    %604 = arith.mulf %603, %599 : vector<14x124xf32>
    %605 = arith.addf %568, %604 : vector<14x124xf32>
    %c64 = arith.constant 64 : index
    %c0_108 = arith.constant 0 : index
    %606 = vector.load %arg0[%c64, %c0_108] : memref<294x124xf32, #tpu.memory_space<vmem>>, vector<1x124xf32>
    %607 = vector.shape_cast %606 : vector<1x124xf32> to vector<124xf32>
    %608 = vector.shape_cast %607 : vector<124xf32> to vector<1x124xf32>
    %609 = vector.broadcast %608 : vector<1x124xf32> to vector<14x124xf32>
    %610 = arith.mulf %609, %599 : vector<14x124xf32>
    %611 = arith.addf %574, %610 : vector<14x124xf32>
    %c113 = arith.constant 113 : index
    %c0_109 = arith.constant 0 : index
    %612 = vector.load %arg0[%c113, %c0_109] : memref<294x124xf32, #tpu.memory_space<vmem>>, vector<1x124xf32>
    %613 = vector.shape_cast %612 : vector<1x124xf32> to vector<124xf32>
    %614 = vector.shape_cast %613 : vector<124xf32> to vector<1x124xf32>
    %615 = vector.broadcast %614 : vector<1x124xf32> to vector<14x124xf32>
    %616 = arith.mulf %615, %599 : vector<14x124xf32>
    %617 = arith.addf %580, %616 : vector<14x124xf32>
    %c162 = arith.constant 162 : index
    %c0_110 = arith.constant 0 : index
    %618 = vector.load %arg0[%c162, %c0_110] : memref<294x124xf32, #tpu.memory_space<vmem>>, vector<1x124xf32>
    %619 = vector.shape_cast %618 : vector<1x124xf32> to vector<124xf32>
    %620 = vector.shape_cast %619 : vector<124xf32> to vector<1x124xf32>
    %621 = vector.broadcast %620 : vector<1x124xf32> to vector<14x124xf32>
    %622 = arith.mulf %621, %599 : vector<14x124xf32>
    %623 = arith.addf %586, %622 : vector<14x124xf32>
    %c211 = arith.constant 211 : index
    %c0_111 = arith.constant 0 : index
    %624 = vector.load %arg0[%c211, %c0_111] : memref<294x124xf32, #tpu.memory_space<vmem>>, vector<1x124xf32>
    %625 = vector.shape_cast %624 : vector<1x124xf32> to vector<124xf32>
    %626 = vector.shape_cast %625 : vector<124xf32> to vector<1x124xf32>
    %627 = vector.broadcast %626 : vector<1x124xf32> to vector<14x124xf32>
    %628 = arith.mulf %627, %599 : vector<14x124xf32>
    %629 = arith.addf %592, %628 : vector<14x124xf32>
    %c260 = arith.constant 260 : index
    %c0_112 = arith.constant 0 : index
    %630 = vector.load %arg0[%c260, %c0_112] : memref<294x124xf32, #tpu.memory_space<vmem>>, vector<1x124xf32>
    %631 = vector.shape_cast %630 : vector<1x124xf32> to vector<124xf32>
    %632 = vector.shape_cast %631 : vector<124xf32> to vector<1x124xf32>
    %633 = vector.broadcast %632 : vector<1x124xf32> to vector<14x124xf32>
    %634 = arith.mulf %633, %599 : vector<14x124xf32>
    %635 = arith.addf %598, %634 : vector<14x124xf32>
    %636 = vector.extract_strided_slice %11 {offsets = [2, 0], sizes = [14, 124], strides = [1, 1]} : vector<20x124xf32> to vector<14x124xf32>
    %c16 = arith.constant 16 : index
    %c0_113 = arith.constant 0 : index
    %637 = vector.load %arg0[%c16, %c0_113] : memref<294x124xf32, #tpu.memory_space<vmem>>, vector<1x124xf32>
    %638 = vector.shape_cast %637 : vector<1x124xf32> to vector<124xf32>
    %639 = vector.shape_cast %638 : vector<124xf32> to vector<1x124xf32>
    %640 = vector.broadcast %639 : vector<1x124xf32> to vector<14x124xf32>
    %641 = arith.mulf %640, %636 : vector<14x124xf32>
    %642 = arith.addf %605, %641 : vector<14x124xf32>
    %c65 = arith.constant 65 : index
    %c0_114 = arith.constant 0 : index
    %643 = vector.load %arg0[%c65, %c0_114] : memref<294x124xf32, #tpu.memory_space<vmem>>, vector<1x124xf32>
    %644 = vector.shape_cast %643 : vector<1x124xf32> to vector<124xf32>
    %645 = vector.shape_cast %644 : vector<124xf32> to vector<1x124xf32>
    %646 = vector.broadcast %645 : vector<1x124xf32> to vector<14x124xf32>
    %647 = arith.mulf %646, %636 : vector<14x124xf32>
    %648 = arith.addf %611, %647 : vector<14x124xf32>
    %c114 = arith.constant 114 : index
    %c0_115 = arith.constant 0 : index
    %649 = vector.load %arg0[%c114, %c0_115] : memref<294x124xf32, #tpu.memory_space<vmem>>, vector<1x124xf32>
    %650 = vector.shape_cast %649 : vector<1x124xf32> to vector<124xf32>
    %651 = vector.shape_cast %650 : vector<124xf32> to vector<1x124xf32>
    %652 = vector.broadcast %651 : vector<1x124xf32> to vector<14x124xf32>
    %653 = arith.mulf %652, %636 : vector<14x124xf32>
    %654 = arith.addf %617, %653 : vector<14x124xf32>
    %c163 = arith.constant 163 : index
    %c0_116 = arith.constant 0 : index
    %655 = vector.load %arg0[%c163, %c0_116] : memref<294x124xf32, #tpu.memory_space<vmem>>, vector<1x124xf32>
    %656 = vector.shape_cast %655 : vector<1x124xf32> to vector<124xf32>
    %657 = vector.shape_cast %656 : vector<124xf32> to vector<1x124xf32>
    %658 = vector.broadcast %657 : vector<1x124xf32> to vector<14x124xf32>
    %659 = arith.mulf %658, %636 : vector<14x124xf32>
    %660 = arith.addf %623, %659 : vector<14x124xf32>
    %c212 = arith.constant 212 : index
    %c0_117 = arith.constant 0 : index
    %661 = vector.load %arg0[%c212, %c0_117] : memref<294x124xf32, #tpu.memory_space<vmem>>, vector<1x124xf32>
    %662 = vector.shape_cast %661 : vector<1x124xf32> to vector<124xf32>
    %663 = vector.shape_cast %662 : vector<124xf32> to vector<1x124xf32>
    %664 = vector.broadcast %663 : vector<1x124xf32> to vector<14x124xf32>
    %665 = arith.mulf %664, %636 : vector<14x124xf32>
    %666 = arith.addf %629, %665 : vector<14x124xf32>
    %c261 = arith.constant 261 : index
    %c0_118 = arith.constant 0 : index
    %667 = vector.load %arg0[%c261, %c0_118] : memref<294x124xf32, #tpu.memory_space<vmem>>, vector<1x124xf32>
    %668 = vector.shape_cast %667 : vector<1x124xf32> to vector<124xf32>
    %669 = vector.shape_cast %668 : vector<124xf32> to vector<1x124xf32>
    %670 = vector.broadcast %669 : vector<1x124xf32> to vector<14x124xf32>
    %671 = arith.mulf %670, %636 : vector<14x124xf32>
    %672 = arith.addf %635, %671 : vector<14x124xf32>
    %673 = vector.extract_strided_slice %13 {offsets = [2, 0], sizes = [14, 124], strides = [1, 1]} : vector<20x124xf32> to vector<14x124xf32>
    %c17 = arith.constant 17 : index
    %c0_119 = arith.constant 0 : index
    %674 = vector.load %arg0[%c17, %c0_119] : memref<294x124xf32, #tpu.memory_space<vmem>>, vector<1x124xf32>
    %675 = vector.shape_cast %674 : vector<1x124xf32> to vector<124xf32>
    %676 = vector.shape_cast %675 : vector<124xf32> to vector<1x124xf32>
    %677 = vector.broadcast %676 : vector<1x124xf32> to vector<14x124xf32>
    %678 = arith.mulf %677, %673 : vector<14x124xf32>
    %679 = arith.addf %642, %678 : vector<14x124xf32>
    %c66 = arith.constant 66 : index
    %c0_120 = arith.constant 0 : index
    %680 = vector.load %arg0[%c66, %c0_120] : memref<294x124xf32, #tpu.memory_space<vmem>>, vector<1x124xf32>
    %681 = vector.shape_cast %680 : vector<1x124xf32> to vector<124xf32>
    %682 = vector.shape_cast %681 : vector<124xf32> to vector<1x124xf32>
    %683 = vector.broadcast %682 : vector<1x124xf32> to vector<14x124xf32>
    %684 = arith.mulf %683, %673 : vector<14x124xf32>
    %685 = arith.addf %648, %684 : vector<14x124xf32>
    %c115 = arith.constant 115 : index
    %c0_121 = arith.constant 0 : index
    %686 = vector.load %arg0[%c115, %c0_121] : memref<294x124xf32, #tpu.memory_space<vmem>>, vector<1x124xf32>
    %687 = vector.shape_cast %686 : vector<1x124xf32> to vector<124xf32>
    %688 = vector.shape_cast %687 : vector<124xf32> to vector<1x124xf32>
    %689 = vector.broadcast %688 : vector<1x124xf32> to vector<14x124xf32>
    %690 = arith.mulf %689, %673 : vector<14x124xf32>
    %691 = arith.addf %654, %690 : vector<14x124xf32>
    %c164 = arith.constant 164 : index
    %c0_122 = arith.constant 0 : index
    %692 = vector.load %arg0[%c164, %c0_122] : memref<294x124xf32, #tpu.memory_space<vmem>>, vector<1x124xf32>
    %693 = vector.shape_cast %692 : vector<1x124xf32> to vector<124xf32>
    %694 = vector.shape_cast %693 : vector<124xf32> to vector<1x124xf32>
    %695 = vector.broadcast %694 : vector<1x124xf32> to vector<14x124xf32>
    %696 = arith.mulf %695, %673 : vector<14x124xf32>
    %697 = arith.addf %660, %696 : vector<14x124xf32>
    %c213 = arith.constant 213 : index
    %c0_123 = arith.constant 0 : index
    %698 = vector.load %arg0[%c213, %c0_123] : memref<294x124xf32, #tpu.memory_space<vmem>>, vector<1x124xf32>
    %699 = vector.shape_cast %698 : vector<1x124xf32> to vector<124xf32>
    %700 = vector.shape_cast %699 : vector<124xf32> to vector<1x124xf32>
    %701 = vector.broadcast %700 : vector<1x124xf32> to vector<14x124xf32>
    %702 = arith.mulf %701, %673 : vector<14x124xf32>
    %703 = arith.addf %666, %702 : vector<14x124xf32>
    %c262 = arith.constant 262 : index
    %c0_124 = arith.constant 0 : index
    %704 = vector.load %arg0[%c262, %c0_124] : memref<294x124xf32, #tpu.memory_space<vmem>>, vector<1x124xf32>
    %705 = vector.shape_cast %704 : vector<1x124xf32> to vector<124xf32>
    %706 = vector.shape_cast %705 : vector<124xf32> to vector<1x124xf32>
    %707 = vector.broadcast %706 : vector<1x124xf32> to vector<14x124xf32>
    %708 = arith.mulf %707, %673 : vector<14x124xf32>
    %709 = arith.addf %672, %708 : vector<14x124xf32>
    %710 = vector.extract_strided_slice %15 {offsets = [2, 0], sizes = [14, 124], strides = [1, 1]} : vector<20x124xf32> to vector<14x124xf32>
    %c18 = arith.constant 18 : index
    %c0_125 = arith.constant 0 : index
    %711 = vector.load %arg0[%c18, %c0_125] : memref<294x124xf32, #tpu.memory_space<vmem>>, vector<1x124xf32>
    %712 = vector.shape_cast %711 : vector<1x124xf32> to vector<124xf32>
    %713 = vector.shape_cast %712 : vector<124xf32> to vector<1x124xf32>
    %714 = vector.broadcast %713 : vector<1x124xf32> to vector<14x124xf32>
    %715 = arith.mulf %714, %710 : vector<14x124xf32>
    %716 = arith.addf %679, %715 : vector<14x124xf32>
    %c67 = arith.constant 67 : index
    %c0_126 = arith.constant 0 : index
    %717 = vector.load %arg0[%c67, %c0_126] : memref<294x124xf32, #tpu.memory_space<vmem>>, vector<1x124xf32>
    %718 = vector.shape_cast %717 : vector<1x124xf32> to vector<124xf32>
    %719 = vector.shape_cast %718 : vector<124xf32> to vector<1x124xf32>
    %720 = vector.broadcast %719 : vector<1x124xf32> to vector<14x124xf32>
    %721 = arith.mulf %720, %710 : vector<14x124xf32>
    %722 = arith.addf %685, %721 : vector<14x124xf32>
    %c116 = arith.constant 116 : index
    %c0_127 = arith.constant 0 : index
    %723 = vector.load %arg0[%c116, %c0_127] : memref<294x124xf32, #tpu.memory_space<vmem>>, vector<1x124xf32>
    %724 = vector.shape_cast %723 : vector<1x124xf32> to vector<124xf32>
    %725 = vector.shape_cast %724 : vector<124xf32> to vector<1x124xf32>
    %726 = vector.broadcast %725 : vector<1x124xf32> to vector<14x124xf32>
    %727 = arith.mulf %726, %710 : vector<14x124xf32>
    %728 = arith.addf %691, %727 : vector<14x124xf32>
    %c165 = arith.constant 165 : index
    %c0_128 = arith.constant 0 : index
    %729 = vector.load %arg0[%c165, %c0_128] : memref<294x124xf32, #tpu.memory_space<vmem>>, vector<1x124xf32>
    %730 = vector.shape_cast %729 : vector<1x124xf32> to vector<124xf32>
    %731 = vector.shape_cast %730 : vector<124xf32> to vector<1x124xf32>
    %732 = vector.broadcast %731 : vector<1x124xf32> to vector<14x124xf32>
    %733 = arith.mulf %732, %710 : vector<14x124xf32>
    %734 = arith.addf %697, %733 : vector<14x124xf32>
    %c214 = arith.constant 214 : index
    %c0_129 = arith.constant 0 : index
    %735 = vector.load %arg0[%c214, %c0_129] : memref<294x124xf32, #tpu.memory_space<vmem>>, vector<1x124xf32>
    %736 = vector.shape_cast %735 : vector<1x124xf32> to vector<124xf32>
    %737 = vector.shape_cast %736 : vector<124xf32> to vector<1x124xf32>
    %738 = vector.broadcast %737 : vector<1x124xf32> to vector<14x124xf32>
    %739 = arith.mulf %738, %710 : vector<14x124xf32>
    %740 = arith.addf %703, %739 : vector<14x124xf32>
    %c263 = arith.constant 263 : index
    %c0_130 = arith.constant 0 : index
    %741 = vector.load %arg0[%c263, %c0_130] : memref<294x124xf32, #tpu.memory_space<vmem>>, vector<1x124xf32>
    %742 = vector.shape_cast %741 : vector<1x124xf32> to vector<124xf32>
    %743 = vector.shape_cast %742 : vector<124xf32> to vector<1x124xf32>
    %744 = vector.broadcast %743 : vector<1x124xf32> to vector<14x124xf32>
    %745 = arith.mulf %744, %710 : vector<14x124xf32>
    %746 = arith.addf %709, %745 : vector<14x124xf32>
    %747 = vector.extract_strided_slice %17 {offsets = [2, 0], sizes = [14, 124], strides = [1, 1]} : vector<20x124xf32> to vector<14x124xf32>
    %c19 = arith.constant 19 : index
    %c0_131 = arith.constant 0 : index
    %748 = vector.load %arg0[%c19, %c0_131] : memref<294x124xf32, #tpu.memory_space<vmem>>, vector<1x124xf32>
    %749 = vector.shape_cast %748 : vector<1x124xf32> to vector<124xf32>
    %750 = vector.shape_cast %749 : vector<124xf32> to vector<1x124xf32>
    %751 = vector.broadcast %750 : vector<1x124xf32> to vector<14x124xf32>
    %752 = arith.mulf %751, %747 : vector<14x124xf32>
    %753 = arith.addf %716, %752 : vector<14x124xf32>
    %c68 = arith.constant 68 : index
    %c0_132 = arith.constant 0 : index
    %754 = vector.load %arg0[%c68, %c0_132] : memref<294x124xf32, #tpu.memory_space<vmem>>, vector<1x124xf32>
    %755 = vector.shape_cast %754 : vector<1x124xf32> to vector<124xf32>
    %756 = vector.shape_cast %755 : vector<124xf32> to vector<1x124xf32>
    %757 = vector.broadcast %756 : vector<1x124xf32> to vector<14x124xf32>
    %758 = arith.mulf %757, %747 : vector<14x124xf32>
    %759 = arith.addf %722, %758 : vector<14x124xf32>
    %c117 = arith.constant 117 : index
    %c0_133 = arith.constant 0 : index
    %760 = vector.load %arg0[%c117, %c0_133] : memref<294x124xf32, #tpu.memory_space<vmem>>, vector<1x124xf32>
    %761 = vector.shape_cast %760 : vector<1x124xf32> to vector<124xf32>
    %762 = vector.shape_cast %761 : vector<124xf32> to vector<1x124xf32>
    %763 = vector.broadcast %762 : vector<1x124xf32> to vector<14x124xf32>
    %764 = arith.mulf %763, %747 : vector<14x124xf32>
    %765 = arith.addf %728, %764 : vector<14x124xf32>
    %c166 = arith.constant 166 : index
    %c0_134 = arith.constant 0 : index
    %766 = vector.load %arg0[%c166, %c0_134] : memref<294x124xf32, #tpu.memory_space<vmem>>, vector<1x124xf32>
    %767 = vector.shape_cast %766 : vector<1x124xf32> to vector<124xf32>
    %768 = vector.shape_cast %767 : vector<124xf32> to vector<1x124xf32>
    %769 = vector.broadcast %768 : vector<1x124xf32> to vector<14x124xf32>
    %770 = arith.mulf %769, %747 : vector<14x124xf32>
    %771 = arith.addf %734, %770 : vector<14x124xf32>
    %c215 = arith.constant 215 : index
    %c0_135 = arith.constant 0 : index
    %772 = vector.load %arg0[%c215, %c0_135] : memref<294x124xf32, #tpu.memory_space<vmem>>, vector<1x124xf32>
    %773 = vector.shape_cast %772 : vector<1x124xf32> to vector<124xf32>
    %774 = vector.shape_cast %773 : vector<124xf32> to vector<1x124xf32>
    %775 = vector.broadcast %774 : vector<1x124xf32> to vector<14x124xf32>
    %776 = arith.mulf %775, %747 : vector<14x124xf32>
    %777 = arith.addf %740, %776 : vector<14x124xf32>
    %c264 = arith.constant 264 : index
    %c0_136 = arith.constant 0 : index
    %778 = vector.load %arg0[%c264, %c0_136] : memref<294x124xf32, #tpu.memory_space<vmem>>, vector<1x124xf32>
    %779 = vector.shape_cast %778 : vector<1x124xf32> to vector<124xf32>
    %780 = vector.shape_cast %779 : vector<124xf32> to vector<1x124xf32>
    %781 = vector.broadcast %780 : vector<1x124xf32> to vector<14x124xf32>
    %782 = arith.mulf %781, %747 : vector<14x124xf32>
    %783 = arith.addf %746, %782 : vector<14x124xf32>
    %784 = vector.extract_strided_slice %19 {offsets = [2, 0], sizes = [14, 124], strides = [1, 1]} : vector<20x124xf32> to vector<14x124xf32>
    %c20 = arith.constant 20 : index
    %c0_137 = arith.constant 0 : index
    %785 = vector.load %arg0[%c20, %c0_137] : memref<294x124xf32, #tpu.memory_space<vmem>>, vector<1x124xf32>
    %786 = vector.shape_cast %785 : vector<1x124xf32> to vector<124xf32>
    %787 = vector.shape_cast %786 : vector<124xf32> to vector<1x124xf32>
    %788 = vector.broadcast %787 : vector<1x124xf32> to vector<14x124xf32>
    %789 = arith.mulf %788, %784 : vector<14x124xf32>
    %790 = arith.addf %753, %789 : vector<14x124xf32>
    %c69 = arith.constant 69 : index
    %c0_138 = arith.constant 0 : index
    %791 = vector.load %arg0[%c69, %c0_138] : memref<294x124xf32, #tpu.memory_space<vmem>>, vector<1x124xf32>
    %792 = vector.shape_cast %791 : vector<1x124xf32> to vector<124xf32>
    %793 = vector.shape_cast %792 : vector<124xf32> to vector<1x124xf32>
    %794 = vector.broadcast %793 : vector<1x124xf32> to vector<14x124xf32>
    %795 = arith.mulf %794, %784 : vector<14x124xf32>
    %796 = arith.addf %759, %795 : vector<14x124xf32>
    %c118 = arith.constant 118 : index
    %c0_139 = arith.constant 0 : index
    %797 = vector.load %arg0[%c118, %c0_139] : memref<294x124xf32, #tpu.memory_space<vmem>>, vector<1x124xf32>
    %798 = vector.shape_cast %797 : vector<1x124xf32> to vector<124xf32>
    %799 = vector.shape_cast %798 : vector<124xf32> to vector<1x124xf32>
    %800 = vector.broadcast %799 : vector<1x124xf32> to vector<14x124xf32>
    %801 = arith.mulf %800, %784 : vector<14x124xf32>
    %802 = arith.addf %765, %801 : vector<14x124xf32>
    %c167 = arith.constant 167 : index
    %c0_140 = arith.constant 0 : index
    %803 = vector.load %arg0[%c167, %c0_140] : memref<294x124xf32, #tpu.memory_space<vmem>>, vector<1x124xf32>
    %804 = vector.shape_cast %803 : vector<1x124xf32> to vector<124xf32>
    %805 = vector.shape_cast %804 : vector<124xf32> to vector<1x124xf32>
    %806 = vector.broadcast %805 : vector<1x124xf32> to vector<14x124xf32>
    %807 = arith.mulf %806, %784 : vector<14x124xf32>
    %808 = arith.addf %771, %807 : vector<14x124xf32>
    %c216 = arith.constant 216 : index
    %c0_141 = arith.constant 0 : index
    %809 = vector.load %arg0[%c216, %c0_141] : memref<294x124xf32, #tpu.memory_space<vmem>>, vector<1x124xf32>
    %810 = vector.shape_cast %809 : vector<1x124xf32> to vector<124xf32>
    %811 = vector.shape_cast %810 : vector<124xf32> to vector<1x124xf32>
    %812 = vector.broadcast %811 : vector<1x124xf32> to vector<14x124xf32>
    %813 = arith.mulf %812, %784 : vector<14x124xf32>
    %814 = arith.addf %777, %813 : vector<14x124xf32>
    %c265 = arith.constant 265 : index
    %c0_142 = arith.constant 0 : index
    %815 = vector.load %arg0[%c265, %c0_142] : memref<294x124xf32, #tpu.memory_space<vmem>>, vector<1x124xf32>
    %816 = vector.shape_cast %815 : vector<1x124xf32> to vector<124xf32>
    %817 = vector.shape_cast %816 : vector<124xf32> to vector<1x124xf32>
    %818 = vector.broadcast %817 : vector<1x124xf32> to vector<14x124xf32>
    %819 = arith.mulf %818, %784 : vector<14x124xf32>
    %820 = arith.addf %783, %819 : vector<14x124xf32>
    %821 = vector.extract_strided_slice %7 {offsets = [3, 0], sizes = [14, 124], strides = [1, 1]} : vector<20x124xf32> to vector<14x124xf32>
    %c21 = arith.constant 21 : index
    %c0_143 = arith.constant 0 : index
    %822 = vector.load %arg0[%c21, %c0_143] : memref<294x124xf32, #tpu.memory_space<vmem>>, vector<1x124xf32>
    %823 = vector.shape_cast %822 : vector<1x124xf32> to vector<124xf32>
    %824 = vector.shape_cast %823 : vector<124xf32> to vector<1x124xf32>
    %825 = vector.broadcast %824 : vector<1x124xf32> to vector<14x124xf32>
    %826 = arith.mulf %825, %821 : vector<14x124xf32>
    %827 = arith.addf %790, %826 : vector<14x124xf32>
    %c70 = arith.constant 70 : index
    %c0_144 = arith.constant 0 : index
    %828 = vector.load %arg0[%c70, %c0_144] : memref<294x124xf32, #tpu.memory_space<vmem>>, vector<1x124xf32>
    %829 = vector.shape_cast %828 : vector<1x124xf32> to vector<124xf32>
    %830 = vector.shape_cast %829 : vector<124xf32> to vector<1x124xf32>
    %831 = vector.broadcast %830 : vector<1x124xf32> to vector<14x124xf32>
    %832 = arith.mulf %831, %821 : vector<14x124xf32>
    %833 = arith.addf %796, %832 : vector<14x124xf32>
    %c119 = arith.constant 119 : index
    %c0_145 = arith.constant 0 : index
    %834 = vector.load %arg0[%c119, %c0_145] : memref<294x124xf32, #tpu.memory_space<vmem>>, vector<1x124xf32>
    %835 = vector.shape_cast %834 : vector<1x124xf32> to vector<124xf32>
    %836 = vector.shape_cast %835 : vector<124xf32> to vector<1x124xf32>
    %837 = vector.broadcast %836 : vector<1x124xf32> to vector<14x124xf32>
    %838 = arith.mulf %837, %821 : vector<14x124xf32>
    %839 = arith.addf %802, %838 : vector<14x124xf32>
    %c168 = arith.constant 168 : index
    %c0_146 = arith.constant 0 : index
    %840 = vector.load %arg0[%c168, %c0_146] : memref<294x124xf32, #tpu.memory_space<vmem>>, vector<1x124xf32>
    %841 = vector.shape_cast %840 : vector<1x124xf32> to vector<124xf32>
    %842 = vector.shape_cast %841 : vector<124xf32> to vector<1x124xf32>
    %843 = vector.broadcast %842 : vector<1x124xf32> to vector<14x124xf32>
    %844 = arith.mulf %843, %821 : vector<14x124xf32>
    %845 = arith.addf %808, %844 : vector<14x124xf32>
    %c217 = arith.constant 217 : index
    %c0_147 = arith.constant 0 : index
    %846 = vector.load %arg0[%c217, %c0_147] : memref<294x124xf32, #tpu.memory_space<vmem>>, vector<1x124xf32>
    %847 = vector.shape_cast %846 : vector<1x124xf32> to vector<124xf32>
    %848 = vector.shape_cast %847 : vector<124xf32> to vector<1x124xf32>
    %849 = vector.broadcast %848 : vector<1x124xf32> to vector<14x124xf32>
    %850 = arith.mulf %849, %821 : vector<14x124xf32>
    %851 = arith.addf %814, %850 : vector<14x124xf32>
    %c266 = arith.constant 266 : index
    %c0_148 = arith.constant 0 : index
    %852 = vector.load %arg0[%c266, %c0_148] : memref<294x124xf32, #tpu.memory_space<vmem>>, vector<1x124xf32>
    %853 = vector.shape_cast %852 : vector<1x124xf32> to vector<124xf32>
    %854 = vector.shape_cast %853 : vector<124xf32> to vector<1x124xf32>
    %855 = vector.broadcast %854 : vector<1x124xf32> to vector<14x124xf32>
    %856 = arith.mulf %855, %821 : vector<14x124xf32>
    %857 = arith.addf %820, %856 : vector<14x124xf32>
    %858 = vector.extract_strided_slice %9 {offsets = [3, 0], sizes = [14, 124], strides = [1, 1]} : vector<20x124xf32> to vector<14x124xf32>
    %c22 = arith.constant 22 : index
    %c0_149 = arith.constant 0 : index
    %859 = vector.load %arg0[%c22, %c0_149] : memref<294x124xf32, #tpu.memory_space<vmem>>, vector<1x124xf32>
    %860 = vector.shape_cast %859 : vector<1x124xf32> to vector<124xf32>
    %861 = vector.shape_cast %860 : vector<124xf32> to vector<1x124xf32>
    %862 = vector.broadcast %861 : vector<1x124xf32> to vector<14x124xf32>
    %863 = arith.mulf %862, %858 : vector<14x124xf32>
    %864 = arith.addf %827, %863 : vector<14x124xf32>
    %c71 = arith.constant 71 : index
    %c0_150 = arith.constant 0 : index
    %865 = vector.load %arg0[%c71, %c0_150] : memref<294x124xf32, #tpu.memory_space<vmem>>, vector<1x124xf32>
    %866 = vector.shape_cast %865 : vector<1x124xf32> to vector<124xf32>
    %867 = vector.shape_cast %866 : vector<124xf32> to vector<1x124xf32>
    %868 = vector.broadcast %867 : vector<1x124xf32> to vector<14x124xf32>
    %869 = arith.mulf %868, %858 : vector<14x124xf32>
    %870 = arith.addf %833, %869 : vector<14x124xf32>
    %c120 = arith.constant 120 : index
    %c0_151 = arith.constant 0 : index
    %871 = vector.load %arg0[%c120, %c0_151] : memref<294x124xf32, #tpu.memory_space<vmem>>, vector<1x124xf32>
    %872 = vector.shape_cast %871 : vector<1x124xf32> to vector<124xf32>
    %873 = vector.shape_cast %872 : vector<124xf32> to vector<1x124xf32>
    %874 = vector.broadcast %873 : vector<1x124xf32> to vector<14x124xf32>
    %875 = arith.mulf %874, %858 : vector<14x124xf32>
    %876 = arith.addf %839, %875 : vector<14x124xf32>
    %c169 = arith.constant 169 : index
    %c0_152 = arith.constant 0 : index
    %877 = vector.load %arg0[%c169, %c0_152] : memref<294x124xf32, #tpu.memory_space<vmem>>, vector<1x124xf32>
    %878 = vector.shape_cast %877 : vector<1x124xf32> to vector<124xf32>
    %879 = vector.shape_cast %878 : vector<124xf32> to vector<1x124xf32>
    %880 = vector.broadcast %879 : vector<1x124xf32> to vector<14x124xf32>
    %881 = arith.mulf %880, %858 : vector<14x124xf32>
    %882 = arith.addf %845, %881 : vector<14x124xf32>
    %c218 = arith.constant 218 : index
    %c0_153 = arith.constant 0 : index
    %883 = vector.load %arg0[%c218, %c0_153] : memref<294x124xf32, #tpu.memory_space<vmem>>, vector<1x124xf32>
    %884 = vector.shape_cast %883 : vector<1x124xf32> to vector<124xf32>
    %885 = vector.shape_cast %884 : vector<124xf32> to vector<1x124xf32>
    %886 = vector.broadcast %885 : vector<1x124xf32> to vector<14x124xf32>
    %887 = arith.mulf %886, %858 : vector<14x124xf32>
    %888 = arith.addf %851, %887 : vector<14x124xf32>
    %c267 = arith.constant 267 : index
    %c0_154 = arith.constant 0 : index
    %889 = vector.load %arg0[%c267, %c0_154] : memref<294x124xf32, #tpu.memory_space<vmem>>, vector<1x124xf32>
    %890 = vector.shape_cast %889 : vector<1x124xf32> to vector<124xf32>
    %891 = vector.shape_cast %890 : vector<124xf32> to vector<1x124xf32>
    %892 = vector.broadcast %891 : vector<1x124xf32> to vector<14x124xf32>
    %893 = arith.mulf %892, %858 : vector<14x124xf32>
    %894 = arith.addf %857, %893 : vector<14x124xf32>
    %895 = vector.extract_strided_slice %11 {offsets = [3, 0], sizes = [14, 124], strides = [1, 1]} : vector<20x124xf32> to vector<14x124xf32>
    %c23 = arith.constant 23 : index
    %c0_155 = arith.constant 0 : index
    %896 = vector.load %arg0[%c23, %c0_155] : memref<294x124xf32, #tpu.memory_space<vmem>>, vector<1x124xf32>
    %897 = vector.shape_cast %896 : vector<1x124xf32> to vector<124xf32>
    %898 = vector.shape_cast %897 : vector<124xf32> to vector<1x124xf32>
    %899 = vector.broadcast %898 : vector<1x124xf32> to vector<14x124xf32>
    %900 = arith.mulf %899, %895 : vector<14x124xf32>
    %901 = arith.addf %864, %900 : vector<14x124xf32>
    %c72 = arith.constant 72 : index
    %c0_156 = arith.constant 0 : index
    %902 = vector.load %arg0[%c72, %c0_156] : memref<294x124xf32, #tpu.memory_space<vmem>>, vector<1x124xf32>
    %903 = vector.shape_cast %902 : vector<1x124xf32> to vector<124xf32>
    %904 = vector.shape_cast %903 : vector<124xf32> to vector<1x124xf32>
    %905 = vector.broadcast %904 : vector<1x124xf32> to vector<14x124xf32>
    %906 = arith.mulf %905, %895 : vector<14x124xf32>
    %907 = arith.addf %870, %906 : vector<14x124xf32>
    %c121 = arith.constant 121 : index
    %c0_157 = arith.constant 0 : index
    %908 = vector.load %arg0[%c121, %c0_157] : memref<294x124xf32, #tpu.memory_space<vmem>>, vector<1x124xf32>
    %909 = vector.shape_cast %908 : vector<1x124xf32> to vector<124xf32>
    %910 = vector.shape_cast %909 : vector<124xf32> to vector<1x124xf32>
    %911 = vector.broadcast %910 : vector<1x124xf32> to vector<14x124xf32>
    %912 = arith.mulf %911, %895 : vector<14x124xf32>
    %913 = arith.addf %876, %912 : vector<14x124xf32>
    %c170 = arith.constant 170 : index
    %c0_158 = arith.constant 0 : index
    %914 = vector.load %arg0[%c170, %c0_158] : memref<294x124xf32, #tpu.memory_space<vmem>>, vector<1x124xf32>
    %915 = vector.shape_cast %914 : vector<1x124xf32> to vector<124xf32>
    %916 = vector.shape_cast %915 : vector<124xf32> to vector<1x124xf32>
    %917 = vector.broadcast %916 : vector<1x124xf32> to vector<14x124xf32>
    %918 = arith.mulf %917, %895 : vector<14x124xf32>
    %919 = arith.addf %882, %918 : vector<14x124xf32>
    %c219 = arith.constant 219 : index
    %c0_159 = arith.constant 0 : index
    %920 = vector.load %arg0[%c219, %c0_159] : memref<294x124xf32, #tpu.memory_space<vmem>>, vector<1x124xf32>
    %921 = vector.shape_cast %920 : vector<1x124xf32> to vector<124xf32>
    %922 = vector.shape_cast %921 : vector<124xf32> to vector<1x124xf32>
    %923 = vector.broadcast %922 : vector<1x124xf32> to vector<14x124xf32>
    %924 = arith.mulf %923, %895 : vector<14x124xf32>
    %925 = arith.addf %888, %924 : vector<14x124xf32>
    %c268 = arith.constant 268 : index
    %c0_160 = arith.constant 0 : index
    %926 = vector.load %arg0[%c268, %c0_160] : memref<294x124xf32, #tpu.memory_space<vmem>>, vector<1x124xf32>
    %927 = vector.shape_cast %926 : vector<1x124xf32> to vector<124xf32>
    %928 = vector.shape_cast %927 : vector<124xf32> to vector<1x124xf32>
    %929 = vector.broadcast %928 : vector<1x124xf32> to vector<14x124xf32>
    %930 = arith.mulf %929, %895 : vector<14x124xf32>
    %931 = arith.addf %894, %930 : vector<14x124xf32>
    %932 = vector.extract_strided_slice %13 {offsets = [3, 0], sizes = [14, 124], strides = [1, 1]} : vector<20x124xf32> to vector<14x124xf32>
    %c24 = arith.constant 24 : index
    %c0_161 = arith.constant 0 : index
    %933 = vector.load %arg0[%c24, %c0_161] : memref<294x124xf32, #tpu.memory_space<vmem>>, vector<1x124xf32>
    %934 = vector.shape_cast %933 : vector<1x124xf32> to vector<124xf32>
    %935 = vector.shape_cast %934 : vector<124xf32> to vector<1x124xf32>
    %936 = vector.broadcast %935 : vector<1x124xf32> to vector<14x124xf32>
    %937 = arith.mulf %936, %932 : vector<14x124xf32>
    %938 = arith.addf %901, %937 : vector<14x124xf32>
    %c73 = arith.constant 73 : index
    %c0_162 = arith.constant 0 : index
    %939 = vector.load %arg0[%c73, %c0_162] : memref<294x124xf32, #tpu.memory_space<vmem>>, vector<1x124xf32>
    %940 = vector.shape_cast %939 : vector<1x124xf32> to vector<124xf32>
    %941 = vector.shape_cast %940 : vector<124xf32> to vector<1x124xf32>
    %942 = vector.broadcast %941 : vector<1x124xf32> to vector<14x124xf32>
    %943 = arith.mulf %942, %932 : vector<14x124xf32>
    %944 = arith.addf %907, %943 : vector<14x124xf32>
    %c122 = arith.constant 122 : index
    %c0_163 = arith.constant 0 : index
    %945 = vector.load %arg0[%c122, %c0_163] : memref<294x124xf32, #tpu.memory_space<vmem>>, vector<1x124xf32>
    %946 = vector.shape_cast %945 : vector<1x124xf32> to vector<124xf32>
    %947 = vector.shape_cast %946 : vector<124xf32> to vector<1x124xf32>
    %948 = vector.broadcast %947 : vector<1x124xf32> to vector<14x124xf32>
    %949 = arith.mulf %948, %932 : vector<14x124xf32>
    %950 = arith.addf %913, %949 : vector<14x124xf32>
    %c171 = arith.constant 171 : index
    %c0_164 = arith.constant 0 : index
    %951 = vector.load %arg0[%c171, %c0_164] : memref<294x124xf32, #tpu.memory_space<vmem>>, vector<1x124xf32>
    %952 = vector.shape_cast %951 : vector<1x124xf32> to vector<124xf32>
    %953 = vector.shape_cast %952 : vector<124xf32> to vector<1x124xf32>
    %954 = vector.broadcast %953 : vector<1x124xf32> to vector<14x124xf32>
    %955 = arith.mulf %954, %932 : vector<14x124xf32>
    %956 = arith.addf %919, %955 : vector<14x124xf32>
    %c220 = arith.constant 220 : index
    %c0_165 = arith.constant 0 : index
    %957 = vector.load %arg0[%c220, %c0_165] : memref<294x124xf32, #tpu.memory_space<vmem>>, vector<1x124xf32>
    %958 = vector.shape_cast %957 : vector<1x124xf32> to vector<124xf32>
    %959 = vector.shape_cast %958 : vector<124xf32> to vector<1x124xf32>
    %960 = vector.broadcast %959 : vector<1x124xf32> to vector<14x124xf32>
    %961 = arith.mulf %960, %932 : vector<14x124xf32>
    %962 = arith.addf %925, %961 : vector<14x124xf32>
    %c269 = arith.constant 269 : index
    %c0_166 = arith.constant 0 : index
    %963 = vector.load %arg0[%c269, %c0_166] : memref<294x124xf32, #tpu.memory_space<vmem>>, vector<1x124xf32>
    %964 = vector.shape_cast %963 : vector<1x124xf32> to vector<124xf32>
    %965 = vector.shape_cast %964 : vector<124xf32> to vector<1x124xf32>
    %966 = vector.broadcast %965 : vector<1x124xf32> to vector<14x124xf32>
    %967 = arith.mulf %966, %932 : vector<14x124xf32>
    %968 = arith.addf %931, %967 : vector<14x124xf32>
    %969 = vector.extract_strided_slice %15 {offsets = [3, 0], sizes = [14, 124], strides = [1, 1]} : vector<20x124xf32> to vector<14x124xf32>
    %c25 = arith.constant 25 : index
    %c0_167 = arith.constant 0 : index
    %970 = vector.load %arg0[%c25, %c0_167] : memref<294x124xf32, #tpu.memory_space<vmem>>, vector<1x124xf32>
    %971 = vector.shape_cast %970 : vector<1x124xf32> to vector<124xf32>
    %972 = vector.shape_cast %971 : vector<124xf32> to vector<1x124xf32>
    %973 = vector.broadcast %972 : vector<1x124xf32> to vector<14x124xf32>
    %974 = arith.mulf %973, %969 : vector<14x124xf32>
    %975 = arith.addf %938, %974 : vector<14x124xf32>
    %c74 = arith.constant 74 : index
    %c0_168 = arith.constant 0 : index
    %976 = vector.load %arg0[%c74, %c0_168] : memref<294x124xf32, #tpu.memory_space<vmem>>, vector<1x124xf32>
    %977 = vector.shape_cast %976 : vector<1x124xf32> to vector<124xf32>
    %978 = vector.shape_cast %977 : vector<124xf32> to vector<1x124xf32>
    %979 = vector.broadcast %978 : vector<1x124xf32> to vector<14x124xf32>
    %980 = arith.mulf %979, %969 : vector<14x124xf32>
    %981 = arith.addf %944, %980 : vector<14x124xf32>
    %c123 = arith.constant 123 : index
    %c0_169 = arith.constant 0 : index
    %982 = vector.load %arg0[%c123, %c0_169] : memref<294x124xf32, #tpu.memory_space<vmem>>, vector<1x124xf32>
    %983 = vector.shape_cast %982 : vector<1x124xf32> to vector<124xf32>
    %984 = vector.shape_cast %983 : vector<124xf32> to vector<1x124xf32>
    %985 = vector.broadcast %984 : vector<1x124xf32> to vector<14x124xf32>
    %986 = arith.mulf %985, %969 : vector<14x124xf32>
    %987 = arith.addf %950, %986 : vector<14x124xf32>
    %c172 = arith.constant 172 : index
    %c0_170 = arith.constant 0 : index
    %988 = vector.load %arg0[%c172, %c0_170] : memref<294x124xf32, #tpu.memory_space<vmem>>, vector<1x124xf32>
    %989 = vector.shape_cast %988 : vector<1x124xf32> to vector<124xf32>
    %990 = vector.shape_cast %989 : vector<124xf32> to vector<1x124xf32>
    %991 = vector.broadcast %990 : vector<1x124xf32> to vector<14x124xf32>
    %992 = arith.mulf %991, %969 : vector<14x124xf32>
    %993 = arith.addf %956, %992 : vector<14x124xf32>
    %c221 = arith.constant 221 : index
    %c0_171 = arith.constant 0 : index
    %994 = vector.load %arg0[%c221, %c0_171] : memref<294x124xf32, #tpu.memory_space<vmem>>, vector<1x124xf32>
    %995 = vector.shape_cast %994 : vector<1x124xf32> to vector<124xf32>
    %996 = vector.shape_cast %995 : vector<124xf32> to vector<1x124xf32>
    %997 = vector.broadcast %996 : vector<1x124xf32> to vector<14x124xf32>
    %998 = arith.mulf %997, %969 : vector<14x124xf32>
    %999 = arith.addf %962, %998 : vector<14x124xf32>
    %c270 = arith.constant 270 : index
    %c0_172 = arith.constant 0 : index
    %1000 = vector.load %arg0[%c270, %c0_172] : memref<294x124xf32, #tpu.memory_space<vmem>>, vector<1x124xf32>
    %1001 = vector.shape_cast %1000 : vector<1x124xf32> to vector<124xf32>
    %1002 = vector.shape_cast %1001 : vector<124xf32> to vector<1x124xf32>
    %1003 = vector.broadcast %1002 : vector<1x124xf32> to vector<14x124xf32>
    %1004 = arith.mulf %1003, %969 : vector<14x124xf32>
    %1005 = arith.addf %968, %1004 : vector<14x124xf32>
    %1006 = vector.extract_strided_slice %17 {offsets = [3, 0], sizes = [14, 124], strides = [1, 1]} : vector<20x124xf32> to vector<14x124xf32>
    %c26 = arith.constant 26 : index
    %c0_173 = arith.constant 0 : index
    %1007 = vector.load %arg0[%c26, %c0_173] : memref<294x124xf32, #tpu.memory_space<vmem>>, vector<1x124xf32>
    %1008 = vector.shape_cast %1007 : vector<1x124xf32> to vector<124xf32>
    %1009 = vector.shape_cast %1008 : vector<124xf32> to vector<1x124xf32>
    %1010 = vector.broadcast %1009 : vector<1x124xf32> to vector<14x124xf32>
    %1011 = arith.mulf %1010, %1006 : vector<14x124xf32>
    %1012 = arith.addf %975, %1011 : vector<14x124xf32>
    %c75 = arith.constant 75 : index
    %c0_174 = arith.constant 0 : index
    %1013 = vector.load %arg0[%c75, %c0_174] : memref<294x124xf32, #tpu.memory_space<vmem>>, vector<1x124xf32>
    %1014 = vector.shape_cast %1013 : vector<1x124xf32> to vector<124xf32>
    %1015 = vector.shape_cast %1014 : vector<124xf32> to vector<1x124xf32>
    %1016 = vector.broadcast %1015 : vector<1x124xf32> to vector<14x124xf32>
    %1017 = arith.mulf %1016, %1006 : vector<14x124xf32>
    %1018 = arith.addf %981, %1017 : vector<14x124xf32>
    %c124 = arith.constant 124 : index
    %c0_175 = arith.constant 0 : index
    %1019 = vector.load %arg0[%c124, %c0_175] : memref<294x124xf32, #tpu.memory_space<vmem>>, vector<1x124xf32>
    %1020 = vector.shape_cast %1019 : vector<1x124xf32> to vector<124xf32>
    %1021 = vector.shape_cast %1020 : vector<124xf32> to vector<1x124xf32>
    %1022 = vector.broadcast %1021 : vector<1x124xf32> to vector<14x124xf32>
    %1023 = arith.mulf %1022, %1006 : vector<14x124xf32>
    %1024 = arith.addf %987, %1023 : vector<14x124xf32>
    %c173 = arith.constant 173 : index
    %c0_176 = arith.constant 0 : index
    %1025 = vector.load %arg0[%c173, %c0_176] : memref<294x124xf32, #tpu.memory_space<vmem>>, vector<1x124xf32>
    %1026 = vector.shape_cast %1025 : vector<1x124xf32> to vector<124xf32>
    %1027 = vector.shape_cast %1026 : vector<124xf32> to vector<1x124xf32>
    %1028 = vector.broadcast %1027 : vector<1x124xf32> to vector<14x124xf32>
    %1029 = arith.mulf %1028, %1006 : vector<14x124xf32>
    %1030 = arith.addf %993, %1029 : vector<14x124xf32>
    %c222 = arith.constant 222 : index
    %c0_177 = arith.constant 0 : index
    %1031 = vector.load %arg0[%c222, %c0_177] : memref<294x124xf32, #tpu.memory_space<vmem>>, vector<1x124xf32>
    %1032 = vector.shape_cast %1031 : vector<1x124xf32> to vector<124xf32>
    %1033 = vector.shape_cast %1032 : vector<124xf32> to vector<1x124xf32>
    %1034 = vector.broadcast %1033 : vector<1x124xf32> to vector<14x124xf32>
    %1035 = arith.mulf %1034, %1006 : vector<14x124xf32>
    %1036 = arith.addf %999, %1035 : vector<14x124xf32>
    %c271 = arith.constant 271 : index
    %c0_178 = arith.constant 0 : index
    %1037 = vector.load %arg0[%c271, %c0_178] : memref<294x124xf32, #tpu.memory_space<vmem>>, vector<1x124xf32>
    %1038 = vector.shape_cast %1037 : vector<1x124xf32> to vector<124xf32>
    %1039 = vector.shape_cast %1038 : vector<124xf32> to vector<1x124xf32>
    %1040 = vector.broadcast %1039 : vector<1x124xf32> to vector<14x124xf32>
    %1041 = arith.mulf %1040, %1006 : vector<14x124xf32>
    %1042 = arith.addf %1005, %1041 : vector<14x124xf32>
    %1043 = vector.extract_strided_slice %19 {offsets = [3, 0], sizes = [14, 124], strides = [1, 1]} : vector<20x124xf32> to vector<14x124xf32>
    %c27 = arith.constant 27 : index
    %c0_179 = arith.constant 0 : index
    %1044 = vector.load %arg0[%c27, %c0_179] : memref<294x124xf32, #tpu.memory_space<vmem>>, vector<1x124xf32>
    %1045 = vector.shape_cast %1044 : vector<1x124xf32> to vector<124xf32>
    %1046 = vector.shape_cast %1045 : vector<124xf32> to vector<1x124xf32>
    %1047 = vector.broadcast %1046 : vector<1x124xf32> to vector<14x124xf32>
    %1048 = arith.mulf %1047, %1043 : vector<14x124xf32>
    %1049 = arith.addf %1012, %1048 : vector<14x124xf32>
    %c76 = arith.constant 76 : index
    %c0_180 = arith.constant 0 : index
    %1050 = vector.load %arg0[%c76, %c0_180] : memref<294x124xf32, #tpu.memory_space<vmem>>, vector<1x124xf32>
    %1051 = vector.shape_cast %1050 : vector<1x124xf32> to vector<124xf32>
    %1052 = vector.shape_cast %1051 : vector<124xf32> to vector<1x124xf32>
    %1053 = vector.broadcast %1052 : vector<1x124xf32> to vector<14x124xf32>
    %1054 = arith.mulf %1053, %1043 : vector<14x124xf32>
    %1055 = arith.addf %1018, %1054 : vector<14x124xf32>
    %c125 = arith.constant 125 : index
    %c0_181 = arith.constant 0 : index
    %1056 = vector.load %arg0[%c125, %c0_181] : memref<294x124xf32, #tpu.memory_space<vmem>>, vector<1x124xf32>
    %1057 = vector.shape_cast %1056 : vector<1x124xf32> to vector<124xf32>
    %1058 = vector.shape_cast %1057 : vector<124xf32> to vector<1x124xf32>
    %1059 = vector.broadcast %1058 : vector<1x124xf32> to vector<14x124xf32>
    %1060 = arith.mulf %1059, %1043 : vector<14x124xf32>
    %1061 = arith.addf %1024, %1060 : vector<14x124xf32>
    %c174 = arith.constant 174 : index
    %c0_182 = arith.constant 0 : index
    %1062 = vector.load %arg0[%c174, %c0_182] : memref<294x124xf32, #tpu.memory_space<vmem>>, vector<1x124xf32>
    %1063 = vector.shape_cast %1062 : vector<1x124xf32> to vector<124xf32>
    %1064 = vector.shape_cast %1063 : vector<124xf32> to vector<1x124xf32>
    %1065 = vector.broadcast %1064 : vector<1x124xf32> to vector<14x124xf32>
    %1066 = arith.mulf %1065, %1043 : vector<14x124xf32>
    %1067 = arith.addf %1030, %1066 : vector<14x124xf32>
    %c223 = arith.constant 223 : index
    %c0_183 = arith.constant 0 : index
    %1068 = vector.load %arg0[%c223, %c0_183] : memref<294x124xf32, #tpu.memory_space<vmem>>, vector<1x124xf32>
    %1069 = vector.shape_cast %1068 : vector<1x124xf32> to vector<124xf32>
    %1070 = vector.shape_cast %1069 : vector<124xf32> to vector<1x124xf32>
    %1071 = vector.broadcast %1070 : vector<1x124xf32> to vector<14x124xf32>
    %1072 = arith.mulf %1071, %1043 : vector<14x124xf32>
    %1073 = arith.addf %1036, %1072 : vector<14x124xf32>
    %c272 = arith.constant 272 : index
    %c0_184 = arith.constant 0 : index
    %1074 = vector.load %arg0[%c272, %c0_184] : memref<294x124xf32, #tpu.memory_space<vmem>>, vector<1x124xf32>
    %1075 = vector.shape_cast %1074 : vector<1x124xf32> to vector<124xf32>
    %1076 = vector.shape_cast %1075 : vector<124xf32> to vector<1x124xf32>
    %1077 = vector.broadcast %1076 : vector<1x124xf32> to vector<14x124xf32>
    %1078 = arith.mulf %1077, %1043 : vector<14x124xf32>
    %1079 = arith.addf %1042, %1078 : vector<14x124xf32>
    %1080 = vector.extract_strided_slice %7 {offsets = [4, 0], sizes = [14, 124], strides = [1, 1]} : vector<20x124xf32> to vector<14x124xf32>
    %c28 = arith.constant 28 : index
    %c0_185 = arith.constant 0 : index
    %1081 = vector.load %arg0[%c28, %c0_185] : memref<294x124xf32, #tpu.memory_space<vmem>>, vector<1x124xf32>
    %1082 = vector.shape_cast %1081 : vector<1x124xf32> to vector<124xf32>
    %1083 = vector.shape_cast %1082 : vector<124xf32> to vector<1x124xf32>
    %1084 = vector.broadcast %1083 : vector<1x124xf32> to vector<14x124xf32>
    %1085 = arith.mulf %1084, %1080 : vector<14x124xf32>
    %1086 = arith.addf %1049, %1085 : vector<14x124xf32>
    %c77 = arith.constant 77 : index
    %c0_186 = arith.constant 0 : index
    %1087 = vector.load %arg0[%c77, %c0_186] : memref<294x124xf32, #tpu.memory_space<vmem>>, vector<1x124xf32>
    %1088 = vector.shape_cast %1087 : vector<1x124xf32> to vector<124xf32>
    %1089 = vector.shape_cast %1088 : vector<124xf32> to vector<1x124xf32>
    %1090 = vector.broadcast %1089 : vector<1x124xf32> to vector<14x124xf32>
    %1091 = arith.mulf %1090, %1080 : vector<14x124xf32>
    %1092 = arith.addf %1055, %1091 : vector<14x124xf32>
    %c126 = arith.constant 126 : index
    %c0_187 = arith.constant 0 : index
    %1093 = vector.load %arg0[%c126, %c0_187] : memref<294x124xf32, #tpu.memory_space<vmem>>, vector<1x124xf32>
    %1094 = vector.shape_cast %1093 : vector<1x124xf32> to vector<124xf32>
    %1095 = vector.shape_cast %1094 : vector<124xf32> to vector<1x124xf32>
    %1096 = vector.broadcast %1095 : vector<1x124xf32> to vector<14x124xf32>
    %1097 = arith.mulf %1096, %1080 : vector<14x124xf32>
    %1098 = arith.addf %1061, %1097 : vector<14x124xf32>
    %c175 = arith.constant 175 : index
    %c0_188 = arith.constant 0 : index
    %1099 = vector.load %arg0[%c175, %c0_188] : memref<294x124xf32, #tpu.memory_space<vmem>>, vector<1x124xf32>
    %1100 = vector.shape_cast %1099 : vector<1x124xf32> to vector<124xf32>
    %1101 = vector.shape_cast %1100 : vector<124xf32> to vector<1x124xf32>
    %1102 = vector.broadcast %1101 : vector<1x124xf32> to vector<14x124xf32>
    %1103 = arith.mulf %1102, %1080 : vector<14x124xf32>
    %1104 = arith.addf %1067, %1103 : vector<14x124xf32>
    %c224 = arith.constant 224 : index
    %c0_189 = arith.constant 0 : index
    %1105 = vector.load %arg0[%c224, %c0_189] : memref<294x124xf32, #tpu.memory_space<vmem>>, vector<1x124xf32>
    %1106 = vector.shape_cast %1105 : vector<1x124xf32> to vector<124xf32>
    %1107 = vector.shape_cast %1106 : vector<124xf32> to vector<1x124xf32>
    %1108 = vector.broadcast %1107 : vector<1x124xf32> to vector<14x124xf32>
    %1109 = arith.mulf %1108, %1080 : vector<14x124xf32>
    %1110 = arith.addf %1073, %1109 : vector<14x124xf32>
    %c273 = arith.constant 273 : index
    %c0_190 = arith.constant 0 : index
    %1111 = vector.load %arg0[%c273, %c0_190] : memref<294x124xf32, #tpu.memory_space<vmem>>, vector<1x124xf32>
    %1112 = vector.shape_cast %1111 : vector<1x124xf32> to vector<124xf32>
    %1113 = vector.shape_cast %1112 : vector<124xf32> to vector<1x124xf32>
    %1114 = vector.broadcast %1113 : vector<1x124xf32> to vector<14x124xf32>
    %1115 = arith.mulf %1114, %1080 : vector<14x124xf32>
    %1116 = arith.addf %1079, %1115 : vector<14x124xf32>
    %1117 = vector.extract_strided_slice %9 {offsets = [4, 0], sizes = [14, 124], strides = [1, 1]} : vector<20x124xf32> to vector<14x124xf32>
    %c29 = arith.constant 29 : index
    %c0_191 = arith.constant 0 : index
    %1118 = vector.load %arg0[%c29, %c0_191] : memref<294x124xf32, #tpu.memory_space<vmem>>, vector<1x124xf32>
    %1119 = vector.shape_cast %1118 : vector<1x124xf32> to vector<124xf32>
    %1120 = vector.shape_cast %1119 : vector<124xf32> to vector<1x124xf32>
    %1121 = vector.broadcast %1120 : vector<1x124xf32> to vector<14x124xf32>
    %1122 = arith.mulf %1121, %1117 : vector<14x124xf32>
    %1123 = arith.addf %1086, %1122 : vector<14x124xf32>
    %c78 = arith.constant 78 : index
    %c0_192 = arith.constant 0 : index
    %1124 = vector.load %arg0[%c78, %c0_192] : memref<294x124xf32, #tpu.memory_space<vmem>>, vector<1x124xf32>
    %1125 = vector.shape_cast %1124 : vector<1x124xf32> to vector<124xf32>
    %1126 = vector.shape_cast %1125 : vector<124xf32> to vector<1x124xf32>
    %1127 = vector.broadcast %1126 : vector<1x124xf32> to vector<14x124xf32>
    %1128 = arith.mulf %1127, %1117 : vector<14x124xf32>
    %1129 = arith.addf %1092, %1128 : vector<14x124xf32>
    %c127 = arith.constant 127 : index
    %c0_193 = arith.constant 0 : index
    %1130 = vector.load %arg0[%c127, %c0_193] : memref<294x124xf32, #tpu.memory_space<vmem>>, vector<1x124xf32>
    %1131 = vector.shape_cast %1130 : vector<1x124xf32> to vector<124xf32>
    %1132 = vector.shape_cast %1131 : vector<124xf32> to vector<1x124xf32>
    %1133 = vector.broadcast %1132 : vector<1x124xf32> to vector<14x124xf32>
    %1134 = arith.mulf %1133, %1117 : vector<14x124xf32>
    %1135 = arith.addf %1098, %1134 : vector<14x124xf32>
    %c176 = arith.constant 176 : index
    %c0_194 = arith.constant 0 : index
    %1136 = vector.load %arg0[%c176, %c0_194] : memref<294x124xf32, #tpu.memory_space<vmem>>, vector<1x124xf32>
    %1137 = vector.shape_cast %1136 : vector<1x124xf32> to vector<124xf32>
    %1138 = vector.shape_cast %1137 : vector<124xf32> to vector<1x124xf32>
    %1139 = vector.broadcast %1138 : vector<1x124xf32> to vector<14x124xf32>
    %1140 = arith.mulf %1139, %1117 : vector<14x124xf32>
    %1141 = arith.addf %1104, %1140 : vector<14x124xf32>
    %c225 = arith.constant 225 : index
    %c0_195 = arith.constant 0 : index
    %1142 = vector.load %arg0[%c225, %c0_195] : memref<294x124xf32, #tpu.memory_space<vmem>>, vector<1x124xf32>
    %1143 = vector.shape_cast %1142 : vector<1x124xf32> to vector<124xf32>
    %1144 = vector.shape_cast %1143 : vector<124xf32> to vector<1x124xf32>
    %1145 = vector.broadcast %1144 : vector<1x124xf32> to vector<14x124xf32>
    %1146 = arith.mulf %1145, %1117 : vector<14x124xf32>
    %1147 = arith.addf %1110, %1146 : vector<14x124xf32>
    %c274 = arith.constant 274 : index
    %c0_196 = arith.constant 0 : index
    %1148 = vector.load %arg0[%c274, %c0_196] : memref<294x124xf32, #tpu.memory_space<vmem>>, vector<1x124xf32>
    %1149 = vector.shape_cast %1148 : vector<1x124xf32> to vector<124xf32>
    %1150 = vector.shape_cast %1149 : vector<124xf32> to vector<1x124xf32>
    %1151 = vector.broadcast %1150 : vector<1x124xf32> to vector<14x124xf32>
    %1152 = arith.mulf %1151, %1117 : vector<14x124xf32>
    %1153 = arith.addf %1116, %1152 : vector<14x124xf32>
    %1154 = vector.extract_strided_slice %11 {offsets = [4, 0], sizes = [14, 124], strides = [1, 1]} : vector<20x124xf32> to vector<14x124xf32>
    %c30 = arith.constant 30 : index
    %c0_197 = arith.constant 0 : index
    %1155 = vector.load %arg0[%c30, %c0_197] : memref<294x124xf32, #tpu.memory_space<vmem>>, vector<1x124xf32>
    %1156 = vector.shape_cast %1155 : vector<1x124xf32> to vector<124xf32>
    %1157 = vector.shape_cast %1156 : vector<124xf32> to vector<1x124xf32>
    %1158 = vector.broadcast %1157 : vector<1x124xf32> to vector<14x124xf32>
    %1159 = arith.mulf %1158, %1154 : vector<14x124xf32>
    %1160 = arith.addf %1123, %1159 : vector<14x124xf32>
    %c79 = arith.constant 79 : index
    %c0_198 = arith.constant 0 : index
    %1161 = vector.load %arg0[%c79, %c0_198] : memref<294x124xf32, #tpu.memory_space<vmem>>, vector<1x124xf32>
    %1162 = vector.shape_cast %1161 : vector<1x124xf32> to vector<124xf32>
    %1163 = vector.shape_cast %1162 : vector<124xf32> to vector<1x124xf32>
    %1164 = vector.broadcast %1163 : vector<1x124xf32> to vector<14x124xf32>
    %1165 = arith.mulf %1164, %1154 : vector<14x124xf32>
    %1166 = arith.addf %1129, %1165 : vector<14x124xf32>
    %c128 = arith.constant 128 : index
    %c0_199 = arith.constant 0 : index
    %1167 = vector.load %arg0[%c128, %c0_199] : memref<294x124xf32, #tpu.memory_space<vmem>>, vector<1x124xf32>
    %1168 = vector.shape_cast %1167 : vector<1x124xf32> to vector<124xf32>
    %1169 = vector.shape_cast %1168 : vector<124xf32> to vector<1x124xf32>
    %1170 = vector.broadcast %1169 : vector<1x124xf32> to vector<14x124xf32>
    %1171 = arith.mulf %1170, %1154 : vector<14x124xf32>
    %1172 = arith.addf %1135, %1171 : vector<14x124xf32>
    %c177 = arith.constant 177 : index
    %c0_200 = arith.constant 0 : index
    %1173 = vector.load %arg0[%c177, %c0_200] : memref<294x124xf32, #tpu.memory_space<vmem>>, vector<1x124xf32>
    %1174 = vector.shape_cast %1173 : vector<1x124xf32> to vector<124xf32>
    %1175 = vector.shape_cast %1174 : vector<124xf32> to vector<1x124xf32>
    %1176 = vector.broadcast %1175 : vector<1x124xf32> to vector<14x124xf32>
    %1177 = arith.mulf %1176, %1154 : vector<14x124xf32>
    %1178 = arith.addf %1141, %1177 : vector<14x124xf32>
    %c226 = arith.constant 226 : index
    %c0_201 = arith.constant 0 : index
    %1179 = vector.load %arg0[%c226, %c0_201] : memref<294x124xf32, #tpu.memory_space<vmem>>, vector<1x124xf32>
    %1180 = vector.shape_cast %1179 : vector<1x124xf32> to vector<124xf32>
    %1181 = vector.shape_cast %1180 : vector<124xf32> to vector<1x124xf32>
    %1182 = vector.broadcast %1181 : vector<1x124xf32> to vector<14x124xf32>
    %1183 = arith.mulf %1182, %1154 : vector<14x124xf32>
    %1184 = arith.addf %1147, %1183 : vector<14x124xf32>
    %c275 = arith.constant 275 : index
    %c0_202 = arith.constant 0 : index
    %1185 = vector.load %arg0[%c275, %c0_202] : memref<294x124xf32, #tpu.memory_space<vmem>>, vector<1x124xf32>
    %1186 = vector.shape_cast %1185 : vector<1x124xf32> to vector<124xf32>
    %1187 = vector.shape_cast %1186 : vector<124xf32> to vector<1x124xf32>
    %1188 = vector.broadcast %1187 : vector<1x124xf32> to vector<14x124xf32>
    %1189 = arith.mulf %1188, %1154 : vector<14x124xf32>
    %1190 = arith.addf %1153, %1189 : vector<14x124xf32>
    %1191 = vector.extract_strided_slice %13 {offsets = [4, 0], sizes = [14, 124], strides = [1, 1]} : vector<20x124xf32> to vector<14x124xf32>
    %c31 = arith.constant 31 : index
    %c0_203 = arith.constant 0 : index
    %1192 = vector.load %arg0[%c31, %c0_203] : memref<294x124xf32, #tpu.memory_space<vmem>>, vector<1x124xf32>
    %1193 = vector.shape_cast %1192 : vector<1x124xf32> to vector<124xf32>
    %1194 = vector.shape_cast %1193 : vector<124xf32> to vector<1x124xf32>
    %1195 = vector.broadcast %1194 : vector<1x124xf32> to vector<14x124xf32>
    %1196 = arith.mulf %1195, %1191 : vector<14x124xf32>
    %1197 = arith.addf %1160, %1196 : vector<14x124xf32>
    %c80 = arith.constant 80 : index
    %c0_204 = arith.constant 0 : index
    %1198 = vector.load %arg0[%c80, %c0_204] : memref<294x124xf32, #tpu.memory_space<vmem>>, vector<1x124xf32>
    %1199 = vector.shape_cast %1198 : vector<1x124xf32> to vector<124xf32>
    %1200 = vector.shape_cast %1199 : vector<124xf32> to vector<1x124xf32>
    %1201 = vector.broadcast %1200 : vector<1x124xf32> to vector<14x124xf32>
    %1202 = arith.mulf %1201, %1191 : vector<14x124xf32>
    %1203 = arith.addf %1166, %1202 : vector<14x124xf32>
    %c129 = arith.constant 129 : index
    %c0_205 = arith.constant 0 : index
    %1204 = vector.load %arg0[%c129, %c0_205] : memref<294x124xf32, #tpu.memory_space<vmem>>, vector<1x124xf32>
    %1205 = vector.shape_cast %1204 : vector<1x124xf32> to vector<124xf32>
    %1206 = vector.shape_cast %1205 : vector<124xf32> to vector<1x124xf32>
    %1207 = vector.broadcast %1206 : vector<1x124xf32> to vector<14x124xf32>
    %1208 = arith.mulf %1207, %1191 : vector<14x124xf32>
    %1209 = arith.addf %1172, %1208 : vector<14x124xf32>
    %c178 = arith.constant 178 : index
    %c0_206 = arith.constant 0 : index
    %1210 = vector.load %arg0[%c178, %c0_206] : memref<294x124xf32, #tpu.memory_space<vmem>>, vector<1x124xf32>
    %1211 = vector.shape_cast %1210 : vector<1x124xf32> to vector<124xf32>
    %1212 = vector.shape_cast %1211 : vector<124xf32> to vector<1x124xf32>
    %1213 = vector.broadcast %1212 : vector<1x124xf32> to vector<14x124xf32>
    %1214 = arith.mulf %1213, %1191 : vector<14x124xf32>
    %1215 = arith.addf %1178, %1214 : vector<14x124xf32>
    %c227 = arith.constant 227 : index
    %c0_207 = arith.constant 0 : index
    %1216 = vector.load %arg0[%c227, %c0_207] : memref<294x124xf32, #tpu.memory_space<vmem>>, vector<1x124xf32>
    %1217 = vector.shape_cast %1216 : vector<1x124xf32> to vector<124xf32>
    %1218 = vector.shape_cast %1217 : vector<124xf32> to vector<1x124xf32>
    %1219 = vector.broadcast %1218 : vector<1x124xf32> to vector<14x124xf32>
    %1220 = arith.mulf %1219, %1191 : vector<14x124xf32>
    %1221 = arith.addf %1184, %1220 : vector<14x124xf32>
    %c276 = arith.constant 276 : index
    %c0_208 = arith.constant 0 : index
    %1222 = vector.load %arg0[%c276, %c0_208] : memref<294x124xf32, #tpu.memory_space<vmem>>, vector<1x124xf32>
    %1223 = vector.shape_cast %1222 : vector<1x124xf32> to vector<124xf32>
    %1224 = vector.shape_cast %1223 : vector<124xf32> to vector<1x124xf32>
    %1225 = vector.broadcast %1224 : vector<1x124xf32> to vector<14x124xf32>
    %1226 = arith.mulf %1225, %1191 : vector<14x124xf32>
    %1227 = arith.addf %1190, %1226 : vector<14x124xf32>
    %1228 = vector.extract_strided_slice %15 {offsets = [4, 0], sizes = [14, 124], strides = [1, 1]} : vector<20x124xf32> to vector<14x124xf32>
    %c32 = arith.constant 32 : index
    %c0_209 = arith.constant 0 : index
    %1229 = vector.load %arg0[%c32, %c0_209] : memref<294x124xf32, #tpu.memory_space<vmem>>, vector<1x124xf32>
    %1230 = vector.shape_cast %1229 : vector<1x124xf32> to vector<124xf32>
    %1231 = vector.shape_cast %1230 : vector<124xf32> to vector<1x124xf32>
    %1232 = vector.broadcast %1231 : vector<1x124xf32> to vector<14x124xf32>
    %1233 = arith.mulf %1232, %1228 : vector<14x124xf32>
    %1234 = arith.addf %1197, %1233 : vector<14x124xf32>
    %c81 = arith.constant 81 : index
    %c0_210 = arith.constant 0 : index
    %1235 = vector.load %arg0[%c81, %c0_210] : memref<294x124xf32, #tpu.memory_space<vmem>>, vector<1x124xf32>
    %1236 = vector.shape_cast %1235 : vector<1x124xf32> to vector<124xf32>
    %1237 = vector.shape_cast %1236 : vector<124xf32> to vector<1x124xf32>
    %1238 = vector.broadcast %1237 : vector<1x124xf32> to vector<14x124xf32>
    %1239 = arith.mulf %1238, %1228 : vector<14x124xf32>
    %1240 = arith.addf %1203, %1239 : vector<14x124xf32>
    %c130 = arith.constant 130 : index
    %c0_211 = arith.constant 0 : index
    %1241 = vector.load %arg0[%c130, %c0_211] : memref<294x124xf32, #tpu.memory_space<vmem>>, vector<1x124xf32>
    %1242 = vector.shape_cast %1241 : vector<1x124xf32> to vector<124xf32>
    %1243 = vector.shape_cast %1242 : vector<124xf32> to vector<1x124xf32>
    %1244 = vector.broadcast %1243 : vector<1x124xf32> to vector<14x124xf32>
    %1245 = arith.mulf %1244, %1228 : vector<14x124xf32>
    %1246 = arith.addf %1209, %1245 : vector<14x124xf32>
    %c179 = arith.constant 179 : index
    %c0_212 = arith.constant 0 : index
    %1247 = vector.load %arg0[%c179, %c0_212] : memref<294x124xf32, #tpu.memory_space<vmem>>, vector<1x124xf32>
    %1248 = vector.shape_cast %1247 : vector<1x124xf32> to vector<124xf32>
    %1249 = vector.shape_cast %1248 : vector<124xf32> to vector<1x124xf32>
    %1250 = vector.broadcast %1249 : vector<1x124xf32> to vector<14x124xf32>
    %1251 = arith.mulf %1250, %1228 : vector<14x124xf32>
    %1252 = arith.addf %1215, %1251 : vector<14x124xf32>
    %c228 = arith.constant 228 : index
    %c0_213 = arith.constant 0 : index
    %1253 = vector.load %arg0[%c228, %c0_213] : memref<294x124xf32, #tpu.memory_space<vmem>>, vector<1x124xf32>
    %1254 = vector.shape_cast %1253 : vector<1x124xf32> to vector<124xf32>
    %1255 = vector.shape_cast %1254 : vector<124xf32> to vector<1x124xf32>
    %1256 = vector.broadcast %1255 : vector<1x124xf32> to vector<14x124xf32>
    %1257 = arith.mulf %1256, %1228 : vector<14x124xf32>
    %1258 = arith.addf %1221, %1257 : vector<14x124xf32>
    %c277 = arith.constant 277 : index
    %c0_214 = arith.constant 0 : index
    %1259 = vector.load %arg0[%c277, %c0_214] : memref<294x124xf32, #tpu.memory_space<vmem>>, vector<1x124xf32>
    %1260 = vector.shape_cast %1259 : vector<1x124xf32> to vector<124xf32>
    %1261 = vector.shape_cast %1260 : vector<124xf32> to vector<1x124xf32>
    %1262 = vector.broadcast %1261 : vector<1x124xf32> to vector<14x124xf32>
    %1263 = arith.mulf %1262, %1228 : vector<14x124xf32>
    %1264 = arith.addf %1227, %1263 : vector<14x124xf32>
    %1265 = vector.extract_strided_slice %17 {offsets = [4, 0], sizes = [14, 124], strides = [1, 1]} : vector<20x124xf32> to vector<14x124xf32>
    %c33 = arith.constant 33 : index
    %c0_215 = arith.constant 0 : index
    %1266 = vector.load %arg0[%c33, %c0_215] : memref<294x124xf32, #tpu.memory_space<vmem>>, vector<1x124xf32>
    %1267 = vector.shape_cast %1266 : vector<1x124xf32> to vector<124xf32>
    %1268 = vector.shape_cast %1267 : vector<124xf32> to vector<1x124xf32>
    %1269 = vector.broadcast %1268 : vector<1x124xf32> to vector<14x124xf32>
    %1270 = arith.mulf %1269, %1265 : vector<14x124xf32>
    %1271 = arith.addf %1234, %1270 : vector<14x124xf32>
    %c82 = arith.constant 82 : index
    %c0_216 = arith.constant 0 : index
    %1272 = vector.load %arg0[%c82, %c0_216] : memref<294x124xf32, #tpu.memory_space<vmem>>, vector<1x124xf32>
    %1273 = vector.shape_cast %1272 : vector<1x124xf32> to vector<124xf32>
    %1274 = vector.shape_cast %1273 : vector<124xf32> to vector<1x124xf32>
    %1275 = vector.broadcast %1274 : vector<1x124xf32> to vector<14x124xf32>
    %1276 = arith.mulf %1275, %1265 : vector<14x124xf32>
    %1277 = arith.addf %1240, %1276 : vector<14x124xf32>
    %c131 = arith.constant 131 : index
    %c0_217 = arith.constant 0 : index
    %1278 = vector.load %arg0[%c131, %c0_217] : memref<294x124xf32, #tpu.memory_space<vmem>>, vector<1x124xf32>
    %1279 = vector.shape_cast %1278 : vector<1x124xf32> to vector<124xf32>
    %1280 = vector.shape_cast %1279 : vector<124xf32> to vector<1x124xf32>
    %1281 = vector.broadcast %1280 : vector<1x124xf32> to vector<14x124xf32>
    %1282 = arith.mulf %1281, %1265 : vector<14x124xf32>
    %1283 = arith.addf %1246, %1282 : vector<14x124xf32>
    %c180 = arith.constant 180 : index
    %c0_218 = arith.constant 0 : index
    %1284 = vector.load %arg0[%c180, %c0_218] : memref<294x124xf32, #tpu.memory_space<vmem>>, vector<1x124xf32>
    %1285 = vector.shape_cast %1284 : vector<1x124xf32> to vector<124xf32>
    %1286 = vector.shape_cast %1285 : vector<124xf32> to vector<1x124xf32>
    %1287 = vector.broadcast %1286 : vector<1x124xf32> to vector<14x124xf32>
    %1288 = arith.mulf %1287, %1265 : vector<14x124xf32>
    %1289 = arith.addf %1252, %1288 : vector<14x124xf32>
    %c229 = arith.constant 229 : index
    %c0_219 = arith.constant 0 : index
    %1290 = vector.load %arg0[%c229, %c0_219] : memref<294x124xf32, #tpu.memory_space<vmem>>, vector<1x124xf32>
    %1291 = vector.shape_cast %1290 : vector<1x124xf32> to vector<124xf32>
    %1292 = vector.shape_cast %1291 : vector<124xf32> to vector<1x124xf32>
    %1293 = vector.broadcast %1292 : vector<1x124xf32> to vector<14x124xf32>
    %1294 = arith.mulf %1293, %1265 : vector<14x124xf32>
    %1295 = arith.addf %1258, %1294 : vector<14x124xf32>
    %c278 = arith.constant 278 : index
    %c0_220 = arith.constant 0 : index
    %1296 = vector.load %arg0[%c278, %c0_220] : memref<294x124xf32, #tpu.memory_space<vmem>>, vector<1x124xf32>
    %1297 = vector.shape_cast %1296 : vector<1x124xf32> to vector<124xf32>
    %1298 = vector.shape_cast %1297 : vector<124xf32> to vector<1x124xf32>
    %1299 = vector.broadcast %1298 : vector<1x124xf32> to vector<14x124xf32>
    %1300 = arith.mulf %1299, %1265 : vector<14x124xf32>
    %1301 = arith.addf %1264, %1300 : vector<14x124xf32>
    %1302 = vector.extract_strided_slice %19 {offsets = [4, 0], sizes = [14, 124], strides = [1, 1]} : vector<20x124xf32> to vector<14x124xf32>
    %c34 = arith.constant 34 : index
    %c0_221 = arith.constant 0 : index
    %1303 = vector.load %arg0[%c34, %c0_221] : memref<294x124xf32, #tpu.memory_space<vmem>>, vector<1x124xf32>
    %1304 = vector.shape_cast %1303 : vector<1x124xf32> to vector<124xf32>
    %1305 = vector.shape_cast %1304 : vector<124xf32> to vector<1x124xf32>
    %1306 = vector.broadcast %1305 : vector<1x124xf32> to vector<14x124xf32>
    %1307 = arith.mulf %1306, %1302 : vector<14x124xf32>
    %1308 = arith.addf %1271, %1307 : vector<14x124xf32>
    %c83 = arith.constant 83 : index
    %c0_222 = arith.constant 0 : index
    %1309 = vector.load %arg0[%c83, %c0_222] : memref<294x124xf32, #tpu.memory_space<vmem>>, vector<1x124xf32>
    %1310 = vector.shape_cast %1309 : vector<1x124xf32> to vector<124xf32>
    %1311 = vector.shape_cast %1310 : vector<124xf32> to vector<1x124xf32>
    %1312 = vector.broadcast %1311 : vector<1x124xf32> to vector<14x124xf32>
    %1313 = arith.mulf %1312, %1302 : vector<14x124xf32>
    %1314 = arith.addf %1277, %1313 : vector<14x124xf32>
    %c132 = arith.constant 132 : index
    %c0_223 = arith.constant 0 : index
    %1315 = vector.load %arg0[%c132, %c0_223] : memref<294x124xf32, #tpu.memory_space<vmem>>, vector<1x124xf32>
    %1316 = vector.shape_cast %1315 : vector<1x124xf32> to vector<124xf32>
    %1317 = vector.shape_cast %1316 : vector<124xf32> to vector<1x124xf32>
    %1318 = vector.broadcast %1317 : vector<1x124xf32> to vector<14x124xf32>
    %1319 = arith.mulf %1318, %1302 : vector<14x124xf32>
    %1320 = arith.addf %1283, %1319 : vector<14x124xf32>
    %c181 = arith.constant 181 : index
    %c0_224 = arith.constant 0 : index
    %1321 = vector.load %arg0[%c181, %c0_224] : memref<294x124xf32, #tpu.memory_space<vmem>>, vector<1x124xf32>
    %1322 = vector.shape_cast %1321 : vector<1x124xf32> to vector<124xf32>
    %1323 = vector.shape_cast %1322 : vector<124xf32> to vector<1x124xf32>
    %1324 = vector.broadcast %1323 : vector<1x124xf32> to vector<14x124xf32>
    %1325 = arith.mulf %1324, %1302 : vector<14x124xf32>
    %1326 = arith.addf %1289, %1325 : vector<14x124xf32>
    %c230 = arith.constant 230 : index
    %c0_225 = arith.constant 0 : index
    %1327 = vector.load %arg0[%c230, %c0_225] : memref<294x124xf32, #tpu.memory_space<vmem>>, vector<1x124xf32>
    %1328 = vector.shape_cast %1327 : vector<1x124xf32> to vector<124xf32>
    %1329 = vector.shape_cast %1328 : vector<124xf32> to vector<1x124xf32>
    %1330 = vector.broadcast %1329 : vector<1x124xf32> to vector<14x124xf32>
    %1331 = arith.mulf %1330, %1302 : vector<14x124xf32>
    %1332 = arith.addf %1295, %1331 : vector<14x124xf32>
    %c279 = arith.constant 279 : index
    %c0_226 = arith.constant 0 : index
    %1333 = vector.load %arg0[%c279, %c0_226] : memref<294x124xf32, #tpu.memory_space<vmem>>, vector<1x124xf32>
    %1334 = vector.shape_cast %1333 : vector<1x124xf32> to vector<124xf32>
    %1335 = vector.shape_cast %1334 : vector<124xf32> to vector<1x124xf32>
    %1336 = vector.broadcast %1335 : vector<1x124xf32> to vector<14x124xf32>
    %1337 = arith.mulf %1336, %1302 : vector<14x124xf32>
    %1338 = arith.addf %1301, %1337 : vector<14x124xf32>
    %1339 = vector.extract_strided_slice %7 {offsets = [5, 0], sizes = [14, 124], strides = [1, 1]} : vector<20x124xf32> to vector<14x124xf32>
    %c35 = arith.constant 35 : index
    %c0_227 = arith.constant 0 : index
    %1340 = vector.load %arg0[%c35, %c0_227] : memref<294x124xf32, #tpu.memory_space<vmem>>, vector<1x124xf32>
    %1341 = vector.shape_cast %1340 : vector<1x124xf32> to vector<124xf32>
    %1342 = vector.shape_cast %1341 : vector<124xf32> to vector<1x124xf32>
    %1343 = vector.broadcast %1342 : vector<1x124xf32> to vector<14x124xf32>
    %1344 = arith.mulf %1343, %1339 : vector<14x124xf32>
    %1345 = arith.addf %1308, %1344 : vector<14x124xf32>
    %c84 = arith.constant 84 : index
    %c0_228 = arith.constant 0 : index
    %1346 = vector.load %arg0[%c84, %c0_228] : memref<294x124xf32, #tpu.memory_space<vmem>>, vector<1x124xf32>
    %1347 = vector.shape_cast %1346 : vector<1x124xf32> to vector<124xf32>
    %1348 = vector.shape_cast %1347 : vector<124xf32> to vector<1x124xf32>
    %1349 = vector.broadcast %1348 : vector<1x124xf32> to vector<14x124xf32>
    %1350 = arith.mulf %1349, %1339 : vector<14x124xf32>
    %1351 = arith.addf %1314, %1350 : vector<14x124xf32>
    %c133 = arith.constant 133 : index
    %c0_229 = arith.constant 0 : index
    %1352 = vector.load %arg0[%c133, %c0_229] : memref<294x124xf32, #tpu.memory_space<vmem>>, vector<1x124xf32>
    %1353 = vector.shape_cast %1352 : vector<1x124xf32> to vector<124xf32>
    %1354 = vector.shape_cast %1353 : vector<124xf32> to vector<1x124xf32>
    %1355 = vector.broadcast %1354 : vector<1x124xf32> to vector<14x124xf32>
    %1356 = arith.mulf %1355, %1339 : vector<14x124xf32>
    %1357 = arith.addf %1320, %1356 : vector<14x124xf32>
    %c182 = arith.constant 182 : index
    %c0_230 = arith.constant 0 : index
    %1358 = vector.load %arg0[%c182, %c0_230] : memref<294x124xf32, #tpu.memory_space<vmem>>, vector<1x124xf32>
    %1359 = vector.shape_cast %1358 : vector<1x124xf32> to vector<124xf32>
    %1360 = vector.shape_cast %1359 : vector<124xf32> to vector<1x124xf32>
    %1361 = vector.broadcast %1360 : vector<1x124xf32> to vector<14x124xf32>
    %1362 = arith.mulf %1361, %1339 : vector<14x124xf32>
    %1363 = arith.addf %1326, %1362 : vector<14x124xf32>
    %c231 = arith.constant 231 : index
    %c0_231 = arith.constant 0 : index
    %1364 = vector.load %arg0[%c231, %c0_231] : memref<294x124xf32, #tpu.memory_space<vmem>>, vector<1x124xf32>
    %1365 = vector.shape_cast %1364 : vector<1x124xf32> to vector<124xf32>
    %1366 = vector.shape_cast %1365 : vector<124xf32> to vector<1x124xf32>
    %1367 = vector.broadcast %1366 : vector<1x124xf32> to vector<14x124xf32>
    %1368 = arith.mulf %1367, %1339 : vector<14x124xf32>
    %1369 = arith.addf %1332, %1368 : vector<14x124xf32>
    %c280 = arith.constant 280 : index
    %c0_232 = arith.constant 0 : index
    %1370 = vector.load %arg0[%c280, %c0_232] : memref<294x124xf32, #tpu.memory_space<vmem>>, vector<1x124xf32>
    %1371 = vector.shape_cast %1370 : vector<1x124xf32> to vector<124xf32>
    %1372 = vector.shape_cast %1371 : vector<124xf32> to vector<1x124xf32>
    %1373 = vector.broadcast %1372 : vector<1x124xf32> to vector<14x124xf32>
    %1374 = arith.mulf %1373, %1339 : vector<14x124xf32>
    %1375 = arith.addf %1338, %1374 : vector<14x124xf32>
    %1376 = vector.extract_strided_slice %9 {offsets = [5, 0], sizes = [14, 124], strides = [1, 1]} : vector<20x124xf32> to vector<14x124xf32>
    %c36 = arith.constant 36 : index
    %c0_233 = arith.constant 0 : index
    %1377 = vector.load %arg0[%c36, %c0_233] : memref<294x124xf32, #tpu.memory_space<vmem>>, vector<1x124xf32>
    %1378 = vector.shape_cast %1377 : vector<1x124xf32> to vector<124xf32>
    %1379 = vector.shape_cast %1378 : vector<124xf32> to vector<1x124xf32>
    %1380 = vector.broadcast %1379 : vector<1x124xf32> to vector<14x124xf32>
    %1381 = arith.mulf %1380, %1376 : vector<14x124xf32>
    %1382 = arith.addf %1345, %1381 : vector<14x124xf32>
    %c85 = arith.constant 85 : index
    %c0_234 = arith.constant 0 : index
    %1383 = vector.load %arg0[%c85, %c0_234] : memref<294x124xf32, #tpu.memory_space<vmem>>, vector<1x124xf32>
    %1384 = vector.shape_cast %1383 : vector<1x124xf32> to vector<124xf32>
    %1385 = vector.shape_cast %1384 : vector<124xf32> to vector<1x124xf32>
    %1386 = vector.broadcast %1385 : vector<1x124xf32> to vector<14x124xf32>
    %1387 = arith.mulf %1386, %1376 : vector<14x124xf32>
    %1388 = arith.addf %1351, %1387 : vector<14x124xf32>
    %c134 = arith.constant 134 : index
    %c0_235 = arith.constant 0 : index
    %1389 = vector.load %arg0[%c134, %c0_235] : memref<294x124xf32, #tpu.memory_space<vmem>>, vector<1x124xf32>
    %1390 = vector.shape_cast %1389 : vector<1x124xf32> to vector<124xf32>
    %1391 = vector.shape_cast %1390 : vector<124xf32> to vector<1x124xf32>
    %1392 = vector.broadcast %1391 : vector<1x124xf32> to vector<14x124xf32>
    %1393 = arith.mulf %1392, %1376 : vector<14x124xf32>
    %1394 = arith.addf %1357, %1393 : vector<14x124xf32>
    %c183 = arith.constant 183 : index
    %c0_236 = arith.constant 0 : index
    %1395 = vector.load %arg0[%c183, %c0_236] : memref<294x124xf32, #tpu.memory_space<vmem>>, vector<1x124xf32>
    %1396 = vector.shape_cast %1395 : vector<1x124xf32> to vector<124xf32>
    %1397 = vector.shape_cast %1396 : vector<124xf32> to vector<1x124xf32>
    %1398 = vector.broadcast %1397 : vector<1x124xf32> to vector<14x124xf32>
    %1399 = arith.mulf %1398, %1376 : vector<14x124xf32>
    %1400 = arith.addf %1363, %1399 : vector<14x124xf32>
    %c232 = arith.constant 232 : index
    %c0_237 = arith.constant 0 : index
    %1401 = vector.load %arg0[%c232, %c0_237] : memref<294x124xf32, #tpu.memory_space<vmem>>, vector<1x124xf32>
    %1402 = vector.shape_cast %1401 : vector<1x124xf32> to vector<124xf32>
    %1403 = vector.shape_cast %1402 : vector<124xf32> to vector<1x124xf32>
    %1404 = vector.broadcast %1403 : vector<1x124xf32> to vector<14x124xf32>
    %1405 = arith.mulf %1404, %1376 : vector<14x124xf32>
    %1406 = arith.addf %1369, %1405 : vector<14x124xf32>
    %c281 = arith.constant 281 : index
    %c0_238 = arith.constant 0 : index
    %1407 = vector.load %arg0[%c281, %c0_238] : memref<294x124xf32, #tpu.memory_space<vmem>>, vector<1x124xf32>
    %1408 = vector.shape_cast %1407 : vector<1x124xf32> to vector<124xf32>
    %1409 = vector.shape_cast %1408 : vector<124xf32> to vector<1x124xf32>
    %1410 = vector.broadcast %1409 : vector<1x124xf32> to vector<14x124xf32>
    %1411 = arith.mulf %1410, %1376 : vector<14x124xf32>
    %1412 = arith.addf %1375, %1411 : vector<14x124xf32>
    %1413 = vector.extract_strided_slice %11 {offsets = [5, 0], sizes = [14, 124], strides = [1, 1]} : vector<20x124xf32> to vector<14x124xf32>
    %c37 = arith.constant 37 : index
    %c0_239 = arith.constant 0 : index
    %1414 = vector.load %arg0[%c37, %c0_239] : memref<294x124xf32, #tpu.memory_space<vmem>>, vector<1x124xf32>
    %1415 = vector.shape_cast %1414 : vector<1x124xf32> to vector<124xf32>
    %1416 = vector.shape_cast %1415 : vector<124xf32> to vector<1x124xf32>
    %1417 = vector.broadcast %1416 : vector<1x124xf32> to vector<14x124xf32>
    %1418 = arith.mulf %1417, %1413 : vector<14x124xf32>
    %1419 = arith.addf %1382, %1418 : vector<14x124xf32>
    %c86 = arith.constant 86 : index
    %c0_240 = arith.constant 0 : index
    %1420 = vector.load %arg0[%c86, %c0_240] : memref<294x124xf32, #tpu.memory_space<vmem>>, vector<1x124xf32>
    %1421 = vector.shape_cast %1420 : vector<1x124xf32> to vector<124xf32>
    %1422 = vector.shape_cast %1421 : vector<124xf32> to vector<1x124xf32>
    %1423 = vector.broadcast %1422 : vector<1x124xf32> to vector<14x124xf32>
    %1424 = arith.mulf %1423, %1413 : vector<14x124xf32>
    %1425 = arith.addf %1388, %1424 : vector<14x124xf32>
    %c135 = arith.constant 135 : index
    %c0_241 = arith.constant 0 : index
    %1426 = vector.load %arg0[%c135, %c0_241] : memref<294x124xf32, #tpu.memory_space<vmem>>, vector<1x124xf32>
    %1427 = vector.shape_cast %1426 : vector<1x124xf32> to vector<124xf32>
    %1428 = vector.shape_cast %1427 : vector<124xf32> to vector<1x124xf32>
    %1429 = vector.broadcast %1428 : vector<1x124xf32> to vector<14x124xf32>
    %1430 = arith.mulf %1429, %1413 : vector<14x124xf32>
    %1431 = arith.addf %1394, %1430 : vector<14x124xf32>
    %c184 = arith.constant 184 : index
    %c0_242 = arith.constant 0 : index
    %1432 = vector.load %arg0[%c184, %c0_242] : memref<294x124xf32, #tpu.memory_space<vmem>>, vector<1x124xf32>
    %1433 = vector.shape_cast %1432 : vector<1x124xf32> to vector<124xf32>
    %1434 = vector.shape_cast %1433 : vector<124xf32> to vector<1x124xf32>
    %1435 = vector.broadcast %1434 : vector<1x124xf32> to vector<14x124xf32>
    %1436 = arith.mulf %1435, %1413 : vector<14x124xf32>
    %1437 = arith.addf %1400, %1436 : vector<14x124xf32>
    %c233 = arith.constant 233 : index
    %c0_243 = arith.constant 0 : index
    %1438 = vector.load %arg0[%c233, %c0_243] : memref<294x124xf32, #tpu.memory_space<vmem>>, vector<1x124xf32>
    %1439 = vector.shape_cast %1438 : vector<1x124xf32> to vector<124xf32>
    %1440 = vector.shape_cast %1439 : vector<124xf32> to vector<1x124xf32>
    %1441 = vector.broadcast %1440 : vector<1x124xf32> to vector<14x124xf32>
    %1442 = arith.mulf %1441, %1413 : vector<14x124xf32>
    %1443 = arith.addf %1406, %1442 : vector<14x124xf32>
    %c282 = arith.constant 282 : index
    %c0_244 = arith.constant 0 : index
    %1444 = vector.load %arg0[%c282, %c0_244] : memref<294x124xf32, #tpu.memory_space<vmem>>, vector<1x124xf32>
    %1445 = vector.shape_cast %1444 : vector<1x124xf32> to vector<124xf32>
    %1446 = vector.shape_cast %1445 : vector<124xf32> to vector<1x124xf32>
    %1447 = vector.broadcast %1446 : vector<1x124xf32> to vector<14x124xf32>
    %1448 = arith.mulf %1447, %1413 : vector<14x124xf32>
    %1449 = arith.addf %1412, %1448 : vector<14x124xf32>
    %1450 = vector.extract_strided_slice %13 {offsets = [5, 0], sizes = [14, 124], strides = [1, 1]} : vector<20x124xf32> to vector<14x124xf32>
    %c38 = arith.constant 38 : index
    %c0_245 = arith.constant 0 : index
    %1451 = vector.load %arg0[%c38, %c0_245] : memref<294x124xf32, #tpu.memory_space<vmem>>, vector<1x124xf32>
    %1452 = vector.shape_cast %1451 : vector<1x124xf32> to vector<124xf32>
    %1453 = vector.shape_cast %1452 : vector<124xf32> to vector<1x124xf32>
    %1454 = vector.broadcast %1453 : vector<1x124xf32> to vector<14x124xf32>
    %1455 = arith.mulf %1454, %1450 : vector<14x124xf32>
    %1456 = arith.addf %1419, %1455 : vector<14x124xf32>
    %c87 = arith.constant 87 : index
    %c0_246 = arith.constant 0 : index
    %1457 = vector.load %arg0[%c87, %c0_246] : memref<294x124xf32, #tpu.memory_space<vmem>>, vector<1x124xf32>
    %1458 = vector.shape_cast %1457 : vector<1x124xf32> to vector<124xf32>
    %1459 = vector.shape_cast %1458 : vector<124xf32> to vector<1x124xf32>
    %1460 = vector.broadcast %1459 : vector<1x124xf32> to vector<14x124xf32>
    %1461 = arith.mulf %1460, %1450 : vector<14x124xf32>
    %1462 = arith.addf %1425, %1461 : vector<14x124xf32>
    %c136 = arith.constant 136 : index
    %c0_247 = arith.constant 0 : index
    %1463 = vector.load %arg0[%c136, %c0_247] : memref<294x124xf32, #tpu.memory_space<vmem>>, vector<1x124xf32>
    %1464 = vector.shape_cast %1463 : vector<1x124xf32> to vector<124xf32>
    %1465 = vector.shape_cast %1464 : vector<124xf32> to vector<1x124xf32>
    %1466 = vector.broadcast %1465 : vector<1x124xf32> to vector<14x124xf32>
    %1467 = arith.mulf %1466, %1450 : vector<14x124xf32>
    %1468 = arith.addf %1431, %1467 : vector<14x124xf32>
    %c185 = arith.constant 185 : index
    %c0_248 = arith.constant 0 : index
    %1469 = vector.load %arg0[%c185, %c0_248] : memref<294x124xf32, #tpu.memory_space<vmem>>, vector<1x124xf32>
    %1470 = vector.shape_cast %1469 : vector<1x124xf32> to vector<124xf32>
    %1471 = vector.shape_cast %1470 : vector<124xf32> to vector<1x124xf32>
    %1472 = vector.broadcast %1471 : vector<1x124xf32> to vector<14x124xf32>
    %1473 = arith.mulf %1472, %1450 : vector<14x124xf32>
    %1474 = arith.addf %1437, %1473 : vector<14x124xf32>
    %c234 = arith.constant 234 : index
    %c0_249 = arith.constant 0 : index
    %1475 = vector.load %arg0[%c234, %c0_249] : memref<294x124xf32, #tpu.memory_space<vmem>>, vector<1x124xf32>
    %1476 = vector.shape_cast %1475 : vector<1x124xf32> to vector<124xf32>
    %1477 = vector.shape_cast %1476 : vector<124xf32> to vector<1x124xf32>
    %1478 = vector.broadcast %1477 : vector<1x124xf32> to vector<14x124xf32>
    %1479 = arith.mulf %1478, %1450 : vector<14x124xf32>
    %1480 = arith.addf %1443, %1479 : vector<14x124xf32>
    %c283 = arith.constant 283 : index
    %c0_250 = arith.constant 0 : index
    %1481 = vector.load %arg0[%c283, %c0_250] : memref<294x124xf32, #tpu.memory_space<vmem>>, vector<1x124xf32>
    %1482 = vector.shape_cast %1481 : vector<1x124xf32> to vector<124xf32>
    %1483 = vector.shape_cast %1482 : vector<124xf32> to vector<1x124xf32>
    %1484 = vector.broadcast %1483 : vector<1x124xf32> to vector<14x124xf32>
    %1485 = arith.mulf %1484, %1450 : vector<14x124xf32>
    %1486 = arith.addf %1449, %1485 : vector<14x124xf32>
    %1487 = vector.extract_strided_slice %15 {offsets = [5, 0], sizes = [14, 124], strides = [1, 1]} : vector<20x124xf32> to vector<14x124xf32>
    %c39 = arith.constant 39 : index
    %c0_251 = arith.constant 0 : index
    %1488 = vector.load %arg0[%c39, %c0_251] : memref<294x124xf32, #tpu.memory_space<vmem>>, vector<1x124xf32>
    %1489 = vector.shape_cast %1488 : vector<1x124xf32> to vector<124xf32>
    %1490 = vector.shape_cast %1489 : vector<124xf32> to vector<1x124xf32>
    %1491 = vector.broadcast %1490 : vector<1x124xf32> to vector<14x124xf32>
    %1492 = arith.mulf %1491, %1487 : vector<14x124xf32>
    %1493 = arith.addf %1456, %1492 : vector<14x124xf32>
    %c88 = arith.constant 88 : index
    %c0_252 = arith.constant 0 : index
    %1494 = vector.load %arg0[%c88, %c0_252] : memref<294x124xf32, #tpu.memory_space<vmem>>, vector<1x124xf32>
    %1495 = vector.shape_cast %1494 : vector<1x124xf32> to vector<124xf32>
    %1496 = vector.shape_cast %1495 : vector<124xf32> to vector<1x124xf32>
    %1497 = vector.broadcast %1496 : vector<1x124xf32> to vector<14x124xf32>
    %1498 = arith.mulf %1497, %1487 : vector<14x124xf32>
    %1499 = arith.addf %1462, %1498 : vector<14x124xf32>
    %c137 = arith.constant 137 : index
    %c0_253 = arith.constant 0 : index
    %1500 = vector.load %arg0[%c137, %c0_253] : memref<294x124xf32, #tpu.memory_space<vmem>>, vector<1x124xf32>
    %1501 = vector.shape_cast %1500 : vector<1x124xf32> to vector<124xf32>
    %1502 = vector.shape_cast %1501 : vector<124xf32> to vector<1x124xf32>
    %1503 = vector.broadcast %1502 : vector<1x124xf32> to vector<14x124xf32>
    %1504 = arith.mulf %1503, %1487 : vector<14x124xf32>
    %1505 = arith.addf %1468, %1504 : vector<14x124xf32>
    %c186 = arith.constant 186 : index
    %c0_254 = arith.constant 0 : index
    %1506 = vector.load %arg0[%c186, %c0_254] : memref<294x124xf32, #tpu.memory_space<vmem>>, vector<1x124xf32>
    %1507 = vector.shape_cast %1506 : vector<1x124xf32> to vector<124xf32>
    %1508 = vector.shape_cast %1507 : vector<124xf32> to vector<1x124xf32>
    %1509 = vector.broadcast %1508 : vector<1x124xf32> to vector<14x124xf32>
    %1510 = arith.mulf %1509, %1487 : vector<14x124xf32>
    %1511 = arith.addf %1474, %1510 : vector<14x124xf32>
    %c235 = arith.constant 235 : index
    %c0_255 = arith.constant 0 : index
    %1512 = vector.load %arg0[%c235, %c0_255] : memref<294x124xf32, #tpu.memory_space<vmem>>, vector<1x124xf32>
    %1513 = vector.shape_cast %1512 : vector<1x124xf32> to vector<124xf32>
    %1514 = vector.shape_cast %1513 : vector<124xf32> to vector<1x124xf32>
    %1515 = vector.broadcast %1514 : vector<1x124xf32> to vector<14x124xf32>
    %1516 = arith.mulf %1515, %1487 : vector<14x124xf32>
    %1517 = arith.addf %1480, %1516 : vector<14x124xf32>
    %c284 = arith.constant 284 : index
    %c0_256 = arith.constant 0 : index
    %1518 = vector.load %arg0[%c284, %c0_256] : memref<294x124xf32, #tpu.memory_space<vmem>>, vector<1x124xf32>
    %1519 = vector.shape_cast %1518 : vector<1x124xf32> to vector<124xf32>
    %1520 = vector.shape_cast %1519 : vector<124xf32> to vector<1x124xf32>
    %1521 = vector.broadcast %1520 : vector<1x124xf32> to vector<14x124xf32>
    %1522 = arith.mulf %1521, %1487 : vector<14x124xf32>
    %1523 = arith.addf %1486, %1522 : vector<14x124xf32>
    %1524 = vector.extract_strided_slice %17 {offsets = [5, 0], sizes = [14, 124], strides = [1, 1]} : vector<20x124xf32> to vector<14x124xf32>
    %c40 = arith.constant 40 : index
    %c0_257 = arith.constant 0 : index
    %1525 = vector.load %arg0[%c40, %c0_257] : memref<294x124xf32, #tpu.memory_space<vmem>>, vector<1x124xf32>
    %1526 = vector.shape_cast %1525 : vector<1x124xf32> to vector<124xf32>
    %1527 = vector.shape_cast %1526 : vector<124xf32> to vector<1x124xf32>
    %1528 = vector.broadcast %1527 : vector<1x124xf32> to vector<14x124xf32>
    %1529 = arith.mulf %1528, %1524 : vector<14x124xf32>
    %1530 = arith.addf %1493, %1529 : vector<14x124xf32>
    %c89 = arith.constant 89 : index
    %c0_258 = arith.constant 0 : index
    %1531 = vector.load %arg0[%c89, %c0_258] : memref<294x124xf32, #tpu.memory_space<vmem>>, vector<1x124xf32>
    %1532 = vector.shape_cast %1531 : vector<1x124xf32> to vector<124xf32>
    %1533 = vector.shape_cast %1532 : vector<124xf32> to vector<1x124xf32>
    %1534 = vector.broadcast %1533 : vector<1x124xf32> to vector<14x124xf32>
    %1535 = arith.mulf %1534, %1524 : vector<14x124xf32>
    %1536 = arith.addf %1499, %1535 : vector<14x124xf32>
    %c138 = arith.constant 138 : index
    %c0_259 = arith.constant 0 : index
    %1537 = vector.load %arg0[%c138, %c0_259] : memref<294x124xf32, #tpu.memory_space<vmem>>, vector<1x124xf32>
    %1538 = vector.shape_cast %1537 : vector<1x124xf32> to vector<124xf32>
    %1539 = vector.shape_cast %1538 : vector<124xf32> to vector<1x124xf32>
    %1540 = vector.broadcast %1539 : vector<1x124xf32> to vector<14x124xf32>
    %1541 = arith.mulf %1540, %1524 : vector<14x124xf32>
    %1542 = arith.addf %1505, %1541 : vector<14x124xf32>
    %c187 = arith.constant 187 : index
    %c0_260 = arith.constant 0 : index
    %1543 = vector.load %arg0[%c187, %c0_260] : memref<294x124xf32, #tpu.memory_space<vmem>>, vector<1x124xf32>
    %1544 = vector.shape_cast %1543 : vector<1x124xf32> to vector<124xf32>
    %1545 = vector.shape_cast %1544 : vector<124xf32> to vector<1x124xf32>
    %1546 = vector.broadcast %1545 : vector<1x124xf32> to vector<14x124xf32>
    %1547 = arith.mulf %1546, %1524 : vector<14x124xf32>
    %1548 = arith.addf %1511, %1547 : vector<14x124xf32>
    %c236 = arith.constant 236 : index
    %c0_261 = arith.constant 0 : index
    %1549 = vector.load %arg0[%c236, %c0_261] : memref<294x124xf32, #tpu.memory_space<vmem>>, vector<1x124xf32>
    %1550 = vector.shape_cast %1549 : vector<1x124xf32> to vector<124xf32>
    %1551 = vector.shape_cast %1550 : vector<124xf32> to vector<1x124xf32>
    %1552 = vector.broadcast %1551 : vector<1x124xf32> to vector<14x124xf32>
    %1553 = arith.mulf %1552, %1524 : vector<14x124xf32>
    %1554 = arith.addf %1517, %1553 : vector<14x124xf32>
    %c285 = arith.constant 285 : index
    %c0_262 = arith.constant 0 : index
    %1555 = vector.load %arg0[%c285, %c0_262] : memref<294x124xf32, #tpu.memory_space<vmem>>, vector<1x124xf32>
    %1556 = vector.shape_cast %1555 : vector<1x124xf32> to vector<124xf32>
    %1557 = vector.shape_cast %1556 : vector<124xf32> to vector<1x124xf32>
    %1558 = vector.broadcast %1557 : vector<1x124xf32> to vector<14x124xf32>
    %1559 = arith.mulf %1558, %1524 : vector<14x124xf32>
    %1560 = arith.addf %1523, %1559 : vector<14x124xf32>
    %1561 = vector.extract_strided_slice %19 {offsets = [5, 0], sizes = [14, 124], strides = [1, 1]} : vector<20x124xf32> to vector<14x124xf32>
    %c41 = arith.constant 41 : index
    %c0_263 = arith.constant 0 : index
    %1562 = vector.load %arg0[%c41, %c0_263] : memref<294x124xf32, #tpu.memory_space<vmem>>, vector<1x124xf32>
    %1563 = vector.shape_cast %1562 : vector<1x124xf32> to vector<124xf32>
    %1564 = vector.shape_cast %1563 : vector<124xf32> to vector<1x124xf32>
    %1565 = vector.broadcast %1564 : vector<1x124xf32> to vector<14x124xf32>
    %1566 = arith.mulf %1565, %1561 : vector<14x124xf32>
    %1567 = arith.addf %1530, %1566 : vector<14x124xf32>
    %c90 = arith.constant 90 : index
    %c0_264 = arith.constant 0 : index
    %1568 = vector.load %arg0[%c90, %c0_264] : memref<294x124xf32, #tpu.memory_space<vmem>>, vector<1x124xf32>
    %1569 = vector.shape_cast %1568 : vector<1x124xf32> to vector<124xf32>
    %1570 = vector.shape_cast %1569 : vector<124xf32> to vector<1x124xf32>
    %1571 = vector.broadcast %1570 : vector<1x124xf32> to vector<14x124xf32>
    %1572 = arith.mulf %1571, %1561 : vector<14x124xf32>
    %1573 = arith.addf %1536, %1572 : vector<14x124xf32>
    %c139 = arith.constant 139 : index
    %c0_265 = arith.constant 0 : index
    %1574 = vector.load %arg0[%c139, %c0_265] : memref<294x124xf32, #tpu.memory_space<vmem>>, vector<1x124xf32>
    %1575 = vector.shape_cast %1574 : vector<1x124xf32> to vector<124xf32>
    %1576 = vector.shape_cast %1575 : vector<124xf32> to vector<1x124xf32>
    %1577 = vector.broadcast %1576 : vector<1x124xf32> to vector<14x124xf32>
    %1578 = arith.mulf %1577, %1561 : vector<14x124xf32>
    %1579 = arith.addf %1542, %1578 : vector<14x124xf32>
    %c188 = arith.constant 188 : index
    %c0_266 = arith.constant 0 : index
    %1580 = vector.load %arg0[%c188, %c0_266] : memref<294x124xf32, #tpu.memory_space<vmem>>, vector<1x124xf32>
    %1581 = vector.shape_cast %1580 : vector<1x124xf32> to vector<124xf32>
    %1582 = vector.shape_cast %1581 : vector<124xf32> to vector<1x124xf32>
    %1583 = vector.broadcast %1582 : vector<1x124xf32> to vector<14x124xf32>
    %1584 = arith.mulf %1583, %1561 : vector<14x124xf32>
    %1585 = arith.addf %1548, %1584 : vector<14x124xf32>
    %c237 = arith.constant 237 : index
    %c0_267 = arith.constant 0 : index
    %1586 = vector.load %arg0[%c237, %c0_267] : memref<294x124xf32, #tpu.memory_space<vmem>>, vector<1x124xf32>
    %1587 = vector.shape_cast %1586 : vector<1x124xf32> to vector<124xf32>
    %1588 = vector.shape_cast %1587 : vector<124xf32> to vector<1x124xf32>
    %1589 = vector.broadcast %1588 : vector<1x124xf32> to vector<14x124xf32>
    %1590 = arith.mulf %1589, %1561 : vector<14x124xf32>
    %1591 = arith.addf %1554, %1590 : vector<14x124xf32>
    %c286 = arith.constant 286 : index
    %c0_268 = arith.constant 0 : index
    %1592 = vector.load %arg0[%c286, %c0_268] : memref<294x124xf32, #tpu.memory_space<vmem>>, vector<1x124xf32>
    %1593 = vector.shape_cast %1592 : vector<1x124xf32> to vector<124xf32>
    %1594 = vector.shape_cast %1593 : vector<124xf32> to vector<1x124xf32>
    %1595 = vector.broadcast %1594 : vector<1x124xf32> to vector<14x124xf32>
    %1596 = arith.mulf %1595, %1561 : vector<14x124xf32>
    %1597 = arith.addf %1560, %1596 : vector<14x124xf32>
    %1598 = vector.extract_strided_slice %7 {offsets = [6, 0], sizes = [14, 124], strides = [1, 1]} : vector<20x124xf32> to vector<14x124xf32>
    %c42 = arith.constant 42 : index
    %c0_269 = arith.constant 0 : index
    %1599 = vector.load %arg0[%c42, %c0_269] : memref<294x124xf32, #tpu.memory_space<vmem>>, vector<1x124xf32>
    %1600 = vector.shape_cast %1599 : vector<1x124xf32> to vector<124xf32>
    %1601 = vector.shape_cast %1600 : vector<124xf32> to vector<1x124xf32>
    %1602 = vector.broadcast %1601 : vector<1x124xf32> to vector<14x124xf32>
    %1603 = arith.mulf %1602, %1598 : vector<14x124xf32>
    %1604 = arith.addf %1567, %1603 : vector<14x124xf32>
    %c91 = arith.constant 91 : index
    %c0_270 = arith.constant 0 : index
    %1605 = vector.load %arg0[%c91, %c0_270] : memref<294x124xf32, #tpu.memory_space<vmem>>, vector<1x124xf32>
    %1606 = vector.shape_cast %1605 : vector<1x124xf32> to vector<124xf32>
    %1607 = vector.shape_cast %1606 : vector<124xf32> to vector<1x124xf32>
    %1608 = vector.broadcast %1607 : vector<1x124xf32> to vector<14x124xf32>
    %1609 = arith.mulf %1608, %1598 : vector<14x124xf32>
    %1610 = arith.addf %1573, %1609 : vector<14x124xf32>
    %c140 = arith.constant 140 : index
    %c0_271 = arith.constant 0 : index
    %1611 = vector.load %arg0[%c140, %c0_271] : memref<294x124xf32, #tpu.memory_space<vmem>>, vector<1x124xf32>
    %1612 = vector.shape_cast %1611 : vector<1x124xf32> to vector<124xf32>
    %1613 = vector.shape_cast %1612 : vector<124xf32> to vector<1x124xf32>
    %1614 = vector.broadcast %1613 : vector<1x124xf32> to vector<14x124xf32>
    %1615 = arith.mulf %1614, %1598 : vector<14x124xf32>
    %1616 = arith.addf %1579, %1615 : vector<14x124xf32>
    %c189 = arith.constant 189 : index
    %c0_272 = arith.constant 0 : index
    %1617 = vector.load %arg0[%c189, %c0_272] : memref<294x124xf32, #tpu.memory_space<vmem>>, vector<1x124xf32>
    %1618 = vector.shape_cast %1617 : vector<1x124xf32> to vector<124xf32>
    %1619 = vector.shape_cast %1618 : vector<124xf32> to vector<1x124xf32>
    %1620 = vector.broadcast %1619 : vector<1x124xf32> to vector<14x124xf32>
    %1621 = arith.mulf %1620, %1598 : vector<14x124xf32>
    %1622 = arith.addf %1585, %1621 : vector<14x124xf32>
    %c238 = arith.constant 238 : index
    %c0_273 = arith.constant 0 : index
    %1623 = vector.load %arg0[%c238, %c0_273] : memref<294x124xf32, #tpu.memory_space<vmem>>, vector<1x124xf32>
    %1624 = vector.shape_cast %1623 : vector<1x124xf32> to vector<124xf32>
    %1625 = vector.shape_cast %1624 : vector<124xf32> to vector<1x124xf32>
    %1626 = vector.broadcast %1625 : vector<1x124xf32> to vector<14x124xf32>
    %1627 = arith.mulf %1626, %1598 : vector<14x124xf32>
    %1628 = arith.addf %1591, %1627 : vector<14x124xf32>
    %c287 = arith.constant 287 : index
    %c0_274 = arith.constant 0 : index
    %1629 = vector.load %arg0[%c287, %c0_274] : memref<294x124xf32, #tpu.memory_space<vmem>>, vector<1x124xf32>
    %1630 = vector.shape_cast %1629 : vector<1x124xf32> to vector<124xf32>
    %1631 = vector.shape_cast %1630 : vector<124xf32> to vector<1x124xf32>
    %1632 = vector.broadcast %1631 : vector<1x124xf32> to vector<14x124xf32>
    %1633 = arith.mulf %1632, %1598 : vector<14x124xf32>
    %1634 = arith.addf %1597, %1633 : vector<14x124xf32>
    %1635 = vector.extract_strided_slice %9 {offsets = [6, 0], sizes = [14, 124], strides = [1, 1]} : vector<20x124xf32> to vector<14x124xf32>
    %c43 = arith.constant 43 : index
    %c0_275 = arith.constant 0 : index
    %1636 = vector.load %arg0[%c43, %c0_275] : memref<294x124xf32, #tpu.memory_space<vmem>>, vector<1x124xf32>
    %1637 = vector.shape_cast %1636 : vector<1x124xf32> to vector<124xf32>
    %1638 = vector.shape_cast %1637 : vector<124xf32> to vector<1x124xf32>
    %1639 = vector.broadcast %1638 : vector<1x124xf32> to vector<14x124xf32>
    %1640 = arith.mulf %1639, %1635 : vector<14x124xf32>
    %1641 = arith.addf %1604, %1640 : vector<14x124xf32>
    %c92 = arith.constant 92 : index
    %c0_276 = arith.constant 0 : index
    %1642 = vector.load %arg0[%c92, %c0_276] : memref<294x124xf32, #tpu.memory_space<vmem>>, vector<1x124xf32>
    %1643 = vector.shape_cast %1642 : vector<1x124xf32> to vector<124xf32>
    %1644 = vector.shape_cast %1643 : vector<124xf32> to vector<1x124xf32>
    %1645 = vector.broadcast %1644 : vector<1x124xf32> to vector<14x124xf32>
    %1646 = arith.mulf %1645, %1635 : vector<14x124xf32>
    %1647 = arith.addf %1610, %1646 : vector<14x124xf32>
    %c141 = arith.constant 141 : index
    %c0_277 = arith.constant 0 : index
    %1648 = vector.load %arg0[%c141, %c0_277] : memref<294x124xf32, #tpu.memory_space<vmem>>, vector<1x124xf32>
    %1649 = vector.shape_cast %1648 : vector<1x124xf32> to vector<124xf32>
    %1650 = vector.shape_cast %1649 : vector<124xf32> to vector<1x124xf32>
    %1651 = vector.broadcast %1650 : vector<1x124xf32> to vector<14x124xf32>
    %1652 = arith.mulf %1651, %1635 : vector<14x124xf32>
    %1653 = arith.addf %1616, %1652 : vector<14x124xf32>
    %c190 = arith.constant 190 : index
    %c0_278 = arith.constant 0 : index
    %1654 = vector.load %arg0[%c190, %c0_278] : memref<294x124xf32, #tpu.memory_space<vmem>>, vector<1x124xf32>
    %1655 = vector.shape_cast %1654 : vector<1x124xf32> to vector<124xf32>
    %1656 = vector.shape_cast %1655 : vector<124xf32> to vector<1x124xf32>
    %1657 = vector.broadcast %1656 : vector<1x124xf32> to vector<14x124xf32>
    %1658 = arith.mulf %1657, %1635 : vector<14x124xf32>
    %1659 = arith.addf %1622, %1658 : vector<14x124xf32>
    %c239 = arith.constant 239 : index
    %c0_279 = arith.constant 0 : index
    %1660 = vector.load %arg0[%c239, %c0_279] : memref<294x124xf32, #tpu.memory_space<vmem>>, vector<1x124xf32>
    %1661 = vector.shape_cast %1660 : vector<1x124xf32> to vector<124xf32>
    %1662 = vector.shape_cast %1661 : vector<124xf32> to vector<1x124xf32>
    %1663 = vector.broadcast %1662 : vector<1x124xf32> to vector<14x124xf32>
    %1664 = arith.mulf %1663, %1635 : vector<14x124xf32>
    %1665 = arith.addf %1628, %1664 : vector<14x124xf32>
    %c288 = arith.constant 288 : index
    %c0_280 = arith.constant 0 : index
    %1666 = vector.load %arg0[%c288, %c0_280] : memref<294x124xf32, #tpu.memory_space<vmem>>, vector<1x124xf32>
    %1667 = vector.shape_cast %1666 : vector<1x124xf32> to vector<124xf32>
    %1668 = vector.shape_cast %1667 : vector<124xf32> to vector<1x124xf32>
    %1669 = vector.broadcast %1668 : vector<1x124xf32> to vector<14x124xf32>
    %1670 = arith.mulf %1669, %1635 : vector<14x124xf32>
    %1671 = arith.addf %1634, %1670 : vector<14x124xf32>
    %1672 = vector.extract_strided_slice %11 {offsets = [6, 0], sizes = [14, 124], strides = [1, 1]} : vector<20x124xf32> to vector<14x124xf32>
    %c44 = arith.constant 44 : index
    %c0_281 = arith.constant 0 : index
    %1673 = vector.load %arg0[%c44, %c0_281] : memref<294x124xf32, #tpu.memory_space<vmem>>, vector<1x124xf32>
    %1674 = vector.shape_cast %1673 : vector<1x124xf32> to vector<124xf32>
    %1675 = vector.shape_cast %1674 : vector<124xf32> to vector<1x124xf32>
    %1676 = vector.broadcast %1675 : vector<1x124xf32> to vector<14x124xf32>
    %1677 = arith.mulf %1676, %1672 : vector<14x124xf32>
    %1678 = arith.addf %1641, %1677 : vector<14x124xf32>
    %c93 = arith.constant 93 : index
    %c0_282 = arith.constant 0 : index
    %1679 = vector.load %arg0[%c93, %c0_282] : memref<294x124xf32, #tpu.memory_space<vmem>>, vector<1x124xf32>
    %1680 = vector.shape_cast %1679 : vector<1x124xf32> to vector<124xf32>
    %1681 = vector.shape_cast %1680 : vector<124xf32> to vector<1x124xf32>
    %1682 = vector.broadcast %1681 : vector<1x124xf32> to vector<14x124xf32>
    %1683 = arith.mulf %1682, %1672 : vector<14x124xf32>
    %1684 = arith.addf %1647, %1683 : vector<14x124xf32>
    %c142 = arith.constant 142 : index
    %c0_283 = arith.constant 0 : index
    %1685 = vector.load %arg0[%c142, %c0_283] : memref<294x124xf32, #tpu.memory_space<vmem>>, vector<1x124xf32>
    %1686 = vector.shape_cast %1685 : vector<1x124xf32> to vector<124xf32>
    %1687 = vector.shape_cast %1686 : vector<124xf32> to vector<1x124xf32>
    %1688 = vector.broadcast %1687 : vector<1x124xf32> to vector<14x124xf32>
    %1689 = arith.mulf %1688, %1672 : vector<14x124xf32>
    %1690 = arith.addf %1653, %1689 : vector<14x124xf32>
    %c191 = arith.constant 191 : index
    %c0_284 = arith.constant 0 : index
    %1691 = vector.load %arg0[%c191, %c0_284] : memref<294x124xf32, #tpu.memory_space<vmem>>, vector<1x124xf32>
    %1692 = vector.shape_cast %1691 : vector<1x124xf32> to vector<124xf32>
    %1693 = vector.shape_cast %1692 : vector<124xf32> to vector<1x124xf32>
    %1694 = vector.broadcast %1693 : vector<1x124xf32> to vector<14x124xf32>
    %1695 = arith.mulf %1694, %1672 : vector<14x124xf32>
    %1696 = arith.addf %1659, %1695 : vector<14x124xf32>
    %c240 = arith.constant 240 : index
    %c0_285 = arith.constant 0 : index
    %1697 = vector.load %arg0[%c240, %c0_285] : memref<294x124xf32, #tpu.memory_space<vmem>>, vector<1x124xf32>
    %1698 = vector.shape_cast %1697 : vector<1x124xf32> to vector<124xf32>
    %1699 = vector.shape_cast %1698 : vector<124xf32> to vector<1x124xf32>
    %1700 = vector.broadcast %1699 : vector<1x124xf32> to vector<14x124xf32>
    %1701 = arith.mulf %1700, %1672 : vector<14x124xf32>
    %1702 = arith.addf %1665, %1701 : vector<14x124xf32>
    %c289 = arith.constant 289 : index
    %c0_286 = arith.constant 0 : index
    %1703 = vector.load %arg0[%c289, %c0_286] : memref<294x124xf32, #tpu.memory_space<vmem>>, vector<1x124xf32>
    %1704 = vector.shape_cast %1703 : vector<1x124xf32> to vector<124xf32>
    %1705 = vector.shape_cast %1704 : vector<124xf32> to vector<1x124xf32>
    %1706 = vector.broadcast %1705 : vector<1x124xf32> to vector<14x124xf32>
    %1707 = arith.mulf %1706, %1672 : vector<14x124xf32>
    %1708 = arith.addf %1671, %1707 : vector<14x124xf32>
    %1709 = vector.extract_strided_slice %13 {offsets = [6, 0], sizes = [14, 124], strides = [1, 1]} : vector<20x124xf32> to vector<14x124xf32>
    %c45 = arith.constant 45 : index
    %c0_287 = arith.constant 0 : index
    %1710 = vector.load %arg0[%c45, %c0_287] : memref<294x124xf32, #tpu.memory_space<vmem>>, vector<1x124xf32>
    %1711 = vector.shape_cast %1710 : vector<1x124xf32> to vector<124xf32>
    %1712 = vector.shape_cast %1711 : vector<124xf32> to vector<1x124xf32>
    %1713 = vector.broadcast %1712 : vector<1x124xf32> to vector<14x124xf32>
    %1714 = arith.mulf %1713, %1709 : vector<14x124xf32>
    %1715 = arith.addf %1678, %1714 : vector<14x124xf32>
    %c94 = arith.constant 94 : index
    %c0_288 = arith.constant 0 : index
    %1716 = vector.load %arg0[%c94, %c0_288] : memref<294x124xf32, #tpu.memory_space<vmem>>, vector<1x124xf32>
    %1717 = vector.shape_cast %1716 : vector<1x124xf32> to vector<124xf32>
    %1718 = vector.shape_cast %1717 : vector<124xf32> to vector<1x124xf32>
    %1719 = vector.broadcast %1718 : vector<1x124xf32> to vector<14x124xf32>
    %1720 = arith.mulf %1719, %1709 : vector<14x124xf32>
    %1721 = arith.addf %1684, %1720 : vector<14x124xf32>
    %c143 = arith.constant 143 : index
    %c0_289 = arith.constant 0 : index
    %1722 = vector.load %arg0[%c143, %c0_289] : memref<294x124xf32, #tpu.memory_space<vmem>>, vector<1x124xf32>
    %1723 = vector.shape_cast %1722 : vector<1x124xf32> to vector<124xf32>
    %1724 = vector.shape_cast %1723 : vector<124xf32> to vector<1x124xf32>
    %1725 = vector.broadcast %1724 : vector<1x124xf32> to vector<14x124xf32>
    %1726 = arith.mulf %1725, %1709 : vector<14x124xf32>
    %1727 = arith.addf %1690, %1726 : vector<14x124xf32>
    %c192 = arith.constant 192 : index
    %c0_290 = arith.constant 0 : index
    %1728 = vector.load %arg0[%c192, %c0_290] : memref<294x124xf32, #tpu.memory_space<vmem>>, vector<1x124xf32>
    %1729 = vector.shape_cast %1728 : vector<1x124xf32> to vector<124xf32>
    %1730 = vector.shape_cast %1729 : vector<124xf32> to vector<1x124xf32>
    %1731 = vector.broadcast %1730 : vector<1x124xf32> to vector<14x124xf32>
    %1732 = arith.mulf %1731, %1709 : vector<14x124xf32>
    %1733 = arith.addf %1696, %1732 : vector<14x124xf32>
    %c241 = arith.constant 241 : index
    %c0_291 = arith.constant 0 : index
    %1734 = vector.load %arg0[%c241, %c0_291] : memref<294x124xf32, #tpu.memory_space<vmem>>, vector<1x124xf32>
    %1735 = vector.shape_cast %1734 : vector<1x124xf32> to vector<124xf32>
    %1736 = vector.shape_cast %1735 : vector<124xf32> to vector<1x124xf32>
    %1737 = vector.broadcast %1736 : vector<1x124xf32> to vector<14x124xf32>
    %1738 = arith.mulf %1737, %1709 : vector<14x124xf32>
    %1739 = arith.addf %1702, %1738 : vector<14x124xf32>
    %c290 = arith.constant 290 : index
    %c0_292 = arith.constant 0 : index
    %1740 = vector.load %arg0[%c290, %c0_292] : memref<294x124xf32, #tpu.memory_space<vmem>>, vector<1x124xf32>
    %1741 = vector.shape_cast %1740 : vector<1x124xf32> to vector<124xf32>
    %1742 = vector.shape_cast %1741 : vector<124xf32> to vector<1x124xf32>
    %1743 = vector.broadcast %1742 : vector<1x124xf32> to vector<14x124xf32>
    %1744 = arith.mulf %1743, %1709 : vector<14x124xf32>
    %1745 = arith.addf %1708, %1744 : vector<14x124xf32>
    %1746 = vector.extract_strided_slice %15 {offsets = [6, 0], sizes = [14, 124], strides = [1, 1]} : vector<20x124xf32> to vector<14x124xf32>
    %c46 = arith.constant 46 : index
    %c0_293 = arith.constant 0 : index
    %1747 = vector.load %arg0[%c46, %c0_293] : memref<294x124xf32, #tpu.memory_space<vmem>>, vector<1x124xf32>
    %1748 = vector.shape_cast %1747 : vector<1x124xf32> to vector<124xf32>
    %1749 = vector.shape_cast %1748 : vector<124xf32> to vector<1x124xf32>
    %1750 = vector.broadcast %1749 : vector<1x124xf32> to vector<14x124xf32>
    %1751 = arith.mulf %1750, %1746 : vector<14x124xf32>
    %1752 = arith.addf %1715, %1751 : vector<14x124xf32>
    %c95 = arith.constant 95 : index
    %c0_294 = arith.constant 0 : index
    %1753 = vector.load %arg0[%c95, %c0_294] : memref<294x124xf32, #tpu.memory_space<vmem>>, vector<1x124xf32>
    %1754 = vector.shape_cast %1753 : vector<1x124xf32> to vector<124xf32>
    %1755 = vector.shape_cast %1754 : vector<124xf32> to vector<1x124xf32>
    %1756 = vector.broadcast %1755 : vector<1x124xf32> to vector<14x124xf32>
    %1757 = arith.mulf %1756, %1746 : vector<14x124xf32>
    %1758 = arith.addf %1721, %1757 : vector<14x124xf32>
    %c144 = arith.constant 144 : index
    %c0_295 = arith.constant 0 : index
    %1759 = vector.load %arg0[%c144, %c0_295] : memref<294x124xf32, #tpu.memory_space<vmem>>, vector<1x124xf32>
    %1760 = vector.shape_cast %1759 : vector<1x124xf32> to vector<124xf32>
    %1761 = vector.shape_cast %1760 : vector<124xf32> to vector<1x124xf32>
    %1762 = vector.broadcast %1761 : vector<1x124xf32> to vector<14x124xf32>
    %1763 = arith.mulf %1762, %1746 : vector<14x124xf32>
    %1764 = arith.addf %1727, %1763 : vector<14x124xf32>
    %c193 = arith.constant 193 : index
    %c0_296 = arith.constant 0 : index
    %1765 = vector.load %arg0[%c193, %c0_296] : memref<294x124xf32, #tpu.memory_space<vmem>>, vector<1x124xf32>
    %1766 = vector.shape_cast %1765 : vector<1x124xf32> to vector<124xf32>
    %1767 = vector.shape_cast %1766 : vector<124xf32> to vector<1x124xf32>
    %1768 = vector.broadcast %1767 : vector<1x124xf32> to vector<14x124xf32>
    %1769 = arith.mulf %1768, %1746 : vector<14x124xf32>
    %1770 = arith.addf %1733, %1769 : vector<14x124xf32>
    %c242 = arith.constant 242 : index
    %c0_297 = arith.constant 0 : index
    %1771 = vector.load %arg0[%c242, %c0_297] : memref<294x124xf32, #tpu.memory_space<vmem>>, vector<1x124xf32>
    %1772 = vector.shape_cast %1771 : vector<1x124xf32> to vector<124xf32>
    %1773 = vector.shape_cast %1772 : vector<124xf32> to vector<1x124xf32>
    %1774 = vector.broadcast %1773 : vector<1x124xf32> to vector<14x124xf32>
    %1775 = arith.mulf %1774, %1746 : vector<14x124xf32>
    %1776 = arith.addf %1739, %1775 : vector<14x124xf32>
    %c291 = arith.constant 291 : index
    %c0_298 = arith.constant 0 : index
    %1777 = vector.load %arg0[%c291, %c0_298] : memref<294x124xf32, #tpu.memory_space<vmem>>, vector<1x124xf32>
    %1778 = vector.shape_cast %1777 : vector<1x124xf32> to vector<124xf32>
    %1779 = vector.shape_cast %1778 : vector<124xf32> to vector<1x124xf32>
    %1780 = vector.broadcast %1779 : vector<1x124xf32> to vector<14x124xf32>
    %1781 = arith.mulf %1780, %1746 : vector<14x124xf32>
    %1782 = arith.addf %1745, %1781 : vector<14x124xf32>
    %1783 = vector.extract_strided_slice %17 {offsets = [6, 0], sizes = [14, 124], strides = [1, 1]} : vector<20x124xf32> to vector<14x124xf32>
    %c47 = arith.constant 47 : index
    %c0_299 = arith.constant 0 : index
    %1784 = vector.load %arg0[%c47, %c0_299] : memref<294x124xf32, #tpu.memory_space<vmem>>, vector<1x124xf32>
    %1785 = vector.shape_cast %1784 : vector<1x124xf32> to vector<124xf32>
    %1786 = vector.shape_cast %1785 : vector<124xf32> to vector<1x124xf32>
    %1787 = vector.broadcast %1786 : vector<1x124xf32> to vector<14x124xf32>
    %1788 = arith.mulf %1787, %1783 : vector<14x124xf32>
    %1789 = arith.addf %1752, %1788 : vector<14x124xf32>
    %c96 = arith.constant 96 : index
    %c0_300 = arith.constant 0 : index
    %1790 = vector.load %arg0[%c96, %c0_300] : memref<294x124xf32, #tpu.memory_space<vmem>>, vector<1x124xf32>
    %1791 = vector.shape_cast %1790 : vector<1x124xf32> to vector<124xf32>
    %1792 = vector.shape_cast %1791 : vector<124xf32> to vector<1x124xf32>
    %1793 = vector.broadcast %1792 : vector<1x124xf32> to vector<14x124xf32>
    %1794 = arith.mulf %1793, %1783 : vector<14x124xf32>
    %1795 = arith.addf %1758, %1794 : vector<14x124xf32>
    %c145 = arith.constant 145 : index
    %c0_301 = arith.constant 0 : index
    %1796 = vector.load %arg0[%c145, %c0_301] : memref<294x124xf32, #tpu.memory_space<vmem>>, vector<1x124xf32>
    %1797 = vector.shape_cast %1796 : vector<1x124xf32> to vector<124xf32>
    %1798 = vector.shape_cast %1797 : vector<124xf32> to vector<1x124xf32>
    %1799 = vector.broadcast %1798 : vector<1x124xf32> to vector<14x124xf32>
    %1800 = arith.mulf %1799, %1783 : vector<14x124xf32>
    %1801 = arith.addf %1764, %1800 : vector<14x124xf32>
    %c194 = arith.constant 194 : index
    %c0_302 = arith.constant 0 : index
    %1802 = vector.load %arg0[%c194, %c0_302] : memref<294x124xf32, #tpu.memory_space<vmem>>, vector<1x124xf32>
    %1803 = vector.shape_cast %1802 : vector<1x124xf32> to vector<124xf32>
    %1804 = vector.shape_cast %1803 : vector<124xf32> to vector<1x124xf32>
    %1805 = vector.broadcast %1804 : vector<1x124xf32> to vector<14x124xf32>
    %1806 = arith.mulf %1805, %1783 : vector<14x124xf32>
    %1807 = arith.addf %1770, %1806 : vector<14x124xf32>
    %c243 = arith.constant 243 : index
    %c0_303 = arith.constant 0 : index
    %1808 = vector.load %arg0[%c243, %c0_303] : memref<294x124xf32, #tpu.memory_space<vmem>>, vector<1x124xf32>
    %1809 = vector.shape_cast %1808 : vector<1x124xf32> to vector<124xf32>
    %1810 = vector.shape_cast %1809 : vector<124xf32> to vector<1x124xf32>
    %1811 = vector.broadcast %1810 : vector<1x124xf32> to vector<14x124xf32>
    %1812 = arith.mulf %1811, %1783 : vector<14x124xf32>
    %1813 = arith.addf %1776, %1812 : vector<14x124xf32>
    %c292 = arith.constant 292 : index
    %c0_304 = arith.constant 0 : index
    %1814 = vector.load %arg0[%c292, %c0_304] : memref<294x124xf32, #tpu.memory_space<vmem>>, vector<1x124xf32>
    %1815 = vector.shape_cast %1814 : vector<1x124xf32> to vector<124xf32>
    %1816 = vector.shape_cast %1815 : vector<124xf32> to vector<1x124xf32>
    %1817 = vector.broadcast %1816 : vector<1x124xf32> to vector<14x124xf32>
    %1818 = arith.mulf %1817, %1783 : vector<14x124xf32>
    %1819 = arith.addf %1782, %1818 : vector<14x124xf32>
    %1820 = vector.extract_strided_slice %19 {offsets = [6, 0], sizes = [14, 124], strides = [1, 1]} : vector<20x124xf32> to vector<14x124xf32>
    %c48 = arith.constant 48 : index
    %c0_305 = arith.constant 0 : index
    %1821 = vector.load %arg0[%c48, %c0_305] : memref<294x124xf32, #tpu.memory_space<vmem>>, vector<1x124xf32>
    %1822 = vector.shape_cast %1821 : vector<1x124xf32> to vector<124xf32>
    %1823 = vector.shape_cast %1822 : vector<124xf32> to vector<1x124xf32>
    %1824 = vector.broadcast %1823 : vector<1x124xf32> to vector<14x124xf32>
    %1825 = arith.mulf %1824, %1820 : vector<14x124xf32>
    %1826 = arith.addf %1789, %1825 : vector<14x124xf32>
    %c97 = arith.constant 97 : index
    %c0_306 = arith.constant 0 : index
    %1827 = vector.load %arg0[%c97, %c0_306] : memref<294x124xf32, #tpu.memory_space<vmem>>, vector<1x124xf32>
    %1828 = vector.shape_cast %1827 : vector<1x124xf32> to vector<124xf32>
    %1829 = vector.shape_cast %1828 : vector<124xf32> to vector<1x124xf32>
    %1830 = vector.broadcast %1829 : vector<1x124xf32> to vector<14x124xf32>
    %1831 = arith.mulf %1830, %1820 : vector<14x124xf32>
    %1832 = arith.addf %1795, %1831 : vector<14x124xf32>
    %c146 = arith.constant 146 : index
    %c0_307 = arith.constant 0 : index
    %1833 = vector.load %arg0[%c146, %c0_307] : memref<294x124xf32, #tpu.memory_space<vmem>>, vector<1x124xf32>
    %1834 = vector.shape_cast %1833 : vector<1x124xf32> to vector<124xf32>
    %1835 = vector.shape_cast %1834 : vector<124xf32> to vector<1x124xf32>
    %1836 = vector.broadcast %1835 : vector<1x124xf32> to vector<14x124xf32>
    %1837 = arith.mulf %1836, %1820 : vector<14x124xf32>
    %1838 = arith.addf %1801, %1837 : vector<14x124xf32>
    %c195 = arith.constant 195 : index
    %c0_308 = arith.constant 0 : index
    %1839 = vector.load %arg0[%c195, %c0_308] : memref<294x124xf32, #tpu.memory_space<vmem>>, vector<1x124xf32>
    %1840 = vector.shape_cast %1839 : vector<1x124xf32> to vector<124xf32>
    %1841 = vector.shape_cast %1840 : vector<124xf32> to vector<1x124xf32>
    %1842 = vector.broadcast %1841 : vector<1x124xf32> to vector<14x124xf32>
    %1843 = arith.mulf %1842, %1820 : vector<14x124xf32>
    %1844 = arith.addf %1807, %1843 : vector<14x124xf32>
    %c244 = arith.constant 244 : index
    %c0_309 = arith.constant 0 : index
    %1845 = vector.load %arg0[%c244, %c0_309] : memref<294x124xf32, #tpu.memory_space<vmem>>, vector<1x124xf32>
    %1846 = vector.shape_cast %1845 : vector<1x124xf32> to vector<124xf32>
    %1847 = vector.shape_cast %1846 : vector<124xf32> to vector<1x124xf32>
    %1848 = vector.broadcast %1847 : vector<1x124xf32> to vector<14x124xf32>
    %1849 = arith.mulf %1848, %1820 : vector<14x124xf32>
    %1850 = arith.addf %1813, %1849 : vector<14x124xf32>
    %c293 = arith.constant 293 : index
    %c0_310 = arith.constant 0 : index
    %1851 = vector.load %arg0[%c293, %c0_310] : memref<294x124xf32, #tpu.memory_space<vmem>>, vector<1x124xf32>
    %1852 = vector.shape_cast %1851 : vector<1x124xf32> to vector<124xf32>
    %1853 = vector.shape_cast %1852 : vector<124xf32> to vector<1x124xf32>
    %1854 = vector.broadcast %1853 : vector<1x124xf32> to vector<14x124xf32>
    %1855 = arith.mulf %1854, %1820 : vector<14x124xf32>
    %1856 = arith.addf %1819, %1855 : vector<14x124xf32>
    %c0_311 = arith.constant 0 : index
    %c0_312 = arith.constant 0 : index
    %c0_313 = arith.constant 0 : index
    %c0_314 = arith.constant 0 : index
    %1857 = vector.load %arg3[%c0_311, %c0_312, %c0_313, %c0_314] : memref<1x12x14x62xf32, #tpu.memory_space<vmem>>, vector<1x1x14x62xf32>
    %1858 = vector.shape_cast %1857 : vector<1x1x14x62xf32> to vector<14x62xf32>
    %c0_315 = arith.constant 0 : index
    %c6_316 = arith.constant 6 : index
    %c0_317 = arith.constant 0 : index
    %c0_318 = arith.constant 0 : index
    %1859 = vector.load %arg3[%c0_315, %c6_316, %c0_317, %c0_318] : memref<1x12x14x62xf32, #tpu.memory_space<vmem>>, vector<1x1x14x62xf32>
    %1860 = vector.shape_cast %1859 : vector<1x1x14x62xf32> to vector<14x62xf32>
    %1861 = tpu.concatenate %1858, %1860 in 1 : vector<14x62xf32>, vector<14x62xf32> -> vector<14x124xf32>
    %1862 = arith.addf %1826, %1861 : vector<14x124xf32>
    %1863 = vector.extract_strided_slice %1862 {offsets = [0, 0], sizes = [14, 62], strides = [1, 1]} : vector<14x124xf32> to vector<14x62xf32>
    %c0_319 = arith.constant 0 : index
    %c0_320 = arith.constant 0 : index
    %c0_321 = arith.constant 0 : index
    %c0_322 = arith.constant 0 : index
    %1864 = vector.load %arg4[%c0_319, %c0_320, %c0_321, %c0_322] : memref<1x12x14x62xf32, #tpu.memory_space<vmem>>, vector<1x1x14x62xf32>
    %1865 = vector.shape_cast %1864 : vector<1x1x14x62xf32> to vector<14x62xf32>
    %1866 = vector.shape_cast %1863 : vector<14x62xf32> to vector<1x1x14x62xf32>
    tpu.vector_store %arg4[%c0_319, %c0_320, %c0_321, %c0_322], %1866 {strides = array<i32>} : memref<1x12x14x62xf32, #tpu.memory_space<vmem>>, vector<1x1x14x62xf32>,
    %1867 = vector.extract_strided_slice %1862 {offsets = [0, 62], sizes = [14, 62], strides = [1, 1]} : vector<14x124xf32> to vector<14x62xf32>
    %c0_323 = arith.constant 0 : index
    %c6_324 = arith.constant 6 : index
    %c0_325 = arith.constant 0 : index
    %c0_326 = arith.constant 0 : index
    %1868 = vector.load %arg4[%c0_323, %c6_324, %c0_325, %c0_326] : memref<1x12x14x62xf32, #tpu.memory_space<vmem>>, vector<1x1x14x62xf32>
    %1869 = vector.shape_cast %1868 : vector<1x1x14x62xf32> to vector<14x62xf32>
    %1870 = vector.shape_cast %1867 : vector<14x62xf32> to vector<1x1x14x62xf32>
    tpu.vector_store %arg4[%c0_323, %c6_324, %c0_325, %c0_326], %1870 {strides = array<i32>} : memref<1x12x14x62xf32, #tpu.memory_space<vmem>>, vector<1x1x14x62xf32>,
    %c0_327 = arith.constant 0 : index
    %c1_328 = arith.constant 1 : index
    %c0_329 = arith.constant 0 : index
    %c0_330 = arith.constant 0 : index
    %1871 = vector.load %arg3[%c0_327, %c1_328, %c0_329, %c0_330] : memref<1x12x14x62xf32, #tpu.memory_space<vmem>>, vector<1x1x14x62xf32>
    %1872 = vector.shape_cast %1871 : vector<1x1x14x62xf32> to vector<14x62xf32>
    %c0_331 = arith.constant 0 : index
    %c7_332 = arith.constant 7 : index
    %c0_333 = arith.constant 0 : index
    %c0_334 = arith.constant 0 : index
    %1873 = vector.load %arg3[%c0_331, %c7_332, %c0_333, %c0_334] : memref<1x12x14x62xf32, #tpu.memory_space<vmem>>, vector<1x1x14x62xf32>
    %1874 = vector.shape_cast %1873 : vector<1x1x14x62xf32> to vector<14x62xf32>
    %1875 = tpu.concatenate %1872, %1874 in 1 : vector<14x62xf32>, vector<14x62xf32> -> vector<14x124xf32>
    %1876 = arith.addf %1832, %1875 : vector<14x124xf32>
    %1877 = vector.extract_strided_slice %1876 {offsets = [0, 0], sizes = [14, 62], strides = [1, 1]} : vector<14x124xf32> to vector<14x62xf32>
    %c0_335 = arith.constant 0 : index
    %c1_336 = arith.constant 1 : index
    %c0_337 = arith.constant 0 : index
    %c0_338 = arith.constant 0 : index
    %1878 = vector.load %arg4[%c0_335, %c1_336, %c0_337, %c0_338] : memref<1x12x14x62xf32, #tpu.memory_space<vmem>>, vector<1x1x14x62xf32>
    %1879 = vector.shape_cast %1878 : vector<1x1x14x62xf32> to vector<14x62xf32>
    %1880 = vector.shape_cast %1877 : vector<14x62xf32> to vector<1x1x14x62xf32>
    tpu.vector_store %arg4[%c0_335, %c1_336, %c0_337, %c0_338], %1880 {strides = array<i32>} : memref<1x12x14x62xf32, #tpu.memory_space<vmem>>, vector<1x1x14x62xf32>,
    %1881 = vector.extract_strided_slice %1876 {offsets = [0, 62], sizes = [14, 62], strides = [1, 1]} : vector<14x124xf32> to vector<14x62xf32>
    %c0_339 = arith.constant 0 : index
    %c7_340 = arith.constant 7 : index
    %c0_341 = arith.constant 0 : index
    %c0_342 = arith.constant 0 : index
    %1882 = vector.load %arg4[%c0_339, %c7_340, %c0_341, %c0_342] : memref<1x12x14x62xf32, #tpu.memory_space<vmem>>, vector<1x1x14x62xf32>
    %1883 = vector.shape_cast %1882 : vector<1x1x14x62xf32> to vector<14x62xf32>
    %1884 = vector.shape_cast %1881 : vector<14x62xf32> to vector<1x1x14x62xf32>
    tpu.vector_store %arg4[%c0_339, %c7_340, %c0_341, %c0_342], %1884 {strides = array<i32>} : memref<1x12x14x62xf32, #tpu.memory_space<vmem>>, vector<1x1x14x62xf32>,
    %c0_343 = arith.constant 0 : index
    %c2_344 = arith.constant 2 : index
    %c0_345 = arith.constant 0 : index
    %c0_346 = arith.constant 0 : index
    %1885 = vector.load %arg3[%c0_343, %c2_344, %c0_345, %c0_346] : memref<1x12x14x62xf32, #tpu.memory_space<vmem>>, vector<1x1x14x62xf32>
    %1886 = vector.shape_cast %1885 : vector<1x1x14x62xf32> to vector<14x62xf32>
    %c0_347 = arith.constant 0 : index
    %c8_348 = arith.constant 8 : index
    %c0_349 = arith.constant 0 : index
    %c0_350 = arith.constant 0 : index
    %1887 = vector.load %arg3[%c0_347, %c8_348, %c0_349, %c0_350] : memref<1x12x14x62xf32, #tpu.memory_space<vmem>>, vector<1x1x14x62xf32>
    %1888 = vector.shape_cast %1887 : vector<1x1x14x62xf32> to vector<14x62xf32>
    %1889 = tpu.concatenate %1886, %1888 in 1 : vector<14x62xf32>, vector<14x62xf32> -> vector<14x124xf32>
    %1890 = arith.addf %1838, %1889 : vector<14x124xf32>
    %1891 = vector.extract_strided_slice %1890 {offsets = [0, 0], sizes = [14, 62], strides = [1, 1]} : vector<14x124xf32> to vector<14x62xf32>
    %c0_351 = arith.constant 0 : index
    %c2_352 = arith.constant 2 : index
    %c0_353 = arith.constant 0 : index
    %c0_354 = arith.constant 0 : index
    %1892 = vector.load %arg4[%c0_351, %c2_352, %c0_353, %c0_354] : memref<1x12x14x62xf32, #tpu.memory_space<vmem>>, vector<1x1x14x62xf32>
    %1893 = vector.shape_cast %1892 : vector<1x1x14x62xf32> to vector<14x62xf32>
    %1894 = vector.shape_cast %1891 : vector<14x62xf32> to vector<1x1x14x62xf32>
    tpu.vector_store %arg4[%c0_351, %c2_352, %c0_353, %c0_354], %1894 {strides = array<i32>} : memref<1x12x14x62xf32, #tpu.memory_space<vmem>>, vector<1x1x14x62xf32>,
    %1895 = vector.extract_strided_slice %1890 {offsets = [0, 62], sizes = [14, 62], strides = [1, 1]} : vector<14x124xf32> to vector<14x62xf32>
    %c0_355 = arith.constant 0 : index
    %c8_356 = arith.constant 8 : index
    %c0_357 = arith.constant 0 : index
    %c0_358 = arith.constant 0 : index
    %1896 = vector.load %arg4[%c0_355, %c8_356, %c0_357, %c0_358] : memref<1x12x14x62xf32, #tpu.memory_space<vmem>>, vector<1x1x14x62xf32>
    %1897 = vector.shape_cast %1896 : vector<1x1x14x62xf32> to vector<14x62xf32>
    %1898 = vector.shape_cast %1895 : vector<14x62xf32> to vector<1x1x14x62xf32>
    tpu.vector_store %arg4[%c0_355, %c8_356, %c0_357, %c0_358], %1898 {strides = array<i32>} : memref<1x12x14x62xf32, #tpu.memory_space<vmem>>, vector<1x1x14x62xf32>,
    %c0_359 = arith.constant 0 : index
    %c3_360 = arith.constant 3 : index
    %c0_361 = arith.constant 0 : index
    %c0_362 = arith.constant 0 : index
    %1899 = vector.load %arg3[%c0_359, %c3_360, %c0_361, %c0_362] : memref<1x12x14x62xf32, #tpu.memory_space<vmem>>, vector<1x1x14x62xf32>
    %1900 = vector.shape_cast %1899 : vector<1x1x14x62xf32> to vector<14x62xf32>
    %c0_363 = arith.constant 0 : index
    %c9_364 = arith.constant 9 : index
    %c0_365 = arith.constant 0 : index
    %c0_366 = arith.constant 0 : index
    %1901 = vector.load %arg3[%c0_363, %c9_364, %c0_365, %c0_366] : memref<1x12x14x62xf32, #tpu.memory_space<vmem>>, vector<1x1x14x62xf32>
    %1902 = vector.shape_cast %1901 : vector<1x1x14x62xf32> to vector<14x62xf32>
    %1903 = tpu.concatenate %1900, %1902 in 1 : vector<14x62xf32>, vector<14x62xf32> -> vector<14x124xf32>
    %1904 = arith.addf %1844, %1903 : vector<14x124xf32>
    %1905 = vector.extract_strided_slice %1904 {offsets = [0, 0], sizes = [14, 62], strides = [1, 1]} : vector<14x124xf32> to vector<14x62xf32>
    %c0_367 = arith.constant 0 : index
    %c3_368 = arith.constant 3 : index
    %c0_369 = arith.constant 0 : index
    %c0_370 = arith.constant 0 : index
    %1906 = vector.load %arg4[%c0_367, %c3_368, %c0_369, %c0_370] : memref<1x12x14x62xf32, #tpu.memory_space<vmem>>, vector<1x1x14x62xf32>
    %1907 = vector.shape_cast %1906 : vector<1x1x14x62xf32> to vector<14x62xf32>
    %1908 = vector.shape_cast %1905 : vector<14x62xf32> to vector<1x1x14x62xf32>
    tpu.vector_store %arg4[%c0_367, %c3_368, %c0_369, %c0_370], %1908 {strides = array<i32>} : memref<1x12x14x62xf32, #tpu.memory_space<vmem>>, vector<1x1x14x62xf32>,
    %1909 = vector.extract_strided_slice %1904 {offsets = [0, 62], sizes = [14, 62], strides = [1, 1]} : vector<14x124xf32> to vector<14x62xf32>
    %c0_371 = arith.constant 0 : index
    %c9_372 = arith.constant 9 : index
    %c0_373 = arith.constant 0 : index
    %c0_374 = arith.constant 0 : index
    %1910 = vector.load %arg4[%c0_371, %c9_372, %c0_373, %c0_374] : memref<1x12x14x62xf32, #tpu.memory_space<vmem>>, vector<1x1x14x62xf32>
    %1911 = vector.shape_cast %1910 : vector<1x1x14x62xf32> to vector<14x62xf32>
    %1912 = vector.shape_cast %1909 : vector<14x62xf32> to vector<1x1x14x62xf32>
    tpu.vector_store %arg4[%c0_371, %c9_372, %c0_373, %c0_374], %1912 {strides = array<i32>} : memref<1x12x14x62xf32, #tpu.memory_space<vmem>>, vector<1x1x14x62xf32>,
    %c0_375 = arith.constant 0 : index
    %c4_376 = arith.constant 4 : index
    %c0_377 = arith.constant 0 : index
    %c0_378 = arith.constant 0 : index
    %1913 = vector.load %arg3[%c0_375, %c4_376, %c0_377, %c0_378] : memref<1x12x14x62xf32, #tpu.memory_space<vmem>>, vector<1x1x14x62xf32>
    %1914 = vector.shape_cast %1913 : vector<1x1x14x62xf32> to vector<14x62xf32>
    %c0_379 = arith.constant 0 : index
    %c10_380 = arith.constant 10 : index
    %c0_381 = arith.constant 0 : index
    %c0_382 = arith.constant 0 : index
    %1915 = vector.load %arg3[%c0_379, %c10_380, %c0_381, %c0_382] : memref<1x12x14x62xf32, #tpu.memory_space<vmem>>, vector<1x1x14x62xf32>
    %1916 = vector.shape_cast %1915 : vector<1x1x14x62xf32> to vector<14x62xf32>
    %1917 = tpu.concatenate %1914, %1916 in 1 : vector<14x62xf32>, vector<14x62xf32> -> vector<14x124xf32>
    %1918 = arith.addf %1850, %1917 : vector<14x124xf32>
    %1919 = vector.extract_strided_slice %1918 {offsets = [0, 0], sizes = [14, 62], strides = [1, 1]} : vector<14x124xf32> to vector<14x62xf32>
    %c0_383 = arith.constant 0 : index
    %c4_384 = arith.constant 4 : index
    %c0_385 = arith.constant 0 : index
    %c0_386 = arith.constant 0 : index
    %1920 = vector.load %arg4[%c0_383, %c4_384, %c0_385, %c0_386] : memref<1x12x14x62xf32, #tpu.memory_space<vmem>>, vector<1x1x14x62xf32>
    %1921 = vector.shape_cast %1920 : vector<1x1x14x62xf32> to vector<14x62xf32>
    %1922 = vector.shape_cast %1919 : vector<14x62xf32> to vector<1x1x14x62xf32>
    tpu.vector_store %arg4[%c0_383, %c4_384, %c0_385, %c0_386], %1922 {strides = array<i32>} : memref<1x12x14x62xf32, #tpu.memory_space<vmem>>, vector<1x1x14x62xf32>,
    %1923 = vector.extract_strided_slice %1918 {offsets = [0, 62], sizes = [14, 62], strides = [1, 1]} : vector<14x124xf32> to vector<14x62xf32>
    %c0_387 = arith.constant 0 : index
    %c10_388 = arith.constant 10 : index
    %c0_389 = arith.constant 0 : index
    %c0_390 = arith.constant 0 : index
    %1924 = vector.load %arg4[%c0_387, %c10_388, %c0_389, %c0_390] : memref<1x12x14x62xf32, #tpu.memory_space<vmem>>, vector<1x1x14x62xf32>
    %1925 = vector.shape_cast %1924 : vector<1x1x14x62xf32> to vector<14x62xf32>
    %1926 = vector.shape_cast %1923 : vector<14x62xf32> to vector<1x1x14x62xf32>
    tpu.vector_store %arg4[%c0_387, %c10_388, %c0_389, %c0_390], %1926 {strides = array<i32>} : memref<1x12x14x62xf32, #tpu.memory_space<vmem>>, vector<1x1x14x62xf32>,
    %c0_391 = arith.constant 0 : index
    %c5_392 = arith.constant 5 : index
    %c0_393 = arith.constant 0 : index
    %c0_394 = arith.constant 0 : index
    %1927 = vector.load %arg3[%c0_391, %c5_392, %c0_393, %c0_394] : memref<1x12x14x62xf32, #tpu.memory_space<vmem>>, vector<1x1x14x62xf32>
    %1928 = vector.shape_cast %1927 : vector<1x1x14x62xf32> to vector<14x62xf32>
    %c0_395 = arith.constant 0 : index
    %c11_396 = arith.constant 11 : index
    %c0_397 = arith.constant 0 : index
    %c0_398 = arith.constant 0 : index
    %1929 = vector.load %arg3[%c0_395, %c11_396, %c0_397, %c0_398] : memref<1x12x14x62xf32, #tpu.memory_space<vmem>>, vector<1x1x14x62xf32>
    %1930 = vector.shape_cast %1929 : vector<1x1x14x62xf32> to vector<14x62xf32>
    %1931 = tpu.concatenate %1928, %1930 in 1 : vector<14x62xf32>, vector<14x62xf32> -> vector<14x124xf32>
    %1932 = arith.addf %1856, %1931 : vector<14x124xf32>
    %1933 = vector.extract_strided_slice %1932 {offsets = [0, 0], sizes = [14, 62], strides = [1, 1]} : vector<14x124xf32> to vector<14x62xf32>
    %c0_399 = arith.constant 0 : index
    %c5_400 = arith.constant 5 : index
    %c0_401 = arith.constant 0 : index
    %c0_402 = arith.constant 0 : index
    %1934 = vector.load %arg4[%c0_399, %c5_400, %c0_401, %c0_402] : memref<1x12x14x62xf32, #tpu.memory_space<vmem>>, vector<1x1x14x62xf32>
    %1935 = vector.shape_cast %1934 : vector<1x1x14x62xf32> to vector<14x62xf32>
    %1936 = vector.shape_cast %1933 : vector<14x62xf32> to vector<1x1x14x62xf32>
    tpu.vector_store %arg4[%c0_399, %c5_400, %c0_401, %c0_402], %1936 {strides = array<i32>} : memref<1x12x14x62xf32, #tpu.memory_space<vmem>>, vector<1x1x14x62xf32>,
    %1937 = vector.extract_strided_slice %1932 {offsets = [0, 62], sizes = [14, 62], strides = [1, 1]} : vector<14x124xf32> to vector<14x62xf32>
    %c0_403 = arith.constant 0 : index
    %c11_404 = arith.constant 11 : index
    %c0_405 = arith.constant 0 : index
    %c0_406 = arith.constant 0 : index
    %1938 = vector.load %arg4[%c0_403, %c11_404, %c0_405, %c0_406] : memref<1x12x14x62xf32, #tpu.memory_space<vmem>>, vector<1x1x14x62xf32>
    %1939 = vector.shape_cast %1938 : vector<1x1x14x62xf32> to vector<14x62xf32>
    %1940 = vector.shape_cast %1937 : vector<14x62xf32> to vector<1x1x14x62xf32>
    tpu.vector_store %arg4[%c0_403, %c11_404, %c0_405, %c0_406], %1940 {strides = array<i32>} : memref<1x12x14x62xf32, #tpu.memory_space<vmem>>, vector<1x1x14x62xf32>,
    return
  }
}

</mosaic_0001>

<bundles_post_ra>
// kernel: model_forward.1
= control target key start
LH: loop header
LB: loop body
LE: loop exit
PB: predicated region body
PF: predicated region fallthrough
CT: control target
= control target key end

     0   :  { %s6044_s17 = smov 2   ;;  %vm27_vm0 = vcmask 15360   ;;  %vm30_vm1 = vcmask 539648   ;;  %vm35_vm2 = vcmask 1041408   ;;  %s6045_s20 = smov 127   ;;  %vm55_vm3 = vcmask 506880   ;;  %s11576_s2 = inlined_call_operand.vmem [shape: f32[1,1,16,64], index: 2, kind: input, shape index: {}]   ;;  %s11577_s3 = inlined_call_operand.vmem [shape: f32[1,12,14,62], index: 3, kind: input, shape index: {}]   ;;  %s11578_s0 = inlined_call_operand.vmem [shape: f32[294,124], index: 0, kind: input, shape index: {}]   ;;  %s11579_s1 = inlined_call_operand.vmem [shape: f32[6,124], index: 1, kind: input, shape index: {}]   ;;  %s11580_s4 = inlined_call_operand.vmem [shape: f32[1,12,14,62], index: 4, kind: output, shape index: {}]  }
   0x1   :  { %v17_v0 = vld [vmem:[%s11576_s2] sm:$0xff]  ;;  %v18_v1 = vld [vmem:[%s11576_s2 + $0x8] sm:$0xff]  ;;  %s6046_s21 = smov 62   ;;  %s6047_s2 = smov 61   ;;  %v5804_v15 = vld [vmem:[%s11577_s3 + $0x78] sm:$0x3f] }
   0x2   :  { %21 = vrot.lane.b32.xlu0 %v17_v0, %s6044_s17  ;;  %s6048_s22 = smov 126   ;;  %s6049_s23 = smov 60   ;;  %v5798_v13 = vld [vmem:[%s11577_s3 + $0x68] sm:$0x3f]  ;;  %v5797_v14 = vld [vmem:[%s11577_s3 + $0x60] sm:$0xff]  ;;  %v5803_v16 = vld [vmem:[%s11577_s3 + $0x70] sm:$0xff] }
   0x3   :  { %s6050_s24 = smov 125   ;;  %s6051_s25 = smov 59   ;;  %v5812_v17 = vld [vmem:[%s11577_s3 + $0x88] sm:$0x3f]  ;;  %v5811_v18 = vld [vmem:[%s11577_s3 + $0x80] sm:$0xff]  ;;  %v5819_v20 = vld [vmem:[%s11577_s3 + $0x90] sm:$0xff] }
   0x4   :  { %s6052_s26 = smov 124   ;;  %s6053_s27 = smov 58   ;;  %v5820_v19 = vld [vmem:[%s11577_s3 + $0x98] sm:$0x3f]  ;;  %v5828_v21 = vld [vmem:[%s11577_s3 + $0xa8] sm:$0x3f] }
   0x5   :  { %s6054_s28 = smov 123   ;;  %s6055_s29 = smov 57   ;;  %v5827_v22 = vld [vmem:[%s11577_s3 + $0xa0] sm:$0xff]  ;;  %v5836_v23 = vld [vmem:[%s11577_s3 + $0xb8] sm:$0x3f]  ;;  %v5835_v24 = vld [vmem:[%s11577_s3 + $0xb0] sm:$0xff] }
   0x6   :  { %23 = vrot.lane.b32.xlu0 %v18_v1, %s6044_s17  ;;  %s6056_s30 = smov 122   ;;  %s6057_s5 = smov 56   ;;  %v5503_v29 = vld [vmem:[%s11578_s0] ss:$0 sm:$0xff]  ;;  %v5545_v30 = vld [vmem:[%s11578_s0 + $0x7] ss:$0 sm:$0xff] }
   0x7   :  { %v5587_v32 = vld [vmem:[%s11578_s0 + $0xe] ss:$0 sm:$0xff]  ;;  %v5629_v33 = vld [vmem:[%s11578_s0 + $0x15] ss:$0 sm:$0xff]  ;;  %v5671_v34 = vld [vmem:[%s11578_s0 + $0x1c] ss:$0 sm:$0xff] }
   0x8   :  { %v5509_v38 = vld [vmem:[%s11578_s0 + $0x1] ss:$0 sm:$0xff]  ;;  %v5551_v39 = vld [vmem:[%s11578_s0 + $0x8] ss:$0 sm:$0xff]  ;;  %v5593_v40 = vld [vmem:[%s11578_s0 + $0xf] ss:$0 sm:$0xff] }
   0x9   :  { %vm602_vm4 = vcmask 1046528   ;;  %vm1275_vm5 = vcmask 1045504   ;;  %v5713_v42 = vld [vmem:[%s11578_s0 + $0x23] ss:$0 sm:$0xff]  ;;  %v5755_v43 = vld [vmem:[%s11578_s0 + $0x2a] ss:$0 sm:$0xff] }
   0xa   :  { %vm1950_vm6 = vcmask 1044480   ;;  %v5635_v47 = vld [vmem:[%s11578_s0 + $0x16] ss:$0 sm:$0xff]  ;;  %v5504_v48 = vld [vmem:[%s11578_s0 + $0x31] ss:$0 sm:$0xff]  ;;  %vm2791_vm7 = vcmask 1043456  }
   0xb   :  { %v5497_v49 = vld [vmem:[%s11579_s1] ss:$0 sm:$0xff]  ;;  %vm3632_vm8 = vcmask 1042432   ;;  %vm5320_vm9 = vcmask 504832   ;;  %s6058_s14 = smov 66  }
  0x74   :  { %v22_v2 = vpop.permute.xlu0 %21 }
  0x75   :  { %v28_v3 = vsel %vm27_vm0, 0.0, %v22_v2 }
  0x76   :  { %v31_v4 = vsel %vm30_vm1, %v28_v3, 0.0 }
  0x77   :  { %v36_v5 = vrot.slane %v31_v4, 6  ;;  %v5677_v4 = vld [vmem:[%s11578_s0 + $0x1d] ss:$0 sm:$0xff] }
  0x78   :  { %v24_v6 = vpop.permute.xlu0 %23 }
  0x79   :  { %v6091_v7 = vsel %vm35_vm2, 0.0, %v36_v5  ;;  %v29_v8 = vsel %vm27_vm0, 0.0, %v24_v6  ;;  %v5515_v6 = vld [vmem:[%s11578_s0 + $0x2] ss:$0 sm:$0xff] }
  0x7a   :  { %v32_v9 = vsel %vm30_vm1, %v29_v8, 0.0  ;;  %59 = vrot.lane.b32.xlu0 %v6091_v7, %s6045_s20  ;;  %46 = vrot.lane.b32.xlu1 %v6091_v7, %s6046_s21 }
  0x7b   :  { %v37_v10 = vrot.slane %v32_v9, 6 }
  0x7d   :  { %v6098_v11 = vsel %vm35_vm2, %v36_v5, %v37_v10  ;;  %v6135_v12 = vsel %vm35_vm2, %v37_v10, 0.0 }
  0x7e   :  { %68 = vrot.lane.b32.xlu0 %v6091_v7, %s6047_s2  ;;  %48 = vrot.lane.b32.xlu1 %v6098_v11, %s6046_s21  ;;  %11925 = vst [vmem:[#allocation2_spill] sm:$0xff] %v6135_v12 }
  0x82   :  { %80 = vrot.lane.b32.xlu0 %v6091_v7, %s6048_s22  ;;  %61 = vrot.lane.b32.xlu1 %v6098_v11, %s6045_s20 }
  0x86   :  { %89 = vrot.lane.b32.xlu0 %v6091_v7, %s6049_s23  ;;  %70 = vrot.lane.b32.xlu1 %v6098_v11, %s6047_s2 }
  0x8a   :  { %101 = vrot.lane.b32.xlu0 %v6091_v7, %s6050_s24  ;;  %82 = vrot.lane.b32.xlu1 %v6098_v11, %s6048_s22 }
  0x8e   :  { %110 = vrot.lane.b32.xlu0 %v6091_v7, %s6051_s25  ;;  %91 = vrot.lane.b32.xlu1 %v6098_v11, %s6049_s23 }
  0x92   :  { %122 = vrot.lane.b32.xlu0 %v6091_v7, %s6052_s26  ;;  %103 = vrot.lane.b32.xlu1 %v6098_v11, %s6050_s24 }
  0x96   :  { %131 = vrot.lane.b32.xlu0 %v6091_v7, %s6053_s27  ;;  %112 = vrot.lane.b32.xlu1 %v6098_v11, %s6051_s25 }
  0x9a   :  { %143 = vrot.lane.b32.xlu0 %v6091_v7, %s6054_s28  ;;  %124 = vrot.lane.b32.xlu1 %v6098_v11, %s6052_s26 }
  0x9e   :  { %152 = vrot.lane.b32.xlu0 %v6091_v7, %s6055_s29  ;;  %133 = vrot.lane.b32.xlu1 %v6098_v11, %s6053_s27 }
  0xa2   :  { %164 = vrot.lane.b32.xlu0 %v6091_v7, %s6056_s30  ;;  %145 = vrot.lane.b32.xlu1 %v6098_v11, %s6054_s28 }
  0xa6   :  { %173 = vrot.lane.b32.xlu0 %v6091_v7, %s6057_s5  ;;  %154 = vrot.lane.b32.xlu1 %v6098_v11, %s6055_s29 }
  0xaa   :  { %50 = vrot.lane.b32.xlu0 %v6135_v12, %s6046_s21  ;;  %166 = vrot.lane.b32.xlu1 %v6098_v11, %s6056_s30 }
  0xae   :  { %72 = vrot.lane.b32.xlu0 %v6135_v12, %s6047_s2  ;;  %175 = vrot.lane.b32.xlu1 %v6098_v11, %s6057_s5 }
  0xb2   :  { %93 = vrot.lane.b32.xlu0 %v6135_v12, %s6049_s23  ;;  %63 = vrot.lane.b32.xlu1 %v6135_v12, %s6045_s20 }
  0xb6   :  { %114 = vrot.lane.b32.xlu0 %v6135_v12, %s6051_s25  ;;  %84 = vrot.lane.b32.xlu1 %v6135_v12, %s6048_s22 }
  0xba   :  { %135 = vrot.lane.b32.xlu0 %v6135_v12, %s6053_s27  ;;  %105 = vrot.lane.b32.xlu1 %v6135_v12, %s6050_s24 }
  0xbe   :  { %156 = vrot.lane.b32.xlu0 %v6135_v12, %s6055_s29  ;;  %126 = vrot.lane.b32.xlu1 %v6135_v12, %s6052_s26 }
  0xc2   :  { %177 = vrot.lane.b32.xlu0 %v6135_v12, %s6057_s5  ;;  %147 = vrot.lane.b32.xlu1 %v6135_v12, %s6054_s28 }
  0xc6   :  { %168 = vrot.lane.b32.xlu1 %v6135_v12, %s6056_s30  ;;  %5311 = vrot.lane.b32.xlu0 %v5798_v13, %s6046_s21 }
  0xca   :  { %5309 = vrot.lane.b32.xlu1 %v5797_v14, %s6046_s21  ;;  %5343 = vrot.lane.b32.xlu0 %v5804_v15, %s6046_s21 }
  0xce   :  { %5341 = vrot.lane.b32.xlu1 %v5803_v16, %s6046_s21  ;;  %5375 = vrot.lane.b32.xlu0 %v5812_v17, %s6046_s21  ;;  %v5719_v17 = vld [vmem:[%s11578_s0 + $0x24] ss:$0 sm:$0xff] }
  0xd2   :  { %5373 = vrot.lane.b32.xlu1 %v5811_v18, %s6046_s21  ;;  %5407 = vrot.lane.b32.xlu0 %v5820_v19, %s6046_s21 }
  0xd6   :  { %5405 = vrot.lane.b32.xlu1 %v5819_v20, %s6046_s21  ;;  %5439 = vrot.lane.b32.xlu0 %v5828_v21, %s6046_s21  ;;  %v5557_v20 = vld [vmem:[%s11578_s0 + $0x9] ss:$0 sm:$0xff] }
  0xda   :  { %5437 = vrot.lane.b32.xlu1 %v5827_v22, %s6046_s21  ;;  %5471 = vrot.lane.b32.xlu0 %v5836_v23, %s6046_s21 }
  0xde   :  { %5469 = vrot.lane.b32.xlu1 %v5835_v24, %s6046_s21 }
  0xec   :  { %v47_v25 = vpop.permute.xlu1 %46  ;;  %v60_v26 = vpop.permute.xlu0 %59 }
  0xed   :  { %v6215_v31 = vsel %vm55_vm3, %v6091_v7, %v47_v25  ;;  %v5599_v25 = vld [vmem:[%s11578_s0 + $0x10] ss:$0 sm:$0xff] }
  0xee   :  { %v220_v44 = vmul.f32 %v5503_v29, %v6215_v31  ;;  %v598_v45 = vmul.f32 %v5545_v30, %v6215_v31  ;;  %v1271_v46 = vmul.f32 %v5587_v32, %v6215_v31  ;;  %v1944_v52 = vmul.f32 %v5629_v33, %v6215_v31 }
  0xef   :  { %v2785_v53 = vmul.f32 %v5671_v34, %v6215_v31  ;;  %v6273_v58 = vmul.f32 %v5713_v42, %v6215_v31  ;;  %v6276_v59 = vmul.f32 %v5755_v43, %v6215_v31  ;;  %v6288_v63 = vmul.f32 %v5504_v48, %v6215_v31 }
  0xf0   :  { %v49_v27 = vpop.permute.xlu1 %48  ;;  %v69_v28 = vpop.permute.xlu0 %68  ;;  %v222_v0 = vadd.f32 %v5497_v49, %v220_v44  ;;  %v603_v1 = vrot.slane %v598_v45, 1  ;;  %v1276_v2 = vrot.slane %v1271_v46, 2  ;;  %v1951_v9 = vrot.slane %v1944_v52, 3 }
  0xf1   :  { %v6228_v35 = vsel %vm55_vm3, %v6098_v11, %v49_v27  ;;  %v6240_v41 = vsel %vm55_vm3, %v60_v26, %v69_v28  ;;  %v2792_v15 = vrot.slane %v2785_v53, 4  ;;  %v3633_v16 = vrot.slane %v6273_v58, 5  ;;  %v5641_v26 = vld [vmem:[%s11578_s0 + $0x17] ss:$0 sm:$0xff]  ;;  %v5683_v53 = vld [vmem:[%s11578_s0 + $0x1e] ss:$0 sm:$0xff] }
  0xf2   :  { %v6261_v50 = vmul.f32 %v5545_v30, %v6228_v35  ;;  %v6264_v51 = vmul.f32 %v5587_v32, %v6228_v35  ;;  %v274_v56 = vmul.f32 %v5509_v38, %v6240_v41  ;;  %v6270_v57 = vmul.f32 %v5629_v33, %v6228_v35 }
  0xf3   :  { %v6279_v60 = vmul.f32 %v5551_v39, %v6240_v41  ;;  %v6282_v61 = vmul.f32 %v5593_v40, %v6240_v41  ;;  %v6285_v62 = vmul.f32 %v5635_v47, %v6240_v41  ;;  %v6291_v3 = vmul.f32 %v5671_v34, %v6228_v35 }
  0xf4   :  { %v62_v36 = vpop.permute.xlu1 %61  ;;  %v81_v37 = vpop.permute.xlu0 %80  ;;  %11926 = vst [vmem:[#allocation3_spill] sm:$0xff] %v6261_v50  ;;  %11927 = vst [vmem:[#allocation4_spill] sm:$0xff] %v6264_v51  ;;  %v11588_v7 = vrot.slane %v6261_v50, 1  ;;  %v11582_v8 = vrot.slane %v6264_v51, 2  ;;  %v276_v13 = vadd.f32 %v274_v56, %v222_v0  ;;  %v11584_v14 = vrot.slane %v6270_v57, 3 }
  0xf5   :  { %11928 = vst [vmem:[#allocation5_spill] sm:$0xff] %v6270_v57  ;;  %11929 = vst [vmem:[#allocation6_spill] sm:$0xff] %v6291_v3  ;;  %v699_v19 = vrot.slane %v6279_v60, 1  ;;  %v1372_v21 = vrot.slane %v6282_v61, 2  ;;  %v2071_v22 = vrot.slane %v6285_v62, 3  ;;  %v11583_v27 = vrot.slane %v6291_v3, 4 }
  0xf6   :  { %v2906_v28 = vmul.f32 %v5677_v4, %v6240_v41  ;;  %v6335_v29 = vsel %vm602_vm4, %v603_v1, %v11588_v7  ;;  %v6340_v30 = vsel %vm1275_vm5, %v1276_v2, %v11582_v8  ;;  %v6343_v32 = vmul.f32 %v5713_v42, %v6228_v35  ;;  %v5761_v42 = vld [vmem:[%s11578_s0 + $0x2b] ss:$0 sm:$0xff]  ;;  %v5521_v1 = vld [vmem:[%s11578_s0 + $0x3] ss:$0 sm:$0xff] }
  0xf7   :  { %v6346_v33 = vmul.f32 %v5719_v17, %v6240_v41  ;;  %v6352_v38 = vsel %vm1950_vm6, %v1951_v9, %v11584_v14  ;;  %v6380_v49 = vsel %vm2791_vm7, %v2792_v15, %v11583_v27  ;;  %v4473_v56 = vrot.slane %v6276_v59, 6 }
  0xf8   :  { %v71_v54 = vpop.permute.xlu1 %70  ;;  %v90_v55 = vpop.permute.xlu0 %89  ;;  %11932 = vst [vmem:[#allocation9_spill] sm:$0xff] %v6343_v32  ;;  %v2912_v52 = vrot.slane %v2906_v28, 4  ;;  %v6389_v58 = vmul.f32 %v5761_v42, %v6240_v41 }
  0xf9   :  { %v6297_v5 = vsel %vm55_vm3, %v62_v36, %v71_v54  ;;  %v6310_v18 = vsel %vm55_vm3, %v81_v37, %v90_v55  ;;  %v11585_v54 = vrot.slane %v6343_v32, 5  ;;  %v5527_v55 = vld [vmem:[%s11578_s0 + $0x4] ss:$0 sm:$0xff] }
  0xfa   :  { %v6319_v23 = vmul.f32 %v5551_v39, %v6297_v5  ;;  %v6322_v24 = vmul.f32 %v5593_v40, %v6297_v5  ;;  %v328_v37 = vmul.f32 %v5515_v6, %v6310_v18  ;;  %v6355_v39 = vmul.f32 %v5635_v47, %v6297_v5 }
  0xfb   :  { %v6358_v40 = vmul.f32 %v5755_v43, %v6228_v35  ;;  %v6364_v44 = vmul.f32 %v5557_v20, %v6310_v18  ;;  %v6367_v45 = vmul.f32 %v5599_v25, %v6310_v18  ;;  %v6370_v46 = vmul.f32 %v5641_v26, %v6310_v18 }
  0xfc   :  { %v83_v10 = vpop.permute.xlu1 %82  ;;  %v102_v11 = vpop.permute.xlu0 %101  ;;  %11930 = vst [vmem:[#allocation7_spill] sm:$0xff] %v6319_v23  ;;  %11931 = vst [vmem:[#allocation8_spill] sm:$0xff] %v6322_v24  ;;  %v6373_v48 = vmul.f32 %v5677_v4, %v6297_v5  ;;  %v11587_v47 = vrot.slane %v6319_v23, 1  ;;  %v11581_v43 = vrot.slane %v6322_v24, 2  ;;  %v330_v0 = vadd.f32 %v328_v37, %v276_v13  ;;  %v5725_v13 = vld [vmem:[%s11578_s0 + $0x25] ss:$0 sm:$0xff] }
  0xfd   :  { %11933 = vst [vmem:[#allocation10_spill] sm:$0xff] %v6355_v39  ;;  %11934 = vst [vmem:[#allocation11_spill] sm:$0xff] %v6358_v40  ;;  %v11586_v2 = vrot.slane %v6355_v39, 3  ;;  %v11591_v4 = vrot.slane %v6358_v40, 6  ;;  %v795_v6 = vrot.slane %v6364_v44, 1  ;;  %v1468_v59 = vrot.slane %v6367_v45, 2 }
  0xfe   :  { %11935 = vst [vmem:[#allocation12_spill] sm:$0xff] %v6373_v48  ;;  %v2191_v9 = vrot.slane %v6370_v46, 3  ;;  %v6412_v28 = vsel %vm602_vm4, %v699_v19, %v11587_v47  ;;  %v6420_v37 = vsel %vm1275_vm5, %v1372_v21, %v11581_v43  ;;  %v5605_v44 = vld [vmem:[%s11578_s0 + $0x11] ss:$0 sm:$0xff]  ;;  %v3026_v19 = vmul.f32 %v5683_v53, %v6310_v18 }
  0xff   :  { %v6438_v21 = vsel %vm3632_vm8, %v3633_v16, %v11585_v54  ;;  %v6441_v46 = vmul.f32 %v5719_v17, %v6297_v5  ;;  %v6446_v27 = vsel %vm1950_vm6, %v2071_v22, %v11586_v2  ;;  %v6455_v14 = vmul.f32 %v5725_v13, %v6310_v18 }
 0x100   :  { %v92_v34 = vpop.permute.xlu1 %91  ;;  %v111_v36 = vpop.permute.xlu0 %110  ;;  %11938 = vst [vmem:[#allocation15_spill] sm:$0xff] %v6438_v21  ;;  %v6475_v2 = vsel %vm35_vm2, %v4473_v56, %v11591_v4  ;;  %v11949_v56 = vrot.slane %v6346_v33, 5 }
 0x101   :  { %v6392_v60 = vsel %vm55_vm3, %v83_v10, %v92_v34  ;;  %v11589_v10 = vrot.slane %v6373_v48, 4  ;;  %v6407_v15 = vsel %vm55_vm3, %v102_v11, %v111_v36  ;;  %v5563_v34 = vld [vmem:[%s11578_s0 + $0xa] ss:$0 sm:$0xff]  ;;  %v5647_v11 = vld [vmem:[%s11578_s0 + $0x18] ss:$0 sm:$0xff]  ;;  %11939 = vst [vmem:[#allocation16_spill] sm:$0xff] %v6441_v46 }
 0x102   :  { %v6430_v36 = vmul.f32 %v5557_v20, %v6392_v60  ;;  %v6433_v45 = vmul.f32 %v5599_v25, %v6392_v60  ;;  %v6449_v20 = vmul.f32 %v5641_v26, %v6392_v60  ;;  %v6452_v25 = vmul.f32 %v5683_v53, %v6392_v60  ;;  %11942 = vst [vmem:[#allocation19_spill] sm:$0xff] %v6475_v2 }
 0x103   :  { %v382_v16 = vmul.f32 %v5521_v1, %v6407_v15  ;;  %v6459_v17 = vmul.f32 %v5563_v34, %v6407_v15  ;;  %v6462_v54 = vmul.f32 %v5605_v44, %v6407_v15  ;;  %v6465_v22 = vmul.f32 %v5647_v11, %v6407_v15 }
 0x104   :  { %v104_v61 = vpop.permute.xlu1 %103  ;;  %v123_v62 = vpop.permute.xlu0 %122  ;;  %11936 = vst [vmem:[#allocation13_spill] sm:$0xff] %v6430_v36  ;;  %11937 = vst [vmem:[#allocation14_spill] sm:$0xff] %v6433_v45  ;;  %v6470_v26 = vsel %vm2791_vm7, %v2912_v52, %v11589_v10  ;;  %v3032_v53 = vrot.slane %v3026_v19, 4  ;;  %v6478_v1 = vmul.f32 %v5761_v42, %v6297_v5  ;;  %v5689_v52 = vld [vmem:[%s11578_s0 + $0x1f] ss:$0 sm:$0xff]  ;;  %v11948_v4 = vrot.slane %v6441_v46, 5 }
 0x105   :  { %11940 = vst [vmem:[#allocation17_spill] sm:$0xff] %v6449_v20  ;;  %11941 = vst [vmem:[#allocation18_spill] sm:$0xff] %v6452_v25  ;;  %v891_v7 = vrot.slane %v6459_v17, 1  ;;  %v1564_v32 = vrot.slane %v6462_v54, 2  ;;  %v2311_v19 = vrot.slane %v6465_v22, 3  ;;  %v3146_v54 = vmul.f32 %v5689_v52, %v6407_v15 }
 0x106   :  { %11943 = vst [vmem:[#allocation20_spill] sm:$0xff] %v6478_v1  ;;  %v5611_v17 = vld [vmem:[%s11578_s0 + $0x12] ss:$0 sm:$0xff]  ;;  %v11947_v22 = vrot.slane %v6433_v45, 2  ;;  %v6536_v51 = vsel %vm3632_vm8, %v11949_v56, %v11948_v4  ;;  %v6539_v48 = vmul.f32 %v5725_v13, %v6392_v60  ;;  %v11952_v45 = vrot.slane %v6449_v20, 3 }
 0x107   :  { %11950 = vst [vmem:[#allocation23_spill] sm:$0xff] %v6536_v51  ;;  %v11954_v46 = vrot.slane %v6452_v25, 4  ;;  %v5767_v13 = vld [vmem:[%s11578_s0 + $0x2c] ss:$0 sm:$0xff]  ;;  %v3152_v25 = vrot.slane %v3146_v54, 4 }
 0x108   :  { %v113_v43 = vpop.permute.xlu1 %112  ;;  %v132_v8 = vpop.permute.xlu0 %131  ;;  %11951 = vst [vmem:[#allocation24_spill] sm:$0xff] %v6539_v48  ;;  %v6584_v57 = vmul.f32 %v5767_v13, %v6310_v18  ;;  %v6595_v20 = vmul.f32 %v5767_v13, %v6392_v60 }
 0x109   :  { %v6481_v47 = vsel %vm55_vm3, %v104_v61, %v113_v43  ;;  %v384_v61 = vadd.f32 %v382_v16, %v330_v0  ;;  %v6500_v24 = vsel %vm55_vm3, %v123_v62, %v132_v8  ;;  %v5569_v0 = vld [vmem:[%s11578_s0 + $0xb] ss:$0 sm:$0xff]  ;;  %v5731_v8 = vld [vmem:[%s11578_s0 + $0x26] ss:$0 sm:$0xff]  ;;  %v11946_v62 = vrot.slane %v6430_v36, 1 }
 0x10a   :  { %v6503_v42 = vmul.f32 %v5563_v34, %v6481_v47  ;;  %v6509_v16 = vmul.f32 %v5605_v44, %v6481_v47  ;;  %v6526_v44 = vsel %vm1275_vm5, %v1468_v59, %v11947_v22  ;;  %v5653_v43 = vld [vmem:[%s11578_s0 + $0x19] ss:$0 sm:$0xff]  ;;  %v6544_v59 = vsel %vm1950_vm6, %v2191_v9, %v11952_v45  ;;  %11957 = vst [vmem:[#allocation28_spill] sm:$0xff] %v6595_v20 }
 0x10b   :  { %v6521_v34 = vsel %vm602_vm4, %v795_v6, %v11946_v62  ;;  %v6547_v22 = vmul.f32 %v5647_v11, %v6481_v47  ;;  %v6552_v33 = vsel %vm2791_vm7, %v3032_v53, %v11954_v46  ;;  %v6555_v4 = vmul.f32 %v5689_v52, %v6481_v47 }
 0x10c   :  { %v125_v10 = vpop.permute.xlu1 %124  ;;  %v144_v40 = vpop.permute.xlu0 %143  ;;  %11944 = vst [vmem:[#allocation21_spill] sm:$0xff] %v6503_v42  ;;  %11945 = vst [vmem:[#allocation22_spill] sm:$0xff] %v6509_v16  ;;  %v436_v56 = vmul.f32 %v5527_v55, %v6500_v24  ;;  %v6562_v9 = vmul.f32 %v5569_v0, %v6500_v24  ;;  %v6565_v11 = vmul.f32 %v5611_v17, %v6500_v24  ;;  %v5533_v55 = vld [vmem:[%s11578_s0 + $0x5] ss:$0 sm:$0xff]  ;;  %v11958_v54 = vrot.slane %v6503_v42, 1 }
 0x10d   :  { %11953 = vst [vmem:[#allocation25_spill] sm:$0xff] %v6547_v22  ;;  %11955 = vst [vmem:[#allocation26_spill] sm:$0xff] %v6552_v33  ;;  %v6568_v45 = vmul.f32 %v5731_v8, %v6407_v15  ;;  %v6573_v52 = vmul.f32 %v5653_v43, %v6500_v24  ;;  %v11959_v13 = vrot.slane %v6509_v16, 2  ;;  %v11965_v42 = vrot.slane %v6547_v22, 3 }
 0x10e   :  { %11956 = vst [vmem:[#allocation27_spill] sm:$0xff] %v6555_v4  ;;  %v438_v39 = vadd.f32 %v436_v56, %v384_v61  ;;  %v987_v23 = vrot.slane %v6562_v9, 1  ;;  %v1660_v50 = vrot.slane %v6565_v11, 2  ;;  %v6607_v12 = vsel %vm602_vm4, %v891_v7, %v11958_v54  ;;  %v5575_v61 = vld [vmem:[%s11578_s0 + $0xc] ss:$0 sm:$0xff] }
 0x10f   :  { %v6615_v56 = vsel %vm1275_vm5, %v1564_v32, %v11959_v13  ;;  %v2431_v9 = vrot.slane %v6573_v52, 3  ;;  %v5539_v11 = vld [vmem:[%s11578_s0 + $0x6] ss:$0 sm:$0xff]  ;;  %v5659_v32 = vld [vmem:[%s11578_s0 + $0x1a] ss:$0 sm:$0xff]  ;;  %v11962_v54 = vrot.slane %v6539_v48, 5  ;;  %v6644_v2 = vsel %vm1950_vm6, %v2311_v19, %v11965_v42 }
 0x110   :  { %v134_v6 = vpop.permute.xlu1 %133  ;;  %v153_v62 = vpop.permute.xlu0 %152  ;;  %v11963_v13 = vrot.slane %v6455_v14, 5  ;;  %v11966_v51 = vrot.slane %v6555_v4, 4  ;;  %v6652_v33 = vmul.f32 %v5731_v8, %v6481_v47  ;;  %v11971_v22 = vrot.slane %v6389_v58, 6 }
 0x111   :  { %v6576_v3 = vsel %vm55_vm3, %v144_v40, %v153_v62  ;;  %v6587_v53 = vsel %vm55_vm3, %v125_v10, %v134_v6  ;;  %v5695_v62 = vld [vmem:[%s11578_s0 + $0x20] ss:$0 sm:$0xff]  ;;  %v3993_v10 = vrot.slane %v6568_v45, 5  ;;  %v5737_v6 = vld [vmem:[%s11578_s0 + $0x27] ss:$0 sm:$0xff] }
 0x112   :  { %v490_v40 = vmul.f32 %v5533_v55, %v6576_v3  ;;  %v6622_v45 = vmul.f32 %v5569_v0, %v6587_v53  ;;  %v6625_v7 = vmul.f32 %v5611_v17, %v6587_v53  ;;  %v5617_v55 = vld [vmem:[%s11578_s0 + $0x13] ss:$0 sm:$0xff]  ;;  %v3266_v52 = vmul.f32 %v5695_v62, %v6500_v24  ;;  %11967 = vst [vmem:[#allocation32_spill] sm:$0xff] %v6652_v33 }
 0x113   :  { %v6639_v0 = vsel %vm3632_vm8, %v11963_v13, %v11962_v54  ;;  %v6649_v21 = vsel %vm2791_vm7, %v3152_v25, %v11966_v51  ;;  %v6655_v14 = vmul.f32 %v5737_v6, %v6500_v24  ;;  %v6661_v13 = vmul.f32 %v5575_v61, %v6576_v3 }
 0x114   :  { %v146_v46 = vpop.permute.xlu1 %145  ;;  %v165_v36 = vpop.permute.xlu0 %164  ;;  %11960 = vst [vmem:[#allocation29_spill] sm:$0xff] %v6622_v45  ;;  %11961 = vst [vmem:[#allocation30_spill] sm:$0xff] %v6625_v7  ;;  %v6664_v19 = vmul.f32 %v5653_v43, %v6587_v53  ;;  %v6667_v42 = vmul.f32 %v5695_v62, %v6587_v53  ;;  %v492_v51 = vadd.f32 %v490_v40, %v438_v39  ;;  %v3272_v4 = vrot.slane %v3266_v52, 4 }
 0x115   :  { %11964 = vst [vmem:[#allocation31_spill] sm:$0xff] %v6639_v0  ;;  %v6671_v8 = vmul.f32 %v5617_v55, %v6576_v3  ;;  %v6674_v48 = vmul.f32 %v5659_v32, %v6576_v3  ;;  %v11970_v43 = vrot.slane %v6478_v1, 6  ;;  %v5701_v0 = vld [vmem:[%s11578_s0 + $0x21] ss:$0 sm:$0xff]  ;;  %v4713_v52 = vrot.slane %v6584_v57, 6 }
 0x116   :  { %11968 = vst [vmem:[#allocation33_spill] sm:$0xff] %v6664_v19  ;;  %11969 = vst [vmem:[#allocation34_spill] sm:$0xff] %v6667_v42  ;;  %v11974_v58 = vrot.slane %v6625_v7, 2 }
 0x117   :  { %v6683_v62 = vsel %vm35_vm2, %v11971_v22, %v11970_v43  ;;  %v5665_v43 = vld [vmem:[%s11578_s0 + $0x1b] ss:$0 sm:$0xff] }
 0x118   :  { %v155_v16 = vpop.permute.xlu1 %154  ;;  %v174_v17 = vpop.permute.xlu0 %173  ;;  %v6710_v22 = vsel %vm1275_vm5, %v1660_v50, %v11974_v58  ;;  %v5623_v50 = vld [vmem:[%s11578_s0 + $0x14] ss:$0 sm:$0xff] }
 0x119   :  { %v6658_v54 = vsel %vm55_vm3, %v165_v36, %v174_v17  ;;  %v6686_v39 = vsel %vm55_vm3, %v146_v46, %v155_v16  ;;  %v1083_v46 = vrot.slane %v6661_v13, 1  ;;  %v11972_v36 = vrot.slane %v6622_v45, 1  ;;  %v5743_v13 = vld [vmem:[%s11578_s0 + $0x28] ss:$0 sm:$0xff] }
 0x11a   :  { %v544_v25 = vmul.f32 %v5539_v11, %v6658_v54  ;;  %v6705_v17 = vmul.f32 %v5575_v61, %v6686_v39  ;;  %v6721_v61 = vmul.f32 %v5617_v55, %v6686_v39 }
 0x11b   :  { %v989_v57 = vsel %vm602_vm4, %v987_v23, %v11972_v36  ;;  %v5581_v23 = vld [vmem:[%s11578_s0 + $0xd] ss:$0 sm:$0xff]  ;;  %v6727_v36 = vmul.f32 %v5659_v32, %v6686_v39  ;;  %v11979_v32 = vrot.slane %v6667_v42, 4 }
 0x11c   :  { %v167_v40 = vpop.permute.xlu1 %166  ;;  %v546_v11 = vadd.f32 %v544_v25, %v492_v51  ;;  %v1756_v51 = vrot.slane %v6671_v8, 2  ;;  %v2551_v25 = vrot.slane %v6674_v48, 3  ;;  %11973 = vst [vmem:[#allocation35_spill] sm:$0xff] %v6705_v17  ;;  %11975 = vst [vmem:[#allocation36_spill] sm:$0xff] %v6721_v61 }
 0x11d   :  { %11976 = vst [vmem:[#allocation37_spill] sm:$0xff] %v6727_v36  ;;  %v6748_v1 = vsel %vm2791_vm7, %v3272_v4, %v11979_v32  ;;  %v1175_v32 = vmul.f32 %v5581_v23, %v6658_v54 }
 0x11e   :  { %v608_v16 = vadd.f32 %v6335_v29, %v546_v11  ;;  %v3386_v29 = vmul.f32 %v5701_v0, %v6576_v3  ;;  %v11977_v11 = vrot.slane %v6652_v33, 5  ;;  %v6773_v33 = vmul.f32 %v5665_v43, %v6658_v54 }
 0x120   :  { %v176_v8 = vpop.permute.xlu1 %175  ;;  %v704_v48 = vadd.f32 %v6412_v28, %v608_v16  ;;  %v6732_v58 = vsel %vm3632_vm8, %v3993_v10, %v11977_v11  ;;  %v11978_v16 = vrot.slane %v6664_v19, 3  ;;  %v6751_v10 = vmul.f32 %v5737_v6, %v6587_v53 }
 0x121   :  { %v6735_v28 = vsel %vm55_vm3, %v167_v40, %v176_v8  ;;  %v4227_v11 = vmul.f32 %v5743_v13, %v6576_v3  ;;  %v6767_v6 = vmul.f32 %v5623_v50, %v6658_v54  ;;  %v11983_v19 = vrot.slane %v6595_v20, 6 }
 0x122   :  { %v6740_v55 = vsel %vm1950_vm6, %v2431_v9, %v11978_v16  ;;  %11980 = vst [vmem:[#allocation38_spill] sm:$0xff] %v6751_v10  ;;  %v800_v40 = vadd.f32 %v6521_v34, %v704_v48  ;;  %v6755_v8 = vmul.f32 %v5581_v23, %v6735_v28  ;;  %v6758_v9 = vmul.f32 %v5701_v0, %v6686_v39  ;;  %v5773_v16 = vld [vmem:[%s11578_s0 + $0x2d] ss:$0 sm:$0xff]  ;;  %v5707_v0 = vld [vmem:[%s11578_s0 + $0x22] ss:$0 sm:$0xff] }
 0x123   :  { %v3392_v34 = vrot.slane %v3386_v29, 4  ;;  %v6779_v4 = vsel %vm35_vm2, %v4713_v52, %v11983_v19  ;;  %v4827_v23 = vmul.f32 %v5773_v16, %v6407_v15  ;;  %v6783_v29 = vmul.f32 %v5773_v16, %v6481_v47 }
 0x124   :  { %11981 = vst [vmem:[#allocation39_spill] sm:$0xff] %v6755_v8  ;;  %11982 = vst [vmem:[#allocation40_spill] sm:$0xff] %v6758_v9  ;;  %v896_v48 = vadd.f32 %v6607_v12, %v800_v40  ;;  %v4233_v42 = vrot.slane %v4227_v11, 5  ;;  %v11985_v20 = vrot.slane %v6705_v17, 1  ;;  %v1179_v52 = vrot.slane %v1175_v32, 1 }
 0x125   :  { %11984 = vst [vmem:[#allocation41_spill] sm:$0xff] %v6783_v29  ;;  %v1852_v45 = vrot.slane %v6767_v6, 2  ;;  %v6795_v16 = vmul.f32 %v5743_v13, %v6686_v39  ;;  %v11987_v40 = vrot.slane %v6721_v61, 2  ;;  %v11988_v11 = vrot.slane %v6727_v36, 3  ;;  %v5749_v13 = vld [vmem:[%s11578_s0 + $0x29] ss:$0 sm:$0xff] }
 0x126   :  { %v992_v12 = vadd.f32 %v989_v57, %v896_v48  ;;  %v1085_v19 = vsel %vm602_vm4, %v1083_v46, %v11985_v20  ;;  %v5498_v57 = vld [vmem:[%s11579_s1 + $0x1] ss:$0 sm:$0xff]  ;;  %v2671_v46 = vrot.slane %v6773_v33, 3  ;;  %v5510_v32 = vld [vmem:[%s11578_s0 + $0x32] ss:$0 sm:$0xff]  ;;  %v11989_v6 = vrot.slane %v6755_v8, 1 }
 0x127   :  { %11986 = vst [vmem:[#allocation42_spill] sm:$0xff] %v6795_v16  ;;  %v6803_v7 = vsel %vm1275_vm5, %v1756_v51, %v11987_v40  ;;  %v6808_v20 = vsel %vm1950_vm6, %v2551_v25, %v11988_v11  ;;  %v6824_v25 = vmul.f32 %v5665_v43, %v6735_v28  ;;  %v3506_v33 = vmul.f32 %v5707_v0, %v6658_v54  ;;  %v5516_v40 = vld [vmem:[%s11578_s0 + $0x33] ss:$0 sm:$0xff]  ;;  %v5522_v8 = vld [vmem:[%s11578_s0 + $0x34] ss:$0 sm:$0xff] }
 0x128   :  { %v1088_v48 = vadd.f32 %v1085_v19, %v992_v12  ;;  %v1181_v51 = vsel %vm602_vm4, %v1179_v52, %v11989_v6  ;;  %v6821_v12 = vmul.f32 %v5623_v50, %v6735_v28  ;;  %v11992_v11 = vrot.slane %v6758_v9, 4 }
 0x129   :  { %11991 = vst [vmem:[#allocation44_spill] sm:$0xff] %v6824_v25  ;;  %v6836_v52 = vmul.f32 %v5707_v0, %v6735_v28  ;;  %v11994_v50 = vrot.slane %v6751_v10, 5  ;;  %v11995_v43 = vrot.slane %v6655_v14, 5  ;;  %v283_v0 = vmul.f32 %v5510_v32, %v6240_v41 }
 0x12a   :  { %11990 = vst [vmem:[#allocation43_spill] sm:$0xff] %v6821_v12  ;;  %v1184_v19 = vadd.f32 %v1181_v51, %v1088_v48  ;;  %v6833_v61 = vsel %vm2791_vm7, %v3392_v34, %v11992_v11  ;;  %v4347_v51 = vmul.f32 %v5749_v13, %v6658_v54  ;;  %v231_v34 = vadd.f32 %v5498_v57, %v6288_v63 }
 0x12b   :  { %11993 = vst [vmem:[#allocation45_spill] sm:$0xff] %v6836_v52  ;;  %v6843_v6 = vsel %vm3632_vm8, %v11995_v43, %v11994_v50  ;;  %v6854_v10 = vmul.f32 %v5749_v13, %v6735_v28  ;;  %v337_v50 = vmul.f32 %v5516_v40, %v6310_v18  ;;  %v5528_v43 = vld [vmem:[%s11578_s0 + $0x35] ss:$0 sm:$0xff]  ;;  %v391_v57 = vmul.f32 %v5522_v8, %v6407_v15  ;;  %v5534_v40 = vld [vmem:[%s11578_s0 + $0x36] ss:$0 sm:$0xff] }
 0x12c   :  { %v1281_v11 = vadd.f32 %v6340_v30, %v1184_v19  ;;  %v285_v63 = vadd.f32 %v283_v0, %v231_v34  ;;  %v3512_v32 = vrot.slane %v3506_v33, 4  ;;  %v11624_v13 = vrot.slane %v6836_v52, 4 }
 0x12d   :  { %11996 = vst [vmem:[#allocation46_spill] sm:$0xff] %v6854_v10  ;;  %v4833_v19 = vrot.slane %v4827_v23, 6  ;;  %v11997_v14 = vrot.slane %v6795_v16, 5  ;;  %v4353_v48 = vrot.slane %v4347_v51, 5  ;;  %v445_v34 = vmul.f32 %v5528_v43, %v6500_v24 }
 0x12e   :  { %v1377_v30 = vadd.f32 %v6420_v37, %v1281_v11  ;;  %v339_v9 = vadd.f32 %v337_v50, %v285_v63  ;;  %v5546_v37 = vld [vmem:[%s11578_s0 + $0x38] ss:$0 sm:$0xff]  ;;  %v11998_v33 = vrot.slane %v6783_v29, 6  ;;  %v5552_v11 = vld [vmem:[%s11578_s0 + $0x39] ss:$0 sm:$0xff]  ;;  %v12001_v50 = vrot.slane %v6824_v25, 3 }
 0x12f   :  { %v6872_v17 = vsel %vm3632_vm8, %v4233_v42, %v11997_v14  ;;  %v5540_v42 = vld [vmem:[%s11578_s0 + $0x37] ss:$0 sm:$0xff]  ;;  %v6889_v51 = vmul.f32 %v5546_v37, %v6228_v35  ;;  %v5779_v63 = vld [vmem:[%s11578_s0 + $0x2e] ss:$0 sm:$0xff] }
 0x130   :  { %v1473_v8 = vadd.f32 %v6526_v44, %v1377_v30  ;;  %v6883_v0 = vsel %vm35_vm2, %v4833_v19, %v11998_v33  ;;  %v12000_v44 = vrot.slane %v6821_v12, 2  ;;  %v6900_v43 = vsel %vm1950_vm6, %v2671_v46, %v12001_v50  ;;  %v6906_v33 = vpop.permute.xlu1 %63  ;;  %v5785_v46 = vld [vmem:[%s11578_s0 + $0x2f] ss:$0 sm:$0xff] }
 0x131   :  { %11999 = vst [vmem:[#allocation47_spill] sm:$0xff] %v6889_v51  ;;  %v393_v30 = vadd.f32 %v391_v57, %v339_v9  ;;  %v499_v19 = vmul.f32 %v5534_v40, %v6576_v3  ;;  %v6919_v50 = vmul.f32 %v5552_v11, %v6297_v5  ;;  %v5558_v9 = vld [vmem:[%s11578_s0 + $0x3a] ss:$0 sm:$0xff]  ;;  %v711_v40 = vmul.f32 %v5552_v11, %v6240_v41 }
 0x132   :  { %v1854_v14 = vsel %vm1275_vm5, %v1852_v45, %v12000_v44  ;;  %v1569_v23 = vadd.f32 %v6615_v56, %v1473_v8  ;;  %v6912_v45 = vsel %vm2791_vm7, %v3512_v32, %v11624_v13  ;;  %v615_v44 = vmul.f32 %v5546_v37, %v6215_v31 }
 0x133   :  { %12002 = vst [vmem:[#allocation48_spill] sm:$0xff] %v6919_v50  ;;  %v447_v57 = vadd.f32 %v445_v34, %v393_v30  ;;  %v553_v56 = vmul.f32 %v5540_v42, %v6658_v54  ;;  %v6927_v32 = vmul.f32 %v5558_v9, %v6392_v60  ;;  %v12004_v13 = vrot.slane %v6854_v10, 5 }
 0x134   :  { %v1665_v8 = vadd.f32 %v6710_v22, %v1569_v23  ;;  %v6936_v29 = vmul.f32 %v5779_v63, %v6500_v24  ;;  %v6940_v34 = vmul.f32 %v5779_v63, %v6587_v53  ;;  %v6943_v42 = vmul.f32 %v5785_v46, %v6576_v3  ;;  %v5564_v22 = vld [vmem:[%s11578_s0 + $0x3b] ss:$0 sm:$0xff] }
 0x135   :  { %12003 = vst [vmem:[#allocation49_spill] sm:$0xff] %v6927_v32  ;;  %v6933_v37 = vsel %vm3632_vm8, %v4353_v48, %v12004_v13  ;;  %v501_v11 = vadd.f32 %v499_v19, %v447_v57  ;;  %v807_v30 = vmul.f32 %v5558_v9, %v6310_v18  ;;  %v5791_v13 = vld [vmem:[%s11578_s0 + $0x30] ss:$0 sm:$0xff]  ;;  %v619_v23 = vrot.slane %v615_v44, 1  ;;  %v5570_v19 = vld [vmem:[%s11578_s0 + $0x3c] ss:$0 sm:$0xff] }
 0x136   :  { %12005 = vst [vmem:[#allocation50_spill] sm:$0xff] %v6940_v34  ;;  %v1761_v48 = vadd.f32 %v6803_v7, %v1665_v8  ;;  %v6955_v16 = vmul.f32 %v5564_v22, %v6481_v47  ;;  %v6961_v9 = vmul.f32 %v5785_v46, %v6686_v39  ;;  %v715_v10 = vrot.slane %v711_v40, 1  ;;  %v6964_v8 = vpop.permute.xlu1 %84 }
 0x137   :  { %v555_v57 = vadd.f32 %v553_v56, %v501_v11  ;;  %v11634_v7 = vrot.slane %v6927_v32, 1  ;;  %12008 = vst [vmem:[#allocation53_spill] sm:$0xff] %v6964_v8  ;;  %v12009_v44 = vrot.slane %v6889_v51, 1  ;;  %v903_v52 = vmul.f32 %v5564_v22, %v6407_v15  ;;  %v12196_v32 = vld [vmem:[#allocation8_spill] sm:$0xff] }
 0x138   :  { %12006 = vst [vmem:[#allocation51_spill] sm:$0xff] %v6955_v16  ;;  %12007 = vst [vmem:[#allocation52_spill] sm:$0xff] %v6961_v9  ;;  %v1857_v12 = vadd.f32 %v1854_v14, %v1761_v48  ;;  %v6971_v25 = vmul.f32 %v5570_v19, %v6587_v53  ;;  %v6974_v36 = vmul.f32 %v5791_v13, %v6658_v54  ;;  %v811_v56 = vrot.slane %v807_v30, 1  ;;  %v5576_v14 = vld [vmem:[%s11578_s0 + $0x3d] ss:$0 sm:$0xff] }
 0x139   :  { %v621_v63 = vsel %vm602_vm4, %v619_v23, %v12009_v44  ;;  %v999_v40 = vmul.f32 %v5570_v19, %v6500_v24  ;;  %v12011_v48 = vrot.slane %v6919_v50, 1  ;;  %v6986_v44 = vmul.f32 %v5576_v14, %v6686_v39  ;;  %v5582_v30 = vld [vmem:[%s11578_s0 + $0x3e] ss:$0 sm:$0xff] }
 0x13a   :  { %12010 = vst [vmem:[#allocation54_spill] sm:$0xff] %v6971_v25  ;;  %v624_v46 = vadd.f32 %v621_v63, %v555_v57  ;;  %v1958_v11 = vadd.f32 %v6352_v38, %v1857_v12  ;;  %v4953_v63 = vrot.slane %v6936_v29, 6  ;;  %v813_v38 = vsel %vm602_vm4, %v811_v56, %v11634_v7  ;;  %v7006_v56 = vpop.permute.xlu1 %105 }
 0x13b   :  { %v717_v22 = vsel %vm602_vm4, %v715_v10, %v12011_v48  ;;  %12012 = vst [vmem:[#allocation55_spill] sm:$0xff] %v6986_v44  ;;  %v6996_v12 = vmul.f32 %v5582_v30, %v6735_v28  ;;  %v907_v57 = vrot.slane %v903_v52, 1  ;;  %v11635_v48 = vrot.slane %v6971_v25, 1  ;;  %v12047_v25 = vld [vmem:[#allocation31_spill] sm:$0xff] }
 0x13c   :  { %v720_v19 = vadd.f32 %v717_v22, %v624_v46  ;;  %v2078_v10 = vadd.f32 %v6446_v27, %v1958_v11  ;;  %v1095_v23 = vmul.f32 %v5576_v14, %v6576_v3  ;;  %v1003_v8 = vrot.slane %v999_v40, 1  ;;  %v5588_v46 = vld [vmem:[%s11578_s0 + $0x3f] ss:$0 sm:$0xff]  ;;  %v5594_v40 = vld [vmem:[%s11578_s0 + $0x40] ss:$0 sm:$0xff] }
 0x13d   :  { %12013 = vst [vmem:[#allocation56_spill] sm:$0xff] %v6996_v12  ;;  %v1191_v29 = vmul.f32 %v5582_v30, %v6658_v54  ;;  %v12014_v27 = vrot.slane %v6955_v16, 1  ;;  %v7014_v11 = vmul.f32 %v5588_v46, %v6228_v35  ;;  %v7020_v30 = vmul.f32 %v5791_v13, %v6735_v28 }
 0x13e   :  { %v816_v51 = vadd.f32 %v813_v38, %v720_v19  ;;  %v2198_v22 = vadd.f32 %v6544_v59, %v2078_v10  ;;  %v7024_v59 = vmul.f32 %v5594_v40, %v6297_v5  ;;  %v1288_v7 = vmul.f32 %v5588_v46, %v6215_v31 }
 0x13f   :  { %v909_v52 = vsel %vm602_vm4, %v907_v57, %v12014_v27  ;;  %12015 = vst [vmem:[#allocation57_spill] sm:$0xff] %v7014_v11  ;;  %12016 = vst [vmem:[#allocation58_spill] sm:$0xff] %v7020_v30  ;;  %v1005_v57 = vsel %vm602_vm4, %v1003_v8, %v11635_v48  ;;  %v1099_v27 = vrot.slane %v1095_v23, 1  ;;  %v1195_v13 = vrot.slane %v1191_v29, 1 }
 0x140   :  { %v912_v19 = vadd.f32 %v909_v52, %v816_v51  ;;  %12017 = vst [vmem:[#allocation59_spill] sm:$0xff] %v7024_v59  ;;  %v2318_v10 = vadd.f32 %v6644_v2, %v2198_v22  ;;  %v1384_v51 = vmul.f32 %v5594_v40, %v6240_v41  ;;  %v5600_v52 = vld [vmem:[%s11578_s0 + $0x41] ss:$0 sm:$0xff]  ;;  %v12018_v2 = vrot.slane %v6986_v44, 1 }
 0x141   :  { %v11636_v8 = vrot.slane %v7014_v11, 2  ;;  %v7042_v23 = vmul.f32 %v5600_v52, %v6392_v60  ;;  %v12020_v40 = vrot.slane %v6996_v12, 1  ;;  %v1480_v48 = vmul.f32 %v5600_v52, %v6310_v18  ;;  %v5618_v52 = vld [vmem:[%s11578_s0 + $0x44] ss:$0 sm:$0xff] }
 0x142   :  { %v1008_v14 = vadd.f32 %v1005_v57, %v912_v19  ;;  %v2438_v38 = vadd.f32 %v6740_v55, %v2318_v10  ;;  %v1101_v22 = vsel %vm602_vm4, %v1099_v27, %v12018_v2  ;;  %v5606_v55 = vld [vmem:[%s11578_s0 + $0x42] ss:$0 sm:$0xff]  ;;  %v7052_v10 = vpop.permute.xlu1 %126  ;;  %v1292_v2 = vrot.slane %v1288_v7, 2 }
 0x143   :  { %12019 = vst [vmem:[#allocation60_spill] sm:$0xff] %v7042_v23  ;;  %v1197_v19 = vsel %vm602_vm4, %v1195_v13, %v12020_v40  ;;  %v7057_v50 = vmul.f32 %v5606_v55, %v6481_v47  ;;  %v5193_v13 = vrot.slane %v6974_v36, 6  ;;  %v1388_v40 = vrot.slane %v1384_v51, 2  ;;  %v12029_v11 = vld [vmem:[#allocation26_spill] sm:$0xff] }
 0x144   :  { %v1104_v29 = vadd.f32 %v1101_v22, %v1008_v14  ;;  %v2558_v27 = vadd.f32 %v6808_v20, %v2438_v38  ;;  %v5612_v14 = vld [vmem:[%s11578_s0 + $0x43] ss:$0 sm:$0xff]  ;;  %v1294_v20 = vsel %vm1275_vm5, %v1292_v2, %v11636_v8  ;;  %v1576_v38 = vmul.f32 %v5606_v55, %v6407_v15 }
 0x145   :  { %12021 = vst [vmem:[#allocation61_spill] sm:$0xff] %v7057_v50  ;;  %v7064_v46 = vmul.f32 %v5612_v14, %v6587_v53  ;;  %v12023_v36 = vrot.slane %v6940_v34, 6  ;;  %v1484_v8 = vrot.slane %v1480_v48, 2  ;;  %v7087_v7 = vmul.f32 %v5618_v52, %v6686_v39 }
 0x146   :  { %v1200_v22 = vadd.f32 %v1197_v19, %v1104_v29  ;;  %v2678_v57 = vadd.f32 %v6900_v43, %v2558_v27  ;;  %v12024_v43 = vrot.slane %v7024_v59, 2  ;;  %v1672_v27 = vmul.f32 %v5612_v14, %v6500_v24  ;;  %v7100_v48 = vpop.permute.xlu1 %147 }
 0x147   :  { %12022 = vst [vmem:[#allocation62_spill] sm:$0xff] %v7064_v46  ;;  %v7078_v51 = vsel %vm35_vm2, %v4953_v63, %v12023_v36  ;;  %12025 = vst [vmem:[#allocation63_spill] sm:$0xff] %v7087_v7  ;;  %v5624_v63 = vld [vmem:[%s11578_s0 + $0x45] ss:$0 sm:$0xff]  ;;  %v12027_v14 = vrot.slane %v7042_v23, 2  ;;  %v12030_v44 = vrot.slane %v7057_v50, 2 }
 0x148   :  { %v1297_v29 = vadd.f32 %v1294_v20, %v1200_v22  ;;  %v1390_v19 = vsel %vm1275_vm5, %v1388_v40, %v12024_v43  ;;  %v2799_v2 = vadd.f32 %v6380_v49, %v2678_v57  ;;  %v1768_v20 = vmul.f32 %v5618_v52, %v6576_v3  ;;  %v5630_v49 = vld [vmem:[%s11578_s0 + $0x46] ss:$0 sm:$0xff]  ;;  %v5684_v23 = vld [vmem:[%s11578_s0 + $0x4f] ss:$0 sm:$0xff] }
 0x149   :  { %v7095_v40 = vmul.f32 %v5624_v63, %v6735_v28  ;;  %v1486_v43 = vsel %vm1275_vm5, %v1484_v8, %v12027_v14  ;;  %v1676_v55 = vrot.slane %v1672_v27, 2  ;;  %v1864_v59 = vmul.f32 %v5624_v63, %v6658_v54  ;;  %v5642_v27 = vld [vmem:[%s11578_s0 + $0x48] ss:$0 sm:$0xff] }
 0x14a   :  { %v1393_v36 = vadd.f32 %v1390_v19, %v1297_v29  ;;  %v2919_v57 = vadd.f32 %v6470_v26, %v2799_v2  ;;  %v1580_v29 = vrot.slane %v1576_v38, 2  ;;  %v7107_v19 = vmul.f32 %v5630_v49, %v6228_v35  ;;  %v5636_v38 = vld [vmem:[%s11578_s0 + $0x47] ss:$0 sm:$0xff] }
 0x14b   :  { %12026 = vst [vmem:[#allocation64_spill] sm:$0xff] %v7095_v40  ;;  %v1965_v8 = vmul.f32 %v5630_v49, %v6215_v31  ;;  %v12031_v63 = vrot.slane %v7064_v46, 2  ;;  %v1868_v2 = vrot.slane %v1864_v59, 2  ;;  %v12036_v49 = vrot.slane %v7087_v7, 2 }
 0x14c   :  { %12028 = vst [vmem:[#allocation65_spill] sm:$0xff] %v7107_v19  ;;  %v1489_v22 = vadd.f32 %v1486_v43, %v1393_v36  ;;  %v3039_v12 = vadd.f32 %v12029_v11, %v2919_v57  ;;  %v1582_v26 = vsel %vm1275_vm5, %v1580_v29, %v12030_v44  ;;  %v1772_v57 = vrot.slane %v1768_v20, 2 }
 0x14d   :  { %v1678_v11 = vsel %vm1275_vm5, %v1676_v55, %v12031_v63  ;;  %v11641_v44 = vrot.slane %v7095_v40, 2  ;;  %v7130_v43 = vmul.f32 %v5636_v38, %v6297_v5  ;;  %v7133_v29 = vmul.f32 %v5642_v27, %v6392_v60  ;;  %v7137_v55 = vpop.permute.xlu1 %168  ;;  %v5660_v40 = vld [vmem:[%s11578_s0 + $0x4b] ss:$0 sm:$0xff] }
 0x14e   :  { %v1585_v36 = vadd.f32 %v1582_v26, %v1489_v22  ;;  %v3159_v14 = vadd.f32 %v6649_v21, %v3039_v12  ;;  %v2085_v22 = vmul.f32 %v5636_v38, %v6240_v41  ;;  %v2205_v26 = vmul.f32 %v5642_v27, %v6310_v18  ;;  %v5648_v38 = vld [vmem:[%s11578_s0 + $0x49] ss:$0 sm:$0xff] }
 0x14f   :  { %12032 = vst [vmem:[#allocation26_spill] sm:$0xff] %v7130_v43  ;;  %12033 = vst [vmem:[#allocation66_spill] sm:$0xff] %v7133_v29  ;;  %v12034_v21 = vrot.slane %v6961_v9, 6  ;;  %v12035_v12 = vrot.slane %v6943_v42, 6  ;;  %v1971_v59 = vrot.slane %v1965_v8, 3  ;;  %v12037_v27 = vrot.slane %v7020_v30, 6 }
 0x150   :  { %v1681_v52 = vadd.f32 %v1678_v11, %v1585_v36  ;;  %v3279_v20 = vadd.f32 %v6748_v1, %v3159_v14  ;;  %v1774_v36 = vsel %vm1275_vm5, %v1772_v57, %v12036_v49  ;;  %v1870_v42 = vsel %vm1275_vm5, %v1868_v2, %v11641_v44  ;;  %v5654_v8 = vld [vmem:[%s11578_s0 + $0x4a] ss:$0 sm:$0xff]  ;;  %v5302_v57 = vld [vmem:[%s11577_s3] sm:$0xff] }
 0x151   :  { %v7145_v63 = vsel %vm35_vm2, %v12035_v12, %v12034_v21  ;;  %v7156_v1 = vsel %vm35_vm2, %v5193_v13, %v12037_v27  ;;  %v7162_v14 = vmul.f32 %v5648_v38, %v6481_v47  ;;  %v12039_v13 = vrot.slane %v7107_v19, 3  ;;  %v5310_v7 = vpop.permute.xlu1 %5309 }
 0x152   :  { %v1777_v11 = vadd.f32 %v1774_v36, %v1681_v52  ;;  %v3399_v49 = vadd.f32 %v6833_v61, %v3279_v20  ;;  %v11646_v21 = vrot.slane %v7130_v43, 3  ;;  %v11647_v2 = vrot.slane %v7133_v29, 3 }
 0x153   :  { %12038 = vst [vmem:[#allocation67_spill] sm:$0xff] %v7162_v14  ;;  %v1973_v52 = vsel %vm1950_vm6, %v1971_v59, %v12039_v13  ;;  %v2091_v36 = vrot.slane %v2085_v22, 3  ;;  %v2211_v27 = vrot.slane %v2205_v26, 3  ;;  %v2325_v44 = vmul.f32 %v5648_v38, %v6407_v15  ;;  %v5666_v22 = vld [vmem:[%s11578_s0 + $0x4c] ss:$0 sm:$0xff] }
 0x154   :  { %v1873_v12 = vadd.f32 %v1870_v42, %v1777_v11  ;;  %v3519_v61 = vadd.f32 %v6912_v45, %v3399_v49  ;;  %v2445_v20 = vmul.f32 %v5654_v8, %v6500_v24  ;;  %v7183_v59 = vmul.f32 %v5654_v8, %v6587_v53  ;;  %v12043_v42 = vld [vmem:[#allocation15_spill] sm:$0xff] }
 0x155   :  { %v7186_v13 = vmul.f32 %v5660_v40, %v6686_v39  ;;  %v7192_v26 = vsel %vm55_vm3, %v5302_v57, %v5310_v7  ;;  %v7196_v45 = vmul.f32 %v5666_v22, %v6735_v28  ;;  %v2093_v8 = vsel %vm1950_vm6, %v2091_v36, %v11646_v21  ;;  %v5672_v7 = vld [vmem:[%s11578_s0 + $0x4d] ss:$0 sm:$0xff]  ;;  %v5678_v36 = vld [vmem:[%s11578_s0 + $0x4e] ss:$0 sm:$0xff] }
 0x156   :  { %12040 = vst [vmem:[#allocation68_spill] sm:$0xff] %v7183_v59  ;;  %v1978_v38 = vadd.f32 %v1973_v52, %v1873_v12  ;;  %v3640_v49 = vadd.f32 %v12043_v42, %v3519_v61  ;;  %v2213_v46 = vsel %vm1950_vm6, %v2211_v27, %v11647_v2  ;;  %v2565_v50 = vmul.f32 %v5660_v40, %v6576_v3  ;;  %v12045_v42 = vld [vmem:[#allocation23_spill] sm:$0xff] }
 0x157   :  { %12041 = vst [vmem:[#allocation69_spill] sm:$0xff] %v7186_v13  ;;  %12042 = vst [vmem:[#allocation70_spill] sm:$0xff] %v7196_v45  ;;  %v2331_v52 = vrot.slane %v2325_v44, 3  ;;  %v2685_v12 = vmul.f32 %v5666_v22, %v6658_v54  ;;  %v7211_v61 = vmul.f32 %v5672_v7, %v6228_v35  ;;  %v2451_v27 = vrot.slane %v2445_v20, 3 }
 0x158   :  { %v2098_v57 = vadd.f32 %v2093_v8, %v1978_v38  ;;  %v3760_v21 = vadd.f32 %v12045_v42, %v3640_v49  ;;  %v11650_v40 = vrot.slane %v7183_v59, 3  ;;  %v12046_v38 = vrot.slane %v7162_v14, 3 }
 0x159   :  { %12044 = vst [vmem:[#allocation15_spill] sm:$0xff] %v7211_v61  ;;  %v2806_v8 = vmul.f32 %v5672_v7, %v6215_v31  ;;  %v2571_v20 = vrot.slane %v2565_v50, 3  ;;  %v2926_v42 = vmul.f32 %v5678_v36, %v6240_v41  ;;  %v7230_v2 = vmul.f32 %v5678_v36, %v6297_v5 }
 0x15a   :  { %v2218_v11 = vadd.f32 %v2213_v46, %v2098_v57  ;;  %v2333_v44 = vsel %vm1950_vm6, %v2331_v52, %v12046_v38  ;;  %v3880_v49 = vadd.f32 %v12047_v25, %v3760_v21  ;;  %v2691_v57 = vrot.slane %v2685_v12, 3 }
 0x15b   :  { %12048 = vst [vmem:[#allocation23_spill] sm:$0xff] %v7230_v2  ;;  %v11652_v52 = vrot.slane %v7211_v61, 4  ;;  %v7234_v38 = vmul.f32 %v5684_v23, %v6392_v60  ;;  %v2453_v22 = vsel %vm1950_vm6, %v2451_v27, %v11650_v40  ;;  %v12050_v25 = vrot.slane %v7186_v13, 3  ;;  %v5696_v27 = vld [vmem:[%s11578_s0 + $0x51] ss:$0 sm:$0xff]  ;;  %v12058_v13 = vld [vmem:[#allocation19_spill] sm:$0xff] }
 0x15c   :  { %v2338_v46 = vadd.f32 %v2333_v44, %v2218_v11  ;;  %v4000_v7 = vadd.f32 %v6732_v58, %v3880_v49  ;;  %v3046_v21 = vmul.f32 %v5684_v23, %v6310_v18  ;;  %v5690_v11 = vld [vmem:[%s11578_s0 + $0x50] ss:$0 sm:$0xff]  ;;  %v12051_v36 = vrot.slane %v7196_v45, 3 }
 0x15d   :  { %12049 = vst [vmem:[#allocation31_spill] sm:$0xff] %v7234_v38  ;;  %v2573_v50 = vsel %vm1950_vm6, %v2571_v20, %v12050_v25  ;;  %v2812_v58 = vrot.slane %v2806_v8, 4  ;;  %v7251_v49 = vmul.f32 %v5690_v11, %v6481_v47  ;;  %v2932_v23 = vrot.slane %v2926_v42, 4 }
 0x15e   :  { %v2458_v12 = vadd.f32 %v2453_v22, %v2338_v46  ;;  %v2693_v44 = vsel %vm1950_vm6, %v2691_v57, %v12051_v36  ;;  %v4120_v20 = vadd.f32 %v6843_v6, %v4000_v7  ;;  %v7259_v40 = vmul.f32 %v5696_v27, %v6587_v53  ;;  %v5702_v22 = vld [vmem:[%s11578_s0 + $0x52] ss:$0 sm:$0xff] }
 0x15f   :  { %12052 = vst [vmem:[#allocation71_spill] sm:$0xff] %v7251_v49  ;;  %v2814_v46 = vsel %vm2791_vm7, %v2812_v58, %v11652_v52  ;;  %v11656_v57 = vrot.slane %v7234_v38, 4  ;;  %v3166_v36 = vmul.f32 %v5690_v11, %v6407_v15  ;;  %v3052_v42 = vrot.slane %v3046_v21, 4 }
 0x160   :  { %12053 = vst [vmem:[#allocation72_spill] sm:$0xff] %v7259_v40  ;;  %v2578_v8 = vadd.f32 %v2573_v50, %v2458_v12  ;;  %v4240_v6 = vadd.f32 %v6872_v17, %v4120_v20  ;;  %v3286_v7 = vmul.f32 %v5696_v27, %v6500_v24  ;;  %v7272_v25 = vmul.f32 %v5702_v22, %v6686_v39  ;;  %v5708_v50 = vld [vmem:[%s11578_s0 + $0x53] ss:$0 sm:$0xff]  ;;  %v5714_v17 = vld [vmem:[%s11578_s0 + $0x54] ss:$0 sm:$0xff] }
 0x161   :  { %v3406_v58 = vmul.f32 %v5702_v22, %v6576_v3  ;;  %v7280_v52 = vmul.f32 %v5708_v50, %v6735_v28  ;;  %v12056_v11 = vrot.slane %v7230_v2, 4  ;;  %v3054_v22 = vsel %vm2791_vm7, %v3052_v42, %v11656_v57 }
 0x162   :  { %12054 = vst [vmem:[#allocation73_spill] sm:$0xff] %v7272_v25  ;;  %v2698_v12 = vadd.f32 %v2693_v44, %v2578_v8  ;;  %v4360_v21 = vadd.f32 %v6933_v37, %v4240_v6  ;;  %v7291_v44 = vmul.f32 %v5714_v17, %v6228_v35  ;;  %v3172_v61 = vrot.slane %v3166_v36, 4 }
 0x163   :  { %12055 = vst [vmem:[#allocation74_spill] sm:$0xff] %v7280_v52  ;;  %v2934_v27 = vsel %vm2791_vm7, %v2932_v23, %v12056_v11  ;;  %v3526_v45 = vmul.f32 %v5708_v50, %v6658_v54  ;;  %v3292_v37 = vrot.slane %v3286_v7, 4  ;;  %v11657_v6 = vrot.slane %v7272_v25, 4  ;;  %v5720_v11 = vld [vmem:[%s11578_s0 + $0x55] ss:$0 sm:$0xff] }
 0x164   :  { %12057 = vst [vmem:[#allocation75_spill] sm:$0xff] %v7291_v44  ;;  %v2819_v8 = vadd.f32 %v2814_v46, %v2698_v12  ;;  %v4480_v59 = vadd.f32 %v12058_v13, %v4360_v21  ;;  %v3647_v23 = vmul.f32 %v5714_v17, %v6215_v31  ;;  %v12059_v46 = vrot.slane %v7251_v49, 4 }
 0x165   :  { %v3412_v42 = vrot.slane %v3406_v58, 4  ;;  %v11658_v36 = vrot.slane %v7280_v52, 4  ;;  %v12060_v13 = vrot.slane %v7259_v40, 4  ;;  %v11659_v17 = vrot.slane %v7291_v44, 5  ;;  %v5756_v44 = vld [vmem:[%s11578_s0 + $0x5b] ss:$0 sm:$0xff] }
 0x166   :  { %v2939_v20 = vadd.f32 %v2934_v27, %v2819_v8  ;;  %v3174_v12 = vsel %vm2791_vm7, %v3172_v61, %v12059_v46  ;;  %v4600_v50 = vadd.f32 %v6683_v62, %v4480_v59  ;;  %v7313_v21 = vmul.f32 %v5720_v11, %v6297_v5  ;;  %v5726_v27 = vld [vmem:[%s11578_s0 + $0x56] ss:$0 sm:$0xff]  ;;  %v5732_v62 = vld [vmem:[%s11578_s0 + $0x57] ss:$0 sm:$0xff] }
 0x167   :  { %v3294_v7 = vsel %vm2791_vm7, %v3292_v37, %v12060_v13  ;;  %v3532_v61 = vrot.slane %v3526_v45, 4  ;;  %v3767_v58 = vmul.f32 %v5720_v11, %v6240_v41  ;;  %v7320_v46 = vmul.f32 %v5726_v27, %v6392_v60  ;;  %v5738_v45 = vld [vmem:[%s11578_s0 + $0x58] ss:$0 sm:$0xff] }
 0x168   :  { %12061 = vst [vmem:[#allocation19_spill] sm:$0xff] %v7313_v21  ;;  %v3059_v8 = vadd.f32 %v3054_v22, %v2939_v20  ;;  %v4720_v59 = vadd.f32 %v6779_v4, %v4600_v50  ;;  %v3414_v37 = vsel %vm2791_vm7, %v3412_v42, %v11657_v6  ;;  %v3653_v13 = vrot.slane %v3647_v23, 5 }
 0x169   :  { %12062 = vst [vmem:[#allocation76_spill] sm:$0xff] %v7320_v46  ;;  %v7330_v57 = vmul.f32 %v5732_v62, %v6481_v47  ;;  %v3534_v22 = vsel %vm2791_vm7, %v3532_v61, %v11658_v36  ;;  %v3887_v11 = vmul.f32 %v5726_v27, %v6310_v18  ;;  %v7340_v4 = vmul.f32 %v5738_v45, %v6587_v53 }
 0x16a   :  { %v3179_v20 = vadd.f32 %v3174_v12, %v3059_v8  ;;  %v4840_v42 = vadd.f32 %v6883_v0, %v4720_v59  ;;  %v3655_v23 = vsel %vm3632_vm8, %v3653_v13, %v11659_v17  ;;  %v11663_v50 = vrot.slane %v7313_v21, 5  ;;  %v5744_v12 = vld [vmem:[%s11578_s0 + $0x59] ss:$0 sm:$0xff]  ;;  %v5750_v0 = vld [vmem:[%s11578_s0 + $0x5a] ss:$0 sm:$0xff] }
 0x16b   :  { %12063 = vst [vmem:[#allocation77_spill] sm:$0xff] %v7330_v57  ;;  %12064 = vst [vmem:[#allocation78_spill] sm:$0xff] %v7340_v4  ;;  %v4007_v6 = vmul.f32 %v5732_v62, %v6407_v15  ;;  %v3773_v61 = vrot.slane %v3767_v58, 5  ;;  %v4127_v36 = vmul.f32 %v5738_v45, %v6500_v24  ;;  %v7359_v62 = vmul.f32 %v5744_v12, %v6686_v39 }
 0x16c   :  { %v3299_v8 = vadd.f32 %v3294_v7, %v3179_v20  ;;  %v4960_v59 = vadd.f32 %v7078_v51, %v4840_v42  ;;  %v7362_v17 = vmul.f32 %v5750_v0, %v6735_v28  ;;  %v3893_v58 = vrot.slane %v3887_v11, 5 }
 0x16d   :  { %12065 = vst [vmem:[#allocation79_spill] sm:$0xff] %v7359_v62  ;;  %v11662_v20 = vrot.slane %v7340_v4, 5  ;;  %v4247_v45 = vmul.f32 %v5744_v12, %v6576_v3  ;;  %v3775_v51 = vsel %vm3632_vm8, %v3773_v61, %v11663_v50  ;;  %v4013_v42 = vrot.slane %v4007_v6, 5 }
 0x16e   :  { %12066 = vst [vmem:[#allocation80_spill] sm:$0xff] %v7362_v17  ;;  %v3419_v7 = vadd.f32 %v3414_v37, %v3299_v8  ;;  %v5080_v27 = vadd.f32 %v7145_v63, %v4960_v59  ;;  %v4367_v13 = vmul.f32 %v5750_v0, %v6658_v54  ;;  %v12067_v37 = vrot.slane %v7320_v46, 5  ;;  %v5762_v63 = vld [vmem:[%s11578_s0 + $0x5c] ss:$0 sm:$0xff] }
 0x16f   :  { %v4133_v8 = vrot.slane %v4127_v36, 5  ;;  %v7378_v12 = vmul.f32 %v5756_v44, %v6228_v35  ;;  %v12069_v61 = vrot.slane %v7330_v57, 5  ;;  %v11670_v59 = vrot.slane %v7362_v17, 5 }
 0x170   :  { %v3539_v52 = vadd.f32 %v3534_v22, %v3419_v7  ;;  %v3895_v11 = vsel %vm3632_vm8, %v3893_v58, %v12067_v37  ;;  %v5200_v6 = vadd.f32 %v7156_v1, %v5080_v27  ;;  %v11671_v22 = vrot.slane %v7359_v62, 5  ;;  %v5768_v1 = vld [vmem:[%s11578_s0 + $0x5d] ss:$0 sm:$0xff]  ;;  %v5505_v27 = vld [vmem:[%s11578_s0 + $0x62] ss:$0 sm:$0xff] }
 0x171   :  { %12068 = vst [vmem:[#allocation81_spill] sm:$0xff] %v7378_v12  ;;  %v4015_v0 = vsel %vm3632_vm8, %v4013_v42, %v12069_v61  ;;  %v4135_v36 = vsel %vm3632_vm8, %v4133_v8, %v11662_v20  ;;  %v4253_v58 = vrot.slane %v4247_v45, 5  ;;  %v4487_v37 = vmul.f32 %v5756_v44, %v6215_v31  ;;  %v5774_v44 = vld [vmem:[%s11578_s0 + $0x5e] ss:$0 sm:$0xff]  ;;  %v5511_v45 = vld [vmem:[%s11578_s0 + $0x63] ss:$0 sm:$0xff] }
 0x172   :  { %v3660_v7 = vadd.f32 %v3655_v23, %v3539_v52  ;;  %v7400_v42 = vadd.f32 %v7192_v26, %v5200_v6  ;;  %v4373_v61 = vrot.slane %v4367_v13, 5  ;;  %v4607_v52 = vmul.f32 %v5762_v63, %v6240_v41  ;;  %v5517_v6 = vld [vmem:[%s11578_s0 + $0x64] ss:$0 sm:$0xff] }
 0x173   :  { %v7404_v23 = vmul.f32 %v5762_v63, %v6297_v5  ;;  %v7414_v26 = vmul.f32 %v5768_v1, %v6392_v60  ;;  %v7417_v13 = vmul.f32 %v5774_v44, %v6481_v47  ;;  %v5499_v63 = vld [vmem:[%s11579_s1 + $0x2] ss:$0 sm:$0xff]  ;;  %v4727_v50 = vmul.f32 %v5768_v1, %v6310_v18 }
 0x174   :  { %12070 = vst [vmem:[#allocation82_spill] sm:$0xff] %v7400_v42  ;;  %v3780_v8 = vadd.f32 %v3775_v51, %v3660_v7  ;;  %5319 = vst.msk [vmem:[%s11580_s4] sm:$0xff] %vm55_vm3, %v7400_v42  ;;  %v4255_v51 = vsel %vm3632_vm8, %v4253_v58, %v11671_v22  ;;  %v4375_v7 = vsel %vm3632_vm8, %v4373_v61, %v11670_v59  ;;  %v4493_v57 = vrot.slane %v4487_v37, 6  ;;  %v5523_v42 = vld [vmem:[%s11578_s0 + $0x65] ss:$0 sm:$0xff] }
 0x175   :  { %12071 = vst [vmem:[#allocation83_spill] sm:$0xff] %v7404_v23  ;;  %12072 = vst [vmem:[#allocation84_spill] sm:$0xff] %v7414_v26  ;;  %v238_v20 = vmul.f32 %v5505_v27, %v6215_v31  ;;  %v4847_v46 = vmul.f32 %v5774_v44, %v6407_v15  ;;  %v292_v21 = vmul.f32 %v5511_v45, %v6240_v41  ;;  %v4613_v62 = vrot.slane %v4607_v52, 6  ;;  %v5780_v61 = vld [vmem:[%s11578_s0 + $0x5f] ss:$0 sm:$0xff] }
 0x176   :  { %12073 = vst [vmem:[#allocation85_spill] sm:$0xff] %v7417_v13  ;;  %v3900_v4 = vadd.f32 %v3895_v11, %v3780_v8  ;;  %v5786_v11 = vld [vmem:[%s11578_s0 + $0x60] ss:$0 sm:$0xff]  ;;  %v346_v1 = vmul.f32 %v5517_v6, %v6310_v18  ;;  %v12074_v44 = vrot.slane %v7378_v12, 6  ;;  %v11675_v52 = vrot.slane %v7414_v26, 6 }
 0x177   :  { %v240_v37 = vadd.f32 %v5499_v63, %v238_v20  ;;  %v5529_v59 = vld [vmem:[%s11578_s0 + $0x66] ss:$0 sm:$0xff]  ;;  %v4733_v22 = vrot.slane %v4727_v50, 6  ;;  %v7460_v58 = vmul.f32 %v5780_v61, %v6587_v53  ;;  %v400_v63 = vmul.f32 %v5523_v42, %v6407_v15  ;;  %v5535_v8 = vld [vmem:[%s11578_s0 + $0x67] ss:$0 sm:$0xff] }
 0x178   :  { %v4020_v27 = vadd.f32 %v4015_v0, %v3900_v4  ;;  %v4495_v45 = vsel %vm35_vm2, %v4493_v57, %v12074_v44  ;;  %v7463_v4 = vpop.permute.xlu0 %50  ;;  %v4853_v6 = vrot.slane %v4847_v46, 6  ;;  %v4967_v57 = vmul.f32 %v5780_v61, %v6500_v24  ;;  %v5547_v50 = vld [vmem:[%s11578_s0 + $0x69] ss:$0 sm:$0xff]  ;;  %v5565_v26 = vld [vmem:[%s11578_s0 + $0x6c] ss:$0 sm:$0xff] }
 0x179   :  { %12075 = vst [vmem:[#allocation86_spill] sm:$0xff] %v7460_v58  ;;  %v294_v20 = vadd.f32 %v292_v21, %v240_v37  ;;  %v5087_v44 = vmul.f32 %v5786_v11, %v6576_v3  ;;  %v12076_v21 = vrot.slane %v7404_v23, 6  ;;  %v7478_v46 = vmul.f32 %v5547_v50, %v6228_v35 }
 0x17a   :  { %v4140_v0 = vadd.f32 %v4135_v36, %v4020_v27  ;;  %v454_v36 = vmul.f32 %v5529_v59, %v6500_v24  ;;  %v4735_v27 = vsel %vm35_vm2, %v4733_v22, %v11675_v52  ;;  %v12078_v12 = vrot.slane %v7417_v13, 6  ;;  %v5553_v59 = vld [vmem:[%s11578_s0 + $0x6a] ss:$0 sm:$0xff]  ;;  %v5792_v22 = vld [vmem:[%s11578_s0 + $0x61] ss:$0 sm:$0xff] }
 0x17b   :  { %v4615_v42 = vsel %vm35_vm2, %v4613_v62, %v12076_v21  ;;  %v348_v37 = vadd.f32 %v346_v1, %v294_v20  ;;  %12077 = vst [vmem:[#allocation87_spill] sm:$0xff] %v7478_v46  ;;  %v7487_v25 = vmul.f32 %v5786_v11, %v6686_v39  ;;  %v5541_v62 = vld [vmem:[%s11578_s0 + $0x68] ss:$0 sm:$0xff]  ;;  %v631_v11 = vmul.f32 %v5547_v50, %v6215_v31  ;;  %v5559_v52 = vld [vmem:[%s11578_s0 + $0x6b] ss:$0 sm:$0xff] }
 0x17c   :  { %v4260_v61 = vadd.f32 %v4255_v51, %v4140_v0  ;;  %v4855_v17 = vsel %vm35_vm2, %v4853_v6, %v12078_v12  ;;  %v508_v12 = vmul.f32 %v5535_v8, %v6576_v3  ;;  %v4973_v0 = vrot.slane %v4967_v57, 6  ;;  %v7510_v8 = vpop.permute.xlu0 %72 }
 0x17d   :  { %12079 = vst [vmem:[#allocation88_spill] sm:$0xff] %v7487_v25  ;;  %v402_v1 = vadd.f32 %v400_v63, %v348_v37  ;;  %v5093_v6 = vrot.slane %v5087_v44, 6  ;;  %v7502_v21 = vmul.f32 %v5553_v59, %v6297_v5  ;;  %v562_v13 = vmul.f32 %v5541_v62, %v6658_v54 }
 0x17e   :  { %v4380_v20 = vadd.f32 %v4375_v7, %v4260_v61  ;;  %v727_v63 = vmul.f32 %v5553_v59, %v6240_v41  ;;  %v5801_v7 = vld [vmem:[%s11577_s3 + $0x10] sm:$0xff]  ;;  %v5207_v50 = vmul.f32 %v5792_v22, %v6658_v54  ;;  %v7518_v37 = vmul.f32 %v5559_v52, %v6392_v60 }
 0x17f   :  { %12080 = vst [vmem:[#allocation89_spill] sm:$0xff] %v7502_v21  ;;  %v456_v51 = vadd.f32 %v454_v36, %v402_v1  ;;  %v12082_v36 = vrot.slane %v7460_v58, 6  ;;  %v635_v59 = vrot.slane %v631_v11, 1  ;;  %v823_v1 = vmul.f32 %v5559_v52, %v6310_v18  ;;  %v5577_v58 = vld [vmem:[%s11578_s0 + $0x6e] ss:$0 sm:$0xff] }
 0x180   :  { %v4500_v57 = vadd.f32 %v4495_v45, %v4380_v20  ;;  %12081 = vst [vmem:[#allocation90_spill] sm:$0xff] %v7518_v37  ;;  %v5342_v45 = vpop.permute.xlu1 %5341  ;;  %v7528_v44 = vmul.f32 %v5792_v22, %v6735_v28  ;;  %v7532_v40 = vmul.f32 %v5565_v26, %v6481_v47  ;;  %v12085_v11 = vrot.slane %v7478_v46, 1 }
 0x181   :  { %v4975_v61 = vsel %vm35_vm2, %v4973_v0, %v12082_v36  ;;  %v510_v62 = vadd.f32 %v508_v12, %v456_v51  ;;  %v5571_v51 = vld [vmem:[%s11578_s0 + $0x6d] ss:$0 sm:$0xff]  ;;  %v5347_v52 = vsel %vm55_vm3, %v5801_v7, %v5342_v45  ;;  %v919_v36 = vmul.f32 %v5565_v26, %v6407_v15 }
 0x182   :  { %v4620_v20 = vadd.f32 %v4615_v42, %v4500_v57  ;;  %12083 = vst [vmem:[#allocation91_spill] sm:$0xff] %v7528_v44  ;;  %12084 = vst [vmem:[#allocation92_spill] sm:$0xff] %v7532_v40  ;;  %v637_v0 = vsel %vm602_vm4, %v635_v59, %v12085_v11  ;;  %v731_v42 = vrot.slane %v727_v63, 1  ;;  %v7544_v23 = vmul.f32 %v5571_v51, %v6587_v53 }
 0x183   :  { %v564_v12 = vadd.f32 %v562_v13, %v510_v62  ;;  %v12087_v7 = vrot.slane %v7487_v25, 6  ;;  %v827_v45 = vrot.slane %v823_v1, 1  ;;  %v1015_v63 = vmul.f32 %v5571_v51, %v6500_v24 }
 0x184   :  { %v4740_v57 = vadd.f32 %v4735_v27, %v4620_v20  ;;  %12086 = vst [vmem:[#allocation93_spill] sm:$0xff] %v7544_v23  ;;  %v7553_v27 = vpop.permute.xlu0 %93  ;;  %v12088_v26 = vrot.slane %v7502_v21, 1  ;;  %v7560_v22 = vmul.f32 %v5577_v58, %v6686_v39  ;;  %v11687_v1 = vrot.slane %v7528_v44, 6 }
 0x185   :  { %v5095_v13 = vsel %vm35_vm2, %v5093_v6, %v12087_v7  ;;  %v640_v62 = vadd.f32 %v637_v0, %v564_v12  ;;  %v5583_v6 = vld [vmem:[%s11578_s0 + $0x6f] ss:$0 sm:$0xff]  ;;  %v1111_v51 = vmul.f32 %v5577_v58, %v6576_v3  ;;  %v923_v7 = vrot.slane %v919_v36, 1  ;;  %v5589_v58 = vld [vmem:[%s11578_s0 + $0x70] ss:$0 sm:$0xff] }
 0x186   :  { %v4860_v59 = vadd.f32 %v4855_v17, %v4740_v57  ;;  %v733_v20 = vsel %vm602_vm4, %v731_v42, %v12088_v26  ;;  %12089 = vst [vmem:[#allocation94_spill] sm:$0xff] %v7560_v22  ;;  %v7568_v17 = vmul.f32 %v5583_v6, %v6735_v28  ;;  %v12091_v42 = vrot.slane %v7518_v37, 1 }
 0x187   :  { %v736_v12 = vadd.f32 %v733_v20, %v640_v62  ;;  %v11685_v26 = vrot.slane %v7544_v23, 1  ;;  %v5213_v11 = vrot.slane %v5207_v50, 6  ;;  %v1019_v46 = vrot.slane %v1015_v63, 1  ;;  %v5595_v50 = vld [vmem:[%s11578_s0 + $0x71] ss:$0 sm:$0xff] }
 0x188   :  { %12090 = vst [vmem:[#allocation95_spill] sm:$0xff] %v7568_v17  ;;  %v4980_v0 = vadd.f32 %v4975_v61, %v4860_v59  ;;  %v829_v57 = vsel %vm602_vm4, %v827_v45, %v12091_v42  ;;  %v1207_v25 = vmul.f32 %v5583_v6, %v6658_v54  ;;  %v12092_v20 = vrot.slane %v7532_v40, 1  ;;  %v5703_v23 = vld [vmem:[%s11578_s0 + $0x83] ss:$0 sm:$0xff]  ;;  %v5745_v40 = vld [vmem:[%s11578_s0 + $0x8a] ss:$0 sm:$0xff] }
 0x189   :  { %v832_v21 = vadd.f32 %v829_v57, %v736_v12  ;;  %v7583_v36 = vmul.f32 %v5589_v58, %v6228_v35  ;;  %v5215_v45 = vsel %vm35_vm2, %v5213_v11, %v11687_v1  ;;  %v1115_v6 = vrot.slane %v1111_v51, 1  ;;  %v7592_v12 = vpop.permute.xlu0 %114 }
 0x18a   :  { %v5100_v62 = vadd.f32 %v5095_v13, %v4980_v0  ;;  %v925_v61 = vsel %vm602_vm4, %v923_v7, %v12092_v20  ;;  %v11684_v13 = vrot.slane %v7568_v17, 1  ;;  %v1021_v42 = vsel %vm602_vm4, %v1019_v46, %v11685_v26 }
 0x18b   :  { %12093 = vst [vmem:[#allocation96_spill] sm:$0xff] %v7583_v36  ;;  %v928_v63 = vadd.f32 %v925_v61, %v832_v21  ;;  %v1304_v57 = vmul.f32 %v5589_v58, %v6215_v31  ;;  %v7599_v7 = vmul.f32 %v5595_v50, %v6297_v5  ;;  %v1211_v59 = vrot.slane %v1207_v25, 1  ;;  %v5601_v21 = vld [vmem:[%s11578_s0 + $0x72] ss:$0 sm:$0xff] }
 0x18c   :  { %v5220_v0 = vadd.f32 %v5215_v45, %v5100_v62  ;;  %v1400_v11 = vmul.f32 %v5595_v50, %v6240_v41  ;;  %v12096_v62 = vrot.slane %v7560_v22, 1  ;;  %v11686_v46 = vrot.slane %v7583_v36, 2  ;;  %v5607_v50 = vld [vmem:[%s11578_s0 + $0x73] ss:$0 sm:$0xff] }
 0x18d   :  { %12094 = vst [vmem:[#allocation97_spill] sm:$0xff] %v7599_v7  ;;  %v1024_v20 = vadd.f32 %v1021_v42, %v928_v63  ;;  %v7612_v58 = vmul.f32 %v5601_v21, %v6392_v60  ;;  %v1213_v25 = vsel %vm602_vm4, %v1211_v59, %v11684_v13  ;;  %v11691_v63 = vrot.slane %v7599_v7, 2 }
 0x18e   :  { %v7605_v51 = vadd.f32 %v5347_v52, %v5220_v0  ;;  %v1117_v61 = vsel %vm602_vm4, %v1115_v6, %v12096_v62  ;;  %v1308_v52 = vrot.slane %v1304_v57, 2  ;;  %v1496_v6 = vmul.f32 %v5601_v21, %v6310_v18  ;;  %v136_v62 = vpop.permute.xlu0 %135 }
 0x18f   :  { %12097 = vst [vmem:[#allocation99_spill] sm:$0xff] %v7612_v58  ;;  %v1120_v45 = vadd.f32 %v1117_v61, %v1024_v20  ;;  %v7628_v0 = vmul.f32 %v5607_v50, %v6481_v47  ;;  %v1404_v59 = vrot.slane %v1400_v11, 2  ;;  %v5613_v20 = vld [vmem:[%s11578_s0 + $0x74] ss:$0 sm:$0xff]  ;;  %v1592_v13 = vmul.f32 %v5607_v50, %v6407_v15  ;;  %v5619_v11 = vld [vmem:[%s11578_s0 + $0x75] ss:$0 sm:$0xff] }
 0x190   :  { %12095 = vst [vmem:[#allocation98_spill] sm:$0xff] %v7605_v51  ;;  %5805 = vst.msk [vmem:[%s11580_s4 + $0x10] sm:$0xff] %vm55_vm3, %v7605_v51  ;;  %v1310_v61 = vsel %vm1275_vm5, %v1308_v52, %v11686_v46  ;;  %v7639_v21 = vmul.f32 %v5613_v20, %v6587_v53  ;;  %v1500_v52 = vrot.slane %v1496_v6, 2  ;;  %v1688_v50 = vmul.f32 %v5613_v20, %v6500_v24  ;;  %v5625_v51 = vld [vmem:[%s11578_s0 + $0x76] ss:$0 sm:$0xff] }
 0x191   :  { %12098 = vst [vmem:[#allocation100_spill] sm:$0xff] %v7628_v0  ;;  %v1216_v42 = vadd.f32 %v1213_v25, %v1120_v45  ;;  %v7645_v25 = vmul.f32 %v5619_v11, %v6686_v39  ;;  %v1406_v26 = vsel %vm1275_vm5, %v1404_v59, %v11691_v63  ;;  %v11693_v46 = vrot.slane %v7628_v0, 2  ;;  %v12103_v59 = vld [vmem:[#allocation2_spill] sm:$0xff] }
 0x192   :  { %12099 = vst [vmem:[#allocation101_spill] sm:$0xff] %v7639_v21  ;;  %v1784_v57 = vmul.f32 %v5619_v11, %v6576_v3  ;;  %v1596_v36 = vrot.slane %v1592_v13, 2  ;;  %v7661_v6 = vmul.f32 %v5625_v51, %v6735_v28  ;;  %v7669_v20 = vsel %vm55_vm3, %v12103_v59, %v7463_v4  ;;  %v157_v63 = vpop.permute.xlu0 %156  ;;  %v5637_v59 = vld [vmem:[%s11578_s0 + $0x78] ss:$0 sm:$0xff] }
 0x193   :  { %v1313_v45 = vadd.f32 %v1310_v61, %v1216_v42  ;;  %12100 = vst [vmem:[#allocation102_spill] sm:$0xff] %v7645_v25  ;;  %v12101_v42 = vrot.slane %v7612_v58, 2  ;;  %12104 = vst [vmem:[#allocation2_spill] sm:$0xff] %v7669_v20  ;;  %v7682_v58 = vsel %vm55_vm3, %v6906_v33, %v7510_v8  ;;  %v7696_v33 = vmul.f32 %v5637_v59, %v6297_v5 }
 0x194   :  { %12102 = vst [vmem:[#allocation103_spill] sm:$0xff] %v7661_v6  ;;  %v1598_v13 = vsel %vm1275_vm5, %v1596_v36, %v11693_v46  ;;  %12106 = vst [vmem:[#allocation105_spill] sm:$0xff] %v7682_v58  ;;  %v5643_v36 = vld [vmem:[%s11578_s0 + $0x79] ss:$0 sm:$0xff]  ;;  %v12197_v30 = vrot.slane %v12196_v32, 2  ;;  %v12201_v32 = vld [vmem:[#allocation27_spill] sm:$0xff] }
 0x195   :  { %v1409_v1 = vadd.f32 %v1406_v26, %v1313_v45  ;;  %v1502_v61 = vsel %vm1275_vm5, %v1500_v52, %v12101_v42  ;;  %v5631_v26 = vld [vmem:[%s11578_s0 + $0x77] ss:$0 sm:$0xff]  ;;  %v11695_v45 = vrot.slane %v7645_v25, 2  ;;  %v1692_v52 = vrot.slane %v1688_v50, 2  ;;  %12108 = vst [vmem:[#allocation106_spill] sm:$0xff] %v7696_v33 }
 0x196   :  { %v1880_v42 = vmul.f32 %v5625_v51, %v6658_v54  ;;  %v7677_v7 = vmul.f32 %v5631_v26, %v6228_v35  ;;  %v12107_v51 = vrot.slane %v7639_v21, 2  ;;  %v7699_v8 = vmul.f32 %v5643_v36, %v6392_v60 }
 0x197   :  { %v1505_v11 = vadd.f32 %v1502_v61, %v1409_v1  ;;  %v1788_v1 = vrot.slane %v1784_v57, 2  ;;  %v1985_v61 = vmul.f32 %v5631_v26, %v6215_v31  ;;  %v12110_v57 = vld [vmem:[#allocation53_spill] sm:$0xff] }
 0x198   :  { %12105 = vst [vmem:[#allocation104_spill] sm:$0xff] %v7677_v7  ;;  %v1694_v50 = vsel %vm1275_vm5, %v1692_v52, %v12107_v51  ;;  %12109 = vst [vmem:[#allocation107_spill] sm:$0xff] %v7699_v8  ;;  %v7704_v26 = vsel %vm55_vm3, %v12110_v57, %v7553_v27  ;;  %v5649_v51 = vld [vmem:[%s11578_s0 + $0x7a] ss:$0 sm:$0xff]  ;;  %v1884_v46 = vrot.slane %v1880_v42, 2  ;;  %v2105_v27 = vmul.f32 %v5637_v59, %v6240_v41  ;;  %v178_v42 = vpop.permute.xlu0 %177 }
 0x199   :  { %v1601_v4 = vadd.f32 %v1598_v13, %v1505_v11  ;;  %v7709_v11 = vsel %vm55_vm3, %v7006_v56, %v7592_v12  ;;  %v1790_v52 = vsel %vm1275_vm5, %v1788_v1, %v11695_v45  ;;  %v2225_v57 = vmul.f32 %v5643_v36, %v6310_v18  ;;  %v5655_v1 = vld [vmem:[%s11578_s0 + $0x7b] ss:$0 sm:$0xff] }
 0x19a   :  { %v7722_v56 = vsel %vm55_vm3, %v7052_v10, %v136_v62  ;;  %v12112_v45 = vrot.slane %v7661_v6, 2  ;;  %v2345_v10 = vmul.f32 %v5649_v51, %v6407_v15  ;;  %v5661_v62 = vld [vmem:[%s11578_s0 + $0x7c] ss:$0 sm:$0xff]  ;;  %v2111_v21 = vrot.slane %v2105_v27, 3 }
 0x19b   :  { %v1697_v13 = vadd.f32 %v1694_v50, %v1601_v4  ;;  %v1991_v4 = vrot.slane %v1985_v61, 3  ;;  %v7725_v50 = vmul.f32 %v5649_v51, %v6481_v47  ;;  %v7741_v61 = vsel %vm55_vm3, %v7100_v48, %v157_v63  ;;  %v5667_v48 = vld [vmem:[%s11578_s0 + $0x7d] ss:$0 sm:$0xff] }
 0x19c   :  { %v1886_v59 = vsel %vm1275_vm5, %v1884_v46, %v12112_v45  ;;  %v7748_v46 = vmul.f32 %v5655_v1, %v6587_v53  ;;  %v12114_v45 = vrot.slane %v7677_v7, 3  ;;  %v2231_v36 = vrot.slane %v2225_v57, 3 }
 0x19d   :  { %v1793_v12 = vadd.f32 %v1790_v52, %v1697_v13  ;;  %12111 = vst [vmem:[#allocation53_spill] sm:$0xff] %v7725_v50  ;;  %v7745_v13 = vsel %vm55_vm3, %v7137_v55, %v178_v42  ;;  %v2465_v6 = vmul.f32 %v5655_v1, %v6500_v24  ;;  %v7760_v42 = vmul.f32 %v5661_v62, %v6686_v39 }
 0x19e   :  { %12113 = vst [vmem:[#allocation108_spill] sm:$0xff] %v7748_v46  ;;  %v1993_v51 = vsel %vm1950_vm6, %v1991_v4, %v12114_v45  ;;  %v5673_v4 = vld [vmem:[%s11578_s0 + $0x7e] ss:$0 sm:$0xff]  ;;  %v12116_v27 = vrot.slane %v7696_v33, 3  ;;  %v12117_v1 = vrot.slane %v7699_v8, 3  ;;  %v7772_v45 = vmul.f32 %v5667_v48, %v6735_v28 }
 0x19f   :  { %v1889_v52 = vadd.f32 %v1886_v59, %v1793_v12  ;;  %v2585_v12 = vmul.f32 %v5661_v62, %v6576_v3  ;;  %12115 = vst [vmem:[#allocation109_spill] sm:$0xff] %v7760_v42  ;;  %v2705_v55 = vmul.f32 %v5667_v48, %v6658_v54  ;;  %v7777_v25 = vmul.f32 %v5673_v4, %v6228_v35 }
 0x1a0   :  { %v2113_v57 = vsel %vm1950_vm6, %v2111_v21, %v12116_v27  ;;  %v2233_v59 = vsel %vm1950_vm6, %v2231_v36, %v12117_v1  ;;  %12118 = vst [vmem:[#allocation110_spill] sm:$0xff] %v7772_v45  ;;  %v5679_v21 = vld [vmem:[%s11578_s0 + $0x7f] ss:$0 sm:$0xff]  ;;  %v5685_v36 = vld [vmem:[%s11578_s0 + $0x80] ss:$0 sm:$0xff]  ;;  %v2826_v27 = vmul.f32 %v5673_v4, %v6215_v31  ;;  %v12122_v1 = vrot.slane %v7725_v50, 3 }
 0x1a1   :  { %v1998_v63 = vadd.f32 %v1993_v51, %v1889_v52  ;;  %v2351_v52 = vrot.slane %v2345_v10, 3  ;;  %12119 = vst [vmem:[#allocation111_spill] sm:$0xff] %v7777_v25  ;;  %v2471_v10 = vrot.slane %v2465_v6, 3  ;;  %v2591_v0 = vrot.slane %v2585_v12, 3  ;;  %v5691_v6 = vld [vmem:[%s11578_s0 + $0x81] ss:$0 sm:$0xff] }
 0x1a2   :  { %v2946_v22 = vmul.f32 %v5679_v21, %v6240_v41  ;;  %v3066_v8 = vmul.f32 %v5685_v36, %v6310_v18  ;;  %v7803_v33 = vmul.f32 %v5691_v6, %v6481_v47  ;;  %v11706_v17 = vrot.slane %v7777_v25, 4 }
 0x1a3   :  { %v2118_v51 = vadd.f32 %v2113_v57, %v1998_v63  ;;  %v7787_v63 = vmul.f32 %v5679_v21, %v6297_v5  ;;  %v7790_v57 = vmul.f32 %v5685_v36, %v6392_v60  ;;  %v2353_v62 = vsel %vm1950_vm6, %v2351_v52, %v12122_v1 }
 0x1a4   :  { %12123 = vst [vmem:[#allocation114_spill] sm:$0xff] %v7803_v33  ;;  %v12124_v52 = vrot.slane %v7748_v46, 3  ;;  %v2711_v1 = vrot.slane %v2705_v55, 3  ;;  %v2832_v4 = vrot.slane %v2826_v27, 4  ;;  %v3186_v50 = vmul.f32 %v5691_v6, %v6407_v15 }
 0x1a5   :  { %12120 = vst [vmem:[#allocation112_spill] sm:$0xff] %v7787_v63  ;;  %12121 = vst [vmem:[#allocation113_spill] sm:$0xff] %v7790_v57  ;;  %v2238_v48 = vadd.f32 %v2233_v59, %v2118_v51  ;;  %v5697_v59 = vld [vmem:[%s11578_s0 + $0x82] ss:$0 sm:$0xff]  ;;  %v12127_v27 = vrot.slane %v7772_v45, 3  ;;  %v2952_v36 = vrot.slane %v2946_v22, 4 }
 0x1a6   :  { %v2473_v51 = vsel %vm1950_vm6, %v2471_v10, %v12124_v52  ;;  %v3306_v55 = vmul.f32 %v5697_v59, %v6500_v24  ;;  %v7823_v10 = vmul.f32 %v5697_v59, %v6587_v53  ;;  %v3072_v6 = vrot.slane %v3066_v8, 4  ;;  %v5715_v22 = vld [vmem:[%s11578_s0 + $0x85] ss:$0 sm:$0xff] }
 0x1a7   :  { %v2358_v12 = vadd.f32 %v2353_v62, %v2238_v48  ;;  %v12125_v62 = vrot.slane %v7760_v42, 3  ;;  %v2713_v52 = vsel %vm1950_vm6, %v2711_v1, %v12127_v27  ;;  %v3426_v59 = vmul.f32 %v5703_v23, %v6576_v3 }
 0x1a8   :  { %12126 = vst [vmem:[#allocation115_spill] sm:$0xff] %v7823_v10  ;;  %v12129_v8 = vrot.slane %v7787_v63, 4  ;;  %v12130_v27 = vrot.slane %v7790_v57, 4  ;;  %v3312_v21 = vrot.slane %v3306_v55, 4  ;;  %v5721_v63 = vld [vmem:[%s11578_s0 + $0x86] ss:$0 sm:$0xff]  ;;  %v7864_v55 = vmul.f32 %v5715_v22, %v6228_v35 }
 0x1a9   :  { %v2478_v7 = vadd.f32 %v2473_v51, %v2358_v12  ;;  %v2593_v48 = vsel %vm1950_vm6, %v2591_v0, %v12125_v62  ;;  %v5709_v12 = vld [vmem:[%s11578_s0 + $0x84] ss:$0 sm:$0xff]  ;;  %v2834_v0 = vsel %vm2791_vm7, %v2832_v4, %v11706_v17  ;;  %v7837_v62 = vmul.f32 %v5703_v23, %v6686_v39 }
 0x1aa   :  { %v2954_v1 = vsel %vm2791_vm7, %v2952_v36, %v12129_v8  ;;  %v7849_v4 = vmul.f32 %v5709_v12, %v6735_v28  ;;  %v3546_v25 = vmul.f32 %v5709_v12, %v6658_v54  ;;  %v5727_v36 = vld [vmem:[%s11578_s0 + $0x87] ss:$0 sm:$0xff]  ;;  %v3667_v8 = vmul.f32 %v5715_v22, %v6215_v31  ;;  %12133 = vst [vmem:[#allocation118_spill] sm:$0xff] %v7864_v55 }
 0x1ab   :  { %v2598_v51 = vadd.f32 %v2593_v48, %v2478_v7  ;;  %12128 = vst [vmem:[#allocation116_spill] sm:$0xff] %v7837_v62  ;;  %v3074_v7 = vsel %vm2791_vm7, %v3072_v6, %v12130_v27  ;;  %v3192_v48 = vrot.slane %v3186_v50, 4  ;;  %v12132_v6 = vrot.slane %v7803_v33, 4  ;;  %v5733_v33 = vld [vmem:[%s11578_s0 + $0x88] ss:$0 sm:$0xff] }
 0x1ac   :  { %12131 = vst [vmem:[#allocation117_spill] sm:$0xff] %v7849_v4  ;;  %v7871_v23 = vmul.f32 %v5727_v36, %v6392_v60  ;;  %v3907_v22 = vmul.f32 %v5727_v36, %v6310_v18  ;;  %v7880_v57 = vmul.f32 %v5733_v33, %v6481_v47  ;;  %v3552_v45 = vrot.slane %v3546_v25, 4 }
 0x1ad   :  { %v2718_v17 = vadd.f32 %v2713_v52, %v2598_v51  ;;  %v3194_v50 = vsel %vm2791_vm7, %v3192_v48, %v12132_v6  ;;  %v7867_v52 = vmul.f32 %v5721_v63, %v6297_v5  ;;  %v3432_v51 = vrot.slane %v3426_v59, 4 }
 0x1ae   :  { %12135 = vst [vmem:[#allocation120_spill] sm:$0xff] %v7871_v23  ;;  %v3787_v6 = vmul.f32 %v5721_v63, %v6240_v41  ;;  %12136 = vst [vmem:[#allocation121_spill] sm:$0xff] %v7880_v57  ;;  %v12137_v59 = vrot.slane %v7823_v10, 4  ;;  %v3673_v48 = vrot.slane %v3667_v8, 5  ;;  %v4027_v46 = vmul.f32 %v5733_v33, %v6407_v15 }
 0x1af   :  { %12134 = vst [vmem:[#allocation119_spill] sm:$0xff] %v7867_v52  ;;  %v2839_v12 = vadd.f32 %v2834_v0, %v2718_v17  ;;  %v5739_v17 = vld [vmem:[%s11578_s0 + $0x89] ss:$0 sm:$0xff]  ;;  %v11719_v25 = vrot.slane %v7871_v23, 5  ;;  %v12140_v8 = vrot.slane %v7849_v4, 4  ;;  %v3913_v10 = vrot.slane %v3907_v22, 5 }
 0x1b0   :  { %v3314_v27 = vsel %vm2791_vm7, %v3312_v21, %v12137_v59  ;;  %v7889_v42 = vmul.f32 %v5739_v17, %v6587_v53  ;;  %v4147_v59 = vmul.f32 %v5739_v17, %v6500_v24  ;;  %v3793_v36 = vrot.slane %v3787_v6, 5 }
 0x1b1   :  { %v2959_v0 = vadd.f32 %v2954_v1, %v2839_v12  ;;  %v12139_v12 = vrot.slane %v7837_v62, 4  ;;  %v3554_v63 = vsel %vm2791_vm7, %v3552_v45, %v12140_v8  ;;  %v5757_v45 = vld [vmem:[%s11578_s0 + $0x8c] ss:$0 sm:$0xff]  ;;  %v12142_v6 = vrot.slane %v7864_v55, 5 }
 0x1b2   :  { %12138 = vst [vmem:[#allocation122_spill] sm:$0xff] %v7889_v42  ;;  %v12143_v17 = vrot.slane %v7867_v52, 5  ;;  %v4153_v33 = vrot.slane %v4147_v59, 5  ;;  %v12145_v55 = vrot.slane %v7880_v57, 5  ;;  %v7951_v57 = vmul.f32 %v5757_v45, %v6228_v35 }
 0x1b3   :  { %v3079_v1 = vadd.f32 %v3074_v7, %v2959_v0  ;;  %v3434_v21 = vsel %vm2791_vm7, %v3432_v51, %v12139_v12  ;;  %v5751_v7 = vld [vmem:[%s11578_s0 + $0x8b] ss:$0 sm:$0xff]  ;;  %v4267_v51 = vmul.f32 %v5745_v40, %v6576_v3  ;;  %v7912_v12 = vmul.f32 %v5745_v40, %v6686_v39 }
 0x1b4   :  { %v3675_v22 = vsel %vm3632_vm8, %v3673_v48, %v12142_v6  ;;  %v3795_v8 = vsel %vm3632_vm8, %v3793_v36, %v12143_v17  ;;  %v3915_v40 = vsel %vm3632_vm8, %v3913_v10, %v11719_v25  ;;  %v4387_v4 = vmul.f32 %v5751_v7, %v6658_v54  ;;  %v5857_v10 = vld [vmem:[%s11578_s0 + $0x1] ss:$0 sm:$0xff]  ;;  %12147 = vst [vmem:[#allocation125_spill] sm:$0xff] %v7951_v57 }
 0x1b5   :  { %v3199_v0 = vadd.f32 %v3194_v50, %v3079_v1  ;;  %12141 = vst [vmem:[#allocation123_spill] sm:$0xff] %v7912_v12  ;;  %v4033_v50 = vrot.slane %v4027_v46, 5  ;;  %v7924_v1 = vmul.f32 %v5751_v7, %v6735_v28  ;;  %v4507_v6 = vmul.f32 %v5757_v45, %v6215_v31  ;;  %v5763_v46 = vld [vmem:[%s11578_s0 + $0x8d] ss:$0 sm:$0xff] }
 0x1b6   :  { %v275_v59 = vmul.f32 %v5857_v10, %v6297_v5  ;;  %v4273_v17 = vrot.slane %v4267_v51, 5  ;;  %v4627_v45 = vmul.f32 %v5763_v46, %v6240_v41  ;;  %v7965_v25 = vmul.f32 %v5763_v46, %v6297_v5 }
 0x1b7   :  { %12144 = vst [vmem:[#allocation124_spill] sm:$0xff] %v7924_v1  ;;  %v3319_v62 = vadd.f32 %v3314_v27, %v3199_v0  ;;  %v4035_v48 = vsel %vm3632_vm8, %v4033_v50, %v12145_v55  ;;  %v5856_v27 = vld [vmem:[%s11578_s0] ss:$0 sm:$0xff]  ;;  %v12146_v55 = vrot.slane %v7889_v42, 5  ;;  %v4513_v50 = vrot.slane %v4507_v6, 6 }
 0x1b8   :  { %v221_v36 = vmul.f32 %v5856_v27, %v6228_v35  ;;  %v5769_v27 = vld [vmem:[%s11578_s0 + $0x8e] ss:$0 sm:$0xff]  ;;  %12148 = vst [vmem:[#allocation126_spill] sm:$0xff] %v7965_v25 }
 0x1b9   :  { %v3439_v7 = vadd.f32 %v3434_v21, %v3319_v62  ;;  %v4155_v0 = vsel %vm3632_vm8, %v4153_v33, %v12146_v55  ;;  %v5858_v62 = vld [vmem:[%s11579_s1] ss:$0 sm:$0xff]  ;;  %v5859_v33 = vld [vmem:[%s11578_s0 + $0x2] ss:$0 sm:$0xff]  ;;  %v4393_v55 = vrot.slane %v4387_v4, 5  ;;  %v7968_v42 = vmul.f32 %v5769_v27, %v6392_v60 }
 0x1ba   :  { %v223_v21 = vadd.f32 %v5858_v62, %v221_v36  ;;  %v329_v51 = vmul.f32 %v5859_v33, %v6392_v60  ;;  %v5775_v36 = vld [vmem:[%s11578_s0 + $0x8f] ss:$0 sm:$0xff]  ;;  %v5860_v33 = vld [vmem:[%s11578_s0 + $0x3] ss:$0 sm:$0xff]  ;;  %v4747_v6 = vmul.f32 %v5769_v27, %v6310_v18 }
 0x1bb   :  { %v3559_v10 = vadd.f32 %v3554_v63, %v3439_v7  ;;  %12149 = vst [vmem:[#allocation127_spill] sm:$0xff] %v7968_v42  ;;  %v383_v4 = vmul.f32 %v5860_v33, %v6481_v47  ;;  %v12150_v7 = vrot.slane %v7912_v12, 5  ;;  %v7982_v23 = vmul.f32 %v5775_v36, %v6481_v47 }
 0x1bc   :  { %v277_v62 = vadd.f32 %v275_v59, %v223_v21  ;;  %v5781_v59 = vld [vmem:[%s11578_s0 + $0x90] ss:$0 sm:$0xff]  ;;  %v12152_v21 = vrot.slane %v7924_v1, 5  ;;  %v11729_v33 = vrot.slane %v7951_v57, 6  ;;  %v4867_v37 = vmul.f32 %v5775_v36, %v6407_v15  ;;  %v5787_v1 = vld [vmem:[%s11578_s0 + $0x91] ss:$0 sm:$0xff] }
 0x1bd   :  { %v3680_v63 = vadd.f32 %v3675_v22, %v3559_v10  ;;  %v4275_v46 = vsel %vm3632_vm8, %v4273_v17, %v12150_v7  ;;  %12151 = vst [vmem:[#allocation128_spill] sm:$0xff] %v7982_v23  ;;  %v5861_v17 = vld [vmem:[%s11578_s0 + $0x4] ss:$0 sm:$0xff]  ;;  %v4633_v7 = vrot.slane %v4627_v45, 6  ;;  %v8008_v36 = vmul.f32 %v5781_v59, %v6587_v53 }
 0x1be   :  { %v4395_v52 = vsel %vm3632_vm8, %v4393_v55, %v12152_v21  ;;  %v331_v22 = vadd.f32 %v329_v51, %v277_v62  ;;  %v437_v27 = vmul.f32 %v5861_v17, %v6587_v53  ;;  %v4987_v51 = vmul.f32 %v5781_v59, %v6500_v24  ;;  %v5862_v21 = vld [vmem:[%s11578_s0 + $0x5] ss:$0 sm:$0xff] }
 0x1bf   :  { %v3800_v10 = vadd.f32 %v3795_v8, %v3680_v63  ;;  %v491_v8 = vmul.f32 %v5862_v21, %v6686_v39  ;;  %v4753_v63 = vrot.slane %v4747_v6, 6  ;;  %12153 = vst [vmem:[#allocation129_spill] sm:$0xff] %v8008_v36  ;;  %v5107_v12 = vmul.f32 %v5787_v1, %v6576_v3 }
 0x1c0   :  { %v385_v62 = vadd.f32 %v383_v4, %v331_v22  ;;  %v8012_v55 = vmul.f32 %v5787_v1, %v6686_v39  ;;  %v5793_v4 = vld [vmem:[%s11578_s0 + $0x92] ss:$0 sm:$0xff]  ;;  %v4515_v59 = vsel %vm35_vm2, %v4513_v50, %v11729_v33  ;;  %v12155_v21 = vrot.slane %v7965_v25, 6 }
 0x1c1   :  { %v3920_v45 = vadd.f32 %v3915_v40, %v3800_v10  ;;  %v5863_v40 = vld [vmem:[%s11578_s0 + $0x6] ss:$0 sm:$0xff]  ;;  %v4873_v17 = vrot.slane %v4867_v37, 6  ;;  %v4993_v49 = vrot.slane %v4987_v51, 6  ;;  %v12158_v50 = vrot.slane %v7982_v23, 6 }
 0x1c2   :  { %12154 = vst [vmem:[#allocation130_spill] sm:$0xff] %v8012_v55  ;;  %v439_v22 = vadd.f32 %v437_v27, %v385_v62  ;;  %v545_v6 = vmul.f32 %v5863_v40, %v6735_v28  ;;  %v4635_v1 = vsel %vm35_vm2, %v4633_v7, %v12155_v21  ;;  %v5809_v27 = vld [vmem:[%s11577_s3 + $0x20] sm:$0xff]  ;;  %v12156_v62 = vrot.slane %v7968_v42, 6  ;;  %v5374_v21 = vpop.permute.xlu1 %5373  ;;  %v5864_v51 = vld [vmem:[%s11578_s0 + $0x15] ss:$0 sm:$0xff] }
 0x1c3   :  { %v4040_v10 = vadd.f32 %v4035_v48, %v3920_v45  ;;  %v8034_v48 = vmul.f32 %v5793_v4, %v6735_v28  ;;  %v4875_v33 = vsel %vm35_vm2, %v4873_v17, %v12158_v50  ;;  %v11733_v37 = vrot.slane %v8008_v36, 6  ;;  %v5865_v17 = vld [vmem:[%s11578_s0 + $0x16] ss:$0 sm:$0xff] }
 0x1c4   :  { %v4755_v44 = vsel %vm35_vm2, %v4753_v63, %v12156_v62  ;;  %v493_v45 = vadd.f32 %v491_v8, %v439_v22  ;;  %v5227_v7 = vmul.f32 %v5793_v4, %v6658_v54  ;;  %v5113_v25 = vrot.slane %v5107_v12, 6  ;;  %v5866_v12 = vld [vmem:[%s11578_s0 + $0x17] ss:$0 sm:$0xff] }
 0x1c5   :  { %12157 = vst [vmem:[#allocation131_spill] sm:$0xff] %v8034_v48  ;;  %v4160_v40 = vadd.f32 %v4155_v0, %v4040_v10  ;;  %v11735_v42 = vrot.slane %v8012_v55, 6  ;;  %v1946_v8 = vmul.f32 %v5864_v51, %v7669_v20  ;;  %v8047_v63 = vsel %vm55_vm3, %v5809_v27, %v5374_v21  ;;  %v12159_v10 = vld [vmem:[#allocation3_spill] sm:$0xff]  ;;  %v5867_v27 = vld [vmem:[%s11578_s0 + $0x18] ss:$0 sm:$0xff] }
 0x1c6   :  { %v547_v57 = vadd.f32 %v545_v6, %v493_v45  ;;  %v2067_v4 = vmul.f32 %v5865_v17, %v7682_v58  ;;  %v2187_v22 = vmul.f32 %v5866_v12, %v7704_v26  ;;  %v12160_v62 = vrot.slane %v12159_v10, 1 }
 0x1c7   :  { %v4280_v0 = vadd.f32 %v4275_v46, %v4160_v40  ;;  %v2307_v45 = vmul.f32 %v5867_v27, %v7709_v11  ;;  %v5868_v40 = vld [vmem:[%s11578_s0 + $0x19] ss:$0 sm:$0xff]  ;;  %v4995_v51 = vsel %vm35_vm2, %v4993_v49, %v11733_v37  ;;  %v5233_v17 = vrot.slane %v5227_v7, 6 }
 0x1c8   :  { %v609_v46 = vadd.f32 %v12160_v62, %v547_v57  ;;  %v2427_v50 = vmul.f32 %v5868_v40, %v7722_v56  ;;  %v5869_v57 = vld [vmem:[%s11578_s0 + $0x1a] ss:$0 sm:$0xff]  ;;  %v5115_v10 = vsel %vm35_vm2, %v5113_v25, %v11735_v42  ;;  %v12161_v62 = vld [vmem:[#allocation7_spill] sm:$0xff]  ;;  %v1954_v40 = vrot.slane %v1946_v8, 3 }
 0x1c9   :  { %v4400_v21 = vadd.f32 %v4395_v52, %v4280_v0  ;;  %v2547_v12 = vmul.f32 %v5869_v57, %v7741_v61  ;;  %v12162_v27 = vrot.slane %v12161_v62, 1  ;;  %v5870_v52 = vld [vmem:[%s11578_s0 + $0x1b] ss:$0 sm:$0xff]  ;;  %v2074_v0 = vrot.slane %v2067_v4, 3  ;;  %v5871_v57 = vld [vmem:[%s11578_s0 + $0x1c] ss:$0 sm:$0xff] }
 0x1ca   :  { %v2667_v49 = vmul.f32 %v5870_v52, %v7745_v13  ;;  %v2194_v37 = vrot.slane %v2187_v22, 3  ;;  %v2787_v55 = vmul.f32 %v5871_v57, %v7669_v20  ;;  %v12163_v25 = vrot.slane %v8034_v48, 6  ;;  %v12164_v8 = vld [vmem:[#allocation13_spill] sm:$0xff] }
 0x1cb   :  { %v705_v6 = vadd.f32 %v12162_v27, %v609_v46  ;;  %v4520_v7 = vadd.f32 %v4515_v59, %v4400_v21  ;;  %v12165_v62 = vrot.slane %v12164_v8, 1  ;;  %v2314_v42 = vrot.slane %v2307_v45, 3  ;;  %v5872_v59 = vld [vmem:[%s11578_s0 + $0x1d] ss:$0 sm:$0xff]  ;;  %v5873_v22 = vld [vmem:[%s11578_s0 + $0x1e] ss:$0 sm:$0xff] }
 0x1cc   :  { %v5235_v46 = vsel %vm35_vm2, %v5233_v17, %v12163_v25  ;;  %v2434_v36 = vrot.slane %v2427_v50, 3  ;;  %v2554_v52 = vrot.slane %v2547_v12, 3  ;;  %v2908_v4 = vmul.f32 %v5872_v59, %v7682_v58  ;;  %v12166_v17 = vld [vmem:[#allocation21_spill] sm:$0xff] }
 0x1cd   :  { %v801_v27 = vadd.f32 %v12165_v62, %v705_v6  ;;  %v4640_v23 = vadd.f32 %v4635_v1, %v4520_v7  ;;  %v3028_v21 = vmul.f32 %v5873_v22, %v7704_v26  ;;  %v12167_v57 = vrot.slane %v12166_v17, 1  ;;  %v12168_v6 = vld [vmem:[#allocation5_spill] sm:$0xff]  ;;  %v12170_v62 = vld [vmem:[#allocation10_spill] sm:$0xff] }
 0x1ce   :  { %v12169_v45 = vrot.slane %v12168_v6, 3  ;;  %v2674_v50 = vrot.slane %v2667_v49, 3  ;;  %v5874_v12 = vld [vmem:[%s11578_s0 + $0x1f] ss:$0 sm:$0xff]  ;;  %v12171_v59 = vrot.slane %v12170_v62, 3 }
 0x1cf   :  { %v897_v25 = vadd.f32 %v12167_v57, %v801_v27  ;;  %v3148_v7 = vmul.f32 %v5874_v12, %v7709_v11  ;;  %v4760_v8 = vadd.f32 %v4755_v44, %v4640_v23  ;;  %v12172_v17 = vld [vmem:[#allocation17_spill] sm:$0xff] }
 0x1d0   :  { %v8106_v1 = vsel %vm1950_vm6, %v12169_v45, %v1954_v40  ;;  %v8115_v22 = vsel %vm1950_vm6, %v12171_v59, %v2074_v0  ;;  %v12173_v27 = vrot.slane %v12172_v17, 3  ;;  %v2795_v40 = vrot.slane %v2787_v55, 4  ;;  %v12174_v6 = vld [vmem:[#allocation29_spill] sm:$0xff]  ;;  %v5875_v0 = vld [vmem:[%s11578_s0 + $0x20] ss:$0 sm:$0xff] }
 0x1d1   :  { %v12175_v49 = vrot.slane %v12174_v6, 1  ;;  %v12176_v48 = vld [vmem:[#allocation25_spill] sm:$0xff]  ;;  %v4880_v55 = vadd.f32 %v4875_v33, %v4760_v8  ;;  %v12184_v6 = vld [vmem:[#allocation44_spill] sm:$0xff]  ;;  %v5876_v33 = vld [vmem:[%s11578_s0 + $0x21] ss:$0 sm:$0xff] }
 0x1d2   :  { %v8120_v57 = vsel %vm1950_vm6, %v12173_v27, %v2194_v37  ;;  %v12177_v38 = vrot.slane %v12176_v48, 3  ;;  %v12178_v44 = vld [vmem:[#allocation33_spill] sm:$0xff]  ;;  %v3268_v37 = vmul.f32 %v5875_v0, %v7722_v56  ;;  %v2915_v48 = vrot.slane %v2908_v4, 4  ;;  %v5878_v0 = vld [vmem:[%s11578_s0 + $0x23] ss:$0 sm:$0xff] }
 0x1d3   :  { %v993_v45 = vadd.f32 %v12175_v49, %v897_v25  ;;  %v12179_v23 = vrot.slane %v12178_v44, 3  ;;  %v12180_v62 = vld [vmem:[#allocation37_spill] sm:$0xff]  ;;  %v3155_v44 = vrot.slane %v3148_v7, 4  ;;  %v3388_v8 = vmul.f32 %v5876_v33, %v7741_v61 }
 0x1d4   :  { %v8127_v2 = vsel %vm1950_vm6, %v12177_v38, %v2314_v42  ;;  %v12181_v59 = vrot.slane %v12180_v62, 3  ;;  %v3035_v38 = vrot.slane %v3028_v21, 4  ;;  %v12182_v42 = vld [vmem:[#allocation35_spill] sm:$0xff]  ;;  %v5000_v4 = vadd.f32 %v4995_v51, %v4880_v55  ;;  %v12186_v21 = vld [vmem:[#allocation6_spill] sm:$0xff]  ;;  %v5512_v51 = vld [vmem:[%s11578_s0 + $0x94] ss:$0 sm:$0xff] }
 0x1d5   :  { %v8132_v12 = vsel %vm1950_vm6, %v12179_v23, %v2434_v36  ;;  %v12183_v17 = vrot.slane %v12182_v42, 1  ;;  %v12185_v36 = vrot.slane %v12184_v6, 3  ;;  %v12187_v23 = vrot.slane %v12186_v21, 4  ;;  %v12188_v55 = vld [vmem:[#allocation39_spill] sm:$0xff]  ;;  %v5500_v21 = vld [vmem:[%s11579_s1 + $0x3] ss:$0 sm:$0xff] }
 0x1d6   :  { %v8141_v25 = vsel %vm1950_vm6, %v12181_v59, %v2554_v52  ;;  %v5506_v52 = vld [vmem:[%s11578_s0 + $0x93] ss:$0 sm:$0xff]  ;;  %v3628_v62 = vmul.f32 %v5878_v0, %v7669_v20  ;;  %v12189_v59 = vrot.slane %v12188_v55, 1  ;;  %v3275_v42 = vrot.slane %v3268_v37, 4  ;;  %v5881_v0 = vld [vmem:[%s11578_s0 + $0x26] ss:$0 sm:$0xff] }
 0x1d7   :  { %v1089_v27 = vadd.f32 %v12183_v17, %v993_v45  ;;  %v8148_v49 = vsel %vm1950_vm6, %v12185_v36, %v2674_v50  ;;  %v8160_v45 = vsel %vm2791_vm7, %v12187_v23, %v2795_v40  ;;  %v5877_v50 = vld [vmem:[%s11578_s0 + $0x22] ss:$0 sm:$0xff]  ;;  %v5879_v17 = vld [vmem:[%s11578_s0 + $0x24] ss:$0 sm:$0xff]  ;;  %v5880_v36 = vld [vmem:[%s11578_s0 + $0x25] ss:$0 sm:$0xff]  ;;  %v5120_v23 = vadd.f32 %v5115_v10, %v5000_v4 }
 0x1d8   :  { %v3508_v7 = vmul.f32 %v5877_v50, %v7745_v13  ;;  %v3749_v6 = vmul.f32 %v5879_v17, %v7682_v58  ;;  %v3869_v33 = vmul.f32 %v5880_v36, %v7704_v26  ;;  %v12190_v50 = vld [vmem:[#allocation12_spill] sm:$0xff]  ;;  %v3989_v55 = vmul.f32 %v5881_v0, %v7709_v11  ;;  %v12194_v4 = vld [vmem:[#allocation18_spill] sm:$0xff] }
 0x1d9   :  { %v1185_v40 = vadd.f32 %v12189_v59, %v1089_v27  ;;  %v12191_v27 = vrot.slane %v12190_v50, 4  ;;  %v247_v59 = vmul.f32 %v5506_v52, %v6215_v31  ;;  %v5518_v17 = vld [vmem:[%s11578_s0 + $0x95] ss:$0 sm:$0xff]  ;;  %v12195_v50 = vrot.slane %v12194_v4, 4  ;;  %v5524_v0 = vld [vmem:[%s11578_s0 + $0x96] ss:$0 sm:$0xff] }
 0x1da   :  { %v12192_v36 = vld [vmem:[#allocation4_spill] sm:$0xff]  ;;  %v301_v29 = vmul.f32 %v5512_v51, %v6240_v41  ;;  %v5240_v52 = vadd.f32 %v5235_v46, %v5120_v23  ;;  %v3515_v43 = vrot.slane %v3508_v7, 4  ;;  %v3636_v19 = vrot.slane %v3628_v62, 5  ;;  %v12199_v7 = vld [vmem:[#allocation14_spill] sm:$0xff] }
 0x1db   :  { %v8189_v37 = vsel %vm2791_vm7, %v12191_v27, %v2915_v48  ;;  %v12193_v14 = vrot.slane %v12192_v36, 2  ;;  %v8204_v48 = vsel %vm2791_vm7, %v12195_v50, %v3035_v38  ;;  %v3395_v27 = vrot.slane %v3388_v8, 4  ;;  %v5530_v38 = vld [vmem:[%s11578_s0 + $0x97] ss:$0 sm:$0xff] }
 0x1dc   :  { %v249_v16 = vadd.f32 %v5500_v21, %v247_v59  ;;  %v355_v4 = vmul.f32 %v5518_v17, %v6310_v18  ;;  %v8217_v8 = vadd.f32 %v8047_v63, %v5240_v52  ;;  %v3996_v51 = vrot.slane %v3989_v55, 5  ;;  %v12205_v17 = vld [vmem:[#allocation40_spill] sm:$0xff] }
 0x1dd   :  { %v1282_v10 = vadd.f32 %v12193_v14, %v1185_v40  ;;  %v3756_v14 = vrot.slane %v3749_v6, 5  ;;  %v3876_v40 = vrot.slane %v3869_v33, 5  ;;  %v409_v46 = vmul.f32 %v5524_v0, %v6407_v15  ;;  %v12203_v33 = vld [vmem:[#allocation34_spill] sm:$0xff] }
 0x1de   :  { %12198 = vst [vmem:[#allocation3_spill] sm:$0xff] %v8217_v8  ;;  %v303_v50 = vadd.f32 %v301_v29, %v249_v16  ;;  %v12200_v62 = vrot.slane %v12199_v7, 2  ;;  %v12204_v23 = vrot.slane %v12203_v33, 4  ;;  %v12206_v63 = vrot.slane %v12205_v17, 4  ;;  %v5536_v16 = vld [vmem:[%s11578_s0 + $0x98] ss:$0 sm:$0xff] }
 0x1df   :  { %v1378_v36 = vadd.f32 %v12197_v30, %v1282_v10  ;;  %v12202_v30 = vrot.slane %v12201_v32, 4  ;;  %5813 = vst.msk [vmem:[%s11580_s4 + $0x20] sm:$0xff] %vm55_vm3, %v8217_v8  ;;  %v12207_v29 = vld [vmem:[#allocation45_spill] sm:$0xff]  ;;  %v12213_v33 = vld [vmem:[#allocation16_spill] sm:$0xff] }
 0x1e0   :  { %v8230_v59 = vsel %vm2791_vm7, %v12204_v23, %v3275_v42  ;;  %v8235_v55 = vsel %vm2791_vm7, %v12206_v63, %v3395_v27  ;;  %v12209_v10 = vld [vmem:[#allocation9_spill] sm:$0xff]  ;;  %v357_v52 = vadd.f32 %v355_v4, %v303_v50  ;;  %v12214_v23 = vrot.slane %v12213_v33, 5  ;;  %v12215_v17 = vld [vmem:[#allocation24_spill] sm:$0xff] }
 0x1e1   :  { %v1474_v21 = vadd.f32 %v12200_v62, %v1378_v36  ;;  %v8225_v6 = vsel %vm2791_vm7, %v12202_v30, %v3155_v44  ;;  %v12208_v44 = vrot.slane %v12207_v29, 4  ;;  %v12210_v0 = vrot.slane %v12209_v10, 5  ;;  %v5548_v7 = vld [vmem:[%s11578_s0 + $0x9a] ss:$0 sm:$0xff]  ;;  %v12211_v62 = vld [vmem:[#allocation22_spill] sm:$0xff] }
 0x1e2   :  { %v463_v36 = vmul.f32 %v5530_v38, %v6500_v24  ;;  %v12212_v32 = vrot.slane %v12211_v62, 2  ;;  %v12216_v63 = vrot.slane %v12215_v17, 5  ;;  %v5542_v4 = vld [vmem:[%s11578_s0 + $0x99] ss:$0 sm:$0xff]  ;;  %v8275_v38 = vmul.f32 %v5548_v7, %v6228_v35  ;;  %v5554_v50 = vld [vmem:[%s11578_s0 + $0x9b] ss:$0 sm:$0xff] }
 0x1e3   :  { %v8248_v42 = vsel %vm2791_vm7, %v12208_v44, %v3515_v43  ;;  %v8253_v27 = vsel %vm3632_vm8, %v12210_v0, %v3636_v19  ;;  %v8264_v43 = vsel %vm3632_vm8, %v12214_v23, %v3756_v14  ;;  %v411_v10 = vadd.f32 %v409_v46, %v357_v52  ;;  %v12220_v62 = vld [vmem:[#allocation30_spill] sm:$0xff]  ;;  %v5883_v23 = vld [vmem:[%s11578_s0 + $0x28] ss:$0 sm:$0xff]  ;;  %v5560_v46 = vld [vmem:[%s11578_s0 + $0x9c] ss:$0 sm:$0xff] }
 0x1e4   :  { %v1570_v30 = vadd.f32 %v12212_v32, %v1474_v21  ;;  %v8269_v19 = vsel %vm3632_vm8, %v12216_v63, %v3876_v40  ;;  %12217 = vst [vmem:[#allocation7_spill] sm:$0xff] %v8275_v38  ;;  %v12218_v21 = vld [vmem:[#allocation32_spill] sm:$0xff]  ;;  %v5882_v40 = vld [vmem:[%s11578_s0 + $0x27] ss:$0 sm:$0xff]  ;;  %v517_v0 = vmul.f32 %v5536_v16, %v6576_v3  ;;  %v12221_v32 = vrot.slane %v12220_v62, 2 }
 0x1e5   :  { %v12219_v29 = vrot.slane %v12218_v21, 5  ;;  %v8289_v44 = vmul.f32 %v5882_v40, %v7722_v56  ;;  %v647_v17 = vmul.f32 %v5548_v7, %v6215_v31  ;;  %v8302_v63 = vmul.f32 %v5554_v50, %v6297_v5  ;;  %v5884_v7 = vld [vmem:[%s11578_s0 + $0x29] ss:$0 sm:$0xff] }
 0x1e6   :  { %v1666_v33 = vadd.f32 %v12221_v32, %v1570_v30  ;;  %v465_v16 = vadd.f32 %v463_v36, %v411_v10  ;;  %v571_v52 = vmul.f32 %v5542_v4, %v6658_v54  ;;  %v743_v30 = vmul.f32 %v5554_v50, %v6240_v41  ;;  %v5885_v36 = vld [vmem:[%s11578_s0 + $0x2a] ss:$0 sm:$0xff] }
 0x1e7   :  { %v8283_v14 = vsel %vm3632_vm8, %v12219_v29, %v3996_v51  ;;  %v8298_v51 = vmul.f32 %v5883_v23, %v7741_v61  ;;  %12222 = vst [vmem:[#allocation13_spill] sm:$0xff] %v8302_v63  ;;  %v8310_v21 = vmul.f32 %v5560_v46, %v6392_v60  ;;  %v12224_v29 = vld [vmem:[#allocation36_spill] sm:$0xff]  ;;  %v8318_v32 = vmul.f32 %v5884_v7, %v7745_v13  ;;  %v5566_v7 = vld [vmem:[%s11578_s0 + $0x9d] ss:$0 sm:$0xff] }
 0x1e8   :  { %v12225_v40 = vrot.slane %v12224_v29, 2  ;;  %v8324_v4 = vmul.f32 %v5885_v36, %v7669_v20  ;;  %v4116_v10 = vrot.slane %v8289_v44, 5  ;;  %v519_v29 = vadd.f32 %v517_v0, %v465_v16  ;;  %v12226_v36 = vld [vmem:[#allocation43_spill] sm:$0xff]  ;;  %v5578_v44 = vld [vmem:[%s11578_s0 + $0x9f] ss:$0 sm:$0xff] }
 0x1e9   :  { %12223 = vst [vmem:[#allocation21_spill] sm:$0xff] %v8310_v21  ;;  %v12227_v8 = vrot.slane %v12226_v36, 2  ;;  %v651_v50 = vrot.slane %v647_v17, 1  ;;  %v8342_v9 = vmul.f32 %v5566_v7, %v6481_v47  ;;  %v4236_v0 = vrot.slane %v8298_v51, 5  ;;  %v5887_v51 = vld [vmem:[%s11578_s0 + $0x2c] ss:$0 sm:$0xff] }
 0x1ea   :  { %v1762_v62 = vadd.f32 %v12225_v40, %v1666_v33  ;;  %v5886_v33 = vld [vmem:[%s11578_s0 + $0x2b] ss:$0 sm:$0xff]  ;;  %v839_v40 = vmul.f32 %v5560_v46, %v6310_v18  ;;  %v573_v46 = vadd.f32 %v571_v52, %v519_v29  ;;  %v747_v16 = vrot.slane %v743_v30, 1 }
 0x1eb   :  { %v8332_v23 = vmul.f32 %v5886_v33, %v7682_v58  ;;  %12228 = vst [vmem:[#allocation5_spill] sm:$0xff] %v8342_v9  ;;  %v5572_v33 = vld [vmem:[%s11578_s0 + $0x9e] ss:$0 sm:$0xff]  ;;  %v8364_v52 = vmul.f32 %v5887_v51, %v7704_v26  ;;  %v12231_v29 = vrot.slane %v8302_v63, 1  ;;  %v8373_v58 = vmul.f32 %v5578_v44, %v6686_v39  ;;  %v5584_v51 = vld [vmem:[%s11578_s0 + $0xa0] ss:$0 sm:$0xff] }
 0x1ec   :  { %v1858_v20 = vadd.f32 %v12227_v8, %v1762_v62  ;;  %v12229_v8 = vrot.slane %v8275_v38, 1  ;;  %v935_v62 = vmul.f32 %v5566_v7, %v6407_v15  ;;  %v8355_v36 = vmul.f32 %v5572_v33, %v6587_v53  ;;  %v5590_v63 = vld [vmem:[%s11578_s0 + $0xa1] ss:$0 sm:$0xff] }
 0x1ed   :  { %v1031_v30 = vmul.f32 %v5572_v33, %v6500_v24  ;;  %v749_v7 = vsel %vm602_vm4, %v747_v16, %v12231_v29  ;;  %12232 = vst [vmem:[#allocation17_spill] sm:$0xff] %v8373_v58  ;;  %v12233_v33 = vrot.slane %v8310_v21, 1  ;;  %v5596_v29 = vld [vmem:[%s11578_s0 + $0xa2] ss:$0 sm:$0xff]  ;;  %v5919_v21 = vld [vmem:[%s11578_s0 + $0x59] ss:$0 sm:$0xff] }
 0x1ee   :  { %v1959_v34 = vadd.f32 %v8106_v1, %v1858_v20  ;;  %v653_v17 = vsel %vm602_vm4, %v651_v50, %v12229_v8  ;;  %12230 = vst [vmem:[#allocation10_spill] sm:$0xff] %v8355_v36  ;;  %v843_v1 = vrot.slane %v839_v40, 1  ;;  %v8386_v8 = vmul.f32 %v5584_v51, %v6735_v28 }
 0x1ef   :  { %v656_v20 = vadd.f32 %v653_v17, %v573_v46  ;;  %v4356_v46 = vrot.slane %v8318_v32, 5  ;;  %v939_v17 = vrot.slane %v935_v62, 1  ;;  %v4476_v32 = vrot.slane %v8324_v4, 6 }
 0x1f0   :  { %v2079_v50 = vadd.f32 %v8115_v22, %v1959_v34  ;;  %v845_v34 = vsel %vm602_vm4, %v843_v1, %v12233_v33  ;;  %v1127_v22 = vmul.f32 %v5578_v44, %v6576_v3  ;;  %12234 = vst [vmem:[#allocation29_spill] sm:$0xff] %v8386_v8  ;;  %v1223_v1 = vmul.f32 %v5584_v51, %v6658_v54 }
 0x1f1   :  { %v752_v40 = vadd.f32 %v749_v7, %v656_v20  ;;  %v1035_v7 = vrot.slane %v1031_v30, 1  ;;  %v8399_v33 = vmul.f32 %v5590_v63, %v6228_v35  ;;  %v4596_v4 = vrot.slane %v8332_v23, 6  ;;  %v12239_v23 = vld [vmem:[#allocation38_spill] sm:$0xff] }
 0x1f2   :  { %v2199_v16 = vadd.f32 %v8120_v57, %v2079_v50  ;;  %v12235_v57 = vrot.slane %v8342_v9, 1  ;;  %v1320_v51 = vmul.f32 %v5590_v63, %v6215_v31  ;;  %v5602_v50 = vld [vmem:[%s11578_s0 + $0xa3] ss:$0 sm:$0xff] }
 0x1f3   :  { %v848_v20 = vadd.f32 %v845_v34, %v752_v40  ;;  %12236 = vst [vmem:[#allocation25_spill] sm:$0xff] %v8399_v33  ;;  %v1131_v40 = vrot.slane %v1127_v22, 1  ;;  %v12237_v34 = vrot.slane %v8355_v36, 1  ;;  %v8429_v36 = vmul.f32 %v5602_v50, %v6392_v60 }
 0x1f4   :  { %v2319_v44 = vadd.f32 %v8127_v2, %v2199_v16  ;;  %v941_v62 = vsel %vm602_vm4, %v939_v17, %v12235_v57  ;;  %v8412_v57 = vmul.f32 %v5596_v29, %v6297_v5 }
 0x1f5   :  { %v944_v30 = vadd.f32 %v941_v62, %v848_v20  ;;  %v1037_v16 = vsel %vm602_vm4, %v1035_v7, %v12237_v34  ;;  %v12240_v20 = vrot.slane %v12239_v23, 5  ;;  %v12241_v62 = vrot.slane %v8373_v58, 1  ;;  %12242 = vst [vmem:[#allocation37_spill] sm:$0xff] %v8429_v36  ;;  %v12243_v23 = vld [vmem:[#allocation42_spill] sm:$0xff] }
 0x1f6   :  { %v2439_v2 = vadd.f32 %v8132_v12, %v2319_v44  ;;  %12238 = vst [vmem:[#allocation33_spill] sm:$0xff] %v8412_v57  ;;  %v1227_v12 = vrot.slane %v1223_v1, 1  ;;  %v1416_v44 = vmul.f32 %v5596_v29, %v6240_v41 }
 0x1f7   :  { %v8420_v22 = vsel %vm3632_vm8, %v12240_v20, %v4116_v10  ;;  %v1040_v63 = vadd.f32 %v1037_v16, %v944_v30  ;;  %v1133_v34 = vsel %vm602_vm4, %v1131_v40, %v12241_v62  ;;  %v5608_v10 = vld [vmem:[%s11578_s0 + $0xa4] ss:$0 sm:$0xff]  ;;  %v12244_v30 = vrot.slane %v12243_v23, 5 }
 0x1f8   :  { %v2559_v7 = vadd.f32 %v8141_v25, %v2439_v2  ;;  %v1324_v25 = vrot.slane %v1320_v51, 2  ;;  %v1512_v2 = vmul.f32 %v5602_v50, %v6310_v18  ;;  %v12245_v16 = vrot.slane %v8386_v8, 1 }
 0x1f9   :  { %v8437_v1 = vsel %vm3632_vm8, %v12244_v30, %v4236_v0  ;;  %v1136_v29 = vadd.f32 %v1133_v34, %v1040_v63  ;;  %v11757_v62 = vrot.slane %v8412_v57, 2  ;;  %v8446_v17 = vmul.f32 %v5608_v10, %v6481_v47  ;;  %v5614_v0 = vld [vmem:[%s11578_s0 + $0xa5] ss:$0 sm:$0xff]  ;;  %v5525_v57 = vld [vmem:[%s11578_s0 + $0xc7] ss:$0 sm:$0xff] }
 0x1fa   :  { %v2679_v40 = vadd.f32 %v8148_v49, %v2559_v7  ;;  %v1229_v20 = vsel %vm602_vm4, %v1227_v12, %v12245_v16  ;;  %v4716_v63 = vrot.slane %v8364_v52, 6  ;;  %v1420_v34 = vrot.slane %v1416_v44, 2  ;;  %v5620_v16 = vld [vmem:[%s11578_s0 + $0xa6] ss:$0 sm:$0xff] }
 0x1fb   :  { %12246 = vst [vmem:[#allocation35_spill] sm:$0xff] %v8446_v17  ;;  %v1232_v51 = vadd.f32 %v1229_v20, %v1136_v29  ;;  %v1608_v50 = vmul.f32 %v5608_v10, %v6407_v15  ;;  %v12247_v7 = vrot.slane %v8399_v33, 2  ;;  %v8459_v30 = vmul.f32 %v5614_v0, %v6587_v53  ;;  %v12249_v52 = vld [vmem:[#allocation46_spill] sm:$0xff] }
 0x1fc   :  { %v2800_v49 = vadd.f32 %v8160_v45, %v2679_v40  ;;  %v12250_v29 = vrot.slane %v12249_v52, 5  ;;  %v1516_v45 = vrot.slane %v1512_v2, 2  ;;  %v1704_v40 = vmul.f32 %v5614_v0, %v6500_v24  ;;  %v12252_v52 = vld [vmem:[#allocation11_spill] sm:$0xff] }
 0x1fd   :  { %v1326_v12 = vsel %vm1275_vm5, %v1324_v25, %v12247_v7  ;;  %12248 = vst [vmem:[#allocation44_spill] sm:$0xff] %v8459_v30  ;;  %v1422_v20 = vsel %vm1275_vm5, %v1420_v34, %v11757_v62  ;;  %v8476_v23 = vmul.f32 %v5620_v16, %v6686_v39 }
 0x1fe   :  { %v8467_v44 = vsel %vm3632_vm8, %v12250_v29, %v4356_v46  ;;  %v1329_v10 = vadd.f32 %v1326_v12, %v1232_v51  ;;  %v2920_v25 = vadd.f32 %v8189_v37, %v2800_v49  ;;  %v5626_v46 = vld [vmem:[%s11578_s0 + $0xa7] ss:$0 sm:$0xff]  ;;  %v12253_v51 = vrot.slane %v12252_v52, 6  ;;  %v12256_v52 = vld [vmem:[#allocation20_spill] sm:$0xff] }
 0x1ff   :  { %12251 = vst [vmem:[#allocation6_spill] sm:$0xff] %v8476_v23  ;;  %v1612_v37 = vrot.slane %v1608_v50, 2  ;;  %v1800_v49 = vmul.f32 %v5620_v16, %v6576_v3  ;;  %v12254_v12 = vrot.slane %v8429_v36, 2  ;;  %v8493_v7 = vmul.f32 %v5626_v46, %v6735_v28 }
 0x200   :  { %v8484_v2 = vsel %vm35_vm2, %v12253_v51, %v4476_v32  ;;  %v1425_v0 = vadd.f32 %v1422_v20, %v1329_v10  ;;  %v3040_v34 = vadd.f32 %v8204_v48, %v2920_v25  ;;  %v5632_v32 = vld [vmem:[%s11578_s0 + $0xa8] ss:$0 sm:$0xff]  ;;  %v12257_v10 = vrot.slane %v12256_v52, 6  ;;  %v12260_v52 = vld [vmem:[#allocation28_spill] sm:$0xff] }
 0x201   :  { %v1518_v29 = vsel %vm1275_vm5, %v1516_v45, %v12254_v12  ;;  %12255 = vst [vmem:[#allocation39_spill] sm:$0xff] %v8493_v7  ;;  %v1708_v48 = vrot.slane %v1704_v40, 2  ;;  %v1896_v25 = vmul.f32 %v5626_v46, %v6658_v54  ;;  %v12258_v20 = vrot.slane %v8446_v17, 2 }
 0x202   :  { %v8501_v50 = vsel %vm35_vm2, %v12257_v10, %v4596_v4  ;;  %v1521_v16 = vadd.f32 %v1518_v29, %v1425_v0  ;;  %v3160_v45 = vadd.f32 %v8225_v6, %v3040_v34  ;;  %v8510_v62 = vmul.f32 %v5632_v32, %v6228_v35  ;;  %v5638_v4 = vld [vmem:[%s11578_s0 + $0xa9] ss:$0 sm:$0xff] }
 0x203   :  { %v1614_v51 = vsel %vm1275_vm5, %v1612_v37, %v12258_v20  ;;  %v12261_v0 = vrot.slane %v12260_v52, 6  ;;  %v1804_v6 = vrot.slane %v1800_v49, 2  ;;  %v2005_v34 = vmul.f32 %v5632_v32, %v6215_v31  ;;  %v5888_v49 = vld [vmem:[%s11578_s0 + $0x2d] ss:$0 sm:$0xff] }
 0x204   :  { %12259 = vst [vmem:[#allocation12_spill] sm:$0xff] %v8510_v62  ;;  %v1617_v46 = vadd.f32 %v1614_v51, %v1521_v16  ;;  %v3280_v37 = vadd.f32 %v8230_v59, %v3160_v45  ;;  %v12262_v29 = vrot.slane %v8459_v30, 2  ;;  %v11758_v20 = vrot.slane %v8493_v7, 2 }
 0x205   :  { %v8518_v40 = vsel %vm35_vm2, %v12261_v0, %v4716_v63  ;;  %v8527_v12 = vmul.f32 %v5638_v4, %v6297_v5  ;;  %v5644_v63 = vld [vmem:[%s11578_s0 + $0xaa] ss:$0 sm:$0xff]  ;;  %v8536_v32 = vmul.f32 %v5888_v49, %v7709_v11  ;;  %v1900_v16 = vrot.slane %v1896_v25, 2  ;;  %v5650_v49 = vld [vmem:[%s11578_s0 + $0xab] ss:$0 sm:$0xff] }
 0x206   :  { %v1710_v10 = vsel %vm1275_vm5, %v1708_v48, %v12262_v29  ;;  %v2125_v48 = vmul.f32 %v5638_v4, %v6240_v41  ;;  %v3400_v45 = vadd.f32 %v8235_v55, %v3280_v37  ;;  %v12264_v51 = vrot.slane %v8476_v23, 2  ;;  %v5889_v25 = vld [vmem:[%s11578_s0 + $0x2e] ss:$0 sm:$0xff] }
 0x207   :  { %12263 = vst [vmem:[#allocation4_spill] sm:$0xff] %v8527_v12  ;;  %v1713_v59 = vadd.f32 %v1710_v10, %v1617_v46  ;;  %v8545_v29 = vmul.f32 %v5644_v63, %v6392_v60  ;;  %v8554_v4 = vmul.f32 %v5889_v25, %v7722_v56  ;;  %v2011_v46 = vrot.slane %v2005_v34, 3  ;;  %v5656_v25 = vld [vmem:[%s11578_s0 + $0xac] ss:$0 sm:$0xff]  ;;  %v5890_v34 = vld [vmem:[%s11578_s0 + $0x2f] ss:$0 sm:$0xff] }
 0x208   :  { %v1806_v52 = vsel %vm1275_vm5, %v1804_v6, %v12264_v51  ;;  %v2245_v6 = vmul.f32 %v5644_v63, %v6310_v18  ;;  %v3520_v37 = vadd.f32 %v8248_v42, %v3400_v45  ;;  %v1902_v10 = vsel %vm1275_vm5, %v1900_v16, %v11758_v20  ;;  %v5303_v45 = vld [vmem:[%s11577_s3 + $0x8] sm:$0x3f] }
 0x209   :  { %12265 = vst [vmem:[#allocation18_spill] sm:$0xff] %v8545_v29  ;;  %v1809_v55 = vadd.f32 %v1806_v52, %v1713_v59  ;;  %v8563_v0 = vmul.f32 %v5650_v49, %v6481_v47  ;;  %v8572_v63 = vmul.f32 %v5890_v34, %v7741_v61  ;;  %v2131_v59 = vrot.slane %v2125_v48, 3  ;;  %v5662_v48 = vld [vmem:[%s11578_s0 + $0xad] ss:$0 sm:$0xff] }
 0x20a   :  { %v2365_v16 = vmul.f32 %v5650_v49, %v6407_v15  ;;  %v3641_v52 = vadd.f32 %v8253_v27, %v3520_v37  ;;  %v12267_v20 = vrot.slane %v8510_v62, 3  ;;  %v8584_v23 = vmul.f32 %v5656_v25, %v6587_v53  ;;  %v5891_v49 = vld [vmem:[%s11578_s0 + $0x30] ss:$0 sm:$0xff] }
 0x20b   :  { %12266 = vst [vmem:[#allocation8_spill] sm:$0xff] %v8563_v0  ;;  %v1905_v42 = vadd.f32 %v1902_v10, %v1809_v55  ;;  %v8593_v55 = vmul.f32 %v5891_v49, %v7745_v13  ;;  %v2251_v37 = vrot.slane %v2245_v6, 3  ;;  %v12269_v34 = vrot.slane %v8527_v12, 3  ;;  %v5668_v49 = vld [vmem:[%s11578_s0 + $0xae] ss:$0 sm:$0xff] }
 0x20c   :  { %v2013_v51 = vsel %vm1950_vm6, %v2011_v46, %v12267_v20  ;;  %12268 = vst [vmem:[#allocation14_spill] sm:$0xff] %v8584_v23  ;;  %v2485_v20 = vmul.f32 %v5656_v25, %v6500_v24  ;;  %v5312_v46 = vpop.permute.xlu0 %5311  ;;  %v3761_v10 = vadd.f32 %v8264_v43, %v3641_v52  ;;  %v8602_v30 = vmul.f32 %v5662_v48, %v6686_v39 }
 0x20d   :  { %v2018_v27 = vadd.f32 %v2013_v51, %v1905_v42  ;;  %v2133_v7 = vsel %vm1950_vm6, %v2131_v59, %v12269_v34  ;;  %v8608_v6 = vsel %vm55_vm3, %v5303_v45, %v5312_v46  ;;  %v2371_v25 = vrot.slane %v2365_v16, 3  ;;  %v5674_v16 = vld [vmem:[%s11578_s0 + $0xaf] ss:$0 sm:$0xff] }
 0x20e   :  { %12270 = vst [vmem:[#allocation27_spill] sm:$0xff] %v8602_v30  ;;  %v2605_v43 = vmul.f32 %v5662_v48, %v6576_v3  ;;  %v3881_v42 = vadd.f32 %v8269_v19, %v3761_v10  ;;  %v12271_v59 = vrot.slane %v8545_v29, 3  ;;  %v11766_v34 = vrot.slane %v8584_v23, 3  ;;  %v12351_v23 = vld [vmem:[#allocation15_spill] sm:$0xff] }
 0x20f   :  { %v2138_v51 = vadd.f32 %v2133_v7, %v2018_v27  ;;  %v8617_v62 = vmul.f32 %v5668_v49, %v6735_v28  ;;  %v4836_v12 = vrot.slane %v8536_v32, 6  ;;  %v2491_v45 = vrot.slane %v2485_v20, 3  ;;  %v5680_v32 = vld [vmem:[%s11578_s0 + $0xb0] ss:$0 sm:$0xff] }
 0x210   :  { %v2253_v52 = vsel %vm1950_vm6, %v2251_v37, %v12271_v59  ;;  %v2725_v7 = vmul.f32 %v5668_v49, %v6658_v54  ;;  %v4001_v19 = vadd.f32 %v8283_v14, %v3881_v42  ;;  %v12273_v48 = vrot.slane %v8563_v0, 3 }
 0x211   :  { %12272 = vst [vmem:[#allocation34_spill] sm:$0xff] %v8617_v62  ;;  %v2258_v17 = vadd.f32 %v2253_v52, %v2138_v51  ;;  %v11765_v37 = vrot.slane %v8602_v30, 3  ;;  %v8630_v46 = vmul.f32 %v5674_v16, %v6228_v35  ;;  %v4956_v20 = vrot.slane %v8554_v4, 6  ;;  %v5686_v52 = vld [vmem:[%s11578_s0 + $0xb1] ss:$0 sm:$0xff]  ;;  %v12326_v30 = vld [vmem:[#allocation51_spill] sm:$0xff] }
 0x212   :  { %v2373_v27 = vsel %vm1950_vm6, %v2371_v25, %v12273_v48  ;;  %v2611_v49 = vrot.slane %v2605_v43, 3  ;;  %v8637_v51 = vmul.f32 %v5680_v32, %v6297_v5  ;;  %v4121_v14 = vadd.f32 %v8420_v22, %v4001_v19 }
 0x213   :  { %12274 = vst [vmem:[#allocation40_spill] sm:$0xff] %v8630_v46  ;;  %v2378_v10 = vadd.f32 %v2373_v27, %v2258_v17  ;;  %v2493_v25 = vsel %vm1950_vm6, %v2491_v45, %v11766_v34  ;;  %v11768_v42 = vrot.slane %v8617_v62, 3  ;;  %v2846_v59 = vmul.f32 %v5674_v16, %v6215_v31  ;;  %v5692_v27 = vld [vmem:[%s11578_s0 + $0xb2] ss:$0 sm:$0xff] }
 0x214   :  { %12275 = vst [vmem:[#allocation45_spill] sm:$0xff] %v8637_v51  ;;  %v5076_v17 = vrot.slane %v8572_v63, 6  ;;  %v2731_v43 = vrot.slane %v2725_v7, 3  ;;  %v2966_v48 = vmul.f32 %v5680_v32, %v6240_v41  ;;  %v4241_v22 = vadd.f32 %v8437_v1, %v4121_v14 }
 0x215   :  { %v2498_v4 = vadd.f32 %v2493_v25, %v2378_v10  ;;  %v2613_v45 = vsel %vm1950_vm6, %v2611_v49, %v11765_v37  ;;  %v8656_v16 = vmul.f32 %v5686_v52, %v6392_v60  ;;  %v5196_v63 = vrot.slane %v8593_v55, 6  ;;  %v12278_v37 = vld [vmem:[#allocation41_spill] sm:$0xff] }
 0x216   :  { %v11767_v32 = vrot.slane %v8637_v51, 4  ;;  %v3086_v1 = vmul.f32 %v5686_v52, %v6310_v18  ;;  %v4361_v10 = vadd.f32 %v8467_v44, %v4241_v22  ;;  %v2733_v49 = vsel %vm1950_vm6, %v2731_v43, %v11768_v42  ;;  %v5698_v44 = vld [vmem:[%s11578_s0 + $0xb3] ss:$0 sm:$0xff] }
 0x217   :  { %12276 = vst [vmem:[#allocation9_spill] sm:$0xff] %v8656_v16  ;;  %v2618_v7 = vadd.f32 %v2613_v45, %v2498_v4  ;;  %v2852_v14 = vrot.slane %v2846_v59, 4  ;;  %v8669_v25 = vmul.f32 %v5692_v27, %v6481_v47  ;;  %v12279_v34 = vrot.slane %v12278_v37, 6 }
 0x218   :  { %v2972_v4 = vrot.slane %v2966_v48, 4  ;;  %v3206_v45 = vmul.f32 %v5692_v27, %v6407_v15  ;;  %v4481_v52 = vadd.f32 %v8484_v2, %v4361_v10  ;;  %v12280_v43 = vrot.slane %v8630_v46, 4  ;;  %v5704_v2 = vld [vmem:[%s11578_s0 + $0xb4] ss:$0 sm:$0xff] }
 0x219   :  { %12277 = vst [vmem:[#allocation22_spill] sm:$0xff] %v8669_v25  ;;  %v4837_v19 = vsel %vm35_vm2, %v12279_v34, %v4836_v12  ;;  %v2738_v55 = vadd.f32 %v2733_v49, %v2618_v7  ;;  %v11769_v22 = vrot.slane %v8656_v16, 4  ;;  %v8684_v37 = vmul.f32 %v5698_v44, %v6587_v53  ;;  %v12282_v12 = vld [vmem:[#allocation50_spill] sm:$0xff] }
 0x21a   :  { %v2854_v59 = vsel %vm2791_vm7, %v2852_v14, %v12280_v43  ;;  %v12283_v34 = vrot.slane %v12282_v12, 6  ;;  %v2974_v7 = vsel %vm2791_vm7, %v2972_v4, %v11767_v32  ;;  %v3092_v49 = vrot.slane %v3086_v1, 4 }
 0x21b   :  { %12281 = vst [vmem:[#allocation16_spill] sm:$0xff] %v8684_v37  ;;  %v2859_v27 = vadd.f32 %v2854_v59, %v2738_v55  ;;  %v4601_v10 = vadd.f32 %v8501_v50, %v4481_v52  ;;  %v11770_v14 = vrot.slane %v8669_v25, 4  ;;  %v3326_v43 = vmul.f32 %v5698_v44, %v6500_v24  ;;  %v12285_v55 = vld [vmem:[#allocation52_spill] sm:$0xff]  ;;  %v5406_v25 = vpop.permute.xlu1 %5405 }
 0x21c   :  { %v4957_v48 = vsel %vm35_vm2, %v12283_v34, %v4956_v20  ;;  %v8699_v12 = vmul.f32 %v5704_v2, %v6686_v39  ;;  %v5710_v20 = vld [vmem:[%s11578_s0 + $0xb5] ss:$0 sm:$0xff]  ;;  %v12286_v4 = vrot.slane %v12285_v55, 6  ;;  %v3212_v34 = vrot.slane %v3206_v45, 4  ;;  %v5716_v55 = vld [vmem:[%s11578_s0 + $0xb6] ss:$0 sm:$0xff] }
 0x21d   :  { %v2979_v59 = vadd.f32 %v2974_v7, %v2859_v27  ;;  %v8708_v32 = vmul.f32 %v5710_v20, %v6735_v28  ;;  %v4721_v50 = vadd.f32 %v8518_v40, %v4601_v10  ;;  %v3094_v44 = vsel %vm2791_vm7, %v3092_v49, %v11769_v22 }
 0x21e   :  { %12284 = vst [vmem:[#allocation24_spill] sm:$0xff] %v8699_v12  ;;  %v5077_v1 = vsel %vm35_vm2, %v12286_v4, %v5076_v17  ;;  %v3446_v42 = vmul.f32 %v5704_v2, %v6576_v3  ;;  %v12288_v17 = vld [vmem:[#allocation58_spill] sm:$0xff]  ;;  %v3566_v40 = vmul.f32 %v5710_v20, %v6658_v54  ;;  %v8724_v10 = vmul.f32 %v5716_v55, %v6228_v35 }
 0x21f   :  { %12287 = vst [vmem:[#allocation32_spill] sm:$0xff] %v8708_v32  ;;  %v12289_v45 = vrot.slane %v12288_v17, 6  ;;  %v3099_v7 = vadd.f32 %v3094_v44, %v2979_v59  ;;  %v4841_v49 = vadd.f32 %v4837_v19, %v4721_v50  ;;  %v3214_v2 = vsel %vm2791_vm7, %v3212_v34, %v11770_v14  ;;  %v5722_v17 = vld [vmem:[%s11578_s0 + $0xb7] ss:$0 sm:$0xff]  ;;  %v5728_v19 = vld [vmem:[%s11578_s0 + $0xb8] ss:$0 sm:$0xff] }
 0x220   :  { %12290 = vst [vmem:[#allocation30_spill] sm:$0xff] %v8724_v10  ;;  %v3332_v4 = vrot.slane %v3326_v43, 4  ;;  %v3687_v20 = vmul.f32 %v5716_v55, %v6215_v31  ;;  %v8736_v59 = vmul.f32 %v5722_v17, %v6297_v5  ;;  %v12292_v43 = vrot.slane %v8684_v37, 4 }
 0x221   :  { %v5197_v27 = vsel %vm35_vm2, %v12289_v45, %v5196_v63  ;;  %v3219_v52 = vadd.f32 %v3214_v2, %v3099_v7  ;;  %v4961_v34 = vadd.f32 %v4957_v48, %v4841_v49  ;;  %v3452_v44 = vrot.slane %v3446_v42, 4  ;;  %v5734_v63 = vld [vmem:[%s11578_s0 + $0xb9] ss:$0 sm:$0xff] }
 0x222   :  { %12291 = vst [vmem:[#allocation36_spill] sm:$0xff] %v8736_v59  ;;  %v3334_v50 = vsel %vm2791_vm7, %v3332_v4, %v12292_v43  ;;  %v8745_v45 = vmul.f32 %v5728_v19, %v6392_v60  ;;  %v3572_v2 = vrot.slane %v3566_v40, 4  ;;  %v3807_v14 = vmul.f32 %v5722_v17, %v6240_v41 }
 0x223   :  { %v3339_v7 = vadd.f32 %v3334_v50, %v3219_v52  ;;  %v5081_v22 = vadd.f32 %v5077_v1, %v4961_v34  ;;  %v12294_v48 = vrot.slane %v8699_v12, 4  ;;  %v3927_v42 = vmul.f32 %v5728_v19, %v6310_v18  ;;  %v5740_v52 = vld [vmem:[%s11578_s0 + $0xba] ss:$0 sm:$0xff] }
 0x224   :  { %12293 = vst [vmem:[#allocation43_spill] sm:$0xff] %v8745_v45  ;;  %v8757_v4 = vmul.f32 %v5734_v63, %v6481_v47  ;;  %v12296_v17 = vrot.slane %v8708_v32, 4  ;;  %v3693_v50 = vrot.slane %v3687_v20, 5  ;;  %v11775_v1 = vrot.slane %v8736_v59, 5  ;;  %v5746_v20 = vld [vmem:[%s11578_s0 + $0xbb] ss:$0 sm:$0xff] }
 0x225   :  { %v3454_v49 = vsel %vm2791_vm7, %v3452_v44, %v12294_v48  ;;  %v5201_v34 = vadd.f32 %v5197_v27, %v5081_v22  ;;  %v11773_v44 = vrot.slane %v8745_v45, 5  ;;  %v4047_v19 = vmul.f32 %v5734_v63, %v6407_v15  ;;  %v5898_v59 = vld [vmem:[%s11578_s0 + $0x36] ss:$0 sm:$0xff] }
 0x226   :  { %12295 = vst [vmem:[#allocation38_spill] sm:$0xff] %v8757_v4  ;;  %v3459_v40 = vadd.f32 %v3454_v49, %v3339_v7  ;;  %v3574_v43 = vsel %vm2791_vm7, %v3572_v2, %v12296_v17  ;;  %v8769_v48 = vmul.f32 %v5740_v52, %v6587_v53  ;;  %v12298_v12 = vrot.slane %v8724_v10, 5  ;;  %v5758_v17 = vld [vmem:[%s11578_s0 + $0xbd] ss:$0 sm:$0xff] }
 0x227   :  { %v3813_v49 = vrot.slane %v3807_v14, 5  ;;  %v4167_v32 = vmul.f32 %v5740_v52, %v6500_v24  ;;  %v8779_v22 = vadd.f32 %v8608_v6, %v5201_v34  ;;  %v3933_v27 = vrot.slane %v3927_v42, 5 }
 0x228   :  { %12297 = vst [vmem:[#allocation42_spill] sm:$0xff] %v8769_v48  ;;  %v3579_v55 = vadd.f32 %v3574_v43, %v3459_v40  ;;  %v3695_v7 = vsel %vm3632_vm8, %v3693_v50, %v12298_v12  ;;  %v11774_v63 = vrot.slane %v8757_v4, 5  ;;  %v8783_v2 = vmul.f32 %v5746_v20, %v6686_v39  ;;  %v5752_v12 = vld [vmem:[%s11578_s0 + $0xbc] ss:$0 sm:$0xff] }
 0x229   :  { %12299 = vst [vmem:[#allocation46_spill] sm:$0xff] %v8779_v22  ;;  %v3815_v14 = vsel %vm3632_vm8, %v3813_v49, %v11775_v1  ;;  %5321 = vst.msk [vmem:[%s11580_s4 + $0x8] sm:$0x3f] %vm5320_vm9, %v8779_v22  ;;  %v3935_v6 = vsel %vm3632_vm8, %v3933_v27, %v11773_v44  ;;  %v4053_v42 = vrot.slane %v4047_v19, 5  ;;  %v4287_v52 = vmul.f32 %v5746_v20, %v6576_v3 }
 0x22a   :  { %12300 = vst [vmem:[#allocation11_spill] sm:$0xff] %v8783_v2  ;;  %v3700_v40 = vadd.f32 %v3695_v7, %v3579_v55  ;;  %v11778_v55 = vrot.slane %v8769_v48, 5  ;;  %v4173_v50 = vrot.slane %v4167_v32, 5  ;;  %v8805_v34 = vmul.f32 %v5752_v12, %v6735_v28  ;;  %v5892_v7 = vld [vmem:[%s11578_s0 + $0x31] ss:$0 sm:$0xff] }
 0x22b   :  { %v230_v49 = vmul.f32 %v5892_v7, %v6228_v35  ;;  %v4055_v19 = vsel %vm3632_vm8, %v4053_v42, %v11774_v63  ;;  %v4407_v27 = vmul.f32 %v5752_v12, %v6658_v54  ;;  %v5893_v32 = vld [vmem:[%s11578_s0 + $0x32] ss:$0 sm:$0xff]  ;;  %v4527_v44 = vmul.f32 %v5758_v17, %v6215_v31  ;;  %v5764_v7 = vld [vmem:[%s11578_s0 + $0xbe] ss:$0 sm:$0xff]  ;;  %v5894_v42 = vld [vmem:[%s11579_s1 + $0x1] ss:$0 sm:$0xff] }
 0x22c   :  { %v3820_v43 = vadd.f32 %v3815_v14, %v3700_v40  ;;  %12301 = vst [vmem:[#allocation20_spill] sm:$0xff] %v8805_v34  ;;  %v284_v40 = vmul.f32 %v5893_v32, %v6297_v5  ;;  %v5895_v12 = vld [vmem:[%s11578_s0 + $0x33] ss:$0 sm:$0xff]  ;;  %v8835_v32 = vmul.f32 %v5758_v17, %v6228_v35  ;;  %v8838_v20 = vmul.f32 %v5764_v7, %v6297_v5 }
 0x22d   :  { %v232_v63 = vadd.f32 %v5894_v42, %v230_v49  ;;  %v338_v1 = vmul.f32 %v5895_v12, %v6392_v60  ;;  %v5770_v42 = vld [vmem:[%s11578_s0 + $0xbf] ss:$0 sm:$0xff]  ;;  %v5896_v12 = vld [vmem:[%s11578_s0 + $0x34] ss:$0 sm:$0xff]  ;;  %v12304_v17 = vrot.slane %v8783_v2, 5  ;;  %v4533_v48 = vrot.slane %v4527_v44, 6 }
 0x22e   :  { %v3940_v14 = vadd.f32 %v3935_v6, %v3820_v43  ;;  %v4175_v6 = vsel %vm3632_vm8, %v4173_v50, %v11778_v55  ;;  %v4293_v43 = vrot.slane %v4287_v52, 5  ;;  %12302 = vst [vmem:[#allocation28_spill] sm:$0xff] %v8835_v32  ;;  %12303 = vst [vmem:[#allocation41_spill] sm:$0xff] %v8838_v20  ;;  %v392_v52 = vmul.f32 %v5896_v12, %v6481_v47 }
 0x22f   :  { %v286_v45 = vadd.f32 %v284_v40, %v232_v63  ;;  %v4413_v55 = vrot.slane %v4407_v27, 5  ;;  %v5776_v63 = vld [vmem:[%s11578_s0 + $0xc0] ss:$0 sm:$0xff]  ;;  %v5782_v40 = vld [vmem:[%s11578_s0 + $0xc1] ss:$0 sm:$0xff]  ;;  %v4767_v44 = vmul.f32 %v5770_v42, %v6310_v18  ;;  %v12307_v2 = vrot.slane %v8805_v34, 5 }
 0x230   :  { %v4060_v4 = vadd.f32 %v4055_v19, %v3940_v14  ;;  %v4295_v50 = vsel %vm3632_vm8, %v4293_v43, %v12304_v17  ;;  %v4647_v19 = vmul.f32 %v5764_v7, %v6240_v41  ;;  %v8853_v14 = vmul.f32 %v5770_v42, %v6392_v60  ;;  %v5897_v27 = vld [vmem:[%s11578_s0 + $0x35] ss:$0 sm:$0xff] }
 0x231   :  { %v340_v12 = vadd.f32 %v338_v1, %v286_v45  ;;  %v446_v7 = vmul.f32 %v5897_v27, %v6587_v53  ;;  %v4415_v45 = vsel %vm3632_vm8, %v4413_v55, %v12307_v2  ;;  %v500_v27 = vmul.f32 %v5898_v59, %v6686_v39  ;;  %v5899_v59 = vld [vmem:[%s11578_s0 + $0x37] ss:$0 sm:$0xff] }
 0x232   :  { %12305 = vst [vmem:[#allocation50_spill] sm:$0xff] %v8853_v14  ;;  %v4180_v49 = vadd.f32 %v4175_v6, %v4060_v4  ;;  %v8869_v6 = vmul.f32 %v5776_v63, %v6481_v47  ;;  %v4653_v43 = vrot.slane %v4647_v19, 6  ;;  %v4887_v42 = vmul.f32 %v5776_v63, %v6407_v15 }
 0x233   :  { %v394_v1 = vadd.f32 %v392_v52, %v340_v12  ;;  %v5007_v10 = vmul.f32 %v5782_v40, %v6500_v24  ;;  %v8885_v2 = vmul.f32 %v5782_v40, %v6587_v53  ;;  %v554_v52 = vmul.f32 %v5899_v59, %v6735_v28 }
 0x234   :  { %12306 = vst [vmem:[#allocation52_spill] sm:$0xff] %v8869_v6  ;;  %v4300_v17 = vadd.f32 %v4295_v50, %v4180_v49  ;;  %v5788_v49 = vld [vmem:[%s11578_s0 + $0xc2] ss:$0 sm:$0xff]  ;;  %v12309_v19 = vrot.slane %v8835_v32, 6  ;;  %v12310_v12 = vrot.slane %v8838_v20, 6  ;;  %v4773_v34 = vrot.slane %v4767_v44, 6 }
 0x235   :  { %12308 = vst [vmem:[#allocation58_spill] sm:$0xff] %v8885_v2  ;;  %v448_v55 = vadd.f32 %v446_v7, %v394_v1  ;;  %v5127_v7 = vmul.f32 %v5788_v49, %v6576_v3  ;;  %v5794_v1 = vld [vmem:[%s11578_s0 + $0xc3] ss:$0 sm:$0xff]  ;;  %v4893_v20 = vrot.slane %v4887_v42, 6  ;;  %v12352_v0 = vrot.slane %v12351_v23, 4 }
 0x236   :  { %v4420_v50 = vadd.f32 %v4415_v45, %v4300_v17  ;;  %v4535_v63 = vsel %vm35_vm2, %v4533_v48, %v12309_v19  ;;  %v4655_v4 = vsel %vm35_vm2, %v4653_v43, %v12310_v12  ;;  %v8900_v45 = vmul.f32 %v5788_v49, %v6686_v39  ;;  %v5900_v49 = vld [vmem:[%s11578_s0 + $0x46] ss:$0 sm:$0xff] }
 0x237   :  { %v502_v59 = vadd.f32 %v500_v27, %v448_v55  ;;  %v12312_v48 = vrot.slane %v8853_v14, 6  ;;  %v5013_v43 = vrot.slane %v5007_v10, 6  ;;  %v8909_v44 = vmul.f32 %v5794_v1, %v6735_v28  ;;  %v12314_v17 = vld [vmem:[#allocation2_spill] sm:$0xff] }
 0x238   :  { %v4540_v40 = vadd.f32 %v4535_v63, %v4420_v50  ;;  %12311 = vst [vmem:[#allocation132_spill] sm:$0xff] %v8900_v45  ;;  %v1967_v32 = vmul.f32 %v5900_v49, %v12314_v17  ;;  %v12315_v27 = vrot.slane %v8869_v6, 6  ;;  %v5901_v10 = vld [vmem:[%s11578_s0 + $0x47] ss:$0 sm:$0xff]  ;;  %v12317_v63 = vld [vmem:[#allocation47_spill] sm:$0xff]  ;;  %v12320_v6 = vld [vmem:[#allocation48_spill] sm:$0xff] }
 0x239   :  { %v4775_v19 = vsel %vm35_vm2, %v4773_v34, %v12312_v48  ;;  %12313 = vst [vmem:[#allocation133_spill] sm:$0xff] %v8909_v44  ;;  %v556_v12 = vadd.f32 %v554_v52, %v502_v59  ;;  %v5247_v34 = vmul.f32 %v5794_v1, %v6658_v54  ;;  %v5902_v52 = vld [vmem:[%s11578_s0 + $0x48] ss:$0 sm:$0xff]  ;;  %v5133_v48 = vrot.slane %v5127_v7, 6  ;;  %v5817_v1 = vld [vmem:[%s11577_s3 + $0x30] sm:$0xff] }
 0x23a   :  { %v4660_v50 = vadd.f32 %v4655_v4, %v4540_v40  ;;  %v4895_v55 = vsel %vm35_vm2, %v4893_v20, %v12315_v27  ;;  %v12316_v4 = vld [vmem:[#allocation105_spill] sm:$0xff]  ;;  %v2207_v40 = vmul.f32 %v5902_v52, %v7704_v26  ;;  %v12318_v20 = vrot.slane %v12317_v63, 1  ;;  %v5904_v7 = vld [vmem:[%s11578_s0 + $0x4a] ss:$0 sm:$0xff] }
 0x23b   :  { %v2087_v42 = vmul.f32 %v5901_v10, %v12316_v4  ;;  %v5903_v10 = vld [vmem:[%s11578_s0 + $0x49] ss:$0 sm:$0xff]  ;;  %v12319_v52 = vrot.slane %v8885_v2, 6  ;;  %v12321_v49 = vrot.slane %v12320_v6, 1  ;;  %v1974_v37 = vrot.slane %v1967_v32, 3  ;;  %v12323_v6 = vld [vmem:[#allocation49_spill] sm:$0xff] }
 0x23c   :  { %v4780_v59 = vadd.f32 %v4775_v19, %v4660_v50  ;;  %v625_v27 = vadd.f32 %v12318_v20, %v556_v12  ;;  %v2327_v14 = vmul.f32 %v5903_v10, %v7709_v11  ;;  %v2447_v19 = vmul.f32 %v5904_v7, %v7722_v56  ;;  %v5905_v50 = vld [vmem:[%s11578_s0 + $0x4b] ss:$0 sm:$0xff]  ;;  %v5906_v7 = vld [vmem:[%s11578_s0 + $0x4c] ss:$0 sm:$0xff] }
 0x23d   :  { %v2567_v63 = vmul.f32 %v5905_v50, %v7741_v61  ;;  %v5015_v20 = vsel %vm35_vm2, %v5013_v43, %v12319_v52  ;;  %v5253_v16 = vrot.slane %v5247_v34, 6  ;;  %v2094_v51 = vrot.slane %v2087_v42, 3 }
 0x23e   :  { %v4900_v12 = vadd.f32 %v4895_v55, %v4780_v59  ;;  %v721_v10 = vadd.f32 %v12321_v49, %v625_v27  ;;  %v2214_v46 = vrot.slane %v2207_v40, 3  ;;  %v2687_v62 = vmul.f32 %v5906_v7, %v7745_v13 }
 0x23f   :  { %v12322_v55 = vrot.slane %v8900_v45, 6  ;;  %v5411_v43 = vsel %vm55_vm3, %v5817_v1, %v5406_v25  ;;  %v12324_v49 = vrot.slane %v12323_v6, 1  ;;  %v12325_v34 = vrot.slane %v8909_v44, 6  ;;  %v5907_v25 = vld [vmem:[%s11578_s0 + $0x4d] ss:$0 sm:$0xff] }
 0x240   :  { %v5020_v50 = vadd.f32 %v5015_v20, %v4900_v12  ;;  %v2334_v40 = vrot.slane %v2327_v14, 3  ;;  %v2454_v27 = vrot.slane %v2447_v19, 3  ;;  %v2574_v52 = vrot.slane %v2567_v63, 3  ;;  %v12328_v20 = vld [vmem:[#allocation65_spill] sm:$0xff]  ;;  %v12332_v19 = vld [vmem:[#allocation66_spill] sm:$0xff] }
 0x241   :  { %v5135_v59 = vsel %vm35_vm2, %v5133_v48, %v12322_v55  ;;  %v817_v32 = vadd.f32 %v12324_v49, %v721_v10  ;;  %v5255_v42 = vsel %vm35_vm2, %v5253_v16, %v12325_v34  ;;  %v12327_v7 = vrot.slane %v12326_v30, 1  ;;  %v12330_v10 = vld [vmem:[#allocation26_spill] sm:$0xff]  ;;  %v12336_v34 = vld [vmem:[#allocation67_spill] sm:$0xff] }
 0x242   :  { %v5140_v2 = vadd.f32 %v5135_v59, %v5020_v50  ;;  %v12329_v45 = vrot.slane %v12328_v20, 3  ;;  %v2808_v1 = vmul.f32 %v5907_v25, %v12314_v17  ;;  %v12331_v16 = vrot.slane %v12330_v10, 3  ;;  %v12334_v59 = vld [vmem:[#allocation54_spill] sm:$0xff]  ;;  %v12340_v25 = vld [vmem:[#allocation69_spill] sm:$0xff] }
 0x243   :  { %v913_v12 = vadd.f32 %v12327_v7, %v817_v32  ;;  %v12333_v63 = vrot.slane %v12332_v19, 3  ;;  %v2694_v50 = vrot.slane %v2687_v62, 3  ;;  %v12335_v6 = vrot.slane %v12334_v59, 1  ;;  %v5910_v62 = vld [vmem:[%s11578_s0 + $0x50] ss:$0 sm:$0xff] }
 0x244   :  { %v8970_v48 = vsel %vm1950_vm6, %v12329_v45, %v1974_v37  ;;  %v8979_v14 = vsel %vm1950_vm6, %v12331_v16, %v2094_v51  ;;  %v5908_v37 = vld [vmem:[%s11578_s0 + $0x4e] ss:$0 sm:$0xff]  ;;  %v5260_v55 = vadd.f32 %v5255_v42, %v5140_v2  ;;  %v5909_v51 = vld [vmem:[%s11578_s0 + $0x4f] ss:$0 sm:$0xff]  ;;  %v12337_v7 = vrot.slane %v12336_v34, 3  ;;  %v12338_v2 = vld [vmem:[#allocation68_spill] sm:$0xff] }
 0x245   :  { %v8984_v30 = vsel %vm1950_vm6, %v12333_v63, %v2214_v46  ;;  %v2928_v45 = vmul.f32 %v5908_v37, %v12316_v4  ;;  %v1009_v49 = vadd.f32 %v12335_v6, %v913_v12  ;;  %v3048_v32 = vmul.f32 %v5909_v51, %v7704_v26  ;;  %v5911_v19 = vld [vmem:[%s11578_s0 + $0x51] ss:$0 sm:$0xff]  ;;  %v5513_v34 = vld [vmem:[%s11578_s0 + $0xc5] ss:$0 sm:$0xff] }
 0x246   :  { %v3168_v46 = vmul.f32 %v5910_v62, %v7709_v11  ;;  %v9003_v20 = vsel %vm1950_vm6, %v12337_v7, %v2334_v40  ;;  %v12339_v42 = vrot.slane %v12338_v2, 3  ;;  %v12341_v10 = vrot.slane %v12340_v25, 3  ;;  %v12343_v40 = vld [vmem:[#allocation55_spill] sm:$0xff] }
 0x247   :  { %v3288_v63 = vmul.f32 %v5911_v19, %v7722_v56  ;;  %v9019_v37 = vadd.f32 %v5411_v43, %v5260_v55  ;;  %v12344_v59 = vrot.slane %v12343_v40, 1  ;;  %v2815_v51 = vrot.slane %v2808_v1, 4  ;;  %v12345_v43 = vld [vmem:[#allocation70_spill] sm:$0xff] }
 0x248   :  { %v9008_v12 = vsel %vm1950_vm6, %v12339_v42, %v2454_v27  ;;  %v9013_v16 = vsel %vm1950_vm6, %v12341_v10, %v2574_v52  ;;  %v5912_v27 = vld [vmem:[%s11578_s0 + $0x52] ss:$0 sm:$0xff]  ;;  %v5507_v52 = vld [vmem:[%s11578_s0 + $0xc4] ss:$0 sm:$0xff]  ;;  %v12346_v55 = vrot.slane %v12345_v43, 3  ;;  %v2935_v1 = vrot.slane %v2928_v45, 4 }
 0x249   :  { %12342 = vst [vmem:[#allocation47_spill] sm:$0xff] %v9019_v37  ;;  %v1105_v6 = vadd.f32 %v12344_v59, %v1009_v49  ;;  %v3408_v62 = vmul.f32 %v5912_v27, %v7741_v61  ;;  %v5913_v49 = vld [vmem:[%s11578_s0 + $0x53] ss:$0 sm:$0xff]  ;;  %v5914_v42 = vld [vmem:[%s11578_s0 + $0x54] ss:$0 sm:$0xff]  ;;  %5821 = vst.msk [vmem:[%s11580_s4 + $0x30] sm:$0xff] %vm55_vm3, %v9019_v37  ;;  %v9078_v29 = vsel %vm2791_vm7, %v12352_v0, %v2815_v51 }
 0x24a   :  { %v9036_v7 = vsel %vm1950_vm6, %v12346_v55, %v2694_v50  ;;  %v3528_v2 = vmul.f32 %v5913_v49, %v7745_v13  ;;  %v3649_v25 = vmul.f32 %v5914_v42, %v12314_v17  ;;  %v12347_v50 = vld [vmem:[#allocation56_spill] sm:$0xff]  ;;  %v3055_v19 = vrot.slane %v3048_v32, 4  ;;  %v5501_v43 = vld [vmem:[%s11579_s1 + $0x4] ss:$0 sm:$0xff]  ;;  %v5519_v55 = vld [vmem:[%s11578_s0 + $0xc6] ss:$0 sm:$0xff] }
 0x24b   :  { %v12348_v45 = vrot.slane %v12347_v50, 1  ;;  %v3175_v40 = vrot.slane %v3168_v46, 4  ;;  %v5915_v59 = vld [vmem:[%s11578_s0 + $0x55] ss:$0 sm:$0xff]  ;;  %v5917_v46 = vld [vmem:[%s11578_s0 + $0x57] ss:$0 sm:$0xff]  ;;  %v256_v42 = vmul.f32 %v5507_v52, %v6215_v31  ;;  %v310_v50 = vmul.f32 %v5513_v34, %v6240_v41 }
 0x24c   :  { %v3769_v27 = vmul.f32 %v5915_v59, %v12316_v4  ;;  %v4009_v49 = vmul.f32 %v5917_v46, %v7709_v11  ;;  %v3295_v36 = vrot.slane %v3288_v63, 4  ;;  %v3535_v33 = vrot.slane %v3528_v2, 4  ;;  %v12353_v34 = vld [vmem:[#allocation59_spill] sm:$0xff] }
 0x24d   :  { %v1201_v10 = vadd.f32 %v12348_v45, %v1105_v6  ;;  %v5916_v6 = vld [vmem:[%s11578_s0 + $0x56] ss:$0 sm:$0xff]  ;;  %v12349_v45 = vld [vmem:[#allocation57_spill] sm:$0xff]  ;;  %v3656_v46 = vrot.slane %v3649_v25, 5  ;;  %v258_v8 = vadd.f32 %v5501_v43, %v256_v42  ;;  %v364_v52 = vmul.f32 %v5519_v55, %v6310_v18  ;;  %v12357_v0 = vld [vmem:[#allocation31_spill] sm:$0xff] }
 0x24e   :  { %v3889_v32 = vmul.f32 %v5916_v6, %v7704_v26  ;;  %v12350_v59 = vrot.slane %v12349_v45, 2  ;;  %v3415_v6 = vrot.slane %v3408_v62, 4  ;;  %v12354_v58 = vrot.slane %v12353_v34, 2  ;;  %v5531_v2 = vld [vmem:[%s11578_s0 + $0xc8] ss:$0 sm:$0xff] }
 0x24f   :  { %v12358_v63 = vrot.slane %v12357_v0, 4  ;;  %v3776_v62 = vrot.slane %v3769_v27, 5  ;;  %v4016_v43 = vrot.slane %v4009_v49, 5  ;;  %v312_v55 = vadd.f32 %v310_v50, %v258_v8  ;;  %v5537_v8 = vld [vmem:[%s11578_s0 + $0xc9] ss:$0 sm:$0xff] }
 0x250   :  { %v1298_v44 = vadd.f32 %v12350_v59, %v1201_v10  ;;  %v12355_v10 = vld [vmem:[#allocation23_spill] sm:$0xff]  ;;  %v3896_v25 = vrot.slane %v3889_v32, 5 }
 0x251   :  { %v12356_v59 = vrot.slane %v12355_v10, 4  ;;  %v9094_v51 = vsel %vm2791_vm7, %v12358_v63, %v3055_v19  ;;  %v12363_v19 = vld [vmem:[#allocation72_spill] sm:$0xff]  ;;  %v12365_v63 = vld [vmem:[#allocation73_spill] sm:$0xff] }
 0x252   :  { %v1394_v45 = vadd.f32 %v12354_v58, %v1298_v44  ;;  %v418_v58 = vmul.f32 %v5525_v57, %v6407_v15  ;;  %v12359_v44 = vld [vmem:[#allocation60_spill] sm:$0xff]  ;;  %v12364_v0 = vrot.slane %v12363_v19, 4  ;;  %v12366_v9 = vrot.slane %v12365_v63, 4  ;;  %v12367_v57 = vld [vmem:[#allocation74_spill] sm:$0xff]  ;;  %v12373_v19 = vld [vmem:[#allocation19_spill] sm:$0xff] }
 0x253   :  { %v9089_v23 = vsel %vm2791_vm7, %v12356_v59, %v2935_v1  ;;  %v12360_v42 = vrot.slane %v12359_v44, 2  ;;  %v12361_v1 = vld [vmem:[#allocation71_spill] sm:$0xff]  ;;  %v12368_v49 = vrot.slane %v12367_v57, 4 }
 0x254   :  { %v12362_v10 = vrot.slane %v12361_v1, 4  ;;  %v9110_v27 = vsel %vm2791_vm7, %v12364_v0, %v3295_v36  ;;  %v9115_v32 = vsel %vm2791_vm7, %v12366_v9, %v3415_v6  ;;  %v366_v36 = vadd.f32 %v364_v52, %v312_v55  ;;  %v5549_v9 = vld [vmem:[%s11578_s0 + $0xcb] ss:$0 sm:$0xff]  ;;  %v12371_v6 = vld [vmem:[#allocation61_spill] sm:$0xff] }
 0x255   :  { %v1490_v34 = vadd.f32 %v12360_v42, %v1394_v45  ;;  %v9123_v50 = vsel %vm2791_vm7, %v12368_v49, %v3535_v33  ;;  %v472_v42 = vmul.f32 %v5531_v2, %v6500_v24  ;;  %v12372_v1 = vrot.slane %v12371_v6, 2  ;;  %v5543_v2 = vld [vmem:[%s11578_s0 + $0xca] ss:$0 sm:$0xff]  ;;  %v12378_v49 = vld [vmem:[#allocation77_spill] sm:$0xff] }
 0x256   :  { %v9105_v59 = vsel %vm2791_vm7, %v12362_v10, %v3175_v40  ;;  %v12369_v40 = vld [vmem:[#allocation75_spill] sm:$0xff]  ;;  %v12374_v0 = vrot.slane %v12373_v19, 5  ;;  %v9151_v55 = vmul.f32 %v5549_v9, %v6228_v35  ;;  %v420_v6 = vadd.f32 %v418_v58, %v366_v36  ;;  %v12380_v19 = vld [vmem:[#allocation62_spill] sm:$0xff] }
 0x257   :  { %v12370_v45 = vrot.slane %v12369_v40, 5  ;;  %v1586_v10 = vadd.f32 %v12372_v1, %v1490_v34  ;;  %v5555_v34 = vld [vmem:[%s11578_s0 + $0xcc] ss:$0 sm:$0xff]  ;;  %v12379_v40 = vrot.slane %v12378_v49, 5  ;;  %v526_v1 = vmul.f32 %v5537_v8, %v6576_v3 }
 0x258   :  { %v9139_v33 = vsel %vm3632_vm8, %v12374_v0, %v3776_v62  ;;  %12375 = vst [vmem:[#allocation48_spill] sm:$0xff] %v9151_v55  ;;  %v12376_v62 = vld [vmem:[#allocation76_spill] sm:$0xff]  ;;  %v12381_v0 = vrot.slane %v12380_v19, 2  ;;  %v474_v58 = vadd.f32 %v472_v42, %v420_v6  ;;  %v580_v8 = vmul.f32 %v5543_v2, %v6658_v54  ;;  %v12384_v49 = vld [vmem:[#allocation63_spill] sm:$0xff]  ;;  %v5920_v19 = vld [vmem:[%s11578_s0 + $0x5a] ss:$0 sm:$0xff] }
 0x259   :  { %v9128_v44 = vsel %vm3632_vm8, %v12370_v45, %v3656_v46  ;;  %v5918_v46 = vld [vmem:[%s11578_s0 + $0x58] ss:$0 sm:$0xff]  ;;  %v12377_v63 = vrot.slane %v12376_v62, 5  ;;  %v9164_v45 = vsel %vm3632_vm8, %v12379_v40, %v4016_v43  ;;  %v9173_v62 = vmul.f32 %v5919_v21, %v7741_v61  ;;  %v5561_v43 = vld [vmem:[%s11578_s0 + $0xcd] ss:$0 sm:$0xff] }
 0x25a   :  { %v9145_v52 = vmul.f32 %v5918_v46, %v7722_v56  ;;  %v1682_v46 = vadd.f32 %v12381_v0, %v1586_v10  ;;  %v759_v36 = vmul.f32 %v5555_v34, %v6240_v41  ;;  %v9185_v10 = vmul.f32 %v5561_v43, %v6392_v60  ;;  %v5921_v2 = vld [vmem:[%s11578_s0 + $0x5b] ss:$0 sm:$0xff] }
 0x25b   :  { %v9159_v57 = vsel %vm3632_vm8, %v12377_v63, %v3896_v25  ;;  %v663_v25 = vmul.f32 %v5549_v9, %v6215_v31  ;;  %v9177_v63 = vmul.f32 %v5555_v34, %v6297_v5  ;;  %v12385_v21 = vrot.slane %v12384_v49, 2 }
 0x25c   :  { %12383 = vst [vmem:[#allocation51_spill] sm:$0xff] %v9185_v10  ;;  %v4136_v9 = vrot.slane %v9145_v52, 5  ;;  %v9194_v0 = vmul.f32 %v5920_v19, %v7745_v13  ;;  %v9201_v34 = vmul.f32 %v5921_v2, %v12314_v17  ;;  %v5922_v52 = vld [vmem:[%s11578_s0 + $0x5c] ss:$0 sm:$0xff]  ;;  %v855_v49 = vmul.f32 %v5561_v43, %v6310_v18  ;;  %v12386_v19 = vld [vmem:[#allocation64_spill] sm:$0xff] }
 0x25d   :  { %12382 = vst [vmem:[#allocation49_spill] sm:$0xff] %v9177_v63  ;;  %v1778_v40 = vadd.f32 %v12385_v21, %v1682_v46  ;;  %v9207_v6 = vmul.f32 %v5922_v52, %v12316_v4  ;;  %v528_v46 = vadd.f32 %v526_v1, %v474_v58  ;;  %v5567_v21 = vld [vmem:[%s11578_s0 + $0xce] ss:$0 sm:$0xff]  ;;  %v12387_v42 = vrot.slane %v12386_v19, 2  ;;  %v5573_v52 = vld [vmem:[%s11578_s0 + $0xcf] ss:$0 sm:$0xff] }
 0x25e   :  { %v667_v38 = vrot.slane %v663_v25, 1  ;;  %v9217_v22 = vmul.f32 %v5567_v21, %v6481_v47  ;;  %v5923_v1 = vld [vmem:[%s11578_s0 + $0x5d] ss:$0 sm:$0xff]  ;;  %v763_v19 = vrot.slane %v759_v36, 1  ;;  %v951_v4 = vmul.f32 %v5567_v21, %v6407_v15  ;;  %v5591_v21 = vld [vmem:[%s11578_s0 + $0xd2] ss:$0 sm:$0xff] }
 0x25f   :  { %v1874_v37 = vadd.f32 %v12387_v42, %v1778_v40  ;;  %v9226_v43 = vmul.f32 %v5923_v1, %v7704_v26  ;;  %v582_v58 = vadd.f32 %v580_v8, %v528_v46  ;;  %v12389_v42 = vrot.slane %v9151_v55, 1  ;;  %v5579_v1 = vld [vmem:[%s11578_s0 + $0xd0] ss:$0 sm:$0xff]  ;;  %v5585_v55 = vld [vmem:[%s11578_s0 + $0xd1] ss:$0 sm:$0xff] }
 0x260   :  { %12388 = vst [vmem:[#allocation65_spill] sm:$0xff] %v9217_v22  ;;  %v9235_v17 = vmul.f32 %v5573_v52, %v6587_v53  ;;  %v4256_v8 = vrot.slane %v9173_v62, 5  ;;  %v859_v46 = vrot.slane %v855_v49, 1  ;;  %v1047_v25 = vmul.f32 %v5573_v52, %v6500_v24 }
 0x261   :  { %v1979_v40 = vadd.f32 %v8970_v48, %v1874_v37  ;;  %v669_v2 = vsel %vm602_vm4, %v667_v38, %v12389_v42  ;;  %v12391_v37 = vrot.slane %v9177_v63, 1  ;;  %v9248_v42 = vmul.f32 %v5579_v1, %v6686_v39 }
 0x262   :  { %12390 = vst [vmem:[#allocation26_spill] sm:$0xff] %v9235_v17  ;;  %v672_v36 = vadd.f32 %v669_v2, %v582_v58  ;;  %v4376_v62 = vrot.slane %v9194_v0, 5  ;;  %v12393_v2 = vrot.slane %v9185_v10, 1  ;;  %v1143_v52 = vmul.f32 %v5579_v1, %v6576_v3  ;;  %v12395_v0 = vld [vmem:[#allocation78_spill] sm:$0xff] }
 0x263   :  { %v2099_v48 = vadd.f32 %v8979_v14, %v1979_v40  ;;  %v765_v38 = vsel %vm602_vm4, %v763_v19, %v12391_v37  ;;  %12392 = vst [vmem:[#allocation66_spill] sm:$0xff] %v9248_v42  ;;  %v955_v19 = vrot.slane %v951_v4, 1  ;;  %v9261_v37 = vmul.f32 %v5585_v55, %v6735_v28 }
 0x264   :  { %v768_v49 = vadd.f32 %v765_v38, %v672_v36  ;;  %v861_v14 = vsel %vm602_vm4, %v859_v46, %v12393_v2  ;;  %v12396_v36 = vrot.slane %v12395_v0, 5  ;;  %v1051_v2 = vrot.slane %v1047_v25, 1 }
 0x265   :  { %v2219_v58 = vadd.f32 %v8984_v30, %v2099_v48  ;;  %12394 = vst [vmem:[#allocation54_spill] sm:$0xff] %v9261_v37  ;;  %v1239_v1 = vmul.f32 %v5585_v55, %v6658_v54  ;;  %v12397_v30 = vrot.slane %v9217_v22, 1  ;;  %v11815_v40 = vrot.slane %v9248_v42, 1 }
 0x266   :  { %v9269_v38 = vsel %vm3632_vm8, %v12396_v36, %v4136_v9  ;;  %v864_v46 = vadd.f32 %v861_v14, %v768_v49  ;;  %v9278_v10 = vmul.f32 %v5591_v21, %v6228_v35  ;;  %v5597_v9 = vld [vmem:[%s11578_s0 + $0xd3] ss:$0 sm:$0xff]  ;;  %v4496_v49 = vrot.slane %v9201_v34, 6 }
 0x267   :  { %v2339_v4 = vadd.f32 %v9003_v20, %v2219_v58  ;;  %v957_v48 = vsel %vm602_vm4, %v955_v19, %v12397_v30  ;;  %v1147_v14 = vrot.slane %v1143_v52, 1  ;;  %v1336_v55 = vmul.f32 %v5591_v21, %v6215_v31  ;;  %v5603_v30 = vld [vmem:[%s11578_s0 + $0xd4] ss:$0 sm:$0xff] }
 0x268   :  { %12398 = vst [vmem:[#allocation67_spill] sm:$0xff] %v9278_v10  ;;  %v960_v25 = vadd.f32 %v957_v48, %v864_v46  ;;  %v12399_v58 = vrot.slane %v9235_v17, 1  ;;  %v11816_v0 = vrot.slane %v9261_v37, 1  ;;  %v9291_v36 = vmul.f32 %v5597_v9, %v6297_v5  ;;  %v12536_v17 = vld [vmem:[#allocation120_spill] sm:$0xff] }
 0x269   :  { %v2459_v20 = vadd.f32 %v9008_v12, %v2339_v4  ;;  %v4616_v34 = vrot.slane %v9207_v6, 6  ;;  %v1243_v46 = vrot.slane %v1239_v1, 1  ;;  %v1432_v21 = vmul.f32 %v5597_v9, %v6240_v41 }
 0x26a   :  { %v1053_v19 = vsel %vm602_vm4, %v1051_v2, %v12399_v58  ;;  %12400 = vst [vmem:[#allocation68_spill] sm:$0xff] %v9291_v36  ;;  %v1149_v2 = vsel %vm602_vm4, %v1147_v14, %v11815_v40  ;;  %v11817_v4 = vrot.slane %v9278_v10, 2  ;;  %v9304_v48 = vmul.f32 %v5603_v30, %v6392_v60  ;;  %v5609_v58 = vld [vmem:[%s11578_s0 + $0xd5] ss:$0 sm:$0xff]  ;;  %v5615_v40 = vld [vmem:[%s11578_s0 + $0xd6] ss:$0 sm:$0xff] }
 0x26b   :  { %v1056_v52 = vadd.f32 %v1053_v19, %v960_v25  ;;  %v2579_v12 = vadd.f32 %v9013_v16, %v2459_v20  ;;  %v4736_v6 = vrot.slane %v9226_v43, 6  ;;  %v1340_v25 = vrot.slane %v1336_v55, 2  ;;  %v12403_v43 = vld [vmem:[#allocation79_spill] sm:$0xff] }
 0x26c   :  { %12401 = vst [vmem:[#allocation69_spill] sm:$0xff] %v9304_v48  ;;  %v1528_v9 = vmul.f32 %v5603_v30, %v6310_v18  ;;  %v1245_v14 = vsel %vm602_vm4, %v1243_v46, %v11816_v0  ;;  %v9317_v19 = vmul.f32 %v5609_v58, %v6481_v47  ;;  %v9334_v20 = vmul.f32 %v5615_v40, %v6587_v53 }
 0x26d   :  { %v1152_v1 = vadd.f32 %v1149_v2, %v1056_v52  ;;  %v2699_v16 = vadd.f32 %v9036_v7, %v2579_v12  ;;  %v12404_v52 = vrot.slane %v12403_v43, 5  ;;  %v1436_v7 = vrot.slane %v1432_v21, 2  ;;  %v12406_v43 = vld [vmem:[#allocation80_spill] sm:$0xff] }
 0x26e   :  { %12402 = vst [vmem:[#allocation55_spill] sm:$0xff] %v9317_v19  ;;  %v1624_v12 = vmul.f32 %v5609_v58, %v6407_v15  ;;  %v1342_v2 = vsel %vm1275_vm5, %v1340_v25, %v11817_v4  ;;  %12405 = vst [vmem:[#allocation70_spill] sm:$0xff] %v9334_v20  ;;  %v12537_v22 = vrot.slane %v12536_v17, 5  ;;  %v12539_v17 = vld [vmem:[#allocation102_spill] sm:$0xff] }
 0x26f   :  { %v9325_v55 = vsel %vm3632_vm8, %v12404_v52, %v4256_v8  ;;  %v1248_v30 = vadd.f32 %v1245_v14, %v1152_v1  ;;  %v2820_v46 = vadd.f32 %v9078_v29, %v2699_v16  ;;  %v5621_v8 = vld [vmem:[%s11578_s0 + $0xd7] ss:$0 sm:$0xff]  ;;  %v12407_v1 = vrot.slane %v12406_v43, 5  ;;  %v12410_v43 = vld [vmem:[#allocation81_spill] sm:$0xff] }
 0x270   :  { %v1532_v29 = vrot.slane %v1528_v9, 2  ;;  %v1720_v16 = vmul.f32 %v5615_v40, %v6500_v24  ;;  %v12408_v14 = vrot.slane %v9291_v36, 2  ;;  %v9351_v0 = vmul.f32 %v5621_v8, %v6686_v39 }
 0x271   :  { %v9342_v21 = vsel %vm3632_vm8, %v12407_v1, %v4376_v62  ;;  %v1345_v58 = vadd.f32 %v1342_v2, %v1248_v30  ;;  %v2940_v25 = vadd.f32 %v9089_v23, %v2820_v46  ;;  %v5627_v62 = vld [vmem:[%s11578_s0 + $0xd8] ss:$0 sm:$0xff]  ;;  %v12411_v30 = vrot.slane %v12410_v43, 6  ;;  %v12414_v43 = vld [vmem:[#allocation83_spill] sm:$0xff] }
 0x272   :  { %v1438_v52 = vsel %vm1275_vm5, %v1436_v7, %v12408_v14  ;;  %12409 = vst [vmem:[#allocation56_spill] sm:$0xff] %v9351_v0  ;;  %v1628_v23 = vrot.slane %v1624_v12, 2  ;;  %v1816_v46 = vmul.f32 %v5621_v8, %v6576_v3  ;;  %v12412_v2 = vrot.slane %v9304_v48, 2 }
 0x273   :  { %v9359_v9 = vsel %vm35_vm2, %v12411_v30, %v4496_v49  ;;  %v1441_v40 = vadd.f32 %v1438_v52, %v1345_v58  ;;  %v3060_v7 = vadd.f32 %v9094_v51, %v2940_v25  ;;  %v9368_v4 = vmul.f32 %v5627_v62, %v6735_v28  ;;  %v5633_v49 = vld [vmem:[%s11578_s0 + $0xd9] ss:$0 sm:$0xff] }
 0x274   :  { %v1534_v1 = vsel %vm1275_vm5, %v1532_v29, %v12412_v2  ;;  %v12415_v58 = vrot.slane %v12414_v43, 6  ;;  %v1724_v51 = vrot.slane %v1720_v16, 2  ;;  %v1912_v25 = vmul.f32 %v5627_v62, %v6658_v54  ;;  %v12418_v43 = vld [vmem:[#allocation84_spill] sm:$0xff] }
 0x275   :  { %12413 = vst [vmem:[#allocation57_spill] sm:$0xff] %v9368_v4  ;;  %v1537_v8 = vadd.f32 %v1534_v1, %v1441_v40  ;;  %v3180_v29 = vadd.f32 %v9105_v59, %v3060_v7  ;;  %v12416_v52 = vrot.slane %v9317_v19, 2  ;;  %v9385_v14 = vmul.f32 %v5633_v49, %v6228_v35  ;;  %v12513_v19 = vld [vmem:[#allocation112_spill] sm:$0xff] }
 0x276   :  { %v9376_v12 = vsel %vm35_vm2, %v12415_v58, %v4616_v34  ;;  %v5639_v34 = vld [vmem:[%s11578_s0 + $0xda] ss:$0 sm:$0xff]  ;;  %v12419_v40 = vrot.slane %v12418_v43, 6  ;;  %v1820_v59 = vrot.slane %v1816_v46, 2  ;;  %v2025_v7 = vmul.f32 %v5633_v49, %v6215_v31  ;;  %v5924_v46 = vld [vmem:[%s11578_s0 + $0x5e] ss:$0 sm:$0xff] }
 0x277   :  { %v1630_v30 = vsel %vm1275_vm5, %v1628_v23, %v12416_v52  ;;  %12417 = vst [vmem:[#allocation15_spill] sm:$0xff] %v9385_v14  ;;  %v3300_v23 = vadd.f32 %v9110_v27, %v3180_v29  ;;  %v12420_v1 = vrot.slane %v9334_v20, 2  ;;  %v11818_v52 = vrot.slane %v9368_v4, 2 }
 0x278   :  { %v9393_v16 = vsel %vm35_vm2, %v12419_v40, %v4736_v6  ;;  %v1633_v62 = vadd.f32 %v1630_v30, %v1537_v8  ;;  %v9402_v2 = vmul.f32 %v5639_v34, %v6297_v5  ;;  %v5645_v6 = vld [vmem:[%s11578_s0 + $0xdb] ss:$0 sm:$0xff]  ;;  %v9411_v49 = vmul.f32 %v5924_v46, %v7709_v11  ;;  %v5651_v46 = vld [vmem:[%s11578_s0 + $0xdc] ss:$0 sm:$0xff] }
 0x279   :  { %v1726_v58 = vsel %vm1275_vm5, %v1724_v51, %v12420_v1  ;;  %v1916_v8 = vrot.slane %v1912_v25, 2  ;;  %v2145_v51 = vmul.f32 %v5639_v34, %v6240_v41  ;;  %v3420_v29 = vadd.f32 %v9115_v32, %v3300_v23  ;;  %v5925_v25 = vld [vmem:[%s11578_s0 + $0x5f] ss:$0 sm:$0xff] }
 0x27a   :  { %12421 = vst [vmem:[#allocation59_spill] sm:$0xff] %v9402_v2  ;;  %v1729_v27 = vadd.f32 %v1726_v58, %v1633_v62  ;;  %v12422_v30 = vrot.slane %v9351_v0, 2  ;;  %v9420_v1 = vmul.f32 %v5645_v6, %v6392_v60  ;;  %v9429_v34 = vmul.f32 %v5925_v25, %v7722_v56  ;;  %v5657_v25 = vld [vmem:[%s11578_s0 + $0xdd] ss:$0 sm:$0xff] }
 0x27b   :  { %v2031_v62 = vrot.slane %v2025_v7, 3  ;;  %v3540_v23 = vadd.f32 %v9123_v50, %v3420_v29  ;;  %v1918_v58 = vsel %vm1275_vm5, %v1916_v8, %v11818_v52  ;;  %v9438_v40 = vmul.f32 %v5651_v46, %v6481_v47  ;;  %v5926_v7 = vld [vmem:[%s11578_s0 + $0x60] ss:$0 sm:$0xff] }
 0x27c   :  { %v1822_v43 = vsel %vm1275_vm5, %v1820_v59, %v12422_v30  ;;  %12423 = vst [vmem:[#allocation23_spill] sm:$0xff] %v9420_v1  ;;  %v2265_v59 = vmul.f32 %v5645_v6, %v6310_v18  ;;  %v9447_v6 = vmul.f32 %v5926_v7, %v7741_v61  ;;  %v2385_v8 = vmul.f32 %v5651_v46, %v6407_v15  ;;  %v5663_v7 = vld [vmem:[%s11578_s0 + $0xde] ss:$0 sm:$0xff] }
 0x27d   :  { %v1825_v32 = vadd.f32 %v1822_v43, %v1729_v27  ;;  %12424 = vst [vmem:[#allocation31_spill] sm:$0xff] %v9438_v40  ;;  %v2151_v27 = vrot.slane %v2145_v51, 3  ;;  %v3661_v29 = vadd.f32 %v9128_v44, %v3540_v23  ;;  %v12425_v43 = vrot.slane %v9385_v14, 3  ;;  %v5927_v51 = vld [vmem:[%s11578_s0 + $0x61] ss:$0 sm:$0xff] }
 0x27e   :  { %v9456_v4 = vmul.f32 %v5657_v25, %v6587_v53  ;;  %v9465_v46 = vmul.f32 %v5927_v51, %v7745_v13  ;;  %v5802_v23 = vld [vmem:[%s11577_s3 + $0x18] sm:$0x3f]  ;;  %v9477_v0 = vmul.f32 %v5663_v7, %v6686_v39  ;;  %v2625_v51 = vmul.f32 %v5663_v7, %v6576_v3 }
 0x27f   :  { %v1921_v50 = vadd.f32 %v1918_v58, %v1825_v32  ;;  %v2033_v52 = vsel %vm1950_vm6, %v2031_v62, %v12425_v43  ;;  %v2271_v32 = vrot.slane %v2265_v59, 3  ;;  %v2505_v62 = vmul.f32 %v5657_v25, %v6500_v24 }
 0x280   :  { %12426 = vst [vmem:[#allocation60_spill] sm:$0xff] %v9456_v4  ;;  %v3781_v58 = vadd.f32 %v9139_v33, %v3661_v29  ;;  %v12427_v43 = vrot.slane %v9402_v2, 3  ;;  %12428 = vst [vmem:[#allocation71_spill] sm:$0xff] %v9477_v0  ;;  %v4856_v59 = vrot.slane %v9411_v49, 6  ;;  %v5344_v33 = vpop.permute.xlu0 %5343  ;;  %v11824_v14 = vrot.slane %v9456_v4, 3 }
 0x281   :  { %v2038_v44 = vadd.f32 %v2033_v52, %v1921_v50  ;;  %v5669_v52 = vld [vmem:[%s11578_s0 + $0xdf] ss:$0 sm:$0xff]  ;;  %v2391_v50 = vrot.slane %v2385_v8, 3  ;;  %v9493_v20 = vsel %vm55_vm3, %v5802_v23, %v5344_v33  ;;  %v4976_v23 = vrot.slane %v9429_v34, 6 }
 0x282   :  { %v2153_v30 = vsel %vm1950_vm6, %v2151_v27, %v12427_v43  ;;  %v3901_v29 = vadd.f32 %v9159_v57, %v3781_v58  ;;  %v12429_v27 = vrot.slane %v9420_v1, 3  ;;  %v9490_v2 = vmul.f32 %v5669_v52, %v6735_v28  ;;  %v5675_v57 = vld [vmem:[%s11578_s0 + $0xe0] ss:$0 sm:$0xff] }
 0x283   :  { %v2158_v25 = vadd.f32 %v2153_v30, %v2038_v44  ;;  %v2511_v30 = vrot.slane %v2505_v62, 3  ;;  %v2745_v8 = vmul.f32 %v5669_v52, %v6658_v54  ;;  %v12431_v44 = vrot.slane %v9438_v40, 3  ;;  %v5681_v62 = vld [vmem:[%s11578_s0 + $0xe1] ss:$0 sm:$0xff] }
 0x284   :  { %v2273_v43 = vsel %vm1950_vm6, %v2271_v32, %v12429_v27  ;;  %12430 = vst [vmem:[#allocation72_spill] sm:$0xff] %v9490_v2  ;;  %v4021_v7 = vadd.f32 %v9164_v45, %v3901_v29  ;;  %v11825_v58 = vrot.slane %v9477_v0, 3  ;;  %v9505_v27 = vmul.f32 %v5675_v57, %v6228_v35 }
 0x285   :  { %v2278_v49 = vadd.f32 %v2273_v43, %v2158_v25  ;;  %v2393_v32 = vsel %vm1950_vm6, %v2391_v50, %v12431_v44  ;;  %v2631_v25 = vrot.slane %v2625_v51, 3  ;;  %v9512_v33 = vmul.f32 %v5681_v62, %v6297_v5  ;;  %v5687_v44 = vld [vmem:[%s11578_s0 + $0xe2] ss:$0 sm:$0xff] }
 0x286   :  { %12432 = vst [vmem:[#allocation73_spill] sm:$0xff] %v9505_v27  ;;  %v4141_v45 = vadd.f32 %v9269_v38, %v4021_v7  ;;  %v2513_v50 = vsel %vm1950_vm6, %v2511_v30, %v11824_v14  ;;  %v11827_v29 = vrot.slane %v9490_v2, 3  ;;  %v2866_v43 = vmul.f32 %v5675_v57, %v6215_v31  ;;  %v5693_v14 = vld [vmem:[%s11578_s0 + $0xe3] ss:$0 sm:$0xff] }
 0x287   :  { %v2398_v52 = vadd.f32 %v2393_v32, %v2278_v49  ;;  %12433 = vst [vmem:[#allocation74_spill] sm:$0xff] %v9512_v33  ;;  %v5096_v34 = vrot.slane %v9447_v6, 6  ;;  %v2751_v49 = vrot.slane %v2745_v8, 3  ;;  %v2986_v32 = vmul.f32 %v5681_v62, %v6240_v41 }
 0x288   :  { %v4261_v38 = vadd.f32 %v9325_v55, %v4141_v45  ;;  %v2633_v30 = vsel %vm1950_vm6, %v2631_v25, %v11825_v58  ;;  %v9531_v57 = vmul.f32 %v5687_v44, %v6392_v60  ;;  %v5216_v6 = vrot.slane %v9465_v46, 6  ;;  %v12436_v58 = vld [vmem:[#allocation85_spill] sm:$0xff] }
 0x289   :  { %v2518_v51 = vadd.f32 %v2513_v50, %v2398_v52  ;;  %v11828_v62 = vrot.slane %v9512_v33, 4  ;;  %v3106_v55 = vmul.f32 %v5687_v44, %v6310_v18  ;;  %v2753_v25 = vsel %vm1950_vm6, %v2751_v49, %v11827_v29 }
 0x28a   :  { %12434 = vst [vmem:[#allocation75_spill] sm:$0xff] %v9531_v57  ;;  %v4381_v52 = vadd.f32 %v9342_v21, %v4261_v38  ;;  %v2872_v45 = vrot.slane %v2866_v43, 4  ;;  %v9544_v50 = vmul.f32 %v5693_v14, %v6481_v47  ;;  %v12437_v7 = vrot.slane %v12436_v58, 6  ;;  %v5699_v21 = vld [vmem:[%s11578_s0 + $0xe4] ss:$0 sm:$0xff] }
 0x28b   :  { %v2638_v8 = vadd.f32 %v2633_v30, %v2518_v51  ;;  %v2992_v51 = vrot.slane %v2986_v32, 4  ;;  %v3226_v30 = vmul.f32 %v5693_v14, %v6407_v15  ;;  %v12438_v49 = vrot.slane %v9505_v27, 4  ;;  %v12440_v14 = vld [vmem:[#allocation86_spill] sm:$0xff] }
 0x28c   :  { %12435 = vst [vmem:[#allocation61_spill] sm:$0xff] %v9544_v50  ;;  %v4857_v0 = vsel %vm35_vm2, %v12437_v7, %v4856_v59  ;;  %v4501_v44 = vadd.f32 %v9359_v9, %v4381_v52  ;;  %v11829_v38 = vrot.slane %v9531_v57, 4  ;;  %v9559_v58 = vmul.f32 %v5699_v21, %v6587_v53  ;;  %v5705_v59 = vld [vmem:[%s11578_s0 + $0xe5] ss:$0 sm:$0xff] }
 0x28d   :  { %v2758_v46 = vadd.f32 %v2753_v25, %v2638_v8  ;;  %v2874_v43 = vsel %vm2791_vm7, %v2872_v45, %v12438_v49  ;;  %v12441_v32 = vrot.slane %v12440_v14, 6  ;;  %v2994_v9 = vsel %vm2791_vm7, %v2992_v51, %v11828_v62  ;;  %v5711_v14 = vld [vmem:[%s11578_s0 + $0xe6] ss:$0 sm:$0xff] }
 0x28e   :  { %12439 = vst [vmem:[#allocation19_spill] sm:$0xff] %v9559_v58  ;;  %v3112_v52 = vrot.slane %v3106_v55, 4  ;;  %v4621_v25 = vadd.f32 %v9376_v12, %v4501_v44  ;;  %v11830_v45 = vrot.slane %v9544_v50, 4  ;;  %v3346_v49 = vmul.f32 %v5699_v21, %v6500_v24 }
 0x28f   :  { %v4977_v7 = vsel %vm35_vm2, %v12441_v32, %v4976_v23  ;;  %v2879_v8 = vadd.f32 %v2874_v43, %v2758_v46  ;;  %v9574_v29 = vmul.f32 %v5705_v59, %v6686_v39  ;;  %v12443_v23 = vld [vmem:[#allocation88_spill] sm:$0xff]  ;;  %v3232_v51 = vrot.slane %v3226_v30, 4 }
 0x290   :  { %v12444_v46 = vrot.slane %v12443_v23, 6  ;;  %v3466_v55 = vmul.f32 %v5705_v59, %v6576_v3  ;;  %v4741_v12 = vadd.f32 %v9393_v16, %v4621_v25  ;;  %v3114_v21 = vsel %vm2791_vm7, %v3112_v52, %v11829_v38  ;;  %v5717_v23 = vld [vmem:[%s11578_s0 + $0xe7] ss:$0 sm:$0xff] }
 0x291   :  { %12442 = vst [vmem:[#allocation76_spill] sm:$0xff] %v9574_v29  ;;  %v2999_v32 = vadd.f32 %v2994_v9, %v2879_v8  ;;  %v9589_v62 = vmul.f32 %v5711_v14, %v6735_v28  ;;  %v3586_v16 = vmul.f32 %v5711_v14, %v6658_v54  ;;  %v9599_v9 = vmul.f32 %v5717_v23, %v6228_v35 }
 0x292   :  { %v5097_v43 = vsel %vm35_vm2, %v12444_v46, %v5096_v34  ;;  %v12446_v34 = vld [vmem:[#allocation91_spill] sm:$0xff]  ;;  %v4861_v52 = vadd.f32 %v4857_v0, %v4741_v12  ;;  %v3234_v25 = vsel %vm2791_vm7, %v3232_v51, %v11830_v45  ;;  %v3352_v46 = vrot.slane %v3346_v49, 4 }
 0x293   :  { %12445 = vst [vmem:[#allocation77_spill] sm:$0xff] %v9589_v62  ;;  %v12447_v8 = vrot.slane %v12446_v34, 6  ;;  %v3119_v59 = vadd.f32 %v3114_v21, %v2999_v32  ;;  %12448 = vst [vmem:[#allocation62_spill] sm:$0xff] %v9599_v9  ;;  %v11831_v38 = vrot.slane %v9574_v29, 4  ;;  %v5723_v34 = vld [vmem:[%s11578_s0 + $0xe8] ss:$0 sm:$0xff]  ;;  %v3707_v32 = vmul.f32 %v5717_v23, %v6215_v31 }
 0x294   :  { %v9610_v14 = vmul.f32 %v5723_v34, %v6297_v5  ;;  %v5729_v0 = vld [vmem:[%s11578_s0 + $0xe9] ss:$0 sm:$0xff]  ;;  %v4981_v12 = vadd.f32 %v4977_v7, %v4861_v52  ;;  %v12450_v49 = vrot.slane %v9559_v58, 4  ;;  %v3827_v45 = vmul.f32 %v5723_v34, %v6240_v41  ;;  %v5741_v21 = vld [vmem:[%s11578_s0 + $0xeb] ss:$0 sm:$0xff] }
 0x295   :  { %v5217_v30 = vsel %vm35_vm2, %v12447_v8, %v5216_v6  ;;  %v3239_v44 = vadd.f32 %v3234_v25, %v3119_v59  ;;  %v3472_v6 = vrot.slane %v3466_v55, 4  ;;  %v9620_v8 = vmul.f32 %v5729_v0, %v6392_v60  ;;  %v5735_v55 = vld [vmem:[%s11578_s0 + $0xea] ss:$0 sm:$0xff]  ;;  %v5747_v25 = vld [vmem:[%s11578_s0 + $0xec] ss:$0 sm:$0xff] }
 0x296   :  { %12449 = vst [vmem:[#allocation63_spill] sm:$0xff] %v9610_v14  ;;  %v3354_v51 = vsel %vm2791_vm7, %v3352_v46, %v12450_v49  ;;  %v3592_v59 = vrot.slane %v3586_v16, 4  ;;  %v5101_v7 = vadd.f32 %v5097_v43, %v4981_v12  ;;  %v3947_v46 = vmul.f32 %v5729_v0, %v6310_v18 }
 0x297   :  { %12451 = vst [vmem:[#allocation64_spill] sm:$0xff] %v9620_v8  ;;  %v3359_v23 = vadd.f32 %v3354_v51, %v3239_v44  ;;  %v3474_v52 = vsel %vm2791_vm7, %v3472_v6, %v11831_v38  ;;  %v9632_v49 = vmul.f32 %v5735_v55, %v6481_v47  ;;  %v3713_v16 = vrot.slane %v3707_v32, 5 }
 0x298   :  { %v11832_v51 = vrot.slane %v9610_v14, 5  ;;  %v4067_v34 = vmul.f32 %v5735_v55, %v6407_v15  ;;  %v5221_v43 = vadd.f32 %v5217_v30, %v5101_v7  ;;  %v12453_v12 = vrot.slane %v9589_v62, 4 }
 0x299   :  { %12452 = vst [vmem:[#allocation78_spill] sm:$0xff] %v9632_v49  ;;  %v3479_v44 = vadd.f32 %v3474_v52, %v3359_v23  ;;  %v9644_v38 = vmul.f32 %v5741_v21, %v6587_v53  ;;  %v12455_v32 = vrot.slane %v9599_v9, 5  ;;  %v3833_v55 = vrot.slane %v3827_v45, 5 }
 0x29a   :  { %v3594_v6 = vsel %vm2791_vm7, %v3592_v59, %v12453_v12  ;;  %v4187_v30 = vmul.f32 %v5741_v21, %v6500_v24  ;;  %v9654_v7 = vadd.f32 %v9493_v20, %v5221_v43  ;;  %v3953_v59 = vrot.slane %v3947_v46, 5 }
 0x29b   :  { %12454 = vst [vmem:[#allocation79_spill] sm:$0xff] %v9644_v38  ;;  %v3599_v23 = vadd.f32 %v3594_v6, %v3479_v44  ;;  %v3715_v52 = vsel %vm3632_vm8, %v3713_v16, %v12455_v32  ;;  %v11836_v12 = vrot.slane %v9632_v49, 5  ;;  %v9658_v0 = vmul.f32 %v5747_v25, %v6686_v39  ;;  %v5753_v44 = vld [vmem:[%s11578_s0 + $0xed] ss:$0 sm:$0xff] }
 0x29c   :  { %12456 = vst [vmem:[#allocation80_spill] sm:$0xff] %v9654_v7  ;;  %v3835_v45 = vsel %vm3632_vm8, %v3833_v55, %v11832_v51  ;;  %v4073_v16 = vrot.slane %v4067_v34, 5  ;;  %v4307_v21 = vmul.f32 %v5747_v25, %v6576_v3  ;;  %5806 = vst.msk [vmem:[%s11580_s4 + $0x18] sm:$0x3f] %vm5320_vm9, %v9654_v7  ;;  %v12458_v20 = vrot.slane %v9620_v8, 5 }
 0x29d   :  { %12457 = vst [vmem:[#allocation81_spill] sm:$0xff] %v9658_v0  ;;  %v3720_v6 = vadd.f32 %v3715_v52, %v3599_v23  ;;  %v9677_v23 = vmul.f32 %v5753_v44, %v6735_v28  ;;  %v5759_v34 = vld [vmem:[%s11578_s0 + $0xee] ss:$0 sm:$0xff]  ;;  %v5928_v25 = vld [vmem:[%s11578_s0 + $0x62] ss:$0 sm:$0xff]  ;;  %v4193_v55 = vrot.slane %v4187_v30, 5  ;;  %v4427_v51 = vmul.f32 %v5753_v44, %v6658_v54 }
 0x29e   :  { %v3955_v46 = vsel %vm3632_vm8, %v3953_v59, %v12458_v20  ;;  %v239_v32 = vmul.f32 %v5928_v25, %v6228_v35  ;;  %v5929_v59 = vld [vmem:[%s11578_s0 + $0x63] ss:$0 sm:$0xff]  ;;  %v4075_v43 = vsel %vm3632_vm8, %v4073_v16, %v11836_v12  ;;  %v5930_v25 = vld [vmem:[%s11579_s1 + $0x2] ss:$0 sm:$0xff]  ;;  %v5931_v30 = vld [vmem:[%s11578_s0 + $0x64] ss:$0 sm:$0xff]  ;;  %v9704_v49 = vmul.f32 %v5759_v34, %v6228_v35 }
 0x29f   :  { %12459 = vst [vmem:[#allocation83_spill] sm:$0xff] %v9677_v23  ;;  %v3840_v52 = vadd.f32 %v3835_v45, %v3720_v6  ;;  %v293_v20 = vmul.f32 %v5929_v59, %v6297_v5  ;;  %v347_v44 = vmul.f32 %v5931_v30, %v6392_v60  ;;  %v4313_v14 = vrot.slane %v4307_v21, 5  ;;  %v5765_v16 = vld [vmem:[%s11578_s0 + $0xef] ss:$0 sm:$0xff] }
 0x2a0   :  { %v241_v6 = vadd.f32 %v5930_v25, %v239_v32  ;;  %v4547_v59 = vmul.f32 %v5759_v34, %v6215_v31  ;;  %12460 = vst [vmem:[#allocation84_spill] sm:$0xff] %v9704_v49  ;;  %v12461_v12 = vrot.slane %v9644_v38, 5  ;;  %v5932_v34 = vld [vmem:[%s11578_s0 + $0x65] ss:$0 sm:$0xff]  ;;  %v4433_v8 = vrot.slane %v4427_v51, 5 }
 0x2a1   :  { %v3960_v45 = vadd.f32 %v3955_v46, %v3840_v52  ;;  %v5771_v46 = vld [vmem:[%s11578_s0 + $0xf0] ss:$0 sm:$0xff]  ;;  %v401_v52 = vmul.f32 %v5932_v34, %v6481_v47  ;;  %v9721_v9 = vmul.f32 %v5765_v16, %v6297_v5  ;;  %v5933_v51 = vld [vmem:[%s11578_s0 + $0x66] ss:$0 sm:$0xff]  ;;  %v12514_v48 = vrot.slane %v12513_v19, 4  ;;  %v12515_v19 = vld [vmem:[#allocation99_spill] sm:$0xff] }
 0x2a2   :  { %v4195_v32 = vsel %vm3632_vm8, %v4193_v55, %v12461_v12  ;;  %v295_v21 = vadd.f32 %v293_v20, %v241_v6  ;;  %v9724_v12 = vmul.f32 %v5771_v46, %v6392_v60  ;;  %v12464_v55 = vrot.slane %v9658_v0, 5  ;;  %v5777_v6 = vld [vmem:[%s11578_s0 + $0xf1] ss:$0 sm:$0xff] }
 0x2a3   :  { %v4080_v30 = vadd.f32 %v4075_v43, %v3960_v45  ;;  %12462 = vst [vmem:[#allocation85_spill] sm:$0xff] %v9721_v9  ;;  %v4667_v20 = vmul.f32 %v5765_v16, %v6240_v41  ;;  %v455_v43 = vmul.f32 %v5933_v51, %v6587_v53  ;;  %v4553_v34 = vrot.slane %v4547_v59, 6  ;;  %v5934_v59 = vld [vmem:[%s11578_s0 + $0x67] ss:$0 sm:$0xff] }
 0x2a4   :  { %12463 = vst [vmem:[#allocation86_spill] sm:$0xff] %v9724_v12  ;;  %v4315_v25 = vsel %vm3632_vm8, %v4313_v14, %v12464_v55  ;;  %v349_v38 = vadd.f32 %v347_v44, %v295_v21  ;;  %v9739_v0 = vmul.f32 %v5777_v6, %v6481_v47  ;;  %v5783_v14 = vld [vmem:[%s11578_s0 + $0xf2] ss:$0 sm:$0xff]  ;;  %v12466_v16 = vrot.slane %v9677_v23, 5 }
 0x2a5   :  { %v4200_v45 = vadd.f32 %v4195_v32, %v4080_v30  ;;  %v4787_v21 = vmul.f32 %v5771_v46, %v6310_v18  ;;  %v509_v32 = vmul.f32 %v5934_v59, %v6686_v39  ;;  %v4907_v29 = vmul.f32 %v5777_v6, %v6407_v15 }
 0x2a6   :  { %12465 = vst [vmem:[#allocation88_spill] sm:$0xff] %v9739_v0  ;;  %v4435_v44 = vsel %vm3632_vm8, %v4433_v8, %v12466_v16  ;;  %v403_v55 = vadd.f32 %v401_v52, %v349_v38  ;;  %v5027_v23 = vmul.f32 %v5783_v14, %v6500_v24  ;;  %v9757_v8 = vmul.f32 %v5783_v14, %v6587_v53  ;;  %v5789_v38 = vld [vmem:[%s11578_s0 + $0xf3] ss:$0 sm:$0xff] }
 0x2a7   :  { %v4320_v30 = vadd.f32 %v4315_v25, %v4200_v45  ;;  %v5935_v25 = vld [vmem:[%s11578_s0 + $0x68] ss:$0 sm:$0xff]  ;;  %v4673_v16 = vrot.slane %v4667_v20, 6  ;;  %v11846_v6 = vrot.slane %v9739_v0, 6  ;;  %v12468_v59 = vrot.slane %v9704_v49, 6 }
 0x2a8   :  { %12467 = vst [vmem:[#allocation91_spill] sm:$0xff] %v9757_v8  ;;  %v457_v46 = vadd.f32 %v455_v43, %v403_v55  ;;  %v563_v52 = vmul.f32 %v5935_v25, %v6735_v28  ;;  %v4793_v62 = vrot.slane %v4787_v21, 6  ;;  %v9771_v51 = vmul.f32 %v5789_v38, %v6686_v39  ;;  %v5795_v20 = vld [vmem:[%s11578_s0 + $0xf4] ss:$0 sm:$0xff]  ;;  %v5941_v0 = vld [vmem:[%s11578_s0 + $0x7c] ss:$0 sm:$0xff] }
 0x2a9   :  { %v4440_v45 = vadd.f32 %v4435_v44, %v4320_v30  ;;  %v4555_v14 = vsel %vm35_vm2, %v4553_v34, %v12468_v59  ;;  %v12470_v55 = vrot.slane %v9721_v9, 6  ;;  %v4913_v57 = vrot.slane %v4907_v29, 6  ;;  %v12481_v9 = vld [vmem:[#allocation90_spill] sm:$0xff] }
 0x2aa   :  { %12469 = vst [vmem:[#allocation134_spill] sm:$0xff] %v9771_v51  ;;  %v511_v58 = vadd.f32 %v509_v32, %v457_v46  ;;  %v5147_v44 = vmul.f32 %v5789_v38, %v6576_v3  ;;  %v12471_v30 = vrot.slane %v9724_v12, 6  ;;  %v5033_v21 = vrot.slane %v5027_v23, 6  ;;  %v5936_v38 = vld [vmem:[%s11578_s0 + $0x77] ss:$0 sm:$0xff]  ;;  %v12474_v23 = vld [vmem:[#allocation87_spill] sm:$0xff] }
 0x2ab   :  { %v4560_v43 = vadd.f32 %v4555_v14, %v4440_v45  ;;  %v4675_v50 = vsel %vm35_vm2, %v4673_v16, %v12470_v55  ;;  %v4915_v45 = vsel %vm35_vm2, %v4913_v57, %v11846_v6  ;;  %v9788_v29 = vmul.f32 %v5795_v20, %v6735_v28  ;;  %v12473_v16 = vld [vmem:[#allocation2_spill] sm:$0xff]  ;;  %v5937_v14 = vld [vmem:[%s11578_s0 + $0x78] ss:$0 sm:$0xff] }
 0x2ac   :  { %v4795_v34 = vsel %vm35_vm2, %v4793_v62, %v12471_v30  ;;  %v565_v32 = vadd.f32 %v563_v52, %v511_v58  ;;  %v1987_v59 = vmul.f32 %v5936_v38, %v12473_v16  ;;  %v5825_v62 = vld [vmem:[%s11577_s3 + $0x40] sm:$0xff]  ;;  %v12475_v52 = vrot.slane %v12474_v23, 1  ;;  %v5938_v38 = vld [vmem:[%s11578_s0 + $0x79] ss:$0 sm:$0xff]  ;;  %v5438_v23 = vpop.permute.xlu1 %5437 }
 0x2ad   :  { %v4680_v46 = vadd.f32 %v4675_v50, %v4560_v43  ;;  %12472 = vst [vmem:[#allocation135_spill] sm:$0xff] %v9788_v29  ;;  %v5267_v50 = vmul.f32 %v5795_v20, %v6658_v54  ;;  %v12476_v43 = vld [vmem:[#allocation105_spill] sm:$0xff]  ;;  %v5153_v6 = vrot.slane %v5147_v44, 6  ;;  %v2227_v25 = vmul.f32 %v5938_v38, %v7704_v26 }
 0x2ae   :  { %v641_v57 = vadd.f32 %v12475_v52, %v565_v32  ;;  %v2107_v55 = vmul.f32 %v5937_v14, %v12476_v43  ;;  %v5939_v20 = vld [vmem:[%s11578_s0 + $0x7a] ss:$0 sm:$0xff]  ;;  %v12477_v52 = vrot.slane %v9757_v8, 6  ;;  %v12482_v49 = vrot.slane %v12481_v9, 1  ;;  %v5943_v9 = vld [vmem:[%s11578_s0 + $0x7e] ss:$0 sm:$0xff] }
 0x2af   :  { %v4800_v30 = vadd.f32 %v4795_v34, %v4680_v46  ;;  %v2347_v32 = vmul.f32 %v5939_v20, %v7709_v11  ;;  %v12478_v14 = vld [vmem:[#allocation89_spill] sm:$0xff]  ;;  %v2587_v20 = vmul.f32 %v5941_v0, %v7741_v61  ;;  %v2234_v2 = vrot.slane %v2227_v25, 3 }
 0x2b0   :  { %v5035_v58 = vsel %vm35_vm2, %v5033_v21, %v12477_v52  ;;  %v12479_v34 = vrot.slane %v12478_v14, 1  ;;  %v5940_v46 = vld [vmem:[%s11578_s0 + $0x7b] ss:$0 sm:$0xff]  ;;  %v5443_v21 = vsel %vm55_vm3, %v5825_v62, %v5438_v23  ;;  %v1994_v52 = vrot.slane %v1987_v59, 3  ;;  %v5942_v0 = vld [vmem:[%s11578_s0 + $0x7d] ss:$0 sm:$0xff] }
 0x2b1   :  { %v2467_v38 = vmul.f32 %v5940_v46, %v7722_v56  ;;  %v4920_v12 = vadd.f32 %v4915_v45, %v4800_v30  ;;  %v2114_v33 = vrot.slane %v2107_v55, 3  ;;  %v2354_v4 = vrot.slane %v2347_v32, 3  ;;  %v12483_v62 = vld [vmem:[#allocation92_spill] sm:$0xff]  ;;  %v5944_v32 = vld [vmem:[%s11578_s0 + $0x7f] ss:$0 sm:$0xff] }
 0x2b2   :  { %v737_v44 = vadd.f32 %v12479_v34, %v641_v57  ;;  %v12480_v57 = vrot.slane %v9771_v51, 6  ;;  %v5273_v34 = vrot.slane %v5267_v50, 6  ;;  %v2707_v45 = vmul.f32 %v5942_v0, %v7745_v13  ;;  %v5946_v0 = vld [vmem:[%s11578_s0 + $0x81] ss:$0 sm:$0xff]  ;;  %v12509_v51 = vld [vmem:[#allocation111_spill] sm:$0xff] }
 0x2b3   :  { %v5040_v27 = vadd.f32 %v5035_v58, %v4920_v12  ;;  %v12484_v59 = vrot.slane %v12483_v62, 1  ;;  %v2474_v23 = vrot.slane %v2467_v38, 3  ;;  %v2594_v8 = vrot.slane %v2587_v20, 3  ;;  %v12486_v58 = vld [vmem:[#allocation104_spill] sm:$0xff]  ;;  %v12488_v38 = vld [vmem:[#allocation93_spill] sm:$0xff] }
 0x2b4   :  { %v5155_v14 = vsel %vm35_vm2, %v5153_v6, %v12480_v57  ;;  %v833_v46 = vadd.f32 %v12482_v49, %v737_v44  ;;  %v2828_v49 = vmul.f32 %v5943_v9, %v12473_v16  ;;  %v12485_v6 = vrot.slane %v9788_v29, 6  ;;  %v12492_v9 = vld [vmem:[#allocation107_spill] sm:$0xff] }
 0x2b5   :  { %v5160_v12 = vadd.f32 %v5155_v14, %v5040_v27  ;;  %v12487_v50 = vrot.slane %v12486_v58, 3  ;;  %v2948_v44 = vmul.f32 %v5944_v32, %v12476_v43  ;;  %v12489_v20 = vrot.slane %v12488_v38, 1  ;;  %v12496_v38 = vld [vmem:[#allocation94_spill] sm:$0xff] }
 0x2b6   :  { %v929_v30 = vadd.f32 %v12484_v59, %v833_v46  ;;  %v5275_v25 = vsel %vm35_vm2, %v5273_v34, %v12485_v6  ;;  %v12490_v46 = vld [vmem:[#allocation106_spill] sm:$0xff]  ;;  %v3188_v62 = vmul.f32 %v5946_v0, %v7709_v11  ;;  %v2714_v32 = vrot.slane %v2707_v45, 3 }
 0x2b7   :  { %v9849_v55 = vsel %vm1950_vm6, %v12487_v50, %v1994_v52  ;;  %v12491_v27 = vrot.slane %v12490_v46, 3  ;;  %v5945_v34 = vld [vmem:[%s11578_s0 + $0x80] ss:$0 sm:$0xff]  ;;  %v5280_v59 = vadd.f32 %v5275_v25, %v5160_v12  ;;  %v12500_v12 = vld [vmem:[#allocation109_spill] sm:$0xff]  ;;  %v2955_v45 = vrot.slane %v2948_v44, 4 }
 0x2b8   :  { %v1025_v57 = vadd.f32 %v12489_v20, %v929_v30  ;;  %v3068_v52 = vmul.f32 %v5945_v34, %v7704_v26  ;;  %v12493_v30 = vrot.slane %v12492_v9, 3  ;;  %v12497_v20 = vrot.slane %v12496_v38, 1  ;;  %v5949_v38 = vld [vmem:[%s11578_s0 + $0x84] ss:$0 sm:$0xff] }
 0x2b9   :  { %v9860_v14 = vsel %vm1950_vm6, %v12491_v27, %v2114_v33  ;;  %v12494_v33 = vld [vmem:[#allocation53_spill] sm:$0xff]  ;;  %v12498_v27 = vld [vmem:[#allocation108_spill] sm:$0xff]  ;;  %v12501_v25 = vrot.slane %v12500_v12, 3  ;;  %v9895_v9 = vadd.f32 %v5443_v21, %v5280_v59  ;;  %v5950_v12 = vld [vmem:[%s11578_s0 + $0x85] ss:$0 sm:$0xff]  ;;  %v9960_v36 = vsel %vm2791_vm7, %v12514_v48, %v2955_v45 }
 0x2ba   :  { %v9873_v6 = vsel %vm1950_vm6, %v12493_v30, %v2234_v2  ;;  %v12495_v58 = vrot.slane %v12494_v33, 3  ;;  %v1121_v46 = vadd.f32 %v12497_v20, %v1025_v57  ;;  %v12499_v34 = vrot.slane %v12498_v27, 3  ;;  %v5947_v57 = vld [vmem:[%s11578_s0 + $0x82] ss:$0 sm:$0xff]  ;;  %v5948_v30 = vld [vmem:[%s11578_s0 + $0x83] ss:$0 sm:$0xff] }
 0x2bb   :  { %v9890_v0 = vsel %vm1950_vm6, %v12501_v25, %v2594_v8  ;;  %v2835_v2 = vrot.slane %v2828_v49, 4  ;;  %12502 = vst [vmem:[#allocation2_spill] sm:$0xff] %v9895_v9  ;;  %v3428_v8 = vmul.f32 %v5948_v30, %v7741_v61  ;;  %v5514_v49 = vld [vmem:[%s11578_s0 + $0xf6] ss:$0 sm:$0xff]  ;;  %v12503_v33 = vld [vmem:[#allocation95_spill] sm:$0xff]  ;;  %v3075_v44 = vrot.slane %v3068_v52, 4 }
 0x2bc   :  { %v9878_v50 = vsel %vm1950_vm6, %v12495_v58, %v2354_v4  ;;  %v9885_v29 = vsel %vm1950_vm6, %v12499_v34, %v2474_v23  ;;  %v5508_v4 = vld [vmem:[%s11578_s0 + $0xf5] ss:$0 sm:$0xff]  ;;  %v3308_v23 = vmul.f32 %v5947_v57, %v7722_v56  ;;  %v12504_v21 = vrot.slane %v12503_v33, 1  ;;  %v5502_v27 = vld [vmem:[%s11579_s1 + $0x5] ss:$0 sm:$0xff]  ;;  %5829 = vst.msk [vmem:[%s11580_s4 + $0x40] sm:$0xff] %vm55_vm3, %v9895_v9 }
 0x2bd   :  { %v3195_v58 = vrot.slane %v3188_v62, 4  ;;  %v3548_v20 = vmul.f32 %v5949_v38, %v7745_v13  ;;  %v5520_v34 = vld [vmem:[%s11578_s0 + $0xf7] ss:$0 sm:$0xff]  ;;  %v12505_v52 = vld [vmem:[#allocation110_spill] sm:$0xff]  ;;  %v3669_v25 = vmul.f32 %v5950_v12, %v12473_v16  ;;  %v265_v33 = vmul.f32 %v5508_v4, %v6215_v31  ;;  %v5526_v4 = vld [vmem:[%s11578_s0 + $0xf8] ss:$0 sm:$0xff] }
 0x2be   :  { %v1217_v59 = vadd.f32 %v12504_v21, %v1121_v46  ;;  %v12506_v62 = vrot.slane %v12505_v52, 3  ;;  %v5951_v57 = vld [vmem:[%s11578_s0 + $0x86] ss:$0 sm:$0xff]  ;;  %v12507_v21 = vld [vmem:[#allocation96_spill] sm:$0xff]  ;;  %v5952_v12 = vld [vmem:[%s11578_s0 + $0x87] ss:$0 sm:$0xff]  ;;  %v319_v1 = vmul.f32 %v5514_v49, %v6240_v41 }
 0x2bf   :  { %v3789_v30 = vmul.f32 %v5951_v57, %v12476_v43  ;;  %v12508_v38 = vrot.slane %v12507_v21, 2  ;;  %v3909_v40 = vmul.f32 %v5952_v12, %v7704_v26  ;;  %v3315_v57 = vrot.slane %v3308_v23, 4  ;;  %v5953_v49 = vld [vmem:[%s11578_s0 + $0x88] ss:$0 sm:$0xff]  ;;  %v5532_v23 = vld [vmem:[%s11578_s0 + $0xf9] ss:$0 sm:$0xff] }
 0x2c0   :  { %v9928_v46 = vsel %vm1950_vm6, %v12506_v62, %v2714_v32  ;;  %v12510_v32 = vrot.slane %v12509_v51, 4  ;;  %v3435_v21 = vrot.slane %v3428_v8, 4  ;;  %v373_v51 = vmul.f32 %v5520_v34, %v6310_v18  ;;  %v12517_v45 = vld [vmem:[#allocation113_spill] sm:$0xff] }
 0x2c1   :  { %v1314_v52 = vadd.f32 %v12508_v38, %v1217_v59  ;;  %v267_v59 = vadd.f32 %v5502_v27, %v265_v33  ;;  %v12511_v38 = vld [vmem:[#allocation97_spill] sm:$0xff]  ;;  %v3555_v12 = vrot.slane %v3548_v20, 4  ;;  %v4029_v10 = vmul.f32 %v5953_v49, %v7709_v11 }
 0x2c2   :  { %v9944_v62 = vsel %vm2791_vm7, %v12510_v32, %v2835_v2  ;;  %v12512_v2 = vrot.slane %v12511_v38, 2  ;;  %v3676_v8 = vrot.slane %v3669_v25, 5  ;;  %v3796_v27 = vrot.slane %v3789_v30, 5  ;;  %v12521_v25 = vld [vmem:[#allocation115_spill] sm:$0xff] }
 0x2c3   :  { %v321_v34 = vadd.f32 %v319_v1, %v267_v59  ;;  %v427_v33 = vmul.f32 %v5526_v4, %v6407_v15  ;;  %v12518_v20 = vrot.slane %v12517_v45, 4  ;;  %v3916_v42 = vrot.slane %v3909_v40, 5  ;;  %v5538_v1 = vld [vmem:[%s11578_s0 + $0xfa] ss:$0 sm:$0xff]  ;;  %v12523_v59 = vld [vmem:[#allocation116_spill] sm:$0xff] }
 0x2c4   :  { %v1410_v32 = vadd.f32 %v12512_v2, %v1314_v52  ;;  %v12516_v52 = vrot.slane %v12515_v19, 2  ;;  %v12519_v2 = vld [vmem:[#allocation114_spill] sm:$0xff]  ;;  %v12522_v30 = vrot.slane %v12521_v25, 4  ;;  %v12525_v40 = vld [vmem:[#allocation100_spill] sm:$0xff]  ;;  %v4036_v25 = vrot.slane %v4029_v10, 5 }
 0x2c5   :  { %v9975_v38 = vsel %vm2791_vm7, %v12518_v20, %v3075_v44  ;;  %v12520_v37 = vrot.slane %v12519_v2, 4  ;;  %v375_v19 = vadd.f32 %v373_v51, %v321_v34  ;;  %v12527_v20 = vld [vmem:[#allocation117_spill] sm:$0xff]  ;;  %v12530_v34 = vld [vmem:[#allocation118_spill] sm:$0xff]  ;;  %v10031_v63 = vsel %vm3632_vm8, %v12537_v22, %v3916_v42 }
 0x2c6   :  { %v1506_v48 = vadd.f32 %v12516_v52, %v1410_v32  ;;  %v9988_v4 = vsel %vm2791_vm7, %v12522_v30, %v3315_v57  ;;  %v12524_v32 = vrot.slane %v12523_v59, 4  ;;  %v481_v52 = vmul.f32 %v5532_v23, %v6500_v24  ;;  %v5556_v23 = vld [vmem:[%s11578_s0 + $0xfd] ss:$0 sm:$0xff]  ;;  %v12532_v59 = vld [vmem:[#allocation119_spill] sm:$0xff] }
 0x2c7   :  { %v9980_v49 = vsel %vm2791_vm7, %v12520_v37, %v3195_v58  ;;  %v5550_v37 = vld [vmem:[%s11578_s0 + $0xfc] ss:$0 sm:$0xff]  ;;  %v12526_v58 = vrot.slane %v12525_v40, 2  ;;  %v12528_v2 = vrot.slane %v12527_v20, 4  ;;  %v12531_v30 = vrot.slane %v12530_v34, 5 }
 0x2c8   :  { %v9993_v44 = vsel %vm2791_vm7, %v12524_v32, %v3435_v21  ;;  %v5544_v21 = vld [vmem:[%s11578_s0 + $0xfb] ss:$0 sm:$0xff]  ;;  %v10010_v51 = vmul.f32 %v5550_v37, %v6228_v35  ;;  %v429_v32 = vadd.f32 %v427_v33, %v375_v19  ;;  %v535_v40 = vmul.f32 %v5538_v1, %v6576_v3 }
 0x2c9   :  { %v1602_v45 = vadd.f32 %v12526_v58, %v1506_v48  ;;  %v10004_v57 = vsel %vm2791_vm7, %v12528_v2, %v3555_v12  ;;  %v10018_v48 = vsel %vm3632_vm8, %v12531_v30, %v3676_v8  ;;  %v12533_v12 = vrot.slane %v12532_v59, 5  ;;  %v12534_v58 = vld [vmem:[#allocation101_spill] sm:$0xff] }
 0x2ca   :  { %12529 = vst [vmem:[#allocation87_spill] sm:$0xff] %v10010_v51  ;;  %v12535_v20 = vrot.slane %v12534_v58, 2  ;;  %v679_v34 = vmul.f32 %v5550_v37, %v6215_v31  ;;  %v10035_v8 = vmul.f32 %v5556_v23, %v6297_v5  ;;  %v483_v33 = vadd.f32 %v481_v52, %v429_v32  ;;  %v12541_v30 = vld [vmem:[#allocation121_spill] sm:$0xff] }
 0x2cb   :  { %v10023_v10 = vsel %vm3632_vm8, %v12533_v12, %v3796_v27  ;;  %v5562_v27 = vld [vmem:[%s11578_s0 + $0xfe] ss:$0 sm:$0xff]  ;;  %v589_v1 = vmul.f32 %v5544_v21, %v6658_v54  ;;  %v775_v19 = vmul.f32 %v5556_v23, %v6240_v41  ;;  %v12540_v22 = vrot.slane %v12539_v17, 2  ;;  %v5954_v12 = vld [vmem:[%s11578_s0 + $0x89] ss:$0 sm:$0xff] }
 0x2cc   :  { %v1698_v2 = vadd.f32 %v12535_v20, %v1602_v45  ;;  %12538 = vst [vmem:[#allocation105_spill] sm:$0xff] %v10035_v8  ;;  %v10043_v45 = vmul.f32 %v5562_v27, %v6392_v60  ;;  %v12542_v37 = vrot.slane %v12541_v30, 5  ;;  %v10056_v52 = vmul.f32 %v5954_v12, %v7722_v56  ;;  %v5955_v23 = vld [vmem:[%s11578_s0 + $0x8a] ss:$0 sm:$0xff]  ;;  %v5568_v17 = vld [vmem:[%s11578_s0 + $0xff] ss:$0 sm:$0xff] }
 0x2cd   :  { %v10063_v32 = vmul.f32 %v5955_v23, %v7741_v61  ;;  %v537_v20 = vadd.f32 %v535_v40, %v483_v33  ;;  %v683_v12 = vrot.slane %v679_v34, 1  ;;  %v10079_v21 = vmul.f32 %v5568_v17, %v6481_v47  ;;  %v5957_v40 = vld [vmem:[%s11578_s0 + $0x8c] ss:$0 sm:$0xff] }
 0x2ce   :  { %v1794_v42 = vadd.f32 %v12540_v22, %v1698_v2  ;;  %v10050_v59 = vsel %vm3632_vm8, %v12542_v37, %v4036_v25  ;;  %v5956_v25 = vld [vmem:[%s11578_s0 + $0x8b] ss:$0 sm:$0xff]  ;;  %v871_v2 = vmul.f32 %v5562_v27, %v6310_v18  ;;  %v10088_v27 = vmul.f32 %v5957_v40, %v12473_v16  ;;  %v5580_v40 = vld [vmem:[%s11578_s0 + $0x101] ss:$0 sm:$0xff] }
 0x2cf   :  { %v10069_v58 = vmul.f32 %v5956_v25, %v7745_v13  ;;  %v12543_v22 = vld [vmem:[#allocation103_spill] sm:$0xff]  ;;  %v5574_v25 = vld [vmem:[%s11578_s0 + $0x100] ss:$0 sm:$0xff]  ;;  %v591_v33 = vadd.f32 %v589_v1, %v537_v20  ;;  %v967_v9 = vmul.f32 %v5568_v17, %v6407_v15 }
 0x2d0   :  { %v12544_v30 = vrot.slane %v12543_v22, 2  ;;  %v779_v22 = vrot.slane %v775_v19, 1  ;;  %v10097_v7 = vmul.f32 %v5574_v25, %v6587_v53  ;;  %v5958_v1 = vld [vmem:[%s11578_s0 + $0x8d] ss:$0 sm:$0xff]  ;;  %v875_v20 = vrot.slane %v871_v2, 1 }
 0x2d1   :  { %v10106_v19 = vmul.f32 %v5958_v1, %v12476_v43  ;;  %v5586_v1 = vld [vmem:[%s11578_s0 + $0x102] ss:$0 sm:$0xff] }
 0x2d2   :  { %v1890_v37 = vadd.f32 %v12544_v30, %v1794_v42  ;;  %v12545_v30 = vrot.slane %v10010_v51, 1  ;;  %12546 = vst [vmem:[#allocation89_spill] sm:$0xff] %v10097_v7  ;;  %v10115_v51 = vmul.f32 %v5580_v40, %v6686_v39  ;;  %v10128_v34 = vmul.f32 %v5586_v1, %v6735_v28 }
 0x2d4   :  { %v1999_v42 = vadd.f32 %v9849_v55, %v1890_v37  ;;  %v685_v23 = vsel %vm602_vm4, %v683_v12, %v12545_v30  ;;  %v1063_v37 = vmul.f32 %v5574_v25, %v6500_v24  ;;  %v12547_v12 = vrot.slane %v10035_v8, 1  ;;  %v5592_v8 = vld [vmem:[%s11578_s0 + $0x103] ss:$0 sm:$0xff] }
 0x2d5   :  { %v688_v55 = vadd.f32 %v685_v23, %v591_v33  ;;  %v4156_v23 = vrot.slane %v10056_v52, 5  ;;  %v12548_v25 = vrot.slane %v10043_v45, 1  ;;  %v1159_v33 = vmul.f32 %v5580_v40, %v6576_v3 }
 0x2d6   :  { %v2119_v17 = vadd.f32 %v9860_v14, %v1999_v42  ;;  %v781_v30 = vsel %vm602_vm4, %v779_v22, %v12547_v12  ;;  %v971_v42 = vrot.slane %v967_v9, 1  ;;  %v4276_v52 = vrot.slane %v10063_v32, 5  ;;  %v5598_v12 = vld [vmem:[%s11578_s0 + $0x104] ss:$0 sm:$0xff]  ;;  %v5959_v32 = vld [vmem:[%s11578_s0 + $0x8e] ss:$0 sm:$0xff] }
 0x2d7   :  { %v784_v2 = vadd.f32 %v781_v30, %v688_v55  ;;  %v877_v14 = vsel %vm602_vm4, %v875_v20, %v12548_v25  ;;  %v1067_v30 = vrot.slane %v1063_v37, 1  ;;  %v1255_v20 = vmul.f32 %v5586_v1, %v6658_v54 }
 0x2d8   :  { %v2239_v22 = vadd.f32 %v9873_v6, %v2119_v17  ;;  %v12549_v6 = vrot.slane %v10079_v21, 1  ;;  %v10141_v25 = vmul.f32 %v5592_v8, %v6228_v35  ;;  %v10150_v37 = vmul.f32 %v5959_v32, %v7704_v26  ;;  %v5604_v32 = vld [vmem:[%s11578_s0 + $0x105] ss:$0 sm:$0xff] }
 0x2d9   :  { %v880_v55 = vadd.f32 %v877_v14, %v784_v2  ;;  %v1163_v1 = vrot.slane %v1159_v33, 1  ;;  %v1352_v2 = vmul.f32 %v5592_v8, %v6215_v31  ;;  %v10159_v17 = vmul.f32 %v5598_v12, %v6297_v5 }
 0x2da   :  { %v2359_v40 = vadd.f32 %v9878_v50, %v2239_v22  ;;  %v973_v9 = vsel %vm602_vm4, %v971_v42, %v12549_v6  ;;  %12550 = vst [vmem:[#allocation90_spill] sm:$0xff] %v10141_v25  ;;  %v12551_v22 = vrot.slane %v10097_v7, 1  ;;  %v1448_v8 = vmul.f32 %v5598_v12, %v6240_v41  ;;  %v5610_v7 = vld [vmem:[%s11578_s0 + $0x106] ss:$0 sm:$0xff] }
 0x2db   :  { %v976_v50 = vadd.f32 %v973_v9, %v880_v55  ;;  %v4396_v55 = vrot.slane %v10069_v58, 5  ;;  %v1259_v9 = vrot.slane %v1255_v20, 1  ;;  %v10172_v6 = vmul.f32 %v5604_v32, %v6392_v60 }
 0x2dc   :  { %v2479_v14 = vadd.f32 %v9885_v29, %v2359_v40  ;;  %v1069_v42 = vsel %vm602_vm4, %v1067_v30, %v12551_v22  ;;  %v12552_v40 = vrot.slane %v10115_v51, 1  ;;  %v4516_v58 = vrot.slane %v10088_v27, 6  ;;  %v5616_v22 = vld [vmem:[%s11578_s0 + $0x107] ss:$0 sm:$0xff] }
 0x2dd   :  { %v1072_v33 = vadd.f32 %v1069_v42, %v976_v50  ;;  %v1356_v50 = vrot.slane %v1352_v2, 2  ;;  %v1544_v12 = vmul.f32 %v5604_v32, %v6310_v18  ;;  %v4636_v27 = vrot.slane %v10106_v19, 6  ;;  %v5622_v42 = vld [vmem:[%s11578_s0 + $0x108] ss:$0 sm:$0xff]  ;;  %v12556_v19 = vld [vmem:[#allocation122_spill] sm:$0xff] }
 0x2de   :  { %v2599_v29 = vadd.f32 %v9890_v0, %v2479_v14  ;;  %v1165_v30 = vsel %vm602_vm4, %v1163_v1, %v12552_v40  ;;  %v12553_v14 = vrot.slane %v10128_v34, 1  ;;  %v10185_v40 = vmul.f32 %v5610_v7, %v6481_v47 }
 0x2df   :  { %v1168_v20 = vadd.f32 %v1165_v30, %v1072_v33  ;;  %v1452_v33 = vrot.slane %v1448_v8, 2  ;;  %v1640_v32 = vmul.f32 %v5610_v7, %v6407_v15 }
 0x2e0   :  { %v2719_v0 = vadd.f32 %v9928_v46, %v2599_v29  ;;  %v1261_v1 = vsel %vm602_vm4, %v1259_v9, %v12553_v14  ;;  %v12554_v29 = vrot.slane %v10141_v25, 2  ;;  %v10198_v14 = vmul.f32 %v5616_v22, %v6587_v53 }
 0x2e1   :  { %v1264_v2 = vadd.f32 %v1261_v1, %v1168_v20  ;;  %v12557_v20 = vrot.slane %v12556_v19, 5  ;;  %v12558_v1 = vrot.slane %v10159_v17, 2  ;;  %v10215_v25 = vmul.f32 %v5622_v42, %v6686_v39  ;;  %v12560_v19 = vld [vmem:[#allocation123_spill] sm:$0xff] }
 0x2e2   :  { %v2840_v46 = vadd.f32 %v9944_v62, %v2719_v0  ;;  %v1358_v9 = vsel %vm1275_vm5, %v1356_v50, %v12554_v29  ;;  %12555 = vst [vmem:[#allocation92_spill] sm:$0xff] %v10198_v14  ;;  %v1548_v62 = vrot.slane %v1544_v12, 2  ;;  %v1736_v0 = vmul.f32 %v5616_v22, %v6500_v24 }
 0x2e3   :  { %v10206_v8 = vsel %vm3632_vm8, %v12557_v20, %v4156_v23  ;;  %v1361_v7 = vadd.f32 %v1358_v9, %v1264_v2  ;;  %v1454_v29 = vsel %vm1275_vm5, %v1452_v33, %v12558_v1  ;;  %12559 = vst [vmem:[#allocation104_spill] sm:$0xff] %v10215_v25  ;;  %v5628_v23 = vld [vmem:[%s11578_s0 + $0x109] ss:$0 sm:$0xff]  ;;  %v12561_v2 = vrot.slane %v12560_v19, 5 }
 0x2e4   :  { %v2960_v50 = vadd.f32 %v9960_v36, %v2840_v46  ;;  %v1644_v36 = vrot.slane %v1640_v32, 2  ;;  %v1832_v46 = vmul.f32 %v5622_v42, %v6576_v3  ;;  %v12562_v9 = vrot.slane %v10172_v6, 2 }
 0x2e5   :  { %v10223_v12 = vsel %vm3632_vm8, %v12561_v2, %v4276_v52  ;;  %v1457_v22 = vadd.f32 %v1454_v29, %v1361_v7  ;;  %v11875_v1 = vrot.slane %v10198_v14, 2  ;;  %v10232_v30 = vmul.f32 %v5628_v23, %v6735_v28  ;;  %v10237_v52 = vld [vmem:[%s11578_s0 + $0x10a] ss:$0 sm:$0xff] }
 0x2e6   :  { %v3080_v33 = vadd.f32 %v9975_v38, %v2960_v50  ;;  %v1550_v20 = vsel %vm1275_vm5, %v1548_v62, %v12562_v9  ;;  %v4756_v32 = vrot.slane %v10150_v37, 6  ;;  %v1740_v42 = vrot.slane %v1736_v0, 2  ;;  %v10253_v37 = vld [vmem:[%s11578_s0 + $0x10b] ss:$0 sm:$0xff]  ;;  %v12566_v0 = vld [vmem:[#allocation124_spill] sm:$0xff] }
 0x2e7   :  { %12563 = vst [vmem:[#allocation93_spill] sm:$0xff] %v10232_v30  ;;  %v1553_v7 = vadd.f32 %v1550_v20, %v1457_v22  ;;  %v1928_v38 = vmul.f32 %v5628_v23, %v6658_v54  ;;  %v12564_v62 = vrot.slane %v10185_v40, 2  ;;  %v10248_v2 = vmul.f32 %v10237_v52, %v6228_v35 }
 0x2e8   :  { %v3200_v50 = vadd.f32 %v9980_v49, %v3080_v33  ;;  %v12567_v22 = vrot.slane %v12566_v0, 5  ;;  %v1836_v33 = vrot.slane %v1832_v46, 2  ;;  %v1742_v20 = vsel %vm1275_vm5, %v1740_v42, %v11875_v1  ;;  %v12569_v46 = vld [vmem:[#allocation125_spill] sm:$0xff] }
 0x2e9   :  { %v1646_v29 = vsel %vm1275_vm5, %v1644_v36, %v12564_v62  ;;  %12565 = vst [vmem:[#allocation106_spill] sm:$0xff] %v10248_v2  ;;  %v2045_v36 = vmul.f32 %v10237_v52, %v6215_v31  ;;  %v10269_v19 = vmul.f32 %v10253_v37, %v6297_v5  ;;  %v2165_v42 = vmul.f32 %v10253_v37, %v6240_v41 }
 0x2ea   :  { %v10258_v23 = vsel %vm3632_vm8, %v12567_v22, %v4396_v55  ;;  %v1649_v49 = vadd.f32 %v1646_v29, %v1553_v7  ;;  %v3320_v9 = vadd.f32 %v9988_v4, %v3200_v50  ;;  %v10274_v55 = vld [vmem:[%s11578_s0 + $0x10c] ss:$0 sm:$0xff]  ;;  %v12570_v7 = vrot.slane %v12569_v46, 6 }
 0x2eb   :  { %12568 = vst [vmem:[#allocation107_spill] sm:$0xff] %v10269_v19  ;;  %v1932_v50 = vrot.slane %v1928_v38, 2  ;;  %v12571_v22 = vrot.slane %v10215_v25, 2  ;;  %v10290_v14 = vmul.f32 %v10274_v55, %v6392_v60  ;;  %v12574_v38 = vld [vmem:[#allocation126_spill] sm:$0xff] }
 0x2ec   :  { %v10279_v29 = vsel %vm35_vm2, %v12570_v7, %v4516_v58  ;;  %v1745_v4 = vadd.f32 %v1742_v20, %v1649_v49  ;;  %v3440_v0 = vadd.f32 %v9993_v44, %v3320_v9  ;;  %v10295_v58 = vld [vmem:[%s11578_s0 + $0x10d] ss:$0 sm:$0xff]  ;;  %v12575_v49 = vrot.slane %v12574_v38, 6 }
 0x2ed   :  { %v1838_v1 = vsel %vm1275_vm5, %v1836_v33, %v12571_v22  ;;  %12572 = vst [vmem:[#allocation53_spill] sm:$0xff] %v10290_v14  ;;  %12573 = vst [vmem:[#allocation94_spill] sm:$0xff] %v10295_v58  ;;  %v2051_v9 = vrot.slane %v2045_v36, 3  ;;  %v2285_v33 = vmul.f32 %v10274_v55, %v6310_v18  ;;  %v12576_v7 = vrot.slane %v10232_v30, 2 }
 0x2ee   :  { %v10300_v20 = vsel %vm35_vm2, %v12575_v49, %v4636_v27  ;;  %v1841_v44 = vadd.f32 %v1838_v1, %v1745_v4  ;;  %v3560_v46 = vadd.f32 %v10004_v57, %v3440_v0  ;;  %v10311_v25 = vmul.f32 %v10295_v58, %v6481_v47  ;;  %v10316_v27 = vld [vmem:[%s11578_s0 + $0x10e] ss:$0 sm:$0xff] }
 0x2ef   :  { %v1934_v22 = vsel %vm1275_vm5, %v1932_v50, %v12576_v7  ;;  %12578 = vst [vmem:[#allocation109_spill] sm:$0xff] %v10316_v27  ;;  %v12579_v1 = vld [vmem:[#allocation127_spill] sm:$0xff]  ;;  %v2171_v0 = vrot.slane %v2165_v42, 3  ;;  %v2405_v50 = vmul.f32 %v10295_v58, %v6407_v15  ;;  %v12581_v49 = vrot.slane %v10248_v2, 3 }
 0x2f0   :  { %12577 = vst [vmem:[#allocation108_spill] sm:$0xff] %v10311_v25  ;;  %v12580_v36 = vrot.slane %v12579_v1, 6  ;;  %v1937_v57 = vadd.f32 %v1934_v22, %v1841_v44  ;;  %v3681_v38 = vadd.f32 %v10018_v48, %v3560_v46  ;;  %v10332_v30 = vmul.f32 %v10316_v27, %v6587_v53  ;;  %v5960_v42 = vld [vmem:[%s11578_s0 + $0x8f] ss:$0 sm:$0xff] }
 0x2f1   :  { %v2053_v7 = vsel %vm1950_vm6, %v2051_v9, %v12581_v49  ;;  %v10343_v48 = vmul.f32 %v5960_v42, %v7709_v11  ;;  %v2291_v9 = vrot.slane %v2285_v33, 3  ;;  %v2525_v46 = vmul.f32 %v10316_v27, %v6500_v24  ;;  %v5961_v33 = vld [vmem:[%s11578_s0 + $0x90] ss:$0 sm:$0xff] }
 0x2f2   :  { %v10321_v4 = vsel %vm35_vm2, %v12580_v36, %v4756_v32  ;;  %12582 = vst [vmem:[#allocation95_spill] sm:$0xff] %v10332_v30  ;;  %v10337_v32 = vld [vmem:[%s11578_s0 + $0x10f] ss:$0 sm:$0xff]  ;;  %v2058_v44 = vadd.f32 %v2053_v7, %v1937_v57  ;;  %v3801_v22 = vadd.f32 %v10023_v10, %v3681_v38  ;;  %v12584_v1 = vrot.slane %v10269_v19, 3  ;;  %v10359_v57 = vld [vmem:[%s11578_s0 + $0x110] ss:$0 sm:$0xff] }
 0x2f3   :  { %12583 = vst [vmem:[#allocation110_spill] sm:$0xff] %v10337_v32  ;;  %v10354_v62 = vmul.f32 %v10337_v32, %v6686_v39  ;;  %12585 = vst [vmem:[#allocation96_spill] sm:$0xff] %v10359_v57  ;;  %v10365_v10 = vmul.f32 %v5961_v33, %v7722_v56  ;;  %v2645_v7 = vmul.f32 %v10337_v32, %v6576_v3  ;;  %v5810_v33 = vld [vmem:[%s11577_s3 + $0x28] sm:$0x3f]  ;;  %v12588_v19 = vrot.slane %v10311_v25, 3 }
 0x2f4   :  { %v2173_v36 = vsel %vm1950_vm6, %v2171_v0, %v12584_v1  ;;  %v2411_v0 = vrot.slane %v2405_v50, 3  ;;  %v3921_v42 = vadd.f32 %v10031_v63, %v3801_v22  ;;  %v12586_v1 = vrot.slane %v10290_v14, 3  ;;  %v5962_v50 = vld [vmem:[%s11578_s0 + $0x91] ss:$0 sm:$0xff] }
 0x2f5   :  { %v2178_v38 = vadd.f32 %v2173_v36, %v2058_v44  ;;  %v10376_v27 = vmul.f32 %v10359_v57, %v6735_v28  ;;  %v10381_v44 = vld [vmem:[%s11578_s0 + $0x111] ss:$0 sm:$0xff]  ;;  %v10387_v63 = vmul.f32 %v5962_v50, %v7741_v61  ;;  %v2765_v36 = vmul.f32 %v10359_v57, %v6658_v54 }
 0x2f6   :  { %v2293_v49 = vsel %vm1950_vm6, %v2291_v9, %v12586_v1  ;;  %v2531_v9 = vrot.slane %v2525_v46, 3  ;;  %v4041_v1 = vadd.f32 %v10050_v59, %v3921_v42  ;;  %v2413_v14 = vsel %vm1950_vm6, %v2411_v0, %v12588_v19  ;;  %v10406_v46 = vld [vmem:[%s11578_s0 + $0x112] ss:$0 sm:$0xff]  ;;  %v5376_v42 = vpop.permute.xlu0 %5375 }
 0x2f7   :  { %12587 = vst [vmem:[#allocation111_spill] sm:$0xff] %v10376_v27  ;;  %v2298_v22 = vadd.f32 %v2293_v49, %v2178_v38  ;;  %v10401_v50 = vmul.f32 %v10381_v44, %v6228_v35  ;;  %v5963_v49 = vld [vmem:[%s11578_s0 + $0x92] ss:$0 sm:$0xff]  ;;  %v2651_v19 = vrot.slane %v2645_v7, 3  ;;  %v2886_v0 = vmul.f32 %v10381_v44, %v6215_v31 }
 0x2f8   :  { %v10412_v59 = vmul.f32 %v5963_v49, %v7745_v13  ;;  %v4161_v32 = vadd.f32 %v10206_v8, %v4041_v1  ;;  %v12590_v25 = vrot.slane %v10332_v30, 3  ;;  %v10423_v58 = vmul.f32 %v10406_v46, %v6297_v5 }
 0x2f9   :  { %12589 = vst [vmem:[#allocation97_spill] sm:$0xff] %v10401_v50  ;;  %v2418_v38 = vadd.f32 %v2413_v14, %v2298_v22  ;;  %v10428_v14 = vld [vmem:[%s11578_s0 + $0x113] ss:$0 sm:$0xff]  ;;  %v10431_v7 = vsel %vm55_vm3, %v5810_v33, %v5376_v42  ;;  %v2771_v8 = vrot.slane %v2765_v36, 3  ;;  %v3006_v1 = vmul.f32 %v10406_v46, %v6240_v41 }
 0x2fa   :  { %v2533_v57 = vsel %vm1950_vm6, %v2531_v9, %v12590_v25  ;;  %12591 = vst [vmem:[#allocation112_spill] sm:$0xff] %v10423_v58  ;;  %v4281_v25 = vadd.f32 %v10223_v12, %v4161_v32  ;;  %v12592_v9 = vrot.slane %v10354_v62, 3  ;;  %v10442_v30 = vmul.f32 %v10428_v14, %v6392_v60 }
 0x2fb   :  { %v2538_v22 = vadd.f32 %v2533_v57, %v2418_v38  ;;  %v10447_v57 = vld [vmem:[%s11578_s0 + $0x114] ss:$0 sm:$0xff]  ;;  %v4876_v36 = vrot.slane %v10343_v48, 6  ;;  %v2892_v38 = vrot.slane %v2886_v0, 4  ;;  %v3126_v12 = vmul.f32 %v10428_v14, %v6310_v18  ;;  %v10464_v48 = vld [vmem:[%s11578_s0 + $0x115] ss:$0 sm:$0xff] }
 0x2fc   :  { %v2653_v49 = vsel %vm1950_vm6, %v2651_v19, %v12592_v9  ;;  %12593 = vst [vmem:[#allocation99_spill] sm:$0xff] %v10442_v30  ;;  %v4401_v32 = vadd.f32 %v10258_v23, %v4281_v25  ;;  %v12594_v19 = vrot.slane %v10376_v27, 3  ;;  %v10459_v2 = vmul.f32 %v10447_v57, %v6481_v47  ;;  %12596 = vst [vmem:[#allocation114_spill] sm:$0xff] %v10464_v48 }
 0x2fd   :  { %v2658_v33 = vadd.f32 %v2653_v49, %v2538_v22  ;;  %v4996_v0 = vrot.slane %v10365_v10, 6  ;;  %v3012_v49 = vrot.slane %v3006_v1, 4  ;;  %v3246_v23 = vmul.f32 %v10447_v57, %v6407_v15  ;;  %v10481_v10 = vld [vmem:[%s11578_s0 + $0x116] ss:$0 sm:$0xff] }
 0x2fe   :  { %v2773_v42 = vsel %vm1950_vm6, %v2771_v8, %v12594_v19  ;;  %12595 = vst [vmem:[#allocation113_spill] sm:$0xff] %v10459_v2  ;;  %v4521_v8 = vadd.f32 %v10279_v29, %v4401_v32  ;;  %v12597_v25 = vrot.slane %v10401_v50, 4  ;;  %v10476_v27 = vmul.f32 %v10464_v48, %v6587_v53  ;;  %12599 = vst [vmem:[#allocation116_spill] sm:$0xff] %v10481_v10 }
 0x2ff   :  { %v2778_v22 = vadd.f32 %v2773_v42, %v2658_v33  ;;  %v5116_v1 = vrot.slane %v10387_v63, 6  ;;  %v3132_v42 = vrot.slane %v3126_v12, 4  ;;  %v3366_v29 = vmul.f32 %v10464_v48, %v6500_v24  ;;  %v10498_v63 = vld [vmem:[%s11578_s0 + $0x117] ss:$0 sm:$0xff] }
 0x300   :  { %v2894_v19 = vsel %vm2791_vm7, %v2892_v38, %v12597_v25  ;;  %12598 = vst [vmem:[#allocation115_spill] sm:$0xff] %v10476_v27  ;;  %v4641_v38 = vadd.f32 %v10300_v20, %v4521_v8  ;;  %v12600_v32 = vrot.slane %v10423_v58, 4  ;;  %v10493_v50 = vmul.f32 %v10481_v10, %v6686_v39 }
 0x301   :  { %v2899_v33 = vadd.f32 %v2894_v19, %v2778_v22  ;;  %v5236_v12 = vrot.slane %v10412_v59, 6  ;;  %v3252_v19 = vrot.slane %v3246_v23, 4  ;;  %v3486_v20 = vmul.f32 %v10481_v10, %v6576_v3  ;;  %v10515_v59 = vld [vmem:[%s11578_s0 + $0x118] ss:$0 sm:$0xff]  ;;  %v12603_v23 = vld [vmem:[#allocation128_spill] sm:$0xff] }
 0x302   :  { %v3014_v25 = vsel %vm2791_vm7, %v3012_v49, %v12600_v32  ;;  %12601 = vst [vmem:[#allocation100_spill] sm:$0xff] %v10493_v50  ;;  %v4761_v49 = vadd.f32 %v10321_v4, %v4641_v38  ;;  %v12602_v8 = vrot.slane %v10442_v30, 4  ;;  %v10510_v58 = vmul.f32 %v10498_v63, %v6735_v28 }
 0x303   :  { %v3019_v22 = vadd.f32 %v3014_v25, %v2899_v33  ;;  %v12604_v33 = vrot.slane %v12603_v23, 6  ;;  %v3372_v38 = vrot.slane %v3366_v29, 4  ;;  %v12605_v9 = vrot.slane %v10459_v2, 4  ;;  %v12608_v29 = vld [vmem:[#allocation129_spill] sm:$0xff] }
 0x304   :  { %v3134_v32 = vsel %vm2791_vm7, %v3132_v42, %v12602_v8  ;;  %v3606_v42 = vmul.f32 %v10498_v63, %v6658_v54  ;;  %v10528_v48 = vmul.f32 %v10515_v59, %v6228_v35  ;;  %v3492_v23 = vrot.slane %v3486_v20, 4 }
 0x305   :  { %v4877_v25 = vsel %vm35_vm2, %v12604_v33, %v4876_v36  ;;  %v3139_v4 = vadd.f32 %v3134_v32, %v3019_v22  ;;  %v3254_v30 = vsel %vm2791_vm7, %v3252_v19, %v12605_v9  ;;  %v10533_v36 = vld [vmem:[%s11578_s0 + $0x119] ss:$0 sm:$0xff]  ;;  %v12609_v22 = vrot.slane %v12608_v29, 6 }
 0x306   :  { %v4881_v8 = vadd.f32 %v4877_v25, %v4761_v49  ;;  %12606 = vst [vmem:[#allocation117_spill] sm:$0xff] %v10528_v48  ;;  %12607 = vst [vmem:[#allocation118_spill] sm:$0xff] %v10533_v36  ;;  %v3727_v9 = vmul.f32 %v10515_v59, %v6215_v31  ;;  %v12610_v33 = vrot.slane %v10476_v27, 4  ;;  %v10546_v2 = vmul.f32 %v10533_v36, %v6297_v5 }
 0x307   :  { %v4997_v32 = vsel %vm35_vm2, %v12609_v22, %v4996_v0  ;;  %v3259_v49 = vadd.f32 %v3254_v30, %v3139_v4  ;;  %v10551_v0 = vld [vmem:[%s11578_s0 + $0x11a] ss:$0 sm:$0xff]  ;;  %v12612_v30 = vld [vmem:[#allocation130_spill] sm:$0xff]  ;;  %v3612_v29 = vrot.slane %v3606_v42, 4  ;;  %v12617_v42 = vld [vmem:[#allocation131_spill] sm:$0xff] }
 0x308   :  { %v5001_v19 = vadd.f32 %v4997_v32, %v4881_v8  ;;  %v3374_v25 = vsel %vm2791_vm7, %v3372_v38, %v12610_v33  ;;  %12611 = vst [vmem:[#allocation119_spill] sm:$0xff] %v10546_v2  ;;  %v12613_v20 = vrot.slane %v12612_v30, 6  ;;  %v3847_v38 = vmul.f32 %v10533_v36, %v6240_v41 }
 0x309   :  { %v3379_v8 = vadd.f32 %v3374_v25, %v3259_v49  ;;  %v12614_v32 = vrot.slane %v10493_v50, 4  ;;  %v10564_v27 = vmul.f32 %v10551_v0, %v6392_v60  ;;  %v12618_v49 = vrot.slane %v12617_v42, 6 }
 0x30a   :  { %v5117_v4 = vsel %vm35_vm2, %v12613_v20, %v5116_v1  ;;  %v10569_v1 = vld [vmem:[%s11578_s0 + $0x11b] ss:$0 sm:$0xff]  ;;  %v3733_v30 = vrot.slane %v3727_v9, 5  ;;  %v11898_v10 = vrot.slane %v10546_v2, 5  ;;  %v3853_v42 = vrot.slane %v3847_v38, 5 }
 0x30b   :  { %v5121_v22 = vadd.f32 %v5117_v4, %v5001_v19  ;;  %v3494_v33 = vsel %vm2791_vm7, %v3492_v23, %v12614_v32  ;;  %12615 = vst [vmem:[#allocation101_spill] sm:$0xff] %v10564_v27  ;;  %12616 = vst [vmem:[#allocation120_spill] sm:$0xff] %v10569_v1  ;;  %v5237_v25 = vsel %vm35_vm2, %v12618_v49, %v5236_v12  ;;  %v12619_v4 = vrot.slane %v10510_v58, 4  ;;  %v10589_v9 = vld [vmem:[%s11578_s0 + $0x11c] ss:$0 sm:$0xff] }
 0x30c   :  { %v3499_v19 = vadd.f32 %v3494_v33, %v3379_v8  ;;  %v3967_v23 = vmul.f32 %v10551_v0, %v6310_v18  ;;  %v10582_v50 = vmul.f32 %v10569_v1, %v6481_v47  ;;  %v4087_v12 = vmul.f32 %v10569_v1, %v6407_v15  ;;  %12621 = vst [vmem:[#allocation121_spill] sm:$0xff] %v10589_v9  ;;  %v10605_v49 = vld [vmem:[%s11578_s0 + $0x11d] ss:$0 sm:$0xff] }
 0x30d   :  { %v5241_v20 = vadd.f32 %v5237_v25, %v5121_v22  ;;  %v3614_v32 = vsel %vm2791_vm7, %v3612_v29, %v12619_v4  ;;  %v12622_v29 = vrot.slane %v10528_v48, 5  ;;  %v11900_v33 = vrot.slane %v10564_v27, 5  ;;  %12624 = vst [vmem:[#allocation122_spill] sm:$0xff] %v10605_v49  ;;  %v5967_v27 = vld [vmem:[%s11578_s0 + $0x95] ss:$0 sm:$0xff] }
 0x30e   :  { %12620 = vst [vmem:[#allocation102_spill] sm:$0xff] %v10582_v50  ;;  %v3619_v36 = vadd.f32 %v3614_v32, %v3499_v19  ;;  %v10600_v38 = vmul.f32 %v10589_v9, %v6587_v53  ;;  %v3973_v19 = vrot.slane %v3967_v23, 5  ;;  %v10620_v4 = vmul.f32 %v10605_v49, %v6686_v39 }
 0x30f   :  { %v10592_v8 = vadd.f32 %v10431_v7, %v5241_v20  ;;  %v3735_v22 = vsel %vm3632_vm8, %v3733_v30, %v12622_v29  ;;  %v3855_v7 = vsel %vm3632_vm8, %v3853_v42, %v11898_v10  ;;  %v4207_v20 = vmul.f32 %v10589_v9, %v6500_v24  ;;  %v5964_v42 = vld [vmem:[%s11578_s0 + $0x93] ss:$0 sm:$0xff] }
 0x310   :  { %12623 = vst [vmem:[#allocation103_spill] sm:$0xff] %v10600_v38  ;;  %v3740_v25 = vadd.f32 %v3735_v22, %v3619_v36  ;;  %12625 = vst [vmem:[#allocation123_spill] sm:$0xff] %v10620_v4  ;;  %v10625_v36 = vld [vmem:[%s11578_s0 + $0x11e] ss:$0 sm:$0xff]  ;;  %v4093_v32 = vrot.slane %v4087_v12, 5  ;;  %v4327_v29 = vmul.f32 %v10605_v49, %v6576_v3  ;;  %v248_v22 = vmul.f32 %v5964_v42, %v6228_v35 }
 0x311   :  { %5814 = vst.msk [vmem:[%s11580_s4 + $0x28] sm:$0x3f] %vm5320_vm9, %v10592_v8  ;;  %12626 = vst [vmem:[#allocation124_spill] sm:$0xff] %v10625_v36  ;;  %v3975_v10 = vsel %vm3632_vm8, %v3973_v19, %v11900_v33  ;;  %v10639_v2 = vmul.f32 %v10625_v36, %v6735_v28  ;;  %v5965_v12 = vld [vmem:[%s11578_s0 + $0x94] ss:$0 sm:$0xff]  ;;  %v4447_v42 = vmul.f32 %v10625_v36, %v6658_v54  ;;  %v4213_v36 = vrot.slane %v4207_v20, 5 }
 0x312   :  { %v3860_v23 = vadd.f32 %v3855_v7, %v3740_v25  ;;  %v302_v25 = vmul.f32 %v5965_v12, %v6297_v5  ;;  %v10650_v19 = vld [vmem:[%s11578_s0 + $0x11f] ss:$0 sm:$0xff]  ;;  %v5966_v33 = vld [vmem:[%s11579_s1 + $0x3] ss:$0 sm:$0xff]  ;;  %v356_v12 = vmul.f32 %v5967_v27, %v6392_v60  ;;  %v4333_v1 = vrot.slane %v4327_v29, 5 }
 0x313   :  { %12627 = vst [vmem:[#allocation125_spill] sm:$0xff] %v10639_v2  ;;  %12628 = vst [vmem:[#allocation126_spill] sm:$0xff] %v10650_v19  ;;  %v250_v30 = vadd.f32 %v5966_v33, %v248_v22  ;;  %v10665_v9 = vmul.f32 %v10650_v19, %v6228_v35  ;;  %v10670_v33 = vld [vmem:[%s11578_s0 + $0x120] ss:$0 sm:$0xff]  ;;  %v5968_v27 = vld [vmem:[%s11578_s0 + $0x96] ss:$0 sm:$0xff] }
 0x314   :  { %v3980_v7 = vadd.f32 %v3975_v10, %v3860_v23  ;;  %v12629_v10 = vrot.slane %v10582_v50, 5  ;;  %v410_v20 = vmul.f32 %v5968_v27, %v6481_v47  ;;  %v12635_v27 = vld [vmem:[#allocation46_spill] sm:$0xff]  ;;  %v4453_v49 = vrot.slane %v4447_v42, 5 }
 0x315   :  { %12630 = vst [vmem:[#allocation127_spill] sm:$0xff] %v10665_v9  ;;  %v304_v22 = vadd.f32 %v302_v25, %v250_v30  ;;  %v10686_v30 = vmul.f32 %v10670_v33, %v6297_v5  ;;  %v10691_v25 = vld [vmem:[%s11578_s0 + $0x121] ss:$0 sm:$0xff]  ;;  %5326 = vrot.lane.b32.xlu0 %v12635_v27, %s6058_s14  ;;  %v4687_v50 = vmul.f32 %v10670_v33, %v6240_v41  ;;  %v10712_v42 = vld [vmem:[%s11578_s0 + $0x122] ss:$0 sm:$0xff]  ;;  %v12640_v27 = vrot.slane %v10639_v2, 5 }
 0x316   :  { %v4095_v23 = vsel %vm3632_vm8, %v4093_v32, %v12629_v10  ;;  %v12631_v32 = vld [vmem:[#allocation82_spill] sm:$0xff]  ;;  %v12632_v10 = vrot.slane %v10600_v38, 5  ;;  %12634 = vst [vmem:[#allocation129_spill] sm:$0xff] %v10691_v25  ;;  %12638 = vst [vmem:[#allocation131_spill] sm:$0xff] %v10712_v42  ;;  %v12714_v2 = vld [vmem:[#allocation45_spill] sm:$0xff] }
 0x317   :  { %v4100_v48 = vadd.f32 %v4095_v23, %v3980_v7  ;;  %5324 = vrot.lane.b32.xlu1 %v12631_v32, %s6058_s14  ;;  %v4567_v23 = vmul.f32 %v10650_v19, %v6215_v31  ;;  %12633 = vst [vmem:[#allocation128_spill] sm:$0xff] %v10686_v30  ;;  %v12636_v7 = vrot.slane %v10620_v4, 5 }
 0x318   :  { %v4215_v29 = vsel %vm3632_vm8, %v4213_v36, %v12632_v10  ;;  %v358_v36 = vadd.f32 %v356_v12, %v304_v22  ;;  %v5969_v10 = vld [vmem:[%s11578_s0 + $0x97] ss:$0 sm:$0xff]  ;;  %v4807_v22 = vmul.f32 %v10691_v25, %v6310_v18  ;;  %v10728_v18 = vmul.f32 %v10712_v42, %v6481_v47 }
 0x319   :  { %v4220_v32 = vadd.f32 %v4215_v29, %v4100_v48  ;;  %v464_v31 = vmul.f32 %v5969_v10, %v6587_v53  ;;  %v4335_v38 = vsel %vm3632_vm8, %v4333_v1, %v12636_v7  ;;  %v10707_v48 = vmul.f32 %v10691_v25, %v6392_v60  ;;  %v5970_v1 = vld [vmem:[%s11578_s0 + $0x98] ss:$0 sm:$0xff]  ;;  %v12639_v7 = vld [vmem:[#allocation98_spill] sm:$0xff] }
 0x31a   :  { %v412_v29 = vadd.f32 %v410_v20, %v358_v36  ;;  %v518_v41 = vmul.f32 %v5970_v1, %v6686_v39  ;;  %v4455_v10 = vsel %vm3632_vm8, %v4453_v49, %v12640_v27  ;;  %v4573_v19 = vrot.slane %v4567_v23, 6  ;;  %12641 = vst [vmem:[#allocation82_spill] sm:$0xff] %v10728_v18  ;;  %v12642_v20 = vld [vmem:[#allocation80_spill] sm:$0xff]  ;;  %v10737_v1 = vld [vmem:[%s11578_s0 + $0x123] ss:$0 sm:$0xff] }
 0x31b   :  { %12637 = vst [vmem:[#allocation130_spill] sm:$0xff] %v10707_v48  ;;  %v4340_v12 = vadd.f32 %v4335_v38, %v4220_v32  ;;  %5356 = vrot.lane.b32.xlu1 %v12639_v7, %s6058_s14  ;;  %5358 = vrot.lane.b32.xlu0 %v12642_v20, %s6058_s14  ;;  %v4927_v36 = vmul.f32 %v10712_v42, %v6407_v15  ;;  %12643 = vst [vmem:[#allocation46_spill] sm:$0xff] %v10737_v1  ;;  %v5971_v23 = vld [vmem:[%s11578_s0 + $0x99] ss:$0 sm:$0xff]  ;;  %v12644_v27 = vrot.slane %v10665_v9, 6  ;;  %v12712_v9 = vld [vmem:[#allocation40_spill] sm:$0xff] }
 0x31c   :  { %v466_v49 = vadd.f32 %v464_v31, %v412_v29  ;;  %v572_v7 = vmul.f32 %v5971_v23, %v6735_v28  ;;  %v10749_v15 = vmul.f32 %v10737_v1, %v6587_v53  ;;  %v4813_v42 = vrot.slane %v4807_v22, 6  ;;  %v10754_v31 = vld [vmem:[%s11578_s0 + $0x124] ss:$0 sm:$0xff]  ;;  %v12647_v23 = vld [vmem:[#allocation3_spill] sm:$0xff] }
 0x31d   :  { %v4460_v32 = vadd.f32 %v4455_v10, %v4340_v12  ;;  %v4575_v20 = vsel %vm35_vm2, %v4573_v19, %v12644_v27  ;;  %v4693_v12 = vrot.slane %v4687_v50, 6  ;;  %12646 = vst [vmem:[#allocation80_spill] sm:$0xff] %v10754_v31  ;;  %v12648_v19 = vrot.slane %v10686_v30, 6  ;;  %v12655_v30 = vld [vmem:[#allocation47_spill] sm:$0xff] }
 0x31e   :  { %12645 = vst [vmem:[#allocation98_spill] sm:$0xff] %v10749_v15  ;;  %v520_v29 = vadd.f32 %v518_v41, %v466_v49  ;;  %v5047_v10 = vmul.f32 %v10737_v1, %v6500_v24  ;;  %v10766_v22 = vmul.f32 %v10754_v31, %v6686_v39  ;;  %v10773_v49 = vld [vmem:[%s11578_s0 + $0x125] ss:$0 sm:$0xff] }
 0x31f   :  { %v4580_v38 = vadd.f32 %v4575_v20, %v4460_v32  ;;  %5388 = vrot.lane.b32.xlu1 %v12647_v23, %s6058_s14  ;;  %v4695_v50 = vsel %vm35_vm2, %v4693_v12, %v12648_v19  ;;  %5390 = vrot.lane.b32.xlu0 %v10592_v8, %s6058_s14  ;;  %v4933_v32 = vrot.slane %v4927_v36, 6  ;;  %12650 = vst [vmem:[#allocation136_spill] sm:$0xff] %v10773_v49  ;;  %v12651_v12 = vrot.slane %v10707_v48, 6  ;;  %v12653_v36 = vld [vmem:[#allocation7_spill] sm:$0xff]  ;;  %v12657_v48 = vld [vmem:[#allocation13_spill] sm:$0xff] }
 0x320   :  { %12649 = vst [vmem:[#allocation3_spill] sm:$0xff] %v10766_v22  ;;  %v574_v20 = vadd.f32 %v572_v7, %v520_v29  ;;  %v5167_v19 = vmul.f32 %v10754_v31, %v6576_v3  ;;  %v10783_v8 = vmul.f32 %v10773_v49, %v6735_v28  ;;  %v12656_v7 = vrot.slane %v10728_v18, 6  ;;  %v12668_v18 = vld [vmem:[#allocation17_spill] sm:$0xff] }
 0x321   :  { %v4700_v41 = vadd.f32 %v4695_v50, %v4580_v38  ;;  %v4815_v23 = vsel %vm35_vm2, %v4813_v42, %v12651_v12  ;;  %v12654_v50 = vrot.slane %v12653_v36, 1  ;;  %v5053_v29 = vrot.slane %v5047_v10, 6  ;;  %v5833_v10 = vld [vmem:[%s11577_s3 + $0x50] sm:$0xff] }
 0x322   :  { %12652 = vst [vmem:[#allocation137_spill] sm:$0xff] %v10783_v8  ;;  %v4935_v42 = vsel %vm35_vm2, %v4933_v32, %v12656_v7  ;;  %v5287_v3 = vmul.f32 %v10773_v49, %v6658_v54  ;;  %v12658_v31 = vrot.slane %v12657_v48, 1  ;;  %v5173_v36 = vrot.slane %v5167_v19, 6  ;;  %v5470_v32 = vpop.permute.xlu1 %5469  ;;  %v12660_v7 = vld [vmem:[#allocation21_spill] sm:$0xff] }
 0x323   :  { %v4820_v38 = vadd.f32 %v4815_v23, %v4700_v41  ;;  %v657_v27 = vadd.f32 %v12654_v50, %v574_v20  ;;  %5420 = vrot.lane.b32.xlu1 %v12655_v30, %s6058_s14  ;;  %v12659_v23 = vrot.slane %v10749_v15, 6  ;;  %v11918_v30 = vrot.slane %v10783_v8, 6 }
 0x324   :  { %v12661_v12 = vrot.slane %v12660_v7, 1  ;;  %v12663_v48 = vrot.slane %v10766_v22, 6  ;;  %v12669_v22 = vrot.slane %v12668_v18, 1  ;;  %v5973_v18 = vld [vmem:[%s11578_s0 + $0xc5] ss:$0 sm:$0xff] }
 0x325   :  { %v4940_v24 = vadd.f32 %v4935_v42, %v4820_v38  ;;  %v753_v41 = vadd.f32 %v12658_v31, %v657_v27  ;;  %v5055_v20 = vsel %vm35_vm2, %v5053_v29, %v12659_v23  ;;  %v12662_v38 = vld [vmem:[#allocation2_spill] sm:$0xff]  ;;  %v5293_v27 = vrot.slane %v5287_v3, 6  ;;  %v12664_v42 = vld [vmem:[#allocation5_spill] sm:$0xff] }
 0x326   :  { %v5175_v31 = vsel %vm35_vm2, %v5173_v36, %v12663_v48  ;;  %v12665_v29 = vrot.slane %v12664_v42, 1  ;;  %v12670_v3 = vld [vmem:[#allocation29_spill] sm:$0xff] }
 0x327   :  { %v5060_v50 = vadd.f32 %v5055_v20, %v4940_v24  ;;  %v849_v54 = vadd.f32 %v12661_v12, %v753_v41  ;;  %5452 = vrot.lane.b32.xlu1 %v12662_v38, %s6058_s14  ;;  %v5295_v15 = vsel %vm35_vm2, %v5293_v27, %v11918_v30  ;;  %v5475_v24 = vsel %vm55_vm3, %v5833_v10, %v5470_v32  ;;  %v12666_v12 = vld [vmem:[#allocation10_spill] sm:$0xff]  ;;  %v12672_v32 = vld [vmem:[#allocation25_spill] sm:$0xff] }
 0x328   :  { %v12667_v41 = vrot.slane %v12666_v12, 1  ;;  %v12671_v36 = vrot.slane %v12670_v3, 1  ;;  %v5975_v27 = vld [vmem:[%s11578_s0 + $0xc6] ss:$0 sm:$0xff]  ;;  %v12674_v42 = vld [vmem:[#allocation33_spill] sm:$0xff] }
 0x329   :  { %v5180_v19 = vadd.f32 %v5175_v31, %v5060_v50  ;;  %v945_v23 = vadd.f32 %v12665_v29, %v849_v54  ;;  %v12673_v54 = vrot.slane %v12672_v32, 2  ;;  %v12675_v29 = vrot.slane %v12674_v42, 2  ;;  %v5977_v3 = vld [vmem:[%s11578_s0 + $0xa8] ss:$0 sm:$0xff] }
 0x32b   :  { %v5300_v20 = vadd.f32 %v5295_v15, %v5180_v19  ;;  %v1041_v7 = vadd.f32 %v12667_v41, %v945_v23  ;;  %v5972_v15 = vld [vmem:[%s11578_s0 + $0xc4] ss:$0 sm:$0xff]  ;;  %v365_v19 = vmul.f32 %v5975_v27, %v6392_v60  ;;  %v12676_v41 = vld [vmem:[#allocation37_spill] sm:$0xff] }
 0x32c   :  { %v257_v10 = vmul.f32 %v5972_v15, %v6228_v35  ;;  %v5978_v15 = vld [vmem:[%s11578_s0 + $0xc8] ss:$0 sm:$0xff] }
 0x32d   :  { %v5477_v38 = vadd.f32 %v5475_v24, %v5300_v20  ;;  %v1137_v49 = vadd.f32 %v12669_v22, %v1041_v7  ;;  %v311_v22 = vmul.f32 %v5973_v18, %v6297_v5  ;;  %v5976_v20 = vld [vmem:[%s11578_s0 + $0xc7] ss:$0 sm:$0xff]  ;;  %v12677_v7 = vrot.slane %v12676_v41, 2  ;;  %v12678_v18 = vld [vmem:[#allocation35_spill] sm:$0xff] }
 0x32e   :  { %v419_v12 = vmul.f32 %v5976_v20, %v6481_v47 }
 0x32f   :  { %5837 = vst.msk [vmem:[%s11580_s4 + $0x50] sm:$0xff] %vm55_vm3, %v5477_v38  ;;  %v1233_v50 = vadd.f32 %v12671_v36, %v1137_v49  ;;  %5484 = vrot.lane.b32.xlu1 %v5477_v38, %s6058_s14  ;;  %v5974_v49 = vld [vmem:[%s11579_s1 + $0x4] ss:$0 sm:$0xff]  ;;  %v2007_v36 = vmul.f32 %v5977_v3, %v12473_v16 }
 0x330   :  { %v259_v31 = vadd.f32 %v5974_v49, %v257_v10  ;;  %v473_v10 = vmul.f32 %v5978_v15, %v6587_v53 }
 0x331   :  { %v1330_v48 = vadd.f32 %v12673_v54, %v1233_v50  ;;  %v5979_v54 = vld [vmem:[%s11578_s0 + $0xa9] ss:$0 sm:$0xff] }
 0x332   :  { %v313_v24 = vadd.f32 %v311_v22, %v259_v31  ;;  %v12679_v22 = vrot.slane %v12678_v18, 2  ;;  %v5980_v31 = vld [vmem:[%s11578_s0 + $0xc9] ss:$0 sm:$0xff] }
 0x333   :  { %v1426_v23 = vadd.f32 %v12675_v29, %v1330_v48  ;;  %v2127_v48 = vmul.f32 %v5979_v54, %v12476_v43  ;;  %v527_v27 = vmul.f32 %v5980_v31, %v6686_v39 }
 0x334   :  { %v367_v50 = vadd.f32 %v365_v19, %v313_v24  ;;  %v12680_v19 = vld [vmem:[#allocation44_spill] sm:$0xff]  ;;  %v5981_v24 = vld [vmem:[%s11578_s0 + $0xaa] ss:$0 sm:$0xff] }
 0x335   :  { %v1522_v38 = vadd.f32 %v12677_v7, %v1426_v23  ;;  %v12681_v42 = vrot.slane %v12680_v19, 2  ;;  %v2014_v23 = vrot.slane %v2007_v36, 3  ;;  %v2247_v20 = vmul.f32 %v5981_v24, %v7704_v26  ;;  %v5983_v36 = vld [vmem:[%s11578_s0 + $0xab] ss:$0 sm:$0xff]  ;;  %v12686_v19 = vld [vmem:[#allocation12_spill] sm:$0xff] }
 0x336   :  { %v421_v49 = vadd.f32 %v419_v12, %v367_v50  ;;  %v5982_v12 = vld [vmem:[%s11578_s0 + $0xca] ss:$0 sm:$0xff]  ;;  %v2134_v15 = vrot.slane %v2127_v48, 3  ;;  %v2367_v18 = vmul.f32 %v5983_v36, %v7709_v11 }
 0x337   :  { %v1618_v32 = vadd.f32 %v12679_v22, %v1522_v38  ;;  %v581_v7 = vmul.f32 %v5982_v12, %v6735_v28  ;;  %v12682_v38 = vld [vmem:[#allocation6_spill] sm:$0xff] }
 0x338   :  { %v475_v41 = vadd.f32 %v473_v10, %v421_v49  ;;  %v12683_v3 = vrot.slane %v12682_v38, 2  ;;  %v5984_v49 = vld [vmem:[%s11578_s0 + $0xac] ss:$0 sm:$0xff]  ;;  %v12688_v38 = vld [vmem:[#allocation4_spill] sm:$0xff]  ;;  %v2374_v36 = vrot.slane %v2367_v18, 3 }
 0x339   :  { %v1714_v29 = vadd.f32 %v12681_v42, %v1618_v32  ;;  %v12684_v32 = vld [vmem:[#allocation39_spill] sm:$0xff]  ;;  %v2487_v31 = vmul.f32 %v5984_v49, %v7722_v56  ;;  %v12687_v42 = vrot.slane %v12686_v19, 3 }
 0x33a   :  { %v529_v22 = vadd.f32 %v527_v27, %v475_v41  ;;  %v12685_v54 = vrot.slane %v12684_v32, 2  ;;  %v5985_v27 = vld [vmem:[%s11578_s0 + $0xad] ss:$0 sm:$0xff]  ;;  %v12690_v32 = vld [vmem:[#allocation48_spill] sm:$0xff] }
 0x33b   :  { %v1810_v50 = vadd.f32 %v12683_v3, %v1714_v29  ;;  %v2015_v48 = vsel %vm1950_vm6, %v12687_v42, %v2014_v23  ;;  %v2254_v29 = vrot.slane %v2247_v20, 3  ;;  %v2607_v41 = vmul.f32 %v5985_v27, %v7741_v61  ;;  %v12692_v23 = vld [vmem:[#allocation18_spill] sm:$0xff]  ;;  %v12694_v42 = vld [vmem:[#allocation49_spill] sm:$0xff] }
 0x33c   :  { %v583_v24 = vadd.f32 %v581_v7, %v529_v22  ;;  %v12689_v3 = vrot.slane %v12688_v38, 3  ;;  %v2494_v30 = vrot.slane %v2487_v31, 3  ;;  %v12693_v20 = vrot.slane %v12692_v23, 3  ;;  %v5986_v22 = vld [vmem:[%s11578_s0 + $0xae] ss:$0 sm:$0xff]  ;;  %v12696_v38 = vld [vmem:[#allocation8_spill] sm:$0xff] }
 0x33d   :  { %v1906_v10 = vadd.f32 %v12685_v54, %v1810_v50  ;;  %v12691_v54 = vrot.slane %v12690_v32, 1  ;;  %v2614_v18 = vrot.slane %v2607_v41, 3  ;;  %v5987_v31 = vld [vmem:[%s11578_s0 + $0xaf] ss:$0 sm:$0xff] }
 0x33e   :  { %v2135_v50 = vsel %vm1950_vm6, %v12689_v3, %v2134_v15  ;;  %v2255_v7 = vsel %vm1950_vm6, %v12693_v20, %v2254_v29  ;;  %v12697_v3 = vrot.slane %v12696_v38, 3  ;;  %v2848_v29 = vmul.f32 %v5987_v31, %v12473_v16  ;;  %v12698_v32 = vld [vmem:[#allocation51_spill] sm:$0xff]  ;;  %v12702_v38 = vld [vmem:[#allocation65_spill] sm:$0xff] }
 0x33f   :  { %v2019_v12 = vadd.f32 %v2015_v48, %v1906_v10  ;;  %v673_v49 = vadd.f32 %v12691_v54, %v583_v24  ;;  %v2727_v10 = vmul.f32 %v5986_v22, %v7745_v13  ;;  %v12695_v48 = vrot.slane %v12694_v42, 1  ;;  %v5990_v42 = vld [vmem:[%s11578_s0 + $0xb2] ss:$0 sm:$0xff] }
 0x340   :  { %v2375_v24 = vsel %vm1950_vm6, %v12697_v3, %v2374_v36  ;;  %v12699_v54 = vrot.slane %v12698_v32, 1 }
 0x341   :  { %v2139_v19 = vadd.f32 %v2135_v50, %v2019_v12  ;;  %v769_v27 = vadd.f32 %v12695_v48, %v673_v49  ;;  %v5988_v12 = vld [vmem:[%s11578_s0 + $0xb0] ss:$0 sm:$0xff]  ;;  %v2734_v20 = vrot.slane %v2727_v10, 3  ;;  %v3208_v48 = vmul.f32 %v5990_v42, %v7709_v11  ;;  %v5993_v42 = vld [vmem:[%s11578_s0 + $0xb5] ss:$0 sm:$0xff] }
 0x342   :  { %v2968_v50 = vmul.f32 %v5988_v12, %v12476_v43  ;;  %v12704_v12 = vld [vmem:[#allocation27_spill] sm:$0xff] }
 0x343   :  { %v2259_v15 = vadd.f32 %v2255_v7, %v2139_v19  ;;  %v865_v49 = vadd.f32 %v12699_v54, %v769_v27  ;;  %v12700_v19 = vld [vmem:[#allocation14_spill] sm:$0xff]  ;;  %v5989_v7 = vld [vmem:[%s11578_s0 + $0xb1] ss:$0 sm:$0xff]  ;;  %v12703_v27 = vrot.slane %v12702_v38, 1  ;;  %v12705_v32 = vrot.slane %v12704_v12, 3 }
 0x344   :  { %v12701_v23 = vrot.slane %v12700_v19, 3  ;;  %v3088_v22 = vmul.f32 %v5989_v7, %v7704_v26  ;;  %v2855_v19 = vrot.slane %v2848_v29, 4  ;;  %v3568_v38 = vmul.f32 %v5993_v42, %v7745_v13 }
 0x345   :  { %v2379_v41 = vadd.f32 %v2375_v24, %v2259_v15  ;;  %v961_v15 = vadd.f32 %v12703_v27, %v865_v49  ;;  %v5992_v24 = vld [vmem:[%s11578_s0 + $0xb4] ss:$0 sm:$0xff]  ;;  %v2615_v54 = vsel %vm1950_vm6, %v12705_v32, %v2614_v18  ;;  %v12706_v49 = vld [vmem:[#allocation26_spill] sm:$0xff]  ;;  %v5994_v27 = vld [vmem:[%s11578_s0 + $0xb6] ss:$0 sm:$0xff]  ;;  %v3215_v12 = vrot.slane %v3208_v48, 4 }
 0x346   :  { %v2495_v36 = vsel %vm1950_vm6, %v12701_v23, %v2494_v30  ;;  %v5991_v30 = vld [vmem:[%s11578_s0 + $0xb3] ss:$0 sm:$0xff]  ;;  %v3448_v31 = vmul.f32 %v5992_v24, %v7741_v61  ;;  %v2975_v23 = vrot.slane %v2968_v50, 4  ;;  %v5995_v18 = vld [vmem:[%s11578_s0 + $0xb7] ss:$0 sm:$0xff]  ;;  %v12708_v50 = vld [vmem:[#allocation34_spill] sm:$0xff] }
 0x347   :  { %v2499_v3 = vadd.f32 %v2495_v36, %v2379_v41  ;;  %v3328_v10 = vmul.f32 %v5991_v30, %v7722_v56  ;;  %v12707_v41 = vrot.slane %v12706_v49, 1  ;;  %v3689_v30 = vmul.f32 %v5994_v27, %v12473_v16  ;;  %v12710_v32 = vld [vmem:[#allocation66_spill] sm:$0xff]  ;;  %v5996_v27 = vld [vmem:[%s11578_s0 + $0xb8] ss:$0 sm:$0xff]  ;;  %v5997_v48 = vld [vmem:[%s11578_s0 + $0xb9] ss:$0 sm:$0xff] }
 0x348   :  { %v3809_v29 = vmul.f32 %v5995_v18, %v12476_v43  ;;  %v3095_v24 = vrot.slane %v3088_v22, 4  ;;  %v3455_v8 = vrot.slane %v3448_v31, 4  ;;  %v3929_v1 = vmul.f32 %v5996_v27, %v7704_v26  ;;  %v12716_v31 = vld [vmem:[#allocation54_spill] sm:$0xff] }
 0x349   :  { %v1057_v36 = vadd.f32 %v12707_v41, %v961_v15  ;;  %v2619_v7 = vadd.f32 %v2615_v54, %v2499_v3  ;;  %v12709_v15 = vrot.slane %v12708_v50, 3  ;;  %v12711_v54 = vrot.slane %v12710_v32, 1 }
 0x34a   :  { %v3335_v42 = vrot.slane %v3328_v10, 4  ;;  %v12713_v18 = vrot.slane %v12712_v9, 4  ;;  %v4049_v10 = vmul.f32 %v5997_v48, %v7709_v11  ;;  %v3696_v32 = vrot.slane %v3689_v30, 5  ;;  %v12718_v9 = vld [vmem:[#allocation9_spill] sm:$0xff]  ;;  %v5998_v48 = vld [vmem:[%s11578_s0 + $0xf5] ss:$0 sm:$0xff] }
 0x34b   :  { %v2735_v3 = vsel %vm1950_vm6, %v12709_v15, %v2734_v20  ;;  %v1153_v49 = vadd.f32 %v12711_v54, %v1057_v36  ;;  %v12715_v20 = vrot.slane %v12714_v2, 4  ;;  %v12717_v36 = vrot.slane %v12716_v31, 1  ;;  %v12720_v2 = vld [vmem:[#allocation22_spill] sm:$0xff]  ;;  %v12724_v30 = vld [vmem:[#allocation16_spill] sm:$0xff] }
 0x34c   :  { %v2739_v41 = vadd.f32 %v2735_v3, %v2619_v7  ;;  %v2856_v50 = vsel %vm2791_vm7, %v12713_v18, %v2855_v19  ;;  %v3575_v3 = vrot.slane %v3568_v38, 4  ;;  %v3816_v54 = vrot.slane %v3809_v29, 5 }
 0x34d   :  { %v2976_v22 = vsel %vm2791_vm7, %v12715_v20, %v2975_v23  ;;  %v1249_v7 = vadd.f32 %v12717_v36, %v1153_v49  ;;  %v12719_v27 = vrot.slane %v12718_v9, 4  ;;  %v12721_v18 = vrot.slane %v12720_v2, 4  ;;  %v12722_v20 = vld [vmem:[#allocation67_spill] sm:$0xff]  ;;  %v12728_v9 = vld [vmem:[#allocation68_spill] sm:$0xff] }
 0x34e   :  { %v2860_v15 = vadd.f32 %v2856_v50, %v2739_v41  ;;  %v12723_v25 = vrot.slane %v12722_v20, 2  ;;  %v266_v49 = vmul.f32 %v5998_v48, %v6228_v35  ;;  %v12725_v29 = vrot.slane %v12724_v30, 4  ;;  %v12726_v50 = vld [vmem:[#allocation24_spill] sm:$0xff] }
 0x34f   :  { %v3096_v19 = vsel %vm2791_vm7, %v12719_v27, %v3095_v24  ;;  %v3216_v23 = vsel %vm2791_vm7, %v12721_v18, %v3215_v12  ;;  %v12727_v24 = vrot.slane %v12726_v50, 4  ;;  %v3936_v36 = vrot.slane %v3929_v1, 5  ;;  %v6000_v35 = vld [vmem:[%s11578_s0 + $0xf6] ss:$0 sm:$0xff] }
 0x350   :  { %v1346_v4 = vadd.f32 %v12723_v25, %v1249_v7  ;;  %v2980_v38 = vadd.f32 %v2976_v22, %v2860_v15  ;;  %v3336_v41 = vsel %vm2791_vm7, %v12725_v29, %v3335_v42  ;;  %v4056_v12 = vrot.slane %v4049_v10, 5  ;;  %v5999_v7 = vld [vmem:[%s11579_s1 + $0x5] ss:$0 sm:$0xff]  ;;  %v12730_v15 = vld [vmem:[#allocation32_spill] sm:$0xff] }
 0x351   :  { %v3456_v31 = vsel %vm2791_vm7, %v12727_v24, %v3455_v8  ;;  %v12729_v27 = vrot.slane %v12728_v9, 2  ;;  %v268_v2 = vadd.f32 %v5999_v7, %v266_v49  ;;  %v320_v42 = vmul.f32 %v6000_v35, %v6297_v5  ;;  %v12732_v8 = vld [vmem:[#allocation30_spill] sm:$0xff]  ;;  %v12734_v20 = vld [vmem:[#allocation36_spill] sm:$0xff]  ;;  %v6001_v49 = vld [vmem:[%s11578_s0 + $0xba] ss:$0 sm:$0xff] }
 0x352   :  { %v3100_v22 = vadd.f32 %v3096_v19, %v2980_v38  ;;  %v12731_v18 = vrot.slane %v12730_v15, 4  ;;  %v12733_v10 = vrot.slane %v12732_v8, 5  ;;  %v12735_v48 = vrot.slane %v12734_v20, 5  ;;  %v12736_v5 = vld [vmem:[#allocation69_spill] sm:$0xff]  ;;  %v12738_v9 = vld [vmem:[#allocation43_spill] sm:$0xff] }
 0x353   :  { %v1442_v25 = vadd.f32 %v12729_v27, %v1346_v4  ;;  %v4169_v29 = vmul.f32 %v6001_v49, %v7722_v56  ;;  %v12737_v19 = vrot.slane %v12736_v5, 2  ;;  %v322_v50 = vadd.f32 %v320_v42, %v268_v2  ;;  %v6003_v7 = vld [vmem:[%s11578_s0 + $0xd9] ss:$0 sm:$0xff]  ;;  %v12740_v42 = vld [vmem:[#allocation38_spill] sm:$0xff]  ;;  %v6008_v5 = vld [vmem:[%s11578_s0 + $0xda] ss:$0 sm:$0xff] }
 0x354   :  { %v3576_v1 = vsel %vm2791_vm7, %v12731_v18, %v3575_v3  ;;  %v3697_v4 = vsel %vm3632_vm8, %v12733_v10, %v3696_v32  ;;  %v3817_v30 = vsel %vm3632_vm8, %v12735_v48, %v3816_v54  ;;  %v6002_v3 = vld [vmem:[%s11578_s0 + $0xf7] ss:$0 sm:$0xff]  ;;  %v3220_v24 = vadd.f32 %v3216_v23, %v3100_v22  ;;  %v12742_v23 = vld [vmem:[#allocation55_spill] sm:$0xff]  ;;  %v6005_v8 = vld [vmem:[%s11578_s0 + $0xf9] ss:$0 sm:$0xff] }
 0x355   :  { %v1538_v38 = vadd.f32 %v12737_v19, %v1442_v25  ;;  %v374_v32 = vmul.f32 %v6002_v3, %v6392_v60  ;;  %v12739_v27 = vrot.slane %v12738_v9, 5  ;;  %v2027_v35 = vmul.f32 %v6003_v7, %v12473_v16  ;;  %v6004_v25 = vld [vmem:[%s11578_s0 + $0xf8] ss:$0 sm:$0xff] }
 0x356   :  { %v428_v2 = vmul.f32 %v6004_v25, %v6481_v47  ;;  %v12741_v15 = vrot.slane %v12740_v42, 5  ;;  %v12743_v22 = vrot.slane %v12742_v23, 2  ;;  %v482_v10 = vmul.f32 %v6005_v8, %v6587_v53  ;;  %v6006_v47 = vld [vmem:[%s11578_s0 + $0xbb] ss:$0 sm:$0xff]  ;;  %v6012_v42 = vld [vmem:[%s11578_s0 + $0xbe] ss:$0 sm:$0xff] }
 0x357   :  { %v3937_v54 = vsel %vm3632_vm8, %v12739_v27, %v3936_v36  ;;  %v376_v18 = vadd.f32 %v374_v32, %v322_v50  ;;  %v3340_v20 = vadd.f32 %v3336_v41, %v3220_v24  ;;  %v4289_v48 = vmul.f32 %v6006_v47, %v7741_v61  ;;  %v12744_v41 = vld [vmem:[#allocation70_spill] sm:$0xff]  ;;  %v6009_v32 = vld [vmem:[%s11578_s0 + $0xfa] ss:$0 sm:$0xff]  ;;  %v6010_v27 = vld [vmem:[%s11578_s0 + $0xbd] ss:$0 sm:$0xff] }
 0x358   :  { %v11046_v60 = vsel %vm3632_vm8, %v12741_v15, %v4056_v12  ;;  %v1634_v36 = vadd.f32 %v12743_v22, %v1538_v38  ;;  %v6007_v12 = vld [vmem:[%s11578_s0 + $0xbc] ss:$0 sm:$0xff]  ;;  %v2147_v19 = vmul.f32 %v6008_v5, %v12476_v43  ;;  %v4176_v53 = vrot.slane %v4169_v29, 5  ;;  %v6011_v29 = vld [vmem:[%s11578_s0 + $0xdb] ss:$0 sm:$0xff] }
 0x359   :  { %v4409_v49 = vmul.f32 %v6007_v12, %v7745_v13  ;;  %v12745_v38 = vrot.slane %v12744_v41, 2  ;;  %v430_v3 = vadd.f32 %v428_v2, %v376_v18  ;;  %v536_v24 = vmul.f32 %v6009_v32, %v6686_v39  ;;  %v6014_v8 = vld [vmem:[%s11578_s0 + $0xbf] ss:$0 sm:$0xff]  ;;  %v6015_v12 = vld [vmem:[%s11578_s0 + $0xdc] ss:$0 sm:$0xff]  ;;  %v12750_v32 = vld [vmem:[#allocation15_spill] sm:$0xff] }
 0x35a   :  { %v3460_v9 = vadd.f32 %v3456_v31, %v3340_v20  ;;  %v4529_v7 = vmul.f32 %v6010_v27, %v12473_v16  ;;  %v2034_v25 = vrot.slane %v2027_v35, 3  ;;  %v2267_v2 = vmul.f32 %v6011_v29, %v7704_v26  ;;  %v12746_v31 = vld [vmem:[#allocation56_spill] sm:$0xff]  ;;  %v6013_v35 = vld [vmem:[%s11578_s0 + $0xfb] ss:$0 sm:$0xff] }
 0x35b   :  { %v1730_v50 = vadd.f32 %v12745_v38, %v1634_v36  ;;  %v4649_v39 = vmul.f32 %v6012_v42, %v12476_v43  ;;  %v12747_v15 = vrot.slane %v12746_v31, 2  ;;  %v484_v22 = vadd.f32 %v482_v10, %v430_v3  ;;  %v12748_v38 = vld [vmem:[#allocation57_spill] sm:$0xff]  ;;  %v12752_v31 = vld [vmem:[#allocation42_spill] sm:$0xff] }
 0x35c   :  { %v590_v36 = vmul.f32 %v6013_v35, %v6735_v28  ;;  %v3580_v18 = vadd.f32 %v3576_v1, %v3460_v9  ;;  %v4769_v20 = vmul.f32 %v6014_v8, %v7704_v26  ;;  %v2154_v47 = vrot.slane %v2147_v19, 3  ;;  %v6016_v19 = vld [vmem:[%s11578_s0 + $0xdd] ss:$0 sm:$0xff] }
 0x35d   :  { %v1826_v23 = vadd.f32 %v12747_v15, %v1730_v50  ;;  %v2387_v10 = vmul.f32 %v6015_v12, %v7709_v11  ;;  %v4296_v5 = vrot.slane %v4289_v48, 5  ;;  %v4416_v41 = vrot.slane %v4409_v49, 5 }
 0x35e   :  { %v12749_v50 = vrot.slane %v12748_v38, 2  ;;  %v538_v28 = vadd.f32 %v536_v24, %v484_v22  ;;  %v3701_v1 = vadd.f32 %v3697_v4, %v3580_v18  ;;  %v12751_v9 = vrot.slane %v12750_v32, 3  ;;  %v12754_v4 = vld [vmem:[#allocation59_spill] sm:$0xff] }
 0x35f   :  { %v2274_v29 = vrot.slane %v2267_v2, 3  ;;  %v2507_v42 = vmul.f32 %v6016_v19, %v7722_v56  ;;  %v12753_v15 = vrot.slane %v12752_v31, 5  ;;  %v4536_v49 = vrot.slane %v4529_v7, 6  ;;  %v6017_v2 = vld [vmem:[%s11578_s0 + $0xde] ss:$0 sm:$0xff]  ;;  %v12756_v32 = vld [vmem:[#allocation87_spill] sm:$0xff] }
 0x360   :  { %v1922_v3 = vadd.f32 %v12749_v50, %v1826_v23  ;;  %v2035_v27 = vsel %vm1950_vm6, %v12751_v9, %v2034_v25  ;;  %v592_v23 = vadd.f32 %v590_v36, %v538_v28  ;;  %v3821_v24 = vadd.f32 %v3817_v30, %v3701_v1  ;;  %v12758_v36 = vld [vmem:[#allocation23_spill] sm:$0xff] }
 0x361   :  { %v4177_v48 = vsel %vm3632_vm8, %v12753_v15, %v4176_v53  ;;  %v12755_v22 = vrot.slane %v12754_v4, 3  ;;  %v2394_v25 = vrot.slane %v2387_v10, 3  ;;  %v2627_v8 = vmul.f32 %v6017_v2, %v7741_v61  ;;  %v12760_v9 = vld [vmem:[#allocation11_spill] sm:$0xff]  ;;  %v12764_v15 = vld [vmem:[#allocation105_spill] sm:$0xff]  ;;  %v12768_v2 = vld [vmem:[#allocation28_spill] sm:$0xff] }
 0x362   :  { %v2039_v35 = vadd.f32 %v2035_v27, %v1922_v3  ;;  %v4656_v12 = vrot.slane %v4649_v39, 6  ;;  %v4776_v38 = vrot.slane %v4769_v20, 6  ;;  %v12757_v53 = vrot.slane %v12756_v32, 1  ;;  %v12762_v20 = vld [vmem:[#allocation20_spill] sm:$0xff] }
 0x363   :  { %v2155_v18 = vsel %vm1950_vm6, %v12755_v22, %v2154_v47  ;;  %v3941_v3 = vadd.f32 %v3937_v54, %v3821_v24  ;;  %v12759_v30 = vrot.slane %v12758_v36, 3  ;;  %v2514_v1 = vrot.slane %v2507_v42, 3  ;;  %v6018_v47 = vld [vmem:[%s11578_s0 + $0xdf] ss:$0 sm:$0xff]  ;;  %v12766_v42 = vld [vmem:[#allocation31_spill] sm:$0xff] }
 0x364   :  { %v2159_v50 = vadd.f32 %v2155_v18, %v2039_v35  ;;  %v689_v7 = vadd.f32 %v12757_v53, %v592_v23  ;;  %v2747_v10 = vmul.f32 %v6018_v47, %v7745_v13  ;;  %v12761_v27 = vrot.slane %v12760_v9, 5  ;;  %v6019_v18 = vld [vmem:[%s11578_s0 + $0xe0] ss:$0 sm:$0xff]  ;;  %v6020_v9 = vld [vmem:[%s11578_s0 + $0xe1] ss:$0 sm:$0xff] }
 0x365   :  { %v2275_v28 = vsel %vm1950_vm6, %v12759_v30, %v2274_v29  ;;  %v12763_v19 = vrot.slane %v12762_v20, 5  ;;  %v12765_v35 = vrot.slane %v12764_v15, 1  ;;  %v4061_v29 = vadd.f32 %v11046_v60, %v3941_v3  ;;  %v12778_v15 = vld [vmem:[#allocation71_spill] sm:$0xff] }
 0x366   :  { %v4297_v39 = vsel %vm3632_vm8, %v12761_v27, %v4296_v5  ;;  %v2279_v54 = vadd.f32 %v2275_v28, %v2159_v50  ;;  %v12767_v24 = vrot.slane %v12766_v42, 3  ;;  %v2634_v22 = vrot.slane %v2627_v8, 3  ;;  %v12770_v50 = vld [vmem:[#allocation41_spill] sm:$0xff]  ;;  %v12773_v8 = vld [vmem:[#allocation60_spill] sm:$0xff]  ;;  %v12775_v27 = vld [vmem:[#allocation50_spill] sm:$0xff] }
 0x367   :  { %v4417_v31 = vsel %vm3632_vm8, %v12763_v19, %v4416_v41  ;;  %v785_v23 = vadd.f32 %v12765_v35, %v689_v7  ;;  %v2868_v5 = vmul.f32 %v6019_v18, %v12473_v16  ;;  %v12769_v32 = vrot.slane %v12768_v2, 6  ;;  %v12780_v18 = vld [vmem:[#allocation89_spill] sm:$0xff] }
 0x368   :  { %v2395_v4 = vsel %vm1950_vm6, %v12767_v24, %v2394_v25  ;;  %v12771_v53 = vrot.slane %v12770_v50, 6  ;;  %v12772_v3 = vrot.slane %v10043_v45, 1  ;;  %v4181_v25 = vadd.f32 %v4177_v48, %v4061_v29  ;;  %v6021_v45 = vld [vmem:[%s11578_s0 + $0xc0] ss:$0 sm:$0xff]  ;;  %v6023_v24 = vld [vmem:[%s11578_s0 + $0xc1] ss:$0 sm:$0xff] }
 0x369   :  { %v4537_v41 = vsel %vm35_vm2, %v12769_v32, %v4536_v49  ;;  %v2399_v60 = vadd.f32 %v2395_v4, %v2279_v54  ;;  %v12774_v30 = vrot.slane %v12773_v8, 3  ;;  %v2754_v47 = vrot.slane %v2747_v10, 3  ;;  %v5818_v32 = vld [vmem:[%s11577_s3 + $0x38] sm:$0x3f] }
 0x36a   :  { %v4657_v7 = vsel %vm35_vm2, %v12771_v53, %v4656_v12  ;;  %v881_v36 = vadd.f32 %v12772_v3, %v785_v23  ;;  %v2988_v49 = vmul.f32 %v6020_v9, %v12476_v43  ;;  %v12776_v20 = vrot.slane %v12775_v27, 6  ;;  %v12782_v53 = vld [vmem:[#allocation72_spill] sm:$0xff] }
 0x36b   :  { %v2515_v28 = vsel %vm1950_vm6, %v12774_v30, %v2514_v1  ;;  %v4889_v48 = vmul.f32 %v6021_v45, %v7709_v11  ;;  %v12777_v1 = vrot.slane %v10079_v21, 1  ;;  %v4301_v54 = vadd.f32 %v4297_v39, %v4181_v25  ;;  %v6024_v21 = vld [vmem:[%s11578_s0 + $0xc2] ss:$0 sm:$0xff]  ;;  %v6025_v25 = vld [vmem:[%s11578_s0 + $0xe3] ss:$0 sm:$0xff]  ;;  %v5408_v45 = vpop.permute.xlu0 %5407 }
 0x36c   :  { %v4777_v12 = vsel %vm35_vm2, %v12776_v20, %v4776_v38  ;;  %v2519_v19 = vadd.f32 %v2515_v28, %v2399_v60  ;;  %v12779_v35 = vrot.slane %v12778_v15, 3  ;;  %v2875_v29 = vrot.slane %v2868_v5, 4  ;;  %v6022_v38 = vld [vmem:[%s11578_s0 + $0xe2] ss:$0 sm:$0xff]  ;;  %v6026_v28 = vld [vmem:[%s11578_s0 + $0xc3] ss:$0 sm:$0xff] }
 0x36d   :  { %v977_v10 = vadd.f32 %v12777_v1, %v881_v36  ;;  %v3108_v42 = vmul.f32 %v6022_v38, %v7704_v26  ;;  %v5009_v4 = vmul.f32 %v6023_v24, %v7722_v56  ;;  %v5129_v39 = vmul.f32 %v6024_v21, %v7741_v61 }
 0x36e   :  { %v2635_v23 = vsel %vm1950_vm6, %v12779_v35, %v2634_v22  ;;  %v12781_v5 = vrot.slane %v12780_v18, 1  ;;  %v4421_v50 = vadd.f32 %v4417_v31, %v4301_v54  ;;  %v12783_v60 = vrot.slane %v12782_v53, 3 }
 0x36f   :  { %v2639_v22 = vadd.f32 %v2635_v23, %v2519_v19  ;;  %v2995_v36 = vrot.slane %v2988_v49, 4  ;;  %v3228_v8 = vmul.f32 %v6025_v25, %v7709_v11  ;;  %v4896_v30 = vrot.slane %v4889_v48, 6  ;;  %v12785_v49 = vld [vmem:[#allocation73_spill] sm:$0xff]  ;;  %v6027_v48 = vld [vmem:[%s11578_s0 + $0xe4] ss:$0 sm:$0xff] }
 0x370   :  { %v1073_v2 = vadd.f32 %v12781_v5, %v977_v10  ;;  %v2755_v3 = vsel %vm1950_vm6, %v12783_v60, %v2754_v47  ;;  %v5249_v9 = vmul.f32 %v6026_v28, %v7745_v13  ;;  %v12784_v31 = vrot.slane %v10115_v51, 1  ;;  %v12792_v60 = vld [vmem:[#allocation75_spill] sm:$0xff]  ;;  %v12794_v28 = vld [vmem:[#allocation52_spill] sm:$0xff] }
 0x371   :  { %v2759_v27 = vadd.f32 %v2755_v3, %v2639_v22  ;;  %v4541_v47 = vadd.f32 %v4537_v41, %v4421_v50  ;;  %v12786_v19 = vrot.slane %v12785_v49, 4  ;;  %v3115_v10 = vrot.slane %v3108_v42, 4  ;;  %v12788_v41 = vld [vmem:[#allocation74_spill] sm:$0xff] }
 0x372   :  { %v1169_v20 = vadd.f32 %v12784_v31, %v1073_v2  ;;  %v3348_v54 = vmul.f32 %v6027_v48, %v7722_v56  ;;  %v5016_v15 = vrot.slane %v5009_v4, 6  ;;  %v5412_v35 = vsel %vm55_vm3, %v5818_v32, %v5408_v45  ;;  %v6028_v42 = vld [vmem:[%s11578_s0 + $0xe5] ss:$0 sm:$0xff] }
 0x373   :  { %v2876_v1 = vsel %vm2791_vm7, %v12786_v19, %v2875_v29  ;;  %v12787_v51 = vrot.slane %v10128_v34, 1  ;;  %v4661_v24 = vadd.f32 %v4657_v7, %v4541_v47  ;;  %v12789_v21 = vrot.slane %v12788_v41, 4  ;;  %v12790_v32 = vld [vmem:[#allocation90_spill] sm:$0xff] }
 0x374   :  { %v2880_v23 = vadd.f32 %v2876_v1, %v2759_v27  ;;  %v3235_v29 = vrot.slane %v3228_v8, 4  ;;  %v3468_v18 = vmul.f32 %v6028_v42, %v7741_v61  ;;  %v5136_v5 = vrot.slane %v5129_v39, 6  ;;  %v12797_v49 = vld [vmem:[#allocation58_spill] sm:$0xff]  ;;  %v12804_v42 = vld [vmem:[#allocation19_spill] sm:$0xff] }
 0x375   :  { %v1265_v38 = vadd.f32 %v12787_v51, %v1169_v20  ;;  %v2996_v22 = vsel %vm2791_vm7, %v12789_v21, %v2995_v36  ;;  %v5256_v4 = vrot.slane %v5249_v9, 6  ;;  %v12791_v50 = vrot.slane %v12790_v32, 2  ;;  %v6029_v36 = vld [vmem:[%s11578_s0 + $0xe6] ss:$0 sm:$0xff] }
 0x376   :  { %v3000_v2 = vadd.f32 %v2996_v22, %v2880_v23  ;;  %v4781_v34 = vadd.f32 %v4777_v12, %v4661_v24  ;;  %v12793_v7 = vrot.slane %v12792_v60, 4  ;;  %v3355_v25 = vrot.slane %v3348_v54, 4  ;;  %v6030_v12 = vld [vmem:[%s11578_s0 + $0xe7] ss:$0 sm:$0xff]  ;;  %v12801_v23 = vld [vmem:[#allocation132_spill] sm:$0xff] }
 0x377   :  { %v1362_v53 = vadd.f32 %v12791_v50, %v1265_v38  ;;  %v3588_v8 = vmul.f32 %v6029_v36, %v7745_v13  ;;  %v12795_v27 = vrot.slane %v12794_v28, 6  ;;  %v3709_v31 = vmul.f32 %v6030_v12, %v12473_v16  ;;  %v6033_v12 = vld [vmem:[%s11578_s0 + $0xea] ss:$0 sm:$0xff] }
 0x378   :  { %v3116_v3 = vsel %vm2791_vm7, %v12793_v7, %v3115_v10  ;;  %v12796_v20 = vrot.slane %v10159_v17, 2  ;;  %v12798_v19 = vrot.slane %v12797_v49, 6  ;;  %v12799_v10 = vld [vmem:[#allocation61_spill] sm:$0xff]  ;;  %v12802_v51 = vrot.slane %v12801_v23, 6  ;;  %v6031_v17 = vld [vmem:[%s11578_s0 + $0xe8] ss:$0 sm:$0xff] }
 0x379   :  { %v4897_v39 = vsel %vm35_vm2, %v12795_v27, %v4896_v30  ;;  %v3120_v9 = vadd.f32 %v3116_v3, %v3000_v2  ;;  %v12800_v48 = vrot.slane %v12799_v10, 4  ;;  %v3475_v30 = vrot.slane %v3468_v18, 4  ;;  %v12807_v3 = vld [vmem:[#allocation133_spill] sm:$0xff] }
 0x37a   :  { %v1458_v45 = vadd.f32 %v12796_v20, %v1362_v53  ;;  %v4901_v47 = vadd.f32 %v4897_v39, %v4781_v34  ;;  %v5017_v1 = vsel %vm35_vm2, %v12798_v19, %v5016_v15  ;;  %v5137_v38 = vsel %vm35_vm2, %v12802_v51, %v5136_v5  ;;  %v6032_v53 = vld [vmem:[%s11578_s0 + $0xe9] ss:$0 sm:$0xff]  ;;  %v12817_v51 = vld [vmem:[#allocation104_spill] sm:$0xff] }
 0x37b   :  { %v3236_v54 = vsel %vm2791_vm7, %v12800_v48, %v3235_v29  ;;  %v3829_v41 = vmul.f32 %v6031_v17, %v12476_v43  ;;  %v12803_v21 = vrot.slane %v10172_v6, 2  ;;  %v12805_v2 = vrot.slane %v12804_v42, 4  ;;  %v12815_v48 = vld [vmem:[#allocation62_spill] sm:$0xff] }
 0x37c   :  { %v3240_v24 = vadd.f32 %v3236_v54, %v3120_v9  ;;  %v5021_v15 = vadd.f32 %v5017_v1, %v4901_v47  ;;  %v3595_v18 = vrot.slane %v3588_v8, 4  ;;  %v2047_v32 = vmul.f32 %v10237_v52, %v12473_v16  ;;  %v12809_v8 = vld [vmem:[#allocation76_spill] sm:$0xff] }
 0x37d   :  { %v1554_v22 = vadd.f32 %v12803_v21, %v1458_v45  ;;  %v3356_v29 = vsel %vm2791_vm7, %v12805_v2, %v3355_v25  ;;  %v3716_v50 = vrot.slane %v3709_v31, 5  ;;  %v3949_v34 = vmul.f32 %v6032_v53, %v7704_v26  ;;  %v12811_v31 = vld [vmem:[#allocation92_spill] sm:$0xff]  ;;  %v12820_v2 = vld [vmem:[#allocation63_spill] sm:$0xff] }
 0x37e   :  { %v3360_v5 = vadd.f32 %v3356_v29, %v3240_v24  ;;  %v12806_v6 = vrot.slane %v10185_v40, 2  ;;  %v5141_v7 = vadd.f32 %v5137_v38, %v5021_v15  ;;  %v12808_v36 = vrot.slane %v12807_v3, 6  ;;  %v12819_v15 = vld [vmem:[#allocation94_spill] sm:$0xff] }
 0x37f   :  { %v12810_v28 = vrot.slane %v12809_v8, 4  ;;  %v2167_v27 = vmul.f32 %v10253_v37, %v12476_v43  ;;  %v3836_v9 = vrot.slane %v3829_v41, 5  ;;  %v4069_v40 = vmul.f32 %v6033_v12, %v7709_v11  ;;  %v6034_v41 = vld [vmem:[%s11578_s0 + $0xeb] ss:$0 sm:$0xff] }
 0x380   :  { %v1650_v60 = vadd.f32 %v12806_v6, %v1554_v22  ;;  %v5257_v25 = vsel %vm35_vm2, %v12808_v36, %v5256_v4  ;;  %v12812_v20 = vrot.slane %v12811_v31, 2  ;;  %v12813_v4 = vld [vmem:[#allocation77_spill] sm:$0xff]  ;;  %v2054_v1 = vrot.slane %v2047_v32, 3  ;;  %v12824_v6 = vld [vmem:[#allocation106_spill] sm:$0xff]  ;;  %v12829_v31 = vld [vmem:[#allocation107_spill] sm:$0xff] }
 0x381   :  { %v3476_v52 = vsel %vm2791_vm7, %v12810_v28, %v3475_v30  ;;  %v5261_v47 = vadd.f32 %v5257_v25, %v5141_v7  ;;  %v12814_v49 = vrot.slane %v12813_v4, 4  ;;  %v2287_v37 = vmul.f32 %v10274_v55, %v7704_v26  ;;  %v12826_v36 = vld [vmem:[#allocation109_spill] sm:$0xff]  ;;  %v12827_v28 = vld [vmem:[#allocation64_spill] sm:$0xff]  ;;  %v12831_v4 = vld [vmem:[#allocation110_spill] sm:$0xff] }
 0x382   :  { %v3480_v39 = vadd.f32 %v3476_v52, %v3360_v5  ;;  %v1746_v45 = vadd.f32 %v12812_v20, %v1650_v60  ;;  %v12816_v54 = vrot.slane %v12815_v48, 5  ;;  %v3956_v23 = vrot.slane %v3949_v34, 5  ;;  %v12822_v5 = vld [vmem:[#allocation93_spill] sm:$0xff]  ;;  %v6037_v48 = vld [vmem:[%s11578_s0 + $0xee] ss:$0 sm:$0xff] }
 0x383   :  { %v3596_v19 = vsel %vm2791_vm7, %v12814_v49, %v3595_v18  ;;  %v12818_v38 = vrot.slane %v12817_v51, 2  ;;  %v5414_v17 = vadd.f32 %v5412_v35, %v5261_v47  ;;  %v4189_v21 = vmul.f32 %v6034_v41, %v7722_v56  ;;  %v6035_v35 = vld [vmem:[%s11578_s0 + $0xec] ss:$0 sm:$0xff]  ;;  %v12834_v51 = vld [vmem:[#allocation53_spill] sm:$0xff]  ;;  %v12836_v41 = vld [vmem:[#allocation96_spill] sm:$0xff] }
 0x384   :  { %v3600_v10 = vadd.f32 %v3596_v19, %v3480_v39  ;;  %v3717_v30 = vsel %vm3632_vm8, %v12816_v54, %v3716_v50  ;;  %v2174_v22 = vrot.slane %v2167_v27, 3  ;;  %v2407_v55 = vmul.f32 %v12819_v15, %v7709_v11  ;;  %v6036_v39 = vld [vmem:[%s11578_s0 + $0xed] ss:$0 sm:$0xff] }
 0x385   :  { %v1842_v24 = vadd.f32 %v12818_v38, %v1746_v45  ;;  %v12821_v29 = vrot.slane %v12820_v2, 5  ;;  %v4076_v32 = vrot.slane %v4069_v40, 5  ;;  %v12823_v50 = vrot.slane %v12822_v5, 2  ;;  %5822 = vst.msk [vmem:[%s11580_s4 + $0x38] sm:$0x3f] %vm5320_vm9, %v5414_v17  ;;  %5422 = vrot.lane.b32.xlu0 %v5414_v17, %s6058_s14  ;;  %v12839_v5 = vld [vmem:[#allocation108_spill] sm:$0xff] }
 0x386   :  { %v3721_v42 = vadd.f32 %v3717_v30, %v3600_v10  ;;  %v4309_v34 = vmul.f32 %v6035_v35, %v7741_v61  ;;  %v12825_v60 = vrot.slane %v12824_v6, 3  ;;  %v2294_v3 = vrot.slane %v2287_v37, 3  ;;  %v11345_v6 = vpop.permute.xlu0 %5439 }
 0x387   :  { %v3837_v18 = vsel %vm3632_vm8, %v12821_v29, %v3836_v9  ;;  %v1938_v53 = vadd.f32 %v12823_v50, %v1842_v24  ;;  %v2527_v25 = vmul.f32 %v12826_v36, %v7722_v56  ;;  %v12828_v52 = vrot.slane %v12827_v28, 5  ;;  %v12837_v29 = vld [vmem:[#allocation79_spill] sm:$0xff] }
 0x388   :  { %v2055_v7 = vsel %vm1950_vm6, %v12825_v60, %v2054_v1  ;;  %v3841_v8 = vadd.f32 %v3837_v18, %v3721_v42  ;;  %v4429_v9 = vmul.f32 %v6036_v39, %v7745_v13  ;;  %v4196_v40 = vrot.slane %v4189_v21, 5  ;;  %v12832_v1 = vld [vmem:[#allocation78_spill] sm:$0xff] }
 0x389   :  { %v3957_v27 = vsel %vm3632_vm8, %v12828_v52, %v3956_v23  ;;  %v2059_v12 = vadd.f32 %v2055_v7, %v1938_v53  ;;  %v12830_v20 = vrot.slane %v12829_v31, 3  ;;  %v2414_v47 = vrot.slane %v2407_v55, 3  ;;  %v6038_v55 = vld [vmem:[%s11578_s0 + $0xef] ss:$0 sm:$0xff] }
 0x38a   :  { %v2647_v49 = vmul.f32 %v12831_v4, %v7741_v61  ;;  %v3961_v19 = vadd.f32 %v3957_v27, %v3841_v8  ;;  %v12833_v37 = vrot.slane %v12832_v1, 5  ;;  %v4549_v54 = vmul.f32 %v6037_v48, %v12473_v16  ;;  %v12841_v8 = vld [vmem:[#allocation81_spill] sm:$0xff]  ;;  %v12843_v27 = vld [vmem:[#allocation95_spill] sm:$0xff] }
 0x38b   :  { %v2175_v45 = vsel %vm1950_vm6, %v12830_v20, %v2174_v22  ;;  %v4316_v23 = vrot.slane %v4309_v34, 5  ;;  %v12835_v38 = vrot.slane %v12834_v51, 3  ;;  %v2534_v17 = vrot.slane %v2527_v25, 3  ;;  %v12845_v31 = vld [vmem:[#allocation83_spill] sm:$0xff] }
 0x38c   :  { %v4077_v10 = vsel %vm3632_vm8, %v12833_v37, %v4076_v32  ;;  %v2179_v30 = vadd.f32 %v2175_v45, %v2059_v12  ;;  %v2767_v21 = vmul.f32 %v12836_v41, %v7745_v13  ;;  %v4436_v15 = vrot.slane %v4429_v9, 5 }
 0x38d   :  { %v2295_v24 = vsel %vm1950_vm6, %v12835_v38, %v2294_v3  ;;  %v4081_v22 = vadd.f32 %v4077_v10, %v3961_v19  ;;  %v4669_v42 = vmul.f32 %v6038_v55, %v12476_v43  ;;  %v12838_v18 = vrot.slane %v12837_v29, 5  ;;  %v6039_v3 = vld [vmem:[%s11578_s0 + $0xf0] ss:$0 sm:$0xff]  ;;  %v12852_v55 = vld [vmem:[#allocation85_spill] sm:$0xff]  ;;  %v6042_v29 = vld [vmem:[%s11578_s0 + $0xf3] ss:$0 sm:$0xff] }
 0x38e   :  { %v2299_v2 = vadd.f32 %v2295_v24, %v2179_v30  ;;  %v12840_v50 = vrot.slane %v12839_v5, 3  ;;  %v2654_v35 = vrot.slane %v2647_v49, 3  ;;  %v2888_v34 = vmul.f32 %v10381_v44, %v12473_v16  ;;  %v6040_v49 = vld [vmem:[%s11578_s0 + $0xf1] ss:$0 sm:$0xff]  ;;  %v6041_v24 = vld [vmem:[%s11578_s0 + $0xf2] ss:$0 sm:$0xff] }
 0x38f   :  { %v4197_v32 = vsel %vm3632_vm8, %v12838_v18, %v4196_v40  ;;  %v4556_v7 = vrot.slane %v4549_v54, 6  ;;  %v4789_v36 = vmul.f32 %v6039_v3, %v7704_v26  ;;  %v12842_v28 = vrot.slane %v12841_v8, 5  ;;  %v12848_v54 = vld [vmem:[#allocation84_spill] sm:$0xff] }
 0x390   :  { %v2415_v53 = vsel %vm1950_vm6, %v12840_v50, %v2414_v47  ;;  %v4201_v60 = vadd.f32 %v4197_v32, %v4081_v22  ;;  %v12844_v39 = vrot.slane %v12843_v27, 3  ;;  %v2774_v44 = vrot.slane %v2767_v21, 3  ;;  %v11390_v32 = vpop.permute.xlu0 %5471 }
 0x391   :  { %v2419_v25 = vadd.f32 %v2415_v53, %v2299_v2  ;;  %v4317_v52 = vsel %vm3632_vm8, %v12842_v28, %v4316_v23  ;;  %v3008_v12 = vmul.f32 %v10406_v46, %v12476_v43  ;;  %v12846_v20 = vrot.slane %v12845_v31, 5  ;;  %v12854_v53 = vld [vmem:[#allocation97_spill] sm:$0xff]  ;;  %v6043_v28 = vld [vmem:[%s11578_s0 + $0xf4] ss:$0 sm:$0xff] }
 0x392   :  { %v2535_v9 = vsel %vm1950_vm6, %v12844_v39, %v2534_v17  ;;  %v4321_v40 = vadd.f32 %v4317_v52, %v4201_v60  ;;  %v4676_v47 = vrot.slane %v4669_v42, 6  ;;  %v4909_v19 = vmul.f32 %v6040_v49, %v7709_v11  ;;  %v12856_v60 = vld [vmem:[#allocation114_spill] sm:$0xff]  ;;  %v12861_v31 = vld [vmem:[#allocation116_spill] sm:$0xff] }
 0x393   :  { %v4437_v45 = vsel %vm3632_vm8, %v12846_v20, %v4436_v15  ;;  %v2539_v4 = vadd.f32 %v2535_v9, %v2419_v25  ;;  %v12847_v1 = vrot.slane %v10354_v62, 3  ;;  %v2895_v10 = vrot.slane %v2888_v34, 4  ;;  %v12850_v62 = vld [vmem:[#allocation111_spill] sm:$0xff]  ;;  %v12859_v9 = vld [vmem:[#allocation112_spill] sm:$0xff] }
 0x394   :  { %v3128_v46 = vmul.f32 %v10428_v14, %v7704_v26  ;;  %v4441_v48 = vadd.f32 %v4437_v45, %v4321_v40  ;;  %v12849_v30 = vrot.slane %v12848_v54, 6  ;;  %v4796_v51 = vrot.slane %v4789_v36, 6  ;;  %v12857_v36 = vld [vmem:[#allocation86_spill] sm:$0xff]  ;;  %v5325_v45 = vpop.permute.xlu1 %5324 }
 0x395   :  { %v2655_v37 = vsel %vm1950_vm6, %v12847_v1, %v2654_v35  ;;  %v5029_v17 = vmul.f32 %v6041_v24, %v7722_v56  ;;  %v12851_v41 = vrot.slane %v12850_v62, 3  ;;  %v3015_v22 = vrot.slane %v3008_v12, 4  ;;  %5799 = vst.msk [vmem:[%s11580_s4 + $0x60] sm:$0xff] %vm55_vm3, %v5325_v45  ;;  %v12862_v1 = vld [vmem:[#allocation88_spill] sm:$0xff]  ;;  %v12866_v62 = vld [vmem:[#allocation91_spill] sm:$0xff] }
 0x396   :  { %v4557_v23 = vsel %vm35_vm2, %v12849_v30, %v4556_v7  ;;  %v2659_v38 = vadd.f32 %v2655_v37, %v2539_v4  ;;  %v3248_v14 = vmul.f32 %v10447_v57, %v7709_v11  ;;  %v12853_v42 = vrot.slane %v12852_v55, 6 }
 0x397   :  { %v2775_v21 = vsel %vm1950_vm6, %v12851_v41, %v2774_v44  ;;  %v4561_v15 = vadd.f32 %v4557_v23, %v4441_v48  ;;  %v5149_v18 = vmul.f32 %v6042_v29, %v7741_v61  ;;  %v4916_v50 = vrot.slane %v4909_v19, 6  ;;  %v5327_v19 = vpop.permute.xlu0 %5326 }
 0x398   :  { %v4677_v2 = vsel %vm35_vm2, %v12853_v42, %v4676_v47  ;;  %v2779_v5 = vadd.f32 %v2775_v21, %v2659_v38  ;;  %v12855_v35 = vrot.slane %v12854_v53, 4  ;;  %v3135_v57 = vrot.slane %v3128_v46, 4  ;;  %v12864_v46 = vld [vmem:[#allocation99_spill] sm:$0xff]  ;;  %5800 = vst.msk [vmem:[%s11580_s4 + $0x68] sm:$0x3f] %vm5320_vm9, %v5327_v19  ;;  %v5357_v42 = vpop.permute.xlu1 %5356 }
 0x399   :  { %v3368_v7 = vmul.f32 %v12856_v60, %v7722_v56  ;;  %v4681_v3 = vadd.f32 %v4677_v2, %v4561_v15  ;;  %v12858_v25 = vrot.slane %v12857_v36, 6  ;;  %v5269_v52 = vmul.f32 %v6043_v28, %v7745_v13  ;;  %5807 = vst.msk [vmem:[%s11580_s4 + $0x70] sm:$0xff] %vm55_vm3, %v5357_v42 }
 0x39a   :  { %v2896_v34 = vsel %vm2791_vm7, %v12855_v35, %v2895_v10  ;;  %v5036_v39 = vrot.slane %v5029_v17, 6  ;;  %v12860_v44 = vrot.slane %v12859_v9, 4  ;;  %v3255_v40 = vrot.slane %v3248_v14, 4  ;;  %v5826_v17 = vld [vmem:[%s11577_s3 + $0x48] sm:$0x3f] }
 0x39b   :  { %v4797_v8 = vsel %vm35_vm2, %v12858_v25, %v4796_v51  ;;  %v2900_v27 = vadd.f32 %v2896_v34, %v2779_v5  ;;  %v3488_v20 = vmul.f32 %v12861_v31, %v7741_v61  ;;  %v5156_v4 = vrot.slane %v5149_v18, 6  ;;  %v5359_v18 = vpop.permute.xlu0 %5358  ;;  %v12870_v5 = vld [vmem:[#allocation134_spill] sm:$0xff]  ;;  %v12872_v35 = vld [vmem:[#allocation115_spill] sm:$0xff] }
 0x39c   :  { %v3016_v12 = vsel %vm2791_vm7, %v12860_v44, %v3015_v22  ;;  %v4801_v47 = vadd.f32 %v4797_v8, %v4681_v3  ;;  %v12863_v37 = vrot.slane %v12862_v1, 6  ;;  %v12865_v48 = vrot.slane %v12864_v46, 4  ;;  %v12868_v22 = vld [vmem:[#allocation113_spill] sm:$0xff]  ;;  %5808 = vst.msk [vmem:[%s11580_s4 + $0x78] sm:$0x3f] %vm5320_vm9, %v5359_v18  ;;  %v12875_v8 = vld [vmem:[#allocation135_spill] sm:$0xff] }
 0x39d   :  { %v3020_v49 = vadd.f32 %v3016_v12, %v2900_v27  ;;  %v3375_v30 = vrot.slane %v3368_v7, 4  ;;  %v3608_v23 = vmul.f32 %v10498_v63, %v7745_v13  ;;  %v5276_v38 = vrot.slane %v5269_v52, 6  ;;  %v12877_v27 = vld [vmem:[#allocation100_spill] sm:$0xff]  ;;  %v12890_v18 = vld [vmem:[#allocation102_spill] sm:$0xff] }
 0x39e   :  { %v4917_v10 = vsel %vm35_vm2, %v12863_v37, %v4916_v50  ;;  %v3136_v54 = vsel %vm2791_vm7, %v12865_v48, %v3135_v57  ;;  %v12867_v41 = vrot.slane %v12866_v62, 6  ;;  %v12869_v14 = vrot.slane %v12868_v22, 4  ;;  %v12881_v37 = vld [vmem:[#allocation117_spill] sm:$0xff]  ;;  %v12886_v62 = vld [vmem:[#allocation122_spill] sm:$0xff] }
 0x39f   :  { %v4921_v51 = vadd.f32 %v4917_v10, %v4801_v47  ;;  %v3140_v24 = vadd.f32 %v3136_v54, %v3020_v49  ;;  %v3495_v15 = vrot.slane %v3488_v20, 4  ;;  %v3729_v55 = vmul.f32 %v10515_v59, %v12473_v16  ;;  %v12874_v59 = vld [vmem:[#allocation118_spill] sm:$0xff]  ;;  %v12880_v49 = vld [vmem:[#allocation120_spill] sm:$0xff]  ;;  %v12887_v22 = vld [vmem:[#allocation101_spill] sm:$0xff] }
 0x3a0   :  { %v5037_v21 = vsel %vm35_vm2, %v12867_v41, %v5036_v39  ;;  %v3256_v63 = vsel %vm2791_vm7, %v12869_v14, %v3255_v40  ;;  %v12871_v50 = vrot.slane %v12870_v5, 6  ;;  %v12873_v34 = vrot.slane %v12872_v35, 4  ;;  %v5389_v40 = vpop.permute.xlu1 %5388  ;;  %v12892_v35 = vld [vmem:[#allocation126_spill] sm:$0xff] }
 0x3a1   :  { %v5041_v2 = vadd.f32 %v5037_v21, %v4921_v51  ;;  %v3260_v29 = vadd.f32 %v3256_v63, %v3140_v24  ;;  %v3615_v60 = vrot.slane %v3608_v23, 4  ;;  %v3849_v7 = vmul.f32 %v12874_v59, %v12476_v43  ;;  %5815 = vst.msk [vmem:[%s11580_s4 + $0x80] sm:$0xff] %vm55_vm3, %v5389_v40  ;;  %v12884_v51 = vld [vmem:[#allocation119_spill] sm:$0xff] }
 0x3a2   :  { %v5157_v53 = vsel %vm35_vm2, %v12871_v50, %v5156_v4  ;;  %v3376_v57 = vsel %vm2791_vm7, %v12873_v34, %v3375_v30  ;;  %v5444_v36 = vsel %vm55_vm3, %v5826_v17, %v11345_v6  ;;  %v12876_v28 = vrot.slane %v12875_v8, 6  ;;  %v5391_v6 = vpop.permute.xlu0 %5390  ;;  %v12895_v8 = vld [vmem:[#allocation123_spill] sm:$0xff] }
 0x3a3   :  { %v5161_v3 = vadd.f32 %v5157_v53, %v5041_v2  ;;  %v3380_v25 = vadd.f32 %v3376_v57, %v3260_v29  ;;  %v12878_v39 = vrot.slane %v12877_v27, 4  ;;  %v3736_v44 = vrot.slane %v3729_v55, 5  ;;  %5816 = vst.msk [vmem:[%s11580_s4 + $0x88] sm:$0x3f] %vm5320_vm9, %v5391_v6  ;;  %v12889_v55 = vld [vmem:[#allocation124_spill] sm:$0xff] }
 0x3a4   :  { %v5277_v52 = vsel %vm35_vm2, %v12876_v28, %v5276_v38  ;;  %v3969_v12 = vmul.f32 %v10551_v0, %v7704_v26  ;;  %v12879_v45 = vrot.slane %v10510_v58, 4  ;;  %v3856_v4 = vrot.slane %v3849_v7, 5  ;;  %v12883_v58 = vld [vmem:[#allocation121_spill] sm:$0xff]  ;;  %v5421_v30 = vpop.permute.xlu1 %5420 }
 0x3a5   :  { %v3496_v9 = vsel %vm2791_vm7, %v12878_v39, %v3495_v15  ;;  %v5281_v31 = vadd.f32 %v5277_v52, %v5161_v3  ;;  %v4089_v19 = vmul.f32 %v12880_v49, %v7709_v11  ;;  %v12882_v10 = vrot.slane %v12881_v37, 5  ;;  %5823 = vst.msk [vmem:[%s11580_s4 + $0x90] sm:$0xff] %vm55_vm3, %v5421_v30  ;;  %v12897_v39 = vld [vmem:[#allocation129_spill] sm:$0xff]  ;;  %v12903_v49 = vld [vmem:[#allocation46_spill] sm:$0xff] }
 0x3a6   :  { %v3500_v20 = vadd.f32 %v3496_v9, %v3380_v25  ;;  %v3616_v47 = vsel %vm2791_vm7, %v12879_v45, %v3615_v60  ;;  %v3976_v48 = vrot.slane %v3969_v12, 5  ;;  %v4209_v54 = vmul.f32 %v12883_v58, %v7722_v56  ;;  %v12893_v60 = vld [vmem:[#allocation103_spill] sm:$0xff] }
 0x3a7   :  { %v5446_v0 = vadd.f32 %v5444_v36, %v5281_v31  ;;  %v3737_v46 = vsel %vm3632_vm8, %v12882_v10, %v3736_v44  ;;  %v12885_v38 = vrot.slane %v12884_v51, 5  ;;  %v4096_v17 = vrot.slane %v4089_v19, 5 }
 0x3a8   :  { %v3620_v1 = vadd.f32 %v3616_v47, %v3500_v20  ;;  %v4329_v41 = vmul.f32 %v12886_v62, %v7741_v61  ;;  %v12888_v14 = vrot.slane %v12887_v22, 5  ;;  %v4216_v15 = vrot.slane %v4209_v54, 5  ;;  %v5453_v2 = vpop.permute.xlu1 %5452  ;;  %v12900_v20 = vld [vmem:[#allocation131_spill] sm:$0xff]  ;;  %v12907_v54 = vld [vmem:[#allocation130_spill] sm:$0xff] }
 0x3a9   :  { %5830 = vst.msk [vmem:[%s11580_s4 + $0x48] sm:$0x3f] %vm5320_vm9, %v5446_v0  ;;  %5454 = vrot.lane.b32.xlu0 %v5446_v0, %s6058_s14  ;;  %v3857_v24 = vsel %vm3632_vm8, %v12885_v38, %v3856_v4  ;;  %v4449_v42 = vmul.f32 %v12889_v55, %v7745_v13  ;;  %v12891_v5 = vrot.slane %v12890_v18, 5  ;;  %v4569_v34 = vmul.f32 %v12892_v35, %v12473_v16  ;;  %v12898_v16 = vld [vmem:[#allocation125_spill] sm:$0xff]  ;;  %v12909_v38 = vld [vmem:[#allocation136_spill] sm:$0xff] }
 0x3aa   :  { %v3741_v23 = vadd.f32 %v3737_v46, %v3620_v1  ;;  %v3977_v63 = vsel %vm3632_vm8, %v12888_v14, %v3976_v48  ;;  %5831 = vst.msk [vmem:[%s11580_s4 + $0xa0] sm:$0xff] %vm55_vm3, %v5453_v2  ;;  %v4336_v53 = vrot.slane %v4329_v41, 5  ;;  %v12894_v59 = vrot.slane %v12893_v60, 5  ;;  %v12904_v1 = vld [vmem:[#allocation128_spill] sm:$0xff]  ;;  %v12912_v14 = vld [vmem:[#allocation98_spill] sm:$0xff]  ;;  %v12914_v2 = vld [vmem:[#allocation3_spill] sm:$0xff] }
 0x3ab   :  { %v4097_v50 = vsel %vm3632_vm8, %v12891_v5, %v4096_v17  ;;  %v4456_v3 = vrot.slane %v4449_v42, 5  ;;  %v4689_v36 = vmul.f32 %v10670_v33, %v12476_v43  ;;  %v12896_v28 = vrot.slane %v12895_v8, 5  ;;  %v12901_v33 = vld [vmem:[#allocation127_spill] sm:$0xff]  ;;  %v12906_v46 = vld [vmem:[#allocation80_spill] sm:$0xff]  ;;  %v5834_v55 = vld [vmem:[%s11577_s3 + $0x58] sm:$0x3f] }
 0x3ac   :  { %v3861_v21 = vadd.f32 %v3857_v24, %v3741_v23  ;;  %v4217_v7 = vsel %vm3632_vm8, %v12894_v59, %v4216_v15  ;;  %v4576_v27 = vrot.slane %v4569_v34, 6  ;;  %v4809_v9 = vmul.f32 %v12897_v39, %v7704_v26  ;;  %v5485_v45 = vpop.permute.xlu1 %5484  ;;  %v12916_v5 = vld [vmem:[#allocation137_spill] sm:$0xff] }
 0x3ad   :  { %v4337_v52 = vsel %vm3632_vm8, %v12896_v28, %v4336_v53  ;;  %v12899_v12 = vrot.slane %v12898_v16, 5  ;;  %v4696_v31 = vrot.slane %v4689_v36, 6  ;;  %v4929_v6 = vmul.f32 %v12900_v20, %v7709_v11  ;;  %5839 = vst.msk [vmem:[%s11580_s4 + $0xb0] sm:$0xff] %vm55_vm3, %v5485_v45 }
 0x3ae   :  { %v3981_v29 = vadd.f32 %v3977_v63, %v3861_v21  ;;  %v12902_v47 = vrot.slane %v12901_v33, 6  ;;  %v4816_v4 = vrot.slane %v4809_v9, 6  ;;  %v5049_v19 = vmul.f32 %v12903_v49, %v7722_v56  ;;  %v12910_v56 = vld [vmem:[#allocation82_spill] sm:$0xff] }
 0x3af   :  { %v4457_v40 = vsel %vm3632_vm8, %v12899_v12, %v4456_v3  ;;  %v12905_v37 = vrot.slane %v12904_v1, 6  ;;  %v4936_v10 = vrot.slane %v4929_v6, 6  ;;  %v5169_v48 = vmul.f32 %v12906_v46, %v7741_v61 }
 0x3b0   :  { %v4101_v57 = vadd.f32 %v4097_v50, %v3981_v29  ;;  %v4577_v26 = vsel %vm35_vm2, %v12902_v47, %v4576_v27  ;;  %v12908_v30 = vrot.slane %v12907_v54, 6  ;;  %v5056_v51 = vrot.slane %v5049_v19, 6 }
 0x3b1   :  { %v4697_v11 = vsel %vm35_vm2, %v12905_v37, %v4696_v31  ;;  %v5289_v24 = vmul.f32 %v12909_v38, %v7745_v13  ;;  %v12911_v62 = vrot.slane %v12910_v56, 6  ;;  %v5176_v21 = vrot.slane %v5169_v48, 6 }
 0x3b2   :  { %v4221_v25 = vadd.f32 %v4217_v7, %v4101_v57  ;;  %v4817_v23 = vsel %vm35_vm2, %v12908_v30, %v4816_v4  ;;  %v12913_v63 = vrot.slane %v12912_v14, 6  ;;  %v12915_v29 = vrot.slane %v12914_v2, 6 }
 0x3b3   :  { %v4937_v41 = vsel %vm35_vm2, %v12911_v62, %v4936_v10  ;;  %v5296_v15 = vrot.slane %v5289_v24, 6  ;;  %v12917_v50 = vrot.slane %v12916_v5, 6  ;;  %v5476_v35 = vsel %vm55_vm3, %v5834_v55, %v11390_v32 }
 0x3b4   :  { %v4341_v44 = vadd.f32 %v4337_v52, %v4221_v25  ;;  %v5057_v61 = vsel %vm35_vm2, %v12913_v63, %v5056_v51  ;;  %v5177_v13 = vsel %vm35_vm2, %v12915_v29, %v5176_v21 }
 0x3b5   :  { %v5297_v53 = vsel %vm35_vm2, %v12917_v50, %v5296_v15 }
 0x3b6   :  { %v4461_v43 = vadd.f32 %v4457_v40, %v4341_v44 }
 0x3b8   :  { %v4581_v0 = vadd.f32 %v4577_v26, %v4461_v43 }
 0x3ba   :  { %v4701_v58 = vadd.f32 %v4697_v11, %v4581_v0 }
 0x3bc   :  { %v4821_v17 = vadd.f32 %v4817_v23, %v4701_v58 }
 0x3be   :  { %v4941_v22 = vadd.f32 %v4937_v41, %v4821_v17 }
 0x3c0   :  { %v5061_v42 = vadd.f32 %v5057_v61, %v4941_v22 }
 0x3c2   :  { %v5181_v18 = vadd.f32 %v5177_v13, %v5061_v42 }
 0x3c4   :  { %v5301_v34 = vadd.f32 %v5297_v53, %v5181_v18 }
 0x3c6   :  { %v5478_v57 = vadd.f32 %v5476_v35, %v5301_v34 }
 0x3c8   :  { %5838 = vst.msk [vmem:[%s11580_s4 + $0x58] sm:$0x3f] %vm5320_vm9, %v5478_v57  ;;  %5486 = vrot.lane.b32.xlu0 %v5478_v57, %s6058_s14 }
 0x3f7   :  { %v5423_v60 = vpop.permute.xlu0 %5422 }
 0x3f8   :  { %5824 = vst.msk [vmem:[%s11580_s4 + $0x98] sm:$0x3f] %vm5320_vm9, %v5423_v60 }
 0x41b   :  { %v5455_v59 = vpop.permute.xlu0 %5454 }
 0x41c   :  { %5832 = vst.msk [vmem:[%s11580_s4 + $0xa8] sm:$0x3f] %vm5320_vm9, %v5455_v59 }
 0x43a   :  { %v5487_v32 = vpop.permute.xlu0 %5486 }
 0x43b   :  { %5840 = vst.msk [vmem:[%s11580_s4 + $0xb8] sm:$0x3f] %vm5320_vm9, %v5487_v32 }

</bundles_post_ra>
